<compile_context>
chip_gen: v7x
topology: tpu7x:2x2x1
jax: 0.10.0
libtpu: 0.0.40
codegen_flags: <defaults>
</compile_context>

<pallas_src>
import numpy as np
import jax
import jax.numpy as jnp
from jax.experimental import pallas as pl
from jax.experimental.pallas import tpu as pltpu

NEG_MASK = -1.0e10    # same constant the PyTorch module uses for mask==0
NEG_PAD = -1.0e30     # stronger bias for wrapper-introduced padding positions


def _round_up(x, m):
    return ((x + m - 1) // m) * m


def _supports_bf16_transcendentals():
    """bf16 EUP/VPU exists on v6e/v7x; v5e and earlier are f32-only."""
    try:
        kind = jax.devices()[0].device_kind.lower()
    except Exception:
        return False
    return not any(tag in kind for tag in ("v2", "v3", "v4", "v5"))


def _pick_batch_tile(B_p, S_p, Hq_p, Hv_p, A_p, budget_bytes):
    """Largest batch tile (multiple of 8) whose per-step VMEM working set fits
    the budget, while keeping >= 2 grid steps when the batch allows it
    (megacore sharding on v7x + DMA/compute overlap)."""
    per_row = (
        2 * S_p * Hv_p * 2        # value block, bf16, double-buffered
        + 2 * Hq_p * 4            # query block, f32, double-buffered
        + 2 * S_p * 4             # bias block, f32, double-buffered
        + 2 * S_p * A_p * 4       # vp / tanh intermediates
        + S_p * Hv_p * 4          # weight*value product before the sublane reduce
        + 2 * (Hv_p + S_p) * 4    # both outputs, f32, double-buffered
    )
    fixed = 2 * (Hq_p * A_p * 2 + Hv_p * A_p * 2 + 2 * A_p * 4)   # resident weights
    bb = max(8, ((budget_bytes - fixed) // per_row) // 8 * 8)
    bb = min(bb, B_p)
    if B_p >= 16:   # ensure at least two grid steps
        bb = min(bb, _round_up((B_p + 1) // 2, 8))
    return bb


def _make_concat_attention_kernel(tanh_dtype):
    def kernel(q_ref, v_ref, bias_ref, wq_ref, wv_ref, bv_ref, vw_ref,
               attn_ref, weight_ref):
        """One batch tile of ConcatAttention.

        q_ref    : (BB, Hq_p)        query (single decode step, Q dim squeezed), f32
        v_ref    : (BB, S_p, Hv_p)   values, bf16
        bias_ref : (BB, S_p)         precomputed additive mask bias + V.bias, f32
        weights  : wq (Hq_p, A_p) bf16, wv (Hv_p, A_p) bf16,
                   bv (1, A_p) f32, vw (1, A_p) f32
        outputs  : attn (BB, Hv_p) f32, weight (BB, S_p) f32
        """
        q = q_ref[...]
        v = v_ref[...]
        BB, S, Hv = v.shape
        A = wq_ref.shape[1]

        # --- projections on the MXU (bf16 inputs, f32 accumulation) -----------
        qp = jnp.dot(q.astype(wq_ref.dtype), wq_ref[...],
                     preferred_element_type=jnp.float32)                   # (BB, A)
        # reshape is a layout no-op: S_p % 8 == 0, so sublane tiles line up.
        vp = jnp.dot(v.reshape(BB * S, Hv), wv_ref[...],
                     preferred_element_type=jnp.float32)                   # (BB*S, A)
        vp = vp.reshape(BB, S, A) + bv_ref[...]                            # (BB, S, A) f32

        # --- additive scores:  V(tanh(W_q q + W_v v)) + (mask bias + V.bias) ---
        pre = vp + qp[:, None, :]
        t = jnp.tanh(pre.astype(tanh_dtype))                               # EUP (bf16 on v6e/v7x)
        e = jnp.sum(t * vw_ref[...], axis=-1) + bias_ref[...]              # (BB, S) f32

        # --- numerically stable softmax over value positions (lane axis) ------
        m = jnp.max(e, axis=-1, keepdims=True)
        p = jnp.exp(e - m)
        denom = jnp.sum(p, axis=-1, keepdims=True)
        w = p * pl.reciprocal(denom, approx=True)                          # (BB, S) f32

        # --- attention = weight.bmm(value) -------------------------------------
        # Broadcast-multiply + sublane (XLU) reduce instead of BB tiny
        # (1,S)x(S,Hv) MXU matmuls that use 1 of 8 sublanes per pass.
        att = jnp.sum(w[:, :, None] * v, axis=1)                           # (BB, Hv) f32

        attn_ref[...] = att
        weight_ref[...] = w

    return kernel


def concat_attention_pallas(params, query, value, mask, *,
                            vmem_budget_bytes=24 << 20,
                            vmem_limit_bytes=48 << 20):
    """ConcatAttention.forward(query, value, mask) via a single Pallas TPU kernel.

    query : (B, 1, Hq)   value : (B, S, Hv)   mask : (B, 1, S)  (0.0 marks padding)
    returns (attention (B, 1, Hv), weight (B, 1, S)) -- same as the PyTorch module.
    """
    B, Q, Hq = query.shape
    assert Q == 1, "ConcatAttention is used with a single query step (Q == 1)"
    _, S, Hv = value.shape
    A = params["wq"].shape[1]
    f32, bf16 = jnp.float32, jnp.bfloat16

    # --- lane/sublane-dense padded sizes --------------------------------------
    Hq_p = _round_up(Hq, 128)
    Hv_p = _round_up(Hv, 128)
    A_p = _round_up(A, 128)
    S_p = _round_up(S, 128)            # lane dim of scores / attention weights
    B_p = _round_up(B, 8)              # sublane-dense batch

    BB = _pick_batch_tile(B_p, S_p, Hq_p, Hv_p, A_p, vmem_budget_bytes)
    nb = pl.cdiv(B_p, BB)
    B_p = nb * BB

    # --- value stream: bf16 cast (half the HBM bytes); pad only if misaligned.
    # In production, feed value already in this padded bf16 layout to avoid the copy.
    v_b = value.astype(bf16)
    if (B_p, S_p, Hv_p) != (B, S, Hv):
        v_b = jnp.pad(v_b, ((0, B_p - B), (0, S_p - S), (0, Hv_p - Hv)))

    q2 = query[:, 0, :].astype(f32)
    if (B_p, Hq_p) != (B, Hq):
        q2 = jnp.pad(q2, ((0, B_p - B), (0, Hq_p - Hq)))

    # Hoisted, t-invariant mask bias with V.bias folded in: real positions use
    # the PyTorch constant, wrapper padding positions use -1e30 so they never
    # receive probability mass.
    bias = jnp.where(mask[:, 0, :].astype(f32) == 0.0, NEG_MASK, 0.0)
    bias = bias + params["vb"].reshape(1, 1).astype(f32)
    if (B_p, S_p) != (B, S):
        bias = jnp.pad(bias, ((0, B_p - B), (0, S_p - S)), constant_values=NEG_PAD)

    def pad2(a, rows, cols, dtype):
        a = a.astype(dtype)
        if a.shape != (rows, cols):
            a = jnp.pad(a, ((0, rows - a.shape[0]), (0, cols - a.shape[1])))
        return a

    wq = pad2(params["wq"], Hq_p, A_p, bf16)                  # W_q.weight.T (bf16)
    wv = pad2(params["wv"], Hv_p, A_p, bf16)                  # W_v.weight.T (bf16)
    bv = pad2(params["bv"].reshape(1, A), 1, A_p, f32)        # W_v.bias
    vw = pad2(params["vw"].reshape(A, 1).T, 1, A_p, f32)      # V.weight (row layout)

    full2 = lambda i: (0, 0)
    grid_spec = pltpu.PrefetchScalarGridSpec(
        num_scalar_prefetch=0,
        grid=(nb,),
        in_specs=[
            pl.BlockSpec((BB, Hq_p), lambda i: (i, 0)),
            pl.BlockSpec((BB, S_p, Hv_p), lambda i: (i, 0, 0)),
            pl.BlockSpec((BB, S_p), lambda i: (i, 0)),
            pl.BlockSpec((Hq_p, A_p), full2),
            pl.BlockSpec((Hv_p, A_p), full2),
            pl.BlockSpec((1, A_p), full2),
            pl.BlockSpec((1, A_p), full2),
        ],
        out_specs=[
            pl.BlockSpec((BB, Hv_p), lambda i: (i, 0)),
            pl.BlockSpec((BB, S_p), lambda i: (i, 0)),
        ],
    )

    tanh_dtype = bf16 if _supports_bf16_transcendentals() else f32
    kernel = _make_concat_attention_kernel(tanh_dtype)

    attn_p, w_p = pl.pallas_call(
        kernel,
        out_shape=(jax.ShapeDtypeStruct((B_p, Hv_p), f32),
                   jax.ShapeDtypeStruct((B_p, S_p), f32)),
        grid_spec=grid_spec,
        compiler_params=pltpu.CompilerParams(
            dimension_semantics=("parallel",),
            vmem_limit_bytes=vmem_limit_bytes),
    )(q2, v_b, bias, wq, wv, bv, vw)

    attention = attn_p[:B, :Hv][:, None, :]      # (B, 1, Hv)
    weight = w_p[:B, :S][:, None, :]             # (B, 1, S)
    return attention, weight


def concat_attention_ref(params, query, value, mask):
    """Pure-JAX reference mirroring the PyTorch forward (all f32)."""
    qp = query.astype(jnp.float32) @ params["wq"]                       # (B, 1, A)
    vp = value.astype(jnp.float32) @ params["wv"] + params["bv"]        # (B, S, A)
    e = jnp.tanh(qp + vp) @ params["vw"] + params["vb"]                 # (B, S, 1)
    e = jnp.swapaxes(e, 1, 2)                                           # (B, 1, S)
    masked = e + (mask.astype(jnp.float32) == 0.0).astype(jnp.float32) * NEG_MASK
    w = jax.nn.softmax(masked, axis=-1)                                 # (B, 1, S)
    att = jnp.einsum("bqs,bsh->bqh", w, value.astype(jnp.float32))      # (B, 1, Hv)
    return att, w


if __name__ == "__main__":
    B, S = 2, 8
    QUERY_SIZE, VALUE_SIZE, ATTN_SIZE = 32, 32, 32

    root = jax.random.PRNGKey(0)
    kq, kv, kb, kvw, kvb, kqry, kval, kmsk = jax.random.split(root, 8)
    params = {
        "wq": 0.1 * jax.random.normal(kq, (QUERY_SIZE, ATTN_SIZE), jnp.float32),
        "wv": 0.1 * jax.random.normal(kv, (VALUE_SIZE, ATTN_SIZE), jnp.float32),
        "bv": 0.1 * jax.random.normal(kb, (ATTN_SIZE,), jnp.float32),
        "vw": 0.1 * jax.random.normal(kvw, (ATTN_SIZE, 1), jnp.float32),
        "vb": 0.1 * jax.random.normal(kvb, (1,), jnp.float32),
    }
    query = 0.5 * jax.random.normal(kqry, (B, 1, QUERY_SIZE), jnp.float32)
    value = 0.5 * jax.random.normal(kval, (B, S, VALUE_SIZE), jnp.float32)
    mask = (jax.random.uniform(kmsk, (B, 1, S)) > 0.25).astype(jnp.float32)
    mask = mask.at[:, :, 0].set(1.0)   # guarantee at least one valid position per row

    att, wgt = concat_attention_pallas(params, query, value, mask)
    att, wgt = jax.block_until_ready((att, wgt))

    att_ref, wgt_ref = concat_attention_ref(params, query, value, mask)
    att_ref, wgt_ref = jax.block_until_ready((att_ref, wgt_ref))

    assert att.shape == (B, 1, VALUE_SIZE)
    assert wgt.shape == (B, 1, S)
    assert bool(jnp.all(jnp.isfinite(att))) and bool(jnp.all(jnp.isfinite(wgt)))
    # bf16 value/weight streams + approx reciprocal => slightly looser tolerances.
    np.testing.assert_allclose(np.asarray(wgt), np.asarray(wgt_ref), rtol=2e-2, atol=5e-3)
    np.testing.assert_allclose(np.asarray(att), np.asarray(att_ref), rtol=2e-2, atol=5e-3)
    np.testing.assert_allclose(np.asarray(jnp.sum(wgt, axis=-1)), 1.0, rtol=2e-3, atol=2e-3)

    print("KERNEL_OK")
</pallas_src>

<mosaic_0001>
module attributes {stable_mosaic.version = 11 : i64} {
  func.func @kernel(%arg0: i32, %arg1: memref<8x128xf32, #tpu.memory_space<vmem>>, %arg2: memref<8x128x128xbf16, #tpu.memory_space<vmem>>, %arg3: memref<8x128xf32, #tpu.memory_space<vmem>>, %arg4: memref<128x128xbf16, #tpu.memory_space<vmem>>, %arg5: memref<128x128xbf16, #tpu.memory_space<vmem>>, %arg6: memref<1x128xf32, #tpu.memory_space<vmem>>, %arg7: memref<1x128xf32, #tpu.memory_space<vmem>>, %arg8: memref<8x128xf32, #tpu.memory_space<vmem>>, %arg9: memref<8x128xf32, #tpu.memory_space<vmem>>) attributes {dimension_semantics = [#tpu.dimension_semantics<parallel>], iteration_bounds = array<i64: 1>, scalar_prefetch = 0 : i64, scratch_operands = 0 : i64, tpu.core_type = #tpu.core_type<tc>, window_params = [{transform_indices = @transform_0, window_bounds = array<i64: 8, 128>}, {transform_indices = @transform_1, window_bounds = array<i64: 8, 128, 128>}, {transform_indices = @transform_2, window_bounds = array<i64: 8, 128>}, {pipeline_mode = #tpu.pipeline_mode<synchronous>, transform_indices = @transform_3, window_bounds = array<i64: 128, 128>}, {pipeline_mode = #tpu.pipeline_mode<synchronous>, transform_indices = @transform_4, window_bounds = array<i64: 128, 128>}, {pipeline_mode = #tpu.pipeline_mode<synchronous>, transform_indices = @transform_5, window_bounds = array<i64: 1, 128>}, {pipeline_mode = #tpu.pipeline_mode<synchronous>, transform_indices = @transform_6, window_bounds = array<i64: 1, 128>}, {transform_indices = @transform_7, window_bounds = array<i64: 8, 128>}, {transform_indices = @transform_8, window_bounds = array<i64: 8, 128>}]} {
    %c0 = arith.constant 0 : index
    %c0_0 = arith.constant 0 : index
    %0 = vector.load %arg1[%c0, %c0_0] : memref<8x128xf32, #tpu.memory_space<vmem>>, vector<8x128xf32>
    %c0_1 = arith.constant 0 : index
    %c0_2 = arith.constant 0 : index
    %c0_3 = arith.constant 0 : index
    %1 = vector.load %arg2[%c0_1, %c0_2, %c0_3] : memref<8x128x128xbf16, #tpu.memory_space<vmem>>, vector<8x128x128xbf16>
    %2 = arith.truncf %0 : vector<8x128xf32> to vector<8x128xbf16>
    %c0_4 = arith.constant 0 : index
    %c0_5 = arith.constant 0 : index
    %3 = vector.load %arg4[%c0_4, %c0_5] : memref<128x128xbf16, #tpu.memory_space<vmem>>, vector<128x128xbf16>
    %cst = arith.constant dense<0.000000e+00> : vector<8x128xf32>
    %4 = tpu.matmul %2, %3, %cst {dimension_numbers = #tpu.dot_dimension_numbers<[1], [0], [0], [1], [0, 0, 1, 1], [], []>} : vector<8x128xbf16>, vector<128x128xbf16>, vector<8x128xf32> -> vector<8x128xf32>
    %5 = vector.shape_cast %1 : vector<8x128x128xbf16> to vector<1024x128xbf16>
    %c0_6 = arith.constant 0 : index
    %c0_7 = arith.constant 0 : index
    %6 = vector.load %arg5[%c0_6, %c0_7] : memref<128x128xbf16, #tpu.memory_space<vmem>>, vector<128x128xbf16>
    %cst_8 = arith.constant dense<0.000000e+00> : vector<1024x128xf32>
    %7 = tpu.matmul %5, %6, %cst_8 {dimension_numbers = #tpu.dot_dimension_numbers<[1], [0], [0], [1], [0, 0, 1, 1], [], []>} : vector<1024x128xbf16>, vector<128x128xbf16>, vector<1024x128xf32> -> vector<1024x128xf32>
    %8 = vector.shape_cast %7 : vector<1024x128xf32> to vector<8x128x128xf32>
    %c0_9 = arith.constant 0 : index
    %c0_10 = arith.constant 0 : index
    %9 = vector.load %arg6[%c0_9, %c0_10] : memref<1x128xf32, #tpu.memory_space<vmem>>, vector<1x128xf32>
    %10 = vector.shape_cast %9 : vector<1x128xf32> to vector<1x1x128xf32>
    %11 = vector.broadcast %10 : vector<1x1x128xf32> to vector<8x128x128xf32>
    %12 = arith.addf %8, %11 : vector<8x128x128xf32>
    %13 = vector.shape_cast %4 : vector<8x128xf32> to vector<8x1x128xf32>
    %14 = vector.broadcast %13 : vector<8x1x128xf32> to vector<8x128x128xf32>
    %15 = arith.addf %12, %14 : vector<8x128x128xf32>
    %16 = arith.truncf %15 : vector<8x128x128xf32> to vector<8x128x128xbf16>
    %17 = math.tanh %16 : vector<8x128x128xbf16>
    %c0_11 = arith.constant 0 : index
    %c0_12 = arith.constant 0 : index
    %18 = vector.load %arg7[%c0_11, %c0_12] : memref<1x128xf32, #tpu.memory_space<vmem>>, vector<1x128xf32>
    %19 = arith.extf %17 : vector<8x128x128xbf16> to vector<8x128x128xf32>
    %20 = vector.shape_cast %18 : vector<1x128xf32> to vector<1x1x128xf32>
    %21 = vector.broadcast %20 : vector<1x1x128xf32> to vector<8x128x128xf32>
    %22 = arith.mulf %19, %21 : vector<8x128x128xf32>
    %cst_13 = arith.constant dense<0.000000e+00> : vector<8x128xf32>
    %23 = vector.multi_reduction <add>, %22, %cst_13 [2] : vector<8x128x128xf32> to vector<8x128xf32>
    %c0_14 = arith.constant 0 : index
    %c0_15 = arith.constant 0 : index
    %24 = vector.load %arg3[%c0_14, %c0_15] : memref<8x128xf32, #tpu.memory_space<vmem>>, vector<8x128xf32>
    %25 = arith.addf %23, %24 : vector<8x128xf32>
    %cst_16 = arith.constant dense<0xFF800000> : vector<8xf32>
    %26 = vector.multi_reduction <maximumf>, %25, %cst_16 [1] : vector<8x128xf32> to vector<8xf32>
    %27 = vector.shape_cast %26 : vector<8xf32> to vector<8x1xf32>
    %28 = vector.broadcast %27 : vector<8x1xf32> to vector<8x128xf32>
    %29 = arith.subf %25, %28 : vector<8x128xf32>
    %30 = math.exp %29 : vector<8x128xf32>
    %cst_17 = arith.constant dense<0.000000e+00> : vector<8xf32>
    %31 = vector.multi_reduction <add>, %30, %cst_17 [1] : vector<8x128xf32> to vector<8xf32>
    %32 = vector.shape_cast %31 : vector<8xf32> to vector<8x1xf32>
    %33 = tpu.reciprocal %32 {approx = true} : vector<8x1xf32> -> vector<8x1xf32>
    %34 = vector.broadcast %33 : vector<8x1xf32> to vector<8x128xf32>
    %35 = arith.mulf %30, %34 : vector<8x128xf32>
    %36 = vector.shape_cast %35 : vector<8x128xf32> to vector<8x128x1xf32>
    %37 = arith.extf %1 : vector<8x128x128xbf16> to vector<8x128x128xf32>
    %38 = vector.broadcast %36 : vector<8x128x1xf32> to vector<8x128x128xf32>
    %39 = arith.mulf %38, %37 : vector<8x128x128xf32>
    %cst_18 = arith.constant dense<0.000000e+00> : vector<8x128xf32>
    %40 = vector.multi_reduction <add>, %39, %cst_18 [1] : vector<8x128x128xf32> to vector<8x128xf32>
    %c0_19 = arith.constant 0 : index
    %c0_20 = arith.constant 0 : index
    %41 = vector.load %arg8[%c0_19, %c0_20] : memref<8x128xf32, #tpu.memory_space<vmem>>, vector<8x128xf32>
    tpu.vector_store %arg8[%c0_19, %c0_20], %40 {strides = array<i32>} : memref<8x128xf32, #tpu.memory_space<vmem>>, vector<8x128xf32>,
    %c0_21 = arith.constant 0 : index
    %c0_22 = arith.constant 0 : index
    %42 = vector.load %arg9[%c0_21, %c0_22] : memref<8x128xf32, #tpu.memory_space<vmem>>, vector<8x128xf32>
    tpu.vector_store %arg9[%c0_21, %c0_22], %35 {strides = array<i32>} : memref<8x128xf32, #tpu.memory_space<vmem>>, vector<8x128xf32>,
    return
  }
  func.func @transform_0(%arg0: i32) -> (i32, i32) {
    %c0_i32 = arith.constant 0 : i32
    %c0_i32_0 = arith.constant 0 : i32
    return %arg0, %c0_i32 : i32, i32
  }
  func.func @transform_1(%arg0: i32) -> (i32, i32, i32) {
    %c0_i32 = arith.constant 0 : i32
    %c0_i32_0 = arith.constant 0 : i32
    %c0_i32_1 = arith.constant 0 : i32
    return %arg0, %c0_i32, %c0_i32_0 : i32, i32, i32
  }
  func.func @transform_2(%arg0: i32) -> (i32, i32) {
    %c0_i32 = arith.constant 0 : i32
    %c0_i32_0 = arith.constant 0 : i32
    return %arg0, %c0_i32 : i32, i32
  }
  func.func @transform_3(%arg0: i32) -> (i32, i32) {
    %c0_i32 = arith.constant 0 : i32
    %c0_i32_0 = arith.constant 0 : i32
    %c0_i32_1 = arith.constant 0 : i32
    return %c0_i32, %c0_i32_0 : i32, i32
  }
  func.func @transform_4(%arg0: i32) -> (i32, i32) {
    %c0_i32 = arith.constant 0 : i32
    %c0_i32_0 = arith.constant 0 : i32
    %c0_i32_1 = arith.constant 0 : i32
    return %c0_i32, %c0_i32_0 : i32, i32
  }
  func.func @transform_5(%arg0: i32) -> (i32, i32) {
    %c0_i32 = arith.constant 0 : i32
    %c0_i32_0 = arith.constant 0 : i32
    %c0_i32_1 = arith.constant 0 : i32
    return %c0_i32, %c0_i32_0 : i32, i32
  }
  func.func @transform_6(%arg0: i32) -> (i32, i32) {
    %c0_i32 = arith.constant 0 : i32
    %c0_i32_0 = arith.constant 0 : i32
    %c0_i32_1 = arith.constant 0 : i32
    return %c0_i32, %c0_i32_0 : i32, i32
  }
  func.func @transform_7(%arg0: i32) -> (i32, i32) {
    %c0_i32 = arith.constant 0 : i32
    %c0_i32_0 = arith.constant 0 : i32
    return %arg0, %c0_i32 : i32, i32
  }
  func.func @transform_8(%arg0: i32) -> (i32, i32) {
    %c0_i32 = arith.constant 0 : i32
    %c0_i32_0 = arith.constant 0 : i32
    return %arg0, %c0_i32 : i32, i32
  }
}

</mosaic_0001>

<bundles_post_ra>
// kernel: tpu_custom_call.1
= control target key start
LH: loop header
LB: loop body
LE: loop exit
PB: predicated region body
PF: predicated region fallthrough
CT: control target
= control target key end

     0   :  { %14 = vsyncpa [#allocation3], 0  ;;  %s14452_s0 = inlined_call_operand.hbm [shape: f32[8,128], index: 0, kind: input, shape index: {}]   ;;  %s14453_s1 = inlined_call_operand.hbm [shape: bf16[8,128,128], index: 1, kind: input, shape index: {}]   ;;  %s14454_s2 = inlined_call_operand.hbm [shape: f32[8,128], index: 2, kind: input, shape index: {}]   ;;  %s14455_s3 = inlined_call_operand.hbm [shape: bf16[128,128], index: 3, kind: input, shape index: {}]   ;;  %s14456_s4 = inlined_call_operand.hbm [shape: bf16[128,128], index: 4, kind: input, shape index: {}]   ;;  %s14457_s5 = inlined_call_operand.vmem [shape: f32[1,128], index: 5, kind: input, shape index: {}]   ;;  %s14458_s6 = inlined_call_operand.vmem [shape: f32[1,128], index: 6, kind: input, shape index: {}]   ;;  %s14459_s7 = inlined_call_operand.hbm [shape: f32[8,128], index: 7, kind: output, shape index: {0}]   ;;  %s14460_s8 = inlined_call_operand.hbm [shape: f32[8,128], index: 8, kind: output, shape index: {1}]  }
   0x1   :  { %15 = vsyncpa [#allocation6], 0 }
   0x2   :  { %16 = vsyncpa [#allocation9], 0 }
   0x3   :  { %17 = vsyncpa [#allocation4], 0 }
   0x4   :  { %18 = vsyncpa [#allocation13], 0  ;;  %s8930_s27 = smov [#allocation5]   ;;  %s8766_s9 = scalar_lea.hbm %s14453_s1, 8192 }
   0x5   :  { %s34_s28 = sshll.u32 %s8930_s27, 4  ;;  %p8767_p0 = scmp.ne.s32.totalorder %s14453_s1, %s8766_s9  ;;  %s35_s28 = int_to_ptr.vmem [resolvable:$true] %s34_s28 }
   0x6   :  { %p8770_p1 = scmp.lt.u32.totalorder %s8766_s9, %s14453_s1 }
   0x8   :  { %p8772_p2 = pnand %p8770_p1, %p8767_p0 }
   0xa   :  { %8775 = shalt.err (!%p8772_p2)
}
   0xb   :  { %s8776_s14 = scalar_lea.vmem %s35_s28, 8192  ;;  %p8781_p4 = scmp.lt.s32.totalorder %s35_s28, %s35_s28 }
   0xc   :  { %p8777_p3 = scmp.ne.s32.totalorder %s35_s28, %s8776_s14  ;;  %p8782_p5 = scmp.lt.s32.totalorder %s8776_s14, %s8776_s14 }
   0xe   :  { %p8783_p6 = por %p8782_p5, %p8781_p4 }
  0x10   :  { %p8784_p7 = pnand %p8783_p6, %p8777_p3 }
  0x12   :  { %8787 = shalt.err (!%p8784_p7)
}
  0x13   :  { %s8931_s15 = smov 64   ;;  %s8932_s16 = smov 4  }
  0x14   :  { %40 = dma.hbm_to_vmem [thread:$0]  %s14453_s1, 8192, %s35_s28, [#allocation6], %s8931_s15, %s8931_s15, %s8932_s16  }
  0x15   :  { %s8933_s19 = smov [#allocation8]   ;;  %s8934_s21 = smov [#allocation2]  }
  0x16   :  { %s56_s20 = sshll.u32 %s8933_s19, 4  ;;  %s25_s22 = sshll.u32 %s8934_s21, 4  ;;  %s57_s20 = int_to_ptr.vmem [resolvable:$true] %s56_s20  ;;  %s26_s22 = int_to_ptr.vmem [resolvable:$true] %s25_s22 }
  0x17   :  { %s8788_s25 = scalar_lea.hbm %s14455_s3, 1024 }
  0x18   :  { %p8789_p8 = scmp.ne.s32.totalorder %s14455_s3, %s8788_s25  ;;  %p8792_p9 = scmp.lt.u32.totalorder %s8788_s25, %s14455_s3 }
  0x1a   :  { %p8794_p10 = pnand %p8792_p9, %p8789_p8 }
  0x1c   :  { %8797 = shalt.err (!%p8794_p10)
}
  0x1d   :  { %s8798_s1 = scalar_lea.vmem %s57_s20, 1024  ;;  %p8803_p12 = scmp.lt.s32.totalorder %s57_s20, %s57_s20 }
  0x1e   :  { %p8799_p11 = scmp.ne.s32.totalorder %s57_s20, %s8798_s1  ;;  %p8804_p13 = scmp.lt.s32.totalorder %s8798_s1, %s8798_s1 }
  0x20   :  { %p8805_p0 = por %p8804_p13, %p8803_p12 }
  0x22   :  { %p8806_p1 = pnand %p8805_p0, %p8799_p11 }
  0x24   :  { %8809 = shalt.err (!%p8806_p1)
}
  0x25   :  { %62 = dma.hbm_to_vmem [thread:$0]  %s14455_s3, 1024, %s57_s20, [#allocation9], %s8931_s15, %s8931_s15, %s8932_s16  }
  0x26   :  { %s8810_s12 = scalar_lea.hbm %s14452_s0, 128 }
  0x27   :  { %p8811_p2 = scmp.ne.s32.totalorder %s14452_s0, %s8810_s12  ;;  %p8814_p3 = scmp.lt.u32.totalorder %s8810_s12, %s14452_s0 }
  0x29   :  { %p8816_p4 = pnand %p8814_p3, %p8811_p2 }
  0x2b   :  { %8819 = shalt.err (!%p8816_p4)
}
  0x2c   :  { %s8820_s19 = scalar_lea.vmem %s26_s22, 128  ;;  %p8825_p6 = scmp.lt.s32.totalorder %s26_s22, %s26_s22 }
  0x2d   :  { %p8821_p5 = scmp.ne.s32.totalorder %s26_s22, %s8820_s19  ;;  %p8826_p7 = scmp.lt.s32.totalorder %s8820_s19, %s8820_s19 }
  0x2f   :  { %p8827_p8 = por %p8826_p7, %p8825_p6 }
  0x31   :  { %p8828_p9 = pnand %p8827_p8, %p8821_p5 }
  0x33   :  { %8831 = shalt.err (!%p8828_p9)
}
  0x34   :  { %28 = dma.hbm_to_vmem [thread:$0]  %s14452_s0, 128, %s26_s22, [#allocation3]  }
  0x35   :  { %s8935_s21 = smov [#allocation7]   ;;  %s8936_s24 = smov [#allocation10]  }
  0x36   :  { %s47_s23 = sshll.u32 %s8935_s21, 4  ;;  %s68_s25 = sshll.u32 %s8936_s24, 4  ;;  %s48_s23 = int_to_ptr.vmem [resolvable:$true] %s47_s23  ;;  %s69_s25 = int_to_ptr.vmem [resolvable:$true] %s68_s25 }
  0x37   :  { %s8832_s29 = scalar_lea.hbm %s14454_s2, 128 }
  0x38   :  { %p8833_p10 = scmp.ne.s32.totalorder %s14454_s2, %s8832_s29  ;;  %p8836_p11 = scmp.lt.u32.totalorder %s8832_s29, %s14454_s2 }
  0x3a   :  { %p8838_p12 = pnand %p8836_p11, %p8833_p10 }
  0x3c   :  { %8841 = shalt.err (!%p8838_p12)
}
  0x3d   :  { %s8842_s0 = scalar_lea.vmem %s48_s23, 128  ;;  %p8847_p0 = scmp.lt.s32.totalorder %s48_s23, %s48_s23 }
  0x3e   :  { %p8843_p13 = scmp.ne.s32.totalorder %s48_s23, %s8842_s0  ;;  %p8848_p1 = scmp.lt.s32.totalorder %s8842_s0, %s8842_s0 }
  0x40   :  { %p8849_p2 = por %p8848_p1, %p8847_p0 }
  0x42   :  { %p8850_p3 = pnand %p8849_p2, %p8843_p13 }
  0x44   :  { %8853 = shalt.err (!%p8850_p3)
}
  0x45   :  { %50 = dma.hbm_to_vmem [thread:$0]  %s14454_s2, 128, %s48_s23, [#allocation6]  }
  0x46   :  { %s8854_s13 = scalar_lea.hbm %s14456_s4, 1024 }
  0x47   :  { %p8855_p4 = scmp.ne.s32.totalorder %s14456_s4, %s8854_s13  ;;  %p8858_p5 = scmp.lt.u32.totalorder %s8854_s13, %s14456_s4 }
  0x49   :  { %p8860_p6 = pnand %p8858_p5, %p8855_p4 }
  0x4b   :  { %8863 = shalt.err (!%p8860_p6)
}
  0x4c   :  { %s8864_s3 = scalar_lea.vmem %s69_s25, 1024  ;;  %p8869_p8 = scmp.lt.s32.totalorder %s69_s25, %s69_s25 }
  0x4d   :  { %p8865_p7 = scmp.ne.s32.totalorder %s69_s25, %s8864_s3  ;;  %p8870_p9 = scmp.lt.s32.totalorder %s8864_s3, %s8864_s3 }
  0x4f   :  { %p8871_p10 = por %p8870_p9, %p8869_p8 }
  0x51   :  { %p8872_p11 = pnand %p8871_p10, %p8865_p7 }
  0x53   :  { %8875 = shalt.err (!%p8872_p11)
}
  0x54   :  { %74 = dma.hbm_to_vmem [thread:$0]  %s14456_s4, 1024, %s69_s25, [#allocation9], %s8931_s15, %s8931_s15, %s8932_s16  }
  0x55   :  { %8920 = dma.done.wait [#allocation3], 128  }
  0x56   :  { %8921 = vsyncadd [#allocation3], 4294967168 }
  0x57   :  { %8922 = dma.done.wait [#allocation6], 8320  }
  0x58   :  { %8923 = vsyncadd [#allocation6], 4294958976 }
  0x59   :  { %8924 = dma.done.wait [#allocation9], 2048  }
  0x5a   :  { %8925 = vsyncadd [#allocation9], 4294965248  ;;  %v8937_v0 = vmov 0.0   ;;  %vm8938_vm0 = vmmov 0   ;;  %v8169_v1 = vld [vmem:[#allocation8] sm:$0xff]   ;;  %v8171_v3 = vld [vmem:[#allocation8 + $0x8] sm:$0xff]   ;;  %v14461_v10 = vlaneseq }
  0x5b   :  { %7974 = vmatprep.subr.bf16.mxu0 %v8937_v0  ;;  %7990 = vmatprep.mubr.msk.bf16.mxu0 %vm8938_vm0, %v8937_v0  ;;  %v9057_v2 = vld [vmem:[#allocation10] sm:$0xff]   ;;  %v9060_v4 = vld [vmem:[#allocation10 + $0x8] sm:$0xff]   ;;  %v9064_v5 = vld [vmem:[#allocation10 + $0x10] sm:$0xff]   ;;  %vm3639_vm1 = vcmask 130112   ;;  %vm3646_vm2 = vcmask 195712   ;;  %vm3653_vm3 = vcmask 261312  }
  0x5c   :  { %7975 = vmatpush3.bf16.msra.mxu0 %v8169_v1  ;;  %8138 = vmatprep.subr.bf16.mxu1 %v9057_v2  ;;  %v8173_v6 = vld [vmem:[#allocation8 + $0x10] sm:$0xff]   ;;  %v9068_v7 = vld [vmem:[#allocation10 + $0x18] sm:$0xff]   ;;  %v9072_v9 = vld [vmem:[#allocation10 + $0x20] sm:$0xff]   ;;  %v9079_v14 = vshrl.u32 %v14461_v10, 7  ;;  %vm3660_vm4 = vcmask 326912   ;;  %vm14628_vm5 = vcmask 392512  }
  0x5d   :  { %7976 = vmatprep.subr.bf16.mxu0 %v8937_v0  ;;  %8146 = vmatpush3.bf16.msra.mxu1 %v9057_v2  ;;  %v8175_v8 = vld [vmem:[#allocation8 + $0x18] sm:$0xff]   ;;  %v8177_v11 = vld [vmem:[#allocation8 + $0x20] sm:$0xff]   ;;  %v9076_v13 = vld [vmem:[#allocation10 + $0x28] sm:$0xff]   ;;  %vm14629_vm6 = vcmask 458112   ;;  %vm3681_vm7 = vcmask 523712   ;;  %vm14632_vm8 = vcmask 589312  }
  0x5e   :  { %8139 = vmatprep.subr.bf16.mxu1 %v9060_v4  ;;  %v152_v12 = vld [vmem:[#allocation5 + $0xe0] sm:$0xff]   ;;  %14821 = vst [vmem:[#allocation19_spill] sm:$0xff] %v9079_v14  ;;  %v8179_v15 = vld [vmem:[#allocation8 + $0x28] sm:$0xff]   ;;  %v9083_v16 = vld [vmem:[#allocation10 + $0x30] sm:$0xff]   ;;  %v9086_v17 = vsub.s32 0, %v9079_v14  ;;  %v9123_v32 = vsub.s32 1, %v9079_v14 }
  0x5f   :  { %8066 = vmatprep.mubr.bf16.mxu1 %v152_v12  ;;  %v8181_v18 = vld [vmem:[#allocation8 + $0x30] sm:$0xff]   ;;  %v9089_v19 = vld [vmem:[#allocation7] sm:$0xff]  ;;  %v154_v25 = vld [vmem:[#allocation5 + $0xe8] sm:$0xff]   ;;  %v9139_v48 = vsub.s32 2, %v9079_v14  ;;  %vm14631_vm9 = vcmask 654912   ;;  %vm14630_vm10 = vcmask 720512  }
  0x60   :  { %7977 = vmatpush3.bf16.msra.mxu0 %v8171_v3  ;;  %14822 = vst [vmem:[#allocation20_spill] sm:$0xff] %v9086_v17  ;;  %v9092_v20 = vld [vmem:[#allocation10 + $0x38] sm:$0xff]   ;;  %v9096_v21 = vrot.slane %v9089_v19, %v9086_v17  ;;  %v95_v23 = vld [vmem:[#allocation2] sm:$0xff]  ;;  %v156_v27 = vld [vmem:[#allocation5 + $0xf0] sm:$0xff]   ;;  %v2394_v35 = vrot.slane %v9089_v19, %v9123_v32  ;;  %vm3709_vm11 = vcmask 786112   ;;  %vm3716_vm12 = vcmask 851712  }
  0x61   :  { %7978 = vmatprep.subr.bf16.mxu0 %v8937_v0  ;;  %8147 = vmatpush3.bf16.msra.mxu1 %v9060_v4  ;;  %v8183_v22 = vld [vmem:[#allocation8 + $0x38] sm:$0xff]   ;;  %v224_v26 = vpack.c.bf16 %v95_v23, %v95_v23  ;;  %v158_v28 = vld [vmem:[#allocation5 + $0xf8] sm:$0xff]   ;;  %v162_v30 = vld [vmem:[#allocation5 + $0x108] sm:$0xff]   ;;  %14823 = vst [vmem:[#allocation21_spill] sm:$0xff] %v9123_v32  ;;  %v2461_v53 = vrot.slane %v9089_v19, %v9139_v48  ;;  %vm3723_vm13 = vcmask 917312   ;;  %vm3730_vm14 = vcmask 982912  }
  0x62   :  { %8140 = vmatprep.subr.bf16.mxu1 %v9064_v5  ;;  %v96_v24 = vld [vmem:[#allocation5] sm:$0xff]   ;;  %2333 = vbcast.lane.b32.xlu1 %v9096_v21, 264  ;;  %v164_v31 = vld [vmem:[#allocation5 + $0x110] sm:$0xff]   ;;  %v166_v33 = vld [vmem:[#allocation5 + $0x118] sm:$0xff]   ;;  %14824 = vst [vmem:[#allocation22_spill] sm:$0xff] %v9139_v48  ;;  %vm3737_vm15 = vcmask 1048512  }
  0x63   :  { %2329 = vbcast.lane.b32.xlu0 %v9096_v21, 256  ;;  %v160_v29 = vld [vmem:[#allocation5 + $0x100] sm:$0xff]   ;;  %v98_v36 = vld [vmem:[#allocation5 + $0x8] sm:$0xff]   ;;  %v100_v37 = vld [vmem:[#allocation5 + $0x10] sm:$0xff]   ;;  %vm14633_vm0 = vcmask 1041409  }
  0x64   :  { %7979 = vmatpush3.bf16.msra.mxu0 %v8173_v6  ;;  %v168_v34 = vld [vmem:[#allocation5 + $0x120] sm:$0xff]   ;;  %v170_v38 = vld [vmem:[#allocation5 + $0x128] sm:$0xff]   ;;  %v172_v39 = vld [vmem:[#allocation5 + $0x130] sm:$0xff]  }
  0x65   :  { %7980 = vmatprep.subr.bf16.mxu0 %v8937_v0  ;;  %8148 = vmatpush3.bf16.msra.mxu1 %v9064_v5  ;;  %v102_v40 = vld [vmem:[#allocation5 + $0x18] sm:$0xff]   ;;  %v104_v41 = vld [vmem:[#allocation5 + $0x20] sm:$0xff]   ;;  %v106_v44 = vld [vmem:[#allocation5 + $0x28] sm:$0xff]  }
  0x66   :  { %8141 = vmatprep.subr.bf16.mxu1 %v9068_v7  ;;  %2337 = vbcast.lane.b32.xlu1 %v9096_v21, 272  ;;  %v174_v42 = vld [vmem:[#allocation5 + $0x138] sm:$0xff]   ;;  %v176_v43 = vld [vmem:[#allocation5 + $0x140] sm:$0xff]   ;;  %v108_v45 = vld [vmem:[#allocation5 + $0x30] sm:$0xff]  }
  0x67   :  { %2345 = vbcast.lane.b32.xlu0 %v9096_v21, 288  ;;  %v178_v46 = vld [vmem:[#allocation5 + $0x148] sm:$0xff]   ;;  %v180_v47 = vld [vmem:[#allocation5 + $0x150] sm:$0xff]   ;;  %v110_v49 = vld [vmem:[#allocation5 + $0x38] sm:$0xff]  }
  0x68   :  { %7981 = vmatpush3.bf16.msra.mxu0 %v8175_v8  ;;  %v112_v50 = vld [vmem:[#allocation5 + $0x40] sm:$0xff]   ;;  %v182_v51 = vld [vmem:[#allocation5 + $0x158] sm:$0xff]   ;;  %v114_v54 = vld [vmem:[#allocation5 + $0x48] sm:$0xff]  }
  0x69   :  { %7982 = vmatprep.subr.bf16.mxu0 %v8937_v0  ;;  %8149 = vmatpush3.bf16.msra.mxu1 %v9068_v7  ;;  %v184_v52 = vld [vmem:[#allocation5 + $0x160] sm:$0xff]   ;;  %v116_v55 = vld [vmem:[#allocation5 + $0x50] sm:$0xff]   ;;  %v186_v56 = vld [vmem:[#allocation5 + $0x168] sm:$0xff]  }
  0x6a   :  { %8142 = vmatprep.subr.bf16.mxu1 %v9072_v9  ;;  %2341 = vbcast.lane.b32.xlu1 %v9096_v21, 280  ;;  %v188_v57 = vld [vmem:[#allocation5 + $0x170] sm:$0xff]   ;;  %v118_v58 = vld [vmem:[#allocation5 + $0x58] sm:$0xff]   ;;  %v120_v59 = vld [vmem:[#allocation5 + $0x60] sm:$0xff]  }
  0x6b   :  { %2353 = vbcast.lane.b32.xlu0 %v9096_v21, 304  ;;  %v190_v60 = vld [vmem:[#allocation5 + $0x178] sm:$0xff]   ;;  %v192_v61 = vld [vmem:[#allocation5 + $0x180] sm:$0xff]   ;;  %v122_v62 = vld [vmem:[#allocation5 + $0x68] sm:$0xff]  }
  0x6c   :  { %7983 = vmatpush3.bf16.msra.mxu0 %v8177_v11  ;;  %v124_v63 = vld [vmem:[#allocation5 + $0x70] sm:$0xff]   ;;  %v126_v3 = vld [vmem:[#allocation5 + $0x78] sm:$0xff]   ;;  %v200_v6 = vld [vmem:[#allocation5 + $0x1a0] sm:$0xff]  }
  0x6d   :  { %7984 = vmatprep.subr.bf16.mxu0 %v8937_v0  ;;  %8150 = vmatpush3.bf16.msra.mxu1 %v9072_v9  ;;  %v196_v1 = vld [vmem:[#allocation5 + $0x190] sm:$0xff]   ;;  %v130_v8 = vld [vmem:[#allocation5 + $0x88] sm:$0xff]  }
  0x6e   :  { %8143 = vmatprep.subr.bf16.mxu1 %v9076_v13  ;;  %2349 = vbcast.lane.b32.xlu1 %v9096_v21, 296  ;;  %v202_v11 = vld [vmem:[#allocation5 + $0x1a8] sm:$0xff]   ;;  %v204_v12 = vld [vmem:[#allocation5 + $0x1b0] sm:$0xff]  }
  0x6f   :  { %2361 = vbcast.lane.b32.xlu0 %v9096_v21, 320  ;;  %v212_v23 = vld [vmem:[#allocation5 + $0x1d0] sm:$0xff]  }
  0x70   :  { %7985 = vmatpush3.bf16.msra.mxu0 %v8179_v15  ;;  %v136_v15 = vld [vmem:[#allocation5 + $0xa0] sm:$0xff]  }
  0x71   :  { %7986 = vmatprep.subr.bf16.mxu0 %v8937_v0  ;;  %8151 = vmatpush3.bf16.msra.mxu1 %v9076_v13 }
  0x72   :  { %8144 = vmatprep.subr.bf16.mxu1 %v9083_v16  ;;  %2357 = vbcast.lane.b32.xlu1 %v9096_v21, 312 }
  0x73   :  { %2369 = vbcast.lane.b32.xlu0 %v9096_v21, 336 }
  0x74   :  { %7987 = vmatpush3.bf16.msra.mxu0 %v8181_v18  ;;  %v208_v18 = vld [vmem:[#allocation5 + $0x1c0] sm:$0xff]  }
  0x75   :  { %7988 = vmatprep.subr.bf16.mxu0 %v8937_v0  ;;  %8152 = vmatpush3.bf16.msra.mxu1 %v9083_v16  ;;  %v194_v0 = vld [vmem:[#allocation5 + $0x188] sm:$0xff]  }
  0x76   :  { %8145 = vmatprep.subr.bf16.mxu1 %v9092_v20  ;;  %2365 = vbcast.lane.b32.xlu1 %v9096_v21, 328 }
  0x77   :  { %2377 = vbcast.lane.b32.xlu0 %v9096_v21, 352 }
  0x78   :  { %7989 = vmatpush3.bf16.msra.mxu0 %v8183_v22  ;;  %v210_v22 = vld [vmem:[#allocation5 + $0x1c8] sm:$0xff]  }
  0x79   :  { %7994 = vmatprep.subr.bf16.mxu0 %v9057_v2  ;;  %8153 = vmatpush3.bf16.msra.mxu1 %v9092_v20 }
  0x7a   :  { %2373 = vbcast.lane.b32.xlu1 %v9096_v21, 344 }
  0x7b   :  { %7991 = vmatmul.mubr.bf16.vlgmr.msra.gmra.mrb[0].mxu0 %v224_v26  ;;  %2385 = vbcast.lane.b32.xlu0 %v9096_v21, 368  ;;  %v144_v26 = vld [vmem:[#allocation5 + $0xc0] sm:$0xff]  }
  0x7c   :  { %7995 = vmatpush3.bf16.msra.mxu0 %v9057_v2  ;;  %8010 = vmatprep.mubr.bf16.mxu0 %v96_v24  ;;  %v9144_v2 = vsub.s32 3, %v9079_v14  ;;  %v9149_v24 = vsub.s32 4, %v9079_v14 }
  0x7d   :  { %8067 = vmatmul.mubr.bf16.vlgmr.msra.gmra.mrb[0].mxu1 %v154_v25  ;;  %7996 = vmatprep.subr.bf16.mxu0 %v9060_v4  ;;  %v142_v25 = vld [vmem:[#allocation5 + $0xb8] sm:$0xff]  }
  0x7e   :  { %8070 = vmatprep.mubr.bf16.mxu1 %v156_v27  ;;  %2381 = vbcast.lane.b32.xlu1 %v9096_v21, 360  ;;  %14825 = vst [vmem:[#allocation23_spill] sm:$0xff] %v9144_v2  ;;  %14826 = vst [vmem:[#allocation24_spill] sm:$0xff] %v9149_v24  ;;  %v214_v27 = vld [vmem:[#allocation5 + $0x1d8] sm:$0xff]  }
  0x7f   :  { %2396 = vbcast.lane.b32.xlu0 %v2394_v35, 256 }
  0x80   :  { %7997 = vmatpush3.bf16.msra.mxu0 %v9060_v4  ;;  %v128_v4 = vld [vmem:[#allocation5 + $0x80] sm:$0xff]  }
  0x81   :  { %7998 = vmatprep.subr.bf16.mxu0 %v9064_v5 }
  0x82   :  { %2389 = vbcast.lane.b32.xlu1 %v9096_v21, 376  ;;  %v140_v21 = vld [vmem:[#allocation5 + $0xb0] sm:$0xff]  }
  0x83   :  { %2404 = vbcast.lane.b32.xlu0 %v2394_v35, 272 }
  0x84   :  { %7999 = vmatpush3.bf16.msra.mxu0 %v9064_v5  ;;  %v198_v5 = vld [vmem:[#allocation5 + $0x198] sm:$0xff]  }
  0x85   :  { %8071 = vmatmul.mubr.bf16.gmra.mrb[4].mxu1 %v158_v28  ;;  %8000 = vmatprep.subr.bf16.mxu0 %v9068_v7  ;;  %v216_v28 = vld [vmem:[#allocation5 + $0x1e0] sm:$0xff]  }
  0x86   :  { %8074 = vmatprep.mubr.bf16.mxu1 %v160_v29  ;;  %2400 = vbcast.lane.b32.xlu1 %v2394_v35, 264  ;;  %v9153_v29 = vrot.slane %v9089_v19, %v9149_v24 }
  0x87   :  { %2412 = vbcast.lane.b32.xlu0 %v2394_v35, 288 }
  0x88   :  { %8001 = vmatpush3.bf16.msra.mxu0 %v9068_v7  ;;  %v2528_v7 = vrot.slane %v9089_v19, %v9144_v2  ;;  %14827 = vst [vmem:[#allocation25_spill] sm:$0xff] %v9153_v29  ;;  %v150_v19 = vld [vmem:[#allocation5 + $0xd8] sm:$0xff]  }
  0x89   :  { %8002 = vmatprep.subr.bf16.mxu0 %v9072_v9 }
  0x8a   :  { %2408 = vbcast.lane.b32.xlu1 %v2394_v35, 280 }
  0x8b   :  { %2420 = vbcast.lane.b32.xlu0 %v2394_v35, 304 }
  0x8c   :  { %8003 = vmatpush3.bf16.msra.mxu0 %v9072_v9  ;;  %v132_v9 = vld [vmem:[#allocation5 + $0x90] sm:$0xff]  }
  0x8d   :  { %8075 = vmatmul.mubr.bf16.gmra.mrb[8].mxu1 %v162_v30  ;;  %8004 = vmatprep.subr.bf16.mxu0 %v9076_v13  ;;  %v146_v30 = vld [vmem:[#allocation5 + $0xc8] sm:$0xff]  }
  0x8e   :  { %8078 = vmatprep.mubr.bf16.mxu1 %v164_v31  ;;  %2416 = vbcast.lane.b32.xlu1 %v2394_v35, 296  ;;  %v148_v31 = vld [vmem:[#allocation5 + $0xd0] sm:$0xff]  }
  0x8f   :  { %2428 = vbcast.lane.b32.xlu0 %v2394_v35, 320 }
  0x90   :  { %8005 = vmatpush3.bf16.msra.mxu0 %v9076_v13  ;;  %v134_v13 = vld [vmem:[#allocation5 + $0x98] sm:$0xff]  }
  0x91   :  { %8006 = vmatprep.subr.bf16.mxu0 %v9083_v16 }
  0x92   :  { %2424 = vbcast.lane.b32.xlu1 %v2394_v35, 312 }
  0x93   :  { %2436 = vbcast.lane.b32.xlu0 %v2394_v35, 336 }
  0x94   :  { %8007 = vmatpush3.bf16.msra.mxu0 %v9083_v16  ;;  %v206_v16 = vld [vmem:[#allocation5 + $0x1b8] sm:$0xff]  }
  0x95   :  { %8079 = vmatmul.mubr.bf16.gmra.mrb[12].mxu1 %v166_v33  ;;  %8008 = vmatprep.subr.bf16.mxu0 %v9092_v20  ;;  %v218_v33 = vld [vmem:[#allocation5 + $0x1e8] sm:$0xff]  }
  0x96   :  { %8082 = vmatprep.mubr.bf16.mxu1 %v168_v34  ;;  %2432 = vbcast.lane.b32.xlu1 %v2394_v35, 328  ;;  %v220_v34 = vld [vmem:[#allocation5 + $0x1f0] sm:$0xff]  }
  0x97   :  { %2444 = vbcast.lane.b32.xlu0 %v2394_v35, 352 }
  0x98   :  { %8009 = vmatpush3.bf16.msra.mxu0 %v9092_v20  ;;  %v138_v20 = vld [vmem:[#allocation5 + $0xa8] sm:$0xff]  }
  0x9a   :  { %2440 = vbcast.lane.b32.xlu1 %v2394_v35, 344 }
  0x9b   :  { %8011 = vmatmul.mubr.bf16.vlgmr.msra.gmra.mrb[4].mxu0 %v98_v36  ;;  %2452 = vbcast.lane.b32.xlu0 %v2394_v35, 368 }
  0x9c   :  { %8014 = vmatprep.mubr.bf16.mxu0 %v100_v37 }
  0x9d   :  { %8083 = vmatmul.mubr.bf16.gmra.mrb[16].mxu1 %v170_v38 }
  0x9e   :  { %8086 = vmatprep.mubr.bf16.mxu1 %v172_v39  ;;  %2448 = vbcast.lane.b32.xlu1 %v2394_v35, 360 }
  0x9f   :  { %2463 = vbcast.lane.b32.xlu0 %v2461_v53, 256 }
  0xa2   :  { %2456 = vbcast.lane.b32.xlu1 %v2394_v35, 376  ;;  %v222_v35 = vld [vmem:[#allocation5 + $0x1f8] sm:$0xff]  }
  0xa3   :  { %8015 = vmatmul.mubr.bf16.gmra.mrb[8].mxu0 %v102_v40  ;;  %2471 = vbcast.lane.b32.xlu0 %v2461_v53, 272 }
  0xa4   :  { %8018 = vmatprep.mubr.bf16.mxu0 %v104_v41 }
  0xa5   :  { %8087 = vmatmul.mubr.bf16.gmra.mrb[20].mxu1 %v174_v42 }
  0xa6   :  { %8090 = vmatprep.mubr.bf16.mxu1 %v176_v43  ;;  %2467 = vbcast.lane.b32.xlu1 %v2461_v53, 264 }
  0xa7   :  { %2479 = vbcast.lane.b32.xlu0 %v2461_v53, 288 }
  0xaa   :  { %2475 = vbcast.lane.b32.xlu1 %v2461_v53, 280 }
  0xab   :  { %8019 = vmatmul.mubr.bf16.gmra.mrb[12].mxu0 %v106_v44  ;;  %2487 = vbcast.lane.b32.xlu0 %v2461_v53, 304 }
  0xac   :  { %8022 = vmatprep.mubr.bf16.mxu0 %v108_v45 }
  0xad   :  { %8091 = vmatmul.mubr.bf16.gmra.mrb[24].mxu1 %v178_v46 }
  0xae   :  { %8094 = vmatprep.mubr.bf16.mxu1 %v180_v47  ;;  %2483 = vbcast.lane.b32.xlu1 %v2461_v53, 296 }
  0xaf   :  { %2495 = vbcast.lane.b32.xlu0 %v2461_v53, 320 }
  0xb2   :  { %2491 = vbcast.lane.b32.xlu1 %v2461_v53, 312 }
  0xb3   :  { %8023 = vmatmul.mubr.bf16.gmra.mrb[16].mxu0 %v110_v49  ;;  %2503 = vbcast.lane.b32.xlu0 %v2461_v53, 336 }
  0xb4   :  { %8026 = vmatprep.mubr.bf16.mxu0 %v112_v50 }
  0xb5   :  { %8095 = vmatmul.mubr.bf16.gmra.mrb[28].mxu1 %v182_v51 }
  0xb6   :  { %8098 = vmatprep.mubr.bf16.mxu1 %v184_v52  ;;  %2499 = vbcast.lane.b32.xlu1 %v2461_v53, 328 }
  0xb7   :  { %2511 = vbcast.lane.b32.xlu0 %v2461_v53, 352 }
  0xba   :  { %2507 = vbcast.lane.b32.xlu1 %v2461_v53, 344 }
  0xbb   :  { %8027 = vmatmul.mubr.bf16.gmra.mrb[20].mxu0 %v114_v54  ;;  %2519 = vbcast.lane.b32.xlu0 %v2461_v53, 368 }
  0xbc   :  { %8030 = vmatprep.mubr.bf16.mxu0 %v116_v55 }
  0xbd   :  { %8099 = vmatmul.mubr.bf16.gmra.mrb[32].mxu1 %v186_v56 }
  0xbe   :  { %8102 = vmatprep.mubr.bf16.mxu1 %v188_v57  ;;  %2515 = vbcast.lane.b32.xlu1 %v2461_v53, 360 }
  0xbf   :  { %2530 = vbcast.lane.b32.xlu0 %v2528_v7, 256 }
  0xc2   :  { %2523 = vbcast.lane.b32.xlu1 %v2461_v53, 376 }
  0xc3   :  { %8031 = vmatmul.mubr.bf16.gmra.mrb[24].mxu0 %v118_v58  ;;  %2538 = vbcast.lane.b32.xlu0 %v2528_v7, 272 }
  0xc4   :  { %8034 = vmatprep.mubr.bf16.mxu0 %v120_v59  ;;  %v8939_v59 = vmov 1966171168  }
  0xc5   :  { %8103 = vmatmul.mubr.bf16.gmra.mrb[36].mxu1 %v190_v60  ;;  %v1460_v60 = vunpack.c.l.s4 %v8939_v59 }
  0xc6   :  { %8106 = vmatprep.mubr.bf16.mxu1 %v192_v61  ;;  %2534 = vbcast.lane.b32.xlu1 %v2528_v7, 264 }
  0xc7   :  { %2546 = vbcast.lane.b32.xlu0 %v2528_v7, 288 }
  0xca   :  { %2542 = vbcast.lane.b32.xlu1 %v2528_v7, 280 }
  0xcb   :  { %8035 = vmatmul.mubr.bf16.gmra.mrb[28].mxu0 %v122_v62  ;;  %2554 = vbcast.lane.b32.xlu0 %v2528_v7, 304  ;;  %v1461_v62 = vunpack.c.0.s8 %v1460_v60 }
  0xcc   :  { %8038 = vmatprep.mubr.bf16.mxu0 %v124_v63 }
  0xcd   :  { %8107 = vmatmul.mubr.bf16.gmra.mrb[40].mxu1 %v194_v0 }
  0xce   :  { %8110 = vmatprep.mubr.bf16.mxu1 %v196_v1  ;;  %2550 = vbcast.lane.b32.xlu1 %v2528_v7, 296  ;;  %v9215_v1 = vsub.s32 %v1461_v62, %v9079_v14 }
  0xcf   :  { %2562 = vbcast.lane.b32.xlu0 %v2528_v7, 320 }
  0xd2   :  { %2558 = vbcast.lane.b32.xlu1 %v2528_v7, 312 }
  0xd3   :  { %8039 = vmatmul.mubr.bf16.gmra.mrb[32].mxu0 %v126_v3  ;;  %2570 = vbcast.lane.b32.xlu0 %v2528_v7, 336 }
  0xd4   :  { %8042 = vmatprep.mubr.bf16.mxu0 %v128_v4  ;;  %v9161_v36 = vpop.permute.xlu1 %2333 }
  0xd5   :  { %8111 = vmatmul.mubr.bf16.gmra.mrb[44].mxu1 %v198_v5  ;;  %14828 = vst [vmem:[#allocation26_spill] sm:$0xff] %v9161_v36  ;;  %v9165_v37 = vpop.permute.xlu0 %2329 }
  0xd6   :  { %8114 = vmatprep.mubr.bf16.mxu1 %v200_v6  ;;  %2566 = vbcast.lane.b32.xlu1 %v2528_v7, 328  ;;  %14829 = vst [vmem:[#allocation27_spill] sm:$0xff] %v9165_v37 }
  0xd7   :  { %2578 = vbcast.lane.b32.xlu0 %v2528_v7, 352 }
  0xd8   :  { %v9168_v38 = vpop.permute.xlu1 %2337 }
  0xd9   :  { %14830 = vst [vmem:[#allocation28_spill] sm:$0xff] %v9168_v38  ;;  %v9170_v39 = vpop.permute.xlu0 %2345 }
  0xda   :  { %2574 = vbcast.lane.b32.xlu1 %v2528_v7, 344  ;;  %14831 = vst [vmem:[#allocation29_spill] sm:$0xff] %v9170_v39 }
  0xdb   :  { %8043 = vmatmul.mubr.bf16.gmra.mrb[36].mxu0 %v130_v8  ;;  %2586 = vbcast.lane.b32.xlu0 %v2528_v7, 368 }
  0xdc   :  { %8046 = vmatprep.mubr.bf16.mxu0 %v132_v9  ;;  %v9172_v40 = vpop.permute.xlu1 %2341 }
  0xdd   :  { %8115 = vmatmul.mubr.bf16.gmra.mrb[48].mxu1 %v202_v11  ;;  %14832 = vst [vmem:[#allocation30_spill] sm:$0xff] %v9172_v40  ;;  %v9174_v41 = vpop.permute.xlu0 %2353 }
  0xde   :  { %8118 = vmatprep.mubr.bf16.mxu1 %v204_v12  ;;  %2582 = vbcast.lane.b32.xlu1 %v2528_v7, 360  ;;  %14833 = vst [vmem:[#allocation31_spill] sm:$0xff] %v9174_v41 }
  0xdf   :  { %2597 = vbcast.lane.b32.xlu0 %v9153_v29, 256 }
  0xe0   :  { %v9176_v42 = vpop.permute.xlu1 %2349 }
  0xe1   :  { %14834 = vst [vmem:[#allocation32_spill] sm:$0xff] %v9176_v42  ;;  %v9178_v43 = vpop.permute.xlu0 %2361 }
  0xe2   :  { %2590 = vbcast.lane.b32.xlu1 %v2528_v7, 376  ;;  %14835 = vst [vmem:[#allocation33_spill] sm:$0xff] %v9178_v43 }
  0xe3   :  { %8047 = vmatmul.mubr.bf16.gmra.mrb[40].mxu0 %v134_v13  ;;  %2605 = vbcast.lane.b32.xlu0 %v9153_v29, 272 }
  0xe4   :  { %8050 = vmatprep.mubr.bf16.mxu0 %v136_v15  ;;  %v9180_v44 = vpop.permute.xlu1 %2357 }
  0xe5   :  { %8119 = vmatmul.mubr.bf16.gmra.mrb[52].mxu1 %v206_v16  ;;  %14836 = vst [vmem:[#allocation34_spill] sm:$0xff] %v9180_v44  ;;  %v9182_v45 = vpop.permute.xlu0 %2369 }
  0xe6   :  { %8122 = vmatprep.mubr.bf16.mxu1 %v208_v18  ;;  %2601 = vbcast.lane.b32.xlu1 %v9153_v29, 264  ;;  %14837 = vst [vmem:[#allocation35_spill] sm:$0xff] %v9182_v45 }
  0xe7   :  { %2613 = vbcast.lane.b32.xlu0 %v9153_v29, 288 }
  0xe8   :  { %v9184_v46 = vpop.permute.xlu1 %2365 }
  0xe9   :  { %14838 = vst [vmem:[#allocation36_spill] sm:$0xff] %v9184_v46  ;;  %v9186_v47 = vpop.permute.xlu0 %2377 }
  0xea   :  { %2609 = vbcast.lane.b32.xlu1 %v9153_v29, 280  ;;  %14839 = vst [vmem:[#allocation37_spill] sm:$0xff] %v9186_v47 }
  0xeb   :  { %8051 = vmatmul.mubr.bf16.gmra.mrb[44].mxu0 %v138_v20  ;;  %2621 = vbcast.lane.b32.xlu0 %v9153_v29, 304 }
  0xec   :  { %8054 = vmatprep.mubr.bf16.mxu0 %v140_v21  ;;  %v9188_v49 = vpop.permute.xlu1 %2373 }
  0xed   :  { %8123 = vmatmul.mubr.bf16.gmra.mrb[56].mxu1 %v210_v22  ;;  %14840 = vst [vmem:[#allocation38_spill] sm:$0xff] %v9188_v49  ;;  %v9190_v50 = vpop.permute.xlu0 %2385 }
  0xee   :  { %8126 = vmatprep.mubr.bf16.mxu1 %v212_v23  ;;  %2617 = vbcast.lane.b32.xlu1 %v9153_v29, 296  ;;  %14841 = vst [vmem:[#allocation39_spill] sm:$0xff] %v9190_v50  ;;  %v9233_v23 = vld [vmem:[%s14457_s5] ss:$0 sm:$0xff] }
  0xef   :  { %2629 = vbcast.lane.b32.xlu0 %v9153_v29, 320 }
  0xf0   :  { %v9192_v51 = vpop.permute.xlu1 %2381 }
  0xf1   :  { %14842 = vst [vmem:[#allocation40_spill] sm:$0xff] %v9192_v51  ;;  %v9194_v52 = vpop.permute.xlu0 %2396 }
  0xf2   :  { %2625 = vbcast.lane.b32.xlu1 %v9153_v29, 312  ;;  %14843 = vst [vmem:[#allocation41_spill] sm:$0xff] %v9194_v52 }
  0xf3   :  { %8055 = vmatmul.mubr.bf16.gmra.mrb[48].mxu0 %v142_v25 }
  0xf4   :  { %8058 = vmatprep.mubr.bf16.mxu0 %v144_v26  ;;  %v9196_v53 = vpop.permute.xlu1 %2389 }
  0xf5   :  { %8127 = vmatmul.mubr.bf16.gmra.mrb[60].mxu1 %v214_v27  ;;  %14844 = vst [vmem:[#allocation42_spill] sm:$0xff] %v9196_v53  ;;  %v9198_v54 = vpop.permute.xlu0 %2404 }
  0xf6   :  { %8130 = vmatprep.mubr.bf16.mxu1 %v216_v28  ;;  %14845 = vst [vmem:[#allocation43_spill] sm:$0xff] %v9198_v54 }
  0xf8   :  { %v9200_v55 = vpop.permute.xlu1 %2400 }
  0xf9   :  { %14846 = vst [vmem:[#allocation44_spill] sm:$0xff] %v9200_v55  ;;  %v9202_v56 = vpop.permute.xlu0 %2412 }
  0xfa   :  { %14847 = vst [vmem:[#allocation45_spill] sm:$0xff] %v9202_v56 }
  0xfb   :  { %8059 = vmatmul.mubr.bf16.gmra.mrb[52].mxu0 %v146_v30 }
  0xfc   :  { %8062 = vmatprep.mubr.bf16.mxu0 %v148_v31  ;;  %v9204_v57 = vpop.permute.xlu1 %2408 }
  0xfd   :  { %8131 = vmatmul.mubr.bf16.gmra.mrb[64].mxu1 %v218_v33  ;;  %14848 = vst [vmem:[#allocation46_spill] sm:$0xff] %v9204_v57  ;;  %v9206_v58 = vpop.permute.xlu0 %2420 }
  0xfe   :  { %8134 = vmatprep.mubr.bf16.mxu1 %v220_v34  ;;  %14849 = vst [vmem:[#allocation47_spill] sm:$0xff] %v9206_v58 }
 0x100   :  { %v9208_v61 = vpop.permute.xlu1 %2416 }
 0x101   :  { %14850 = vst [vmem:[#allocation48_spill] sm:$0xff] %v9208_v61  ;;  %v9210_v63 = vpop.permute.xlu0 %2428 }
 0x102   :  { %14851 = vst [vmem:[#allocation49_spill] sm:$0xff] %v9210_v63 }
 0x103   :  { %8063 = vmatmul.mubr.bf16.gmra.mrb[56].mxu0 %v150_v19 }
 0x104   :  { %v9212_v0 = vpop.permute.xlu1 %2424 }
 0x105   :  { %8135 = vmatmul.mubr.bf16.gmra.mrb[68].mxu1 %v222_v35  ;;  %14852 = vst [vmem:[#allocation50_spill] sm:$0xff] %v9212_v0  ;;  %v9217_v4 = vpop.permute.xlu0 %2436 }
 0x106   :  { %14853 = vst [vmem:[#allocation51_spill] sm:$0xff] %v9217_v4 }
 0x108   :  { %v9222_v8 = vpop.permute.xlu1 %2432 }
 0x109   :  { %14854 = vst [vmem:[#allocation52_spill] sm:$0xff] %v9222_v8  ;;  %v9240_v27 = vpop.permute.xlu0 %2444 }
 0x10a   :  { %14855 = vst [vmem:[#allocation53_spill] sm:$0xff] %v9240_v27 }
 0x10c   :  { %v9248_v34 = vpop.permute.xlu1 %2440 }
 0x10d   :  { %14856 = vst [vmem:[#allocation54_spill] sm:$0xff] %v9248_v34 }
 0x14e   :  { %v323_v3 = vpop.f32.mrb[0].mxu0 }
 0x14f   :  { %v1458_v5 = vcombine.high %v323_v3, %v323_v3  ;;  %v9220_v6 = vrot.slane %v323_v3, %v9215_v1  ;;  %v7992_v7 = vpop.f32.mrb[1].mxu0 }
 0x150   :  { %v326_v9 = vpop.f32.mrb[2].mxu0  ;;  %v8068_v11 = vpop.f32.mrb[0].mxu1 }
 0x151   :  { %v1472_v12 = vrot.slane %v1458_v5, %v9215_v1  ;;  %v1473_v13 = vcombine.high %v9220_v6, %v9220_v6  ;;  %v7993_v15 = vpop.f32.mrb[3].mxu0  ;;  %v1035_v16 = vpop.f32.mrb[1].mxu1  ;;  %v1387_v30 = vadd.f32 %v8068_v11, %v9233_v23 }
 0x152   :  { %v8069_v18 = vpop.f32.mrb[2].mxu1  ;;  %v1385_v31 = vadd.f32 %v9233_v23, %v1035_v16 }
 0x153   :  { %v1474_v20 = vcombine.high %v1472_v12, %v1472_v12  ;;  %v9228_v21 = vrot.slane %v1473_v13, %v9215_v1  ;;  %v1038_v22 = vpop.f32.mrb[3].mxu1  ;;  %v1388_v33 = vadd.f32 %v8069_v18, %v9233_v23 }
 0x154   :  { %v1386_v19 = vadd.f32 %v9233_v23, %v1038_v22  ;;  %v9259_v22 = vpop.permute.xlu0 %2452 }
 0x155   :  { %v9236_v25 = vrot.slane %v1474_v20, %v9215_v1  ;;  %v1505_v26 = vcombine.high %v9228_v21, %v9228_v21  ;;  %14857 = vst [vmem:[#allocation55_spill] sm:$0xff] %v9259_v22 }
 0x157   :  { %v9243_v28 = vrot.slane %v1505_v26, %v9086_v17  ;;  %v9262_v26 = vrot.slane %v1472_v12, %v9215_v1 }
 0x158   :  { %v8072_v35 = vpop.f32.mrb[4].mxu1 }
 0x159   :  { %v1605_v59 = vadd.f32 %v9243_v28, %v1387_v30  ;;  %v1603_v60 = vadd.f32 %v9243_v28, %v1385_v31  ;;  %v1606_v62 = vadd.f32 %v9243_v28, %v1388_v33  ;;  %v1051_v3 = vpop.f32.mrb[5].mxu1  ;;  %v1604_v5 = vadd.f32 %v9243_v28, %v1386_v19  ;;  %v9266_v33 = vpop.permute.xlu1 %2448 }
 0x15a   :  { %v1391_v7 = vadd.f32 %v8072_v35, %v9233_v23  ;;  %v1389_v9 = vadd.f32 %v9233_v23, %v1051_v3  ;;  %v8073_v11 = vpop.f32.mrb[6].mxu1  ;;  %14858 = vst [vmem:[#allocation56_spill] sm:$0xff] %v9266_v33  ;;  %v9272_v3 = vrot.slane %v9262_v26, %v9086_v17 }
 0x15b   :  { %v1704_v13 = vpack.c.bf16 %v1606_v62, %v1605_v59  ;;  %v1392_v15 = vadd.f32 %v8073_v11, %v9233_v23  ;;  %v1054_v16 = vpop.f32.mrb[7].mxu1  ;;  %v1703_v18 = vpack.c.bf16 %v1604_v5, %v1603_v60 }
 0x15c   :  { %v1390_v20 = vadd.f32 %v9233_v23, %v1054_v16  ;;  %v1609_v30 = vadd.f32 %v9243_v28, %v1391_v7  ;;  %v1607_v19 = vadd.f32 %v9243_v28, %v1389_v9 }
 0x15d   :  { %8313 = vtanh.bf16 %v1704_v13  ;;  %v1610_v31 = vadd.f32 %v9243_v28, %v1392_v15  ;;  %v9276_v13 = vpop.permute.xlu0 %2463 }
 0x15e   :  { %8315 = vtanh.bf16 %v1703_v18  ;;  %v1608_v35 = vadd.f32 %v9243_v28, %v1390_v20  ;;  %14859 = vst [vmem:[#allocation57_spill] sm:$0xff] %v9276_v13  ;;  %v9280_v18 = vpop.permute.xlu1 %2456 }
 0x15f   :  { %v1706_v59 = vpack.c.bf16 %v1610_v31, %v1609_v30  ;;  %14860 = vst [vmem:[#allocation58_spill] sm:$0xff] %v9280_v18 }
 0x160   :  { %v1705_v60 = vpack.c.bf16 %v1608_v35, %v1607_v19  ;;  %v8076_v62 = vpop.f32.mrb[8].mxu1 }
 0x161   :  { %8317 = vtanh.bf16 %v1706_v59  ;;  %v1395_v12 = vadd.f32 %v8076_v62, %v9233_v23  ;;  %v1067_v5 = vpop.f32.mrb[9].mxu1 }
 0x162   :  { %8319 = vtanh.bf16 %v1705_v60  ;;  %v1393_v7 = vadd.f32 %v9233_v23, %v1067_v5  ;;  %v8077_v11 = vpop.f32.mrb[10].mxu1  ;;  %v9286_v5 = vpop.permute.xlu0 %2471 }
 0x163   :  { %v1613_v9 = vadd.f32 %v9272_v3, %v1395_v12  ;;  %v1396_v15 = vadd.f32 %v8077_v11, %v9233_v23  ;;  %v1070_v16 = vpop.f32.mrb[11].mxu1  ;;  %14861 = vst [vmem:[#allocation59_spill] sm:$0xff] %v9286_v5  ;;  %v9290_v11 = vrot.slane %v9220_v6, %v9215_v1 }
 0x164   :  { %v1611_v20 = vadd.f32 %v9272_v3, %v1393_v7  ;;  %v1394_v30 = vadd.f32 %v9233_v23, %v1070_v16 }
 0x165   :  { %v1614_v31 = vadd.f32 %v9272_v3, %v1396_v15  ;;  %v9296_v15 = vld [vmem:[%s14458_s6] ss:$0 sm:$0xff] }
 0x166   :  { %v1612_v19 = vadd.f32 %v9272_v3, %v1394_v30 }
 0x167   :  { %v1708_v35 = vpack.c.bf16 %v1614_v31, %v1613_v9  ;;  %v9298_v9 = vpop.permute.xlu1 %2467 }
 0x168   :  { %v8314_v59 = vpop.eup %8313  ;;  %v1707_v60 = vpack.c.bf16 %v1612_v19, %v1611_v20  ;;  %v8080_v62 = vpop.f32.mrb[12].mxu1  ;;  %14862 = vst [vmem:[#allocation60_spill] sm:$0xff] %v9298_v9 }
 0x169   :  { %v8316_v12 = vpop.eup %8315  ;;  %8321 = vtanh.bf16 %v1708_v35  ;;  %v1399_v7 = vadd.f32 %v8080_v62, %v9233_v23  ;;  %v1083_v10 = vpop.f32.mrb[13].mxu1  ;;  %v1863_v16 = vunpack.c.h.bf16 %v8314_v59  ;;  %v1862_v62 = vunpack.c.l.bf16 %v8314_v59 }
 0x16a   :  { %8323 = vtanh.bf16 %v1707_v60  ;;  %v1397_v20 = vadd.f32 %v9233_v23, %v1083_v10  ;;  %v8081_v30 = vpop.f32.mrb[14].mxu1  ;;  %v1861_v31 = vunpack.c.h.bf16 %v8316_v12  ;;  %v1860_v19 = vunpack.c.l.bf16 %v8316_v12 }
 0x16b   :  { %v1617_v1 = vadd.f32 %v9272_v3, %v1399_v7  ;;  %v1400_v6 = vadd.f32 %v8081_v30, %v9233_v23  ;;  %v1086_v35 = vpop.f32.mrb[15].mxu1  ;;  %v9310_v12 = vrot.slane %v9290_v11, %v9086_v17  ;;  %v9314_v30 = vpop.permute.xlu0 %2479 }
 0x16c   :  { %v8318_v24 = vpop.eup %8317  ;;  %v1615_v2 = vadd.f32 %v9272_v3, %v1397_v20  ;;  %v1398_v48 = vadd.f32 %v9233_v23, %v1086_v35  ;;  %v1995_v32 = vmul.f32 %v9296_v15, %v1861_v31  ;;  %v1994_v60 = vmul.f32 %v9296_v15, %v1860_v19  ;;  %14863 = vst [vmem:[#allocation61_spill] sm:$0xff] %v9314_v30  ;;  %v9318_v13 = vpop.permute.xlu1 %2475 }
 0x16d   :  { %v8320_v5 = vpop.eup %8319  ;;  %v1618_v10 = vadd.f32 %v9272_v3, %v1400_v6  ;;  %v1867_v9 = vunpack.c.h.bf16 %v8318_v24  ;;  %v1997_v20 = vmul.f32 %v9296_v15, %v1863_v16  ;;  %v1996_v6 = vmul.f32 %v9296_v15, %v1862_v62  ;;  %14864 = vst [vmem:[#allocation62_spill] sm:$0xff] %v9318_v13 }
 0x16e   :  { %v1616_v7 = vadd.f32 %v9272_v3, %v1398_v48  ;;  %2180 = vadd.xlane.f32.xlu1 %v1995_v32  ;;  %2178 = vadd.xlane.f32.xlu0 %v1994_v60  ;;  %v8012_v59 = vpop.f32.mrb[4].mxu0  ;;  %v1866_v18 = vunpack.c.l.bf16 %v8318_v24  ;;  %v1865_v27 = vunpack.c.h.bf16 %v8320_v5 }
 0x16f   :  { %v1710_v31 = vpack.c.bf16 %v1618_v10, %v1617_v1  ;;  %v1331_v19 = vadd.f32 %v8012_v59, %v9233_v23  ;;  %v811_v35 = vpop.f32.mrb[5].mxu0  ;;  %v2001_v60 = vmul.f32 %v9296_v15, %v1867_v9  ;;  %v1864_v9 = vunpack.c.l.bf16 %v8320_v5 }
 0x170   :  { %v1709_v22 = vpack.c.bf16 %v1616_v7, %v1615_v2  ;;  %v1329_v33 = vadd.f32 %v9233_v23, %v811_v35  ;;  %v8084_v48 = vpop.f32.mrb[16].mxu1  ;;  %v8013_v32 = vpop.f32.mrb[6].mxu0 }
 0x171   :  { %8325 = vtanh.bf16 %v1710_v31  ;;  %v1549_v16 = vadd.f32 %v9310_v12, %v1331_v19  ;;  %v1403_v1 = vadd.f32 %v8084_v48, %v9233_v23  ;;  %v1332_v10 = vadd.f32 %v8013_v32, %v9233_v23  ;;  %v1099_v59 = vpop.f32.mrb[17].mxu1  ;;  %v814_v62 = vpop.f32.mrb[7].mxu0 }
 0x172   :  { %v1547_v30 = vadd.f32 %v9310_v12, %v1329_v33  ;;  %v1401_v2 = vadd.f32 %v9233_v23, %v1099_v59  ;;  %v8085_v24 = vpop.f32.mrb[18].mxu1  ;;  %2184 = vadd.xlane.f32.xlu1 %v1997_v20  ;;  %2182 = vadd.xlane.f32.xlu0 %v1996_v6  ;;  %v1330_v7 = vadd.f32 %v9233_v23, %v814_v62  ;;  %8327 = vtanh.bf16 %v1709_v22  ;;  %v9344_v34 = vpop.permute.xlu1 %2483 }
 0x173   :  { %v1621_v31 = vadd.f32 %v9272_v3, %v1403_v1  ;;  %v1550_v19 = vadd.f32 %v9310_v12, %v1332_v10  ;;  %v1404_v35 = vadd.f32 %v8085_v24, %v9233_v23  ;;  %v1102_v48 = vpop.f32.mrb[19].mxu1  ;;  %v2000_v20 = vmul.f32 %v9296_v15, %v1866_v18  ;;  %14866 = vst [vmem:[#allocation64_spill] sm:$0xff] %v9344_v34 }
 0x174   :  { %v8322_v32 = vpop.eup %8321  ;;  %v1619_v13 = vadd.f32 %v9272_v3, %v1401_v2  ;;  %v1548_v33 = vadd.f32 %v9310_v12, %v1330_v7  ;;  %v1402_v59 = vadd.f32 %v9233_v23, %v1102_v48  ;;  %v1999_v1 = vmul.f32 %v9296_v15, %v1865_v27  ;;  %v9341_v7 = vpop.permute.xlu0 %2487 }
 0x175   :  { %v9335_v6 = vpop.eup %8323  ;;  %v1676_v5 = vpack.c.bf16 %v1550_v19, %v1549_v16  ;;  %v1622_v22 = vadd.f32 %v9272_v3, %v1404_v35  ;;  %v1998_v2 = vmul.f32 %v9296_v15, %v1864_v9  ;;  %14865 = vst [vmem:[#allocation63_spill] sm:$0xff] %v9341_v7  ;;  %v1871_v19 = vunpack.c.h.bf16 %v8322_v32 }
 0x176   :  { %v1675_v10 = vpack.c.bf16 %v1548_v33, %v1547_v30  ;;  %v1620_v62 = vadd.f32 %v9272_v3, %v1402_v59  ;;  %2192 = vadd.xlane.f32.xlu1 %v2001_v60  ;;  %2190 = vadd.xlane.f32.xlu0 %v2000_v20  ;;  %v8016_v24 = vpop.f32.mrb[8].mxu0  ;;  %v1870_v35 = vunpack.c.l.bf16 %v8322_v32  ;;  %v1869_v60 = vunpack.c.h.bf16 %v9335_v6 }
 0x177   :  { %v1712_v48 = vpack.c.bf16 %v1622_v22, %v1621_v31  ;;  %v1335_v18 = vadd.f32 %v8016_v24, %v9233_v23  ;;  %v827_v16 = vpop.f32.mrb[9].mxu0  ;;  %v1868_v59 = vunpack.c.l.bf16 %v9335_v6  ;;  %8329 = vtanh.bf16 %v1676_v5 }
 0x178   :  { %v1711_v4 = vpack.c.bf16 %v1620_v62, %v1619_v13  ;;  %v1333_v27 = vadd.f32 %v9233_v23, %v827_v16  ;;  %v8088_v30 = vpop.f32.mrb[20].mxu1  ;;  %v8017_v33 = vpop.f32.mrb[10].mxu0  ;;  %8331 = vtanh.bf16 %v1675_v10  ;;  %v2005_v10 = vmul.f32 %v9296_v15, %v1871_v19 }
 0x179   :  { %v9350_v9 = vadd.f32 %v9310_v12, %v1335_v18  ;;  %v1407_v31 = vadd.f32 %v8088_v30, %v9233_v23  ;;  %v1336_v20 = vadd.f32 %v8017_v33, %v9233_v23  ;;  %v1115_v22 = vpop.f32.mrb[21].mxu1  ;;  %v830_v24 = vpop.f32.mrb[11].mxu0  ;;  %8333 = vtanh.bf16 %v1712_v48 }
 0x17a   :  { %v9355_v13 = vadd.f32 %v9310_v12, %v1333_v27  ;;  %v1405_v32 = vadd.f32 %v9233_v23, %v1115_v22  ;;  %v8089_v62 = vpop.f32.mrb[22].mxu1  ;;  %2188 = vadd.xlane.f32.xlu1 %v1999_v1  ;;  %2186 = vadd.xlane.f32.xlu0 %v1998_v2  ;;  %v1334_v6 = vadd.f32 %v9233_v23, %v830_v24  ;;  %8335 = vtanh.bf16 %v1711_v4 }
 0x17b   :  { %v9360_v5 = vadd.f32 %v9272_v3, %v1407_v31  ;;  %v1554_v18 = vadd.f32 %v9310_v12, %v1336_v20  ;;  %v1408_v16 = vadd.f32 %v8089_v62, %v9233_v23  ;;  %v1118_v30 = vpop.f32.mrb[23].mxu1  ;;  %v2004_v2 = vmul.f32 %v9296_v15, %v1870_v35  ;;  %v9385_v35 = vpop.permute.xlu0 %2495 }
 0x17c   :  { %v8326_v33 = vpop.eup %8325  ;;  %v9366_v27 = vadd.f32 %v9272_v3, %v1405_v32  ;;  %v1552_v22 = vadd.f32 %v9310_v12, %v1334_v6  ;;  %v1406_v1 = vadd.f32 %v9233_v23, %v1118_v30  ;;  %v9379_v19 = vrot.slane %v9236_v25, %v9086_v17  ;;  %14867 = vst [vmem:[#allocation65_spill] sm:$0xff] %v9385_v35  ;;  %v9389_v6 = vpop.permute.xlu1 %2491 }
 0x17d   :  { %v1678_v31 = vpack.c.bf16 %v1554_v18, %v9350_v9  ;;  %v9373_v20 = vadd.f32 %v9272_v3, %v1408_v16  ;;  %v9375_v24 = vpop.eup %8327  ;;  %14868 = vst [vmem:[#allocation66_spill] sm:$0xff] %v9389_v6  ;;  %v2003_v4 = vmul.f32 %v9296_v15, %v1869_v60  ;;  %v1875_v30 = vunpack.c.h.bf16 %v8326_v33 }
 0x17e   :  { %v1677_v32 = vpack.c.bf16 %v1552_v22, %v9355_v13  ;;  %v9383_v62 = vadd.f32 %v9272_v3, %v1406_v1  ;;  %2200 = vadd.xlane.f32.xlu1 %v2005_v10  ;;  %2198 = vadd.xlane.f32.xlu0 %v2004_v2  ;;  %v8020_v48 = vpop.f32.mrb[12].mxu0  ;;  %v2002_v1 = vmul.f32 %v9296_v15, %v1868_v59  ;;  %v1874_v2 = vunpack.c.l.bf16 %v8326_v33 }
 0x17f   :  { %v1339_v18 = vadd.f32 %v8020_v48, %v9233_v23  ;;  %v843_v16 = vpop.f32.mrb[13].mxu0  ;;  %v1873_v7 = vunpack.c.h.bf16 %v9375_v24  ;;  %v1872_v33 = vunpack.c.l.bf16 %v9375_v24  ;;  %8337 = vtanh.bf16 %v1678_v31 }
 0x180   :  { %v1337_v13 = vadd.f32 %v9233_v23, %v843_v16  ;;  %v8092_v10 = vpop.f32.mrb[24].mxu1  ;;  %v8021_v22 = vpop.f32.mrb[14].mxu0  ;;  %8339 = vtanh.bf16 %v1677_v32 }
 0x181   :  { %v9398_v9 = vadd.f32 %v9310_v12, %v1339_v18  ;;  %v1411_v35 = vadd.f32 %v8092_v10, %v9233_v23  ;;  %v1340_v48 = vadd.f32 %v8021_v22, %v9233_v23  ;;  %v1131_v6 = vpop.f32.mrb[25].mxu1  ;;  %v846_v60 = vpop.f32.mrb[15].mxu0  ;;  %v2007_v32 = vmul.f32 %v9296_v15, %v1873_v7 }
 0x182   :  { %v9404_v3 = vadd.f32 %v9310_v12, %v1337_v13  ;;  %v1409_v16 = vadd.f32 %v9233_v23, %v1131_v6  ;;  %v8093_v34 = vpop.f32.mrb[26].mxu1  ;;  %2196 = vadd.xlane.f32.xlu1 %v2003_v4  ;;  %2194 = vadd.xlane.f32.xlu0 %v2002_v1  ;;  %v1338_v59 = vadd.f32 %v9233_v23, %v846_v60  ;;  %v9417_v63 = vpop.eup %8329 }
 0x183   :  { %v9410_v18 = vadd.f32 %v9379_v19, %v1411_v35  ;;  %v9413_v10 = vadd.f32 %v9310_v12, %v1340_v48  ;;  %v1412_v22 = vadd.f32 %v8093_v34, %v9233_v23  ;;  %v1134_v8 = vpop.f32.mrb[27].mxu1  ;;  %v2009_v13 = vmul.f32 %v9296_v15, %v1875_v30  ;;  %v9427_v1 = vpop.eup %8331 }
 0x184   :  { %v9420_v6 = vadd.f32 %v9379_v19, %v1409_v16  ;;  %v9423_v4 = vadd.f32 %v9310_v12, %v1338_v59  ;;  %v1410_v24 = vadd.f32 %v9233_v23, %v1134_v8  ;;  %v2008_v35 = vmul.f32 %v9296_v15, %v1874_v2  ;;  %v9439_v16 = vpop.permute.xlu0 %2503  ;;  %v9441_v2 = vpop.permute.xlu1 %2499 }
 0x185   :  { %v9432_v30 = vadd.f32 %v9379_v19, %v1412_v22  ;;  %14869 = vst [vmem:[#allocation67_spill] sm:$0xff] %v9439_v16  ;;  %14870 = vst [vmem:[#allocation68_spill] sm:$0xff] %v9441_v2  ;;  %v1806_v48 = vunpack.c.l.bf16 %v9417_v63  ;;  %v9448_v34 = vpop.eup %8333  ;;  %v2006_v2 = vmul.f32 %v9296_v15, %v1872_v33  ;;  %v1804_v31 = vunpack.c.l.bf16 %v9427_v1 }
 0x186   :  { %v9437_v60 = vadd.f32 %v9379_v19, %v1410_v24  ;;  %2208 = vadd.xlane.f32.xlu1 %v2009_v13  ;;  %2206 = vadd.xlane.f32.xlu0 %v2008_v35  ;;  %v8024_v8 = vpop.f32.mrb[16].mxu0  ;;  %v9455_v0 = vpop.eup %8335  ;;  %v1807_v24 = vunpack.c.h.bf16 %v9417_v63 }
 0x187   :  { %v1343_v59 = vadd.f32 %v8024_v8, %v9233_v23  ;;  %v859_v22 = vpop.f32.mrb[17].mxu0 }
 0x188   :  { %v1341_v13 = vadd.f32 %v9233_v23, %v859_v22  ;;  %v8096_v35 = vpop.f32.mrb[28].mxu1  ;;  %v8025_v16 = vpop.f32.mrb[18].mxu0 }
 0x189   :  { %v9458_v8 = vadd.f32 %v9310_v12, %v1343_v59  ;;  %v1415_v7 = vadd.f32 %v8096_v35, %v9233_v23  ;;  %v1344_v58 = vadd.f32 %v8025_v16, %v9233_v23  ;;  %v1147_v61 = vpop.f32.mrb[29].mxu1  ;;  %v862_v56 = vpop.f32.mrb[19].mxu0  ;;  %v1805_v59 = vunpack.c.h.bf16 %v9427_v1 }
 0x18a   :  { %v9464_v22 = vadd.f32 %v9310_v12, %v1341_v13  ;;  %v1413_v33 = vadd.f32 %v9233_v23, %v1147_v61  ;;  %v8097_v57 = vpop.f32.mrb[30].mxu1  ;;  %2204 = vadd.xlane.f32.xlu1 %v2007_v32  ;;  %2202 = vadd.xlane.f32.xlu0 %v2006_v2  ;;  %v1342_v54 = vadd.f32 %v9233_v23, %v862_v56 }
 0x18b   :  { %v9470_v35 = vadd.f32 %v9379_v19, %v1415_v7  ;;  %v9473_v16 = vadd.f32 %v9310_v12, %v1344_v58  ;;  %v1416_v63 = vadd.f32 %v8097_v57, %v9233_v23  ;;  %v1150_v55 = vpop.f32.mrb[31].mxu1  ;;  %v1940_v13 = vmul.f32 %v9296_v15, %v1806_v48 }
 0x18c   :  { %v9478_v61 = vadd.f32 %v9379_v19, %v1413_v33  ;;  %v9481_v2 = vadd.f32 %v9310_v12, %v1342_v54  ;;  %v1414_v56 = vadd.f32 %v9233_v23, %v1150_v55  ;;  %v1938_v1 = vmul.f32 %v9296_v15, %v1804_v31  ;;  %v9500_v55 = vpop.permute.xlu0 %2511  ;;  %v9507_v31 = vpop.permute.xlu1 %2507 }
 0x18d   :  { %v14871_v32 = vpack.c.bf16 %v9373_v20, %v9360_v5  ;;  %v9491_v58 = vadd.f32 %v9379_v19, %v1416_v63  ;;  %v9495_v48 = vrot.slane %v9228_v21, %v9086_v17  ;;  %v14872_v54 = vpack.c.bf16 %v9383_v62, %v9366_v27  ;;  %14873 = vst [vmem:[#allocation69_spill] sm:$0xff] %v9500_v55  ;;  %v9514_v63 = vpop.eup %8337 }
 0x18e   :  { %v9505_v5 = vadd.f32 %v9379_v19, %v1414_v56  ;;  %2070 = vadd.xlane.f32.xlu1 %v1940_v13  ;;  %2066 = vadd.xlane.f32.xlu0 %v1938_v1  ;;  %v8028_v20 = vpop.f32.mrb[20].mxu0  ;;  %14874 = vst [vmem:[#allocation70_spill] sm:$0xff] %v9507_v31  ;;  %v1941_v62 = vmul.f32 %v9296_v15, %v1807_v24  ;;  %v1879_v33 = vunpack.c.h.bf16 %v9448_v34  ;;  %v1878_v21 = vunpack.c.l.bf16 %v9448_v34  ;;  %v9521_v12 = vpop.eup %8339 }
 0x18f   :  { %8341 = vtanh.bf16 %v14871_v32  ;;  %v1347_v7 = vadd.f32 %v8028_v20, %v9233_v23  ;;  %v875_v27 = vpop.f32.mrb[21].mxu0  ;;  %v1877_v56 = vunpack.c.h.bf16 %v9455_v0 }
 0x190   :  { %8343 = vtanh.bf16 %v14872_v54  ;;  %v1345_v13 = vadd.f32 %v9233_v23, %v875_v27  ;;  %v8100_v1 = vpop.f32.mrb[32].mxu1  ;;  %v8029_v32 = vpop.f32.mrb[22].mxu0  ;;  %v1939_v54 = vmul.f32 %v9296_v15, %v1805_v59 }
 0x191   :  { %v9524_v20 = vadd.f32 %v9495_v48, %v1347_v7  ;;  %v1419_v24 = vadd.f32 %v8100_v1, %v9233_v23  ;;  %v1348_v57 = vadd.f32 %v8029_v32, %v9233_v23  ;;  %v1163_v55 = vpop.f32.mrb[33].mxu1  ;;  %v878_v31 = vpop.f32.mrb[23].mxu0  ;;  %v1876_v7 = vunpack.c.l.bf16 %v9455_v0 }
 0x192   :  { %v9530_v27 = vadd.f32 %v9495_v48, %v1345_v13  ;;  %v1417_v59 = vadd.f32 %v9233_v23, %v1163_v55  ;;  %v8101_v52 = vpop.f32.mrb[34].mxu1  ;;  %2072 = vadd.xlane.f32.xlu1 %v1941_v62  ;;  %2068 = vadd.xlane.f32.xlu0 %v1939_v54  ;;  %v1346_v34 = vadd.f32 %v9233_v23, %v878_v31 }
 0x193   :  { %v9536_v1 = vadd.f32 %v9379_v19, %v1419_v24  ;;  %v9539_v32 = vadd.f32 %v9495_v48, %v1348_v57  ;;  %v1420_v53 = vadd.f32 %v8101_v52, %v9233_v23  ;;  %v1166_v50 = vpop.f32.mrb[35].mxu1  ;;  %v2013_v13 = vmul.f32 %v9296_v15, %v1879_v33 }
 0x194   :  { %v9544_v55 = vadd.f32 %v9379_v19, %v1417_v59  ;;  %v9547_v62 = vadd.f32 %v9495_v48, %v1346_v34  ;;  %v1418_v31 = vadd.f32 %v9233_v23, %v1166_v50  ;;  %v2012_v0 = vmul.f32 %v9296_v15, %v1878_v21  ;;  %v9564_v50 = vpop.permute.xlu0 %2519 }
 0x195   :  { %v14875_v54 = vpack.c.bf16 %v9413_v10, %v9398_v9  ;;  %v9557_v57 = vadd.f32 %v9379_v19, %v1420_v53  ;;  %v1504_v33 = vcombine.high %v9262_v26, %v9262_v26  ;;  %v14876_v24 = vpack.c.bf16 %v9423_v4, %v9404_v3  ;;  %14877 = vst [vmem:[#allocation71_spill] sm:$0xff] %v9564_v50  ;;  %v9571_v53 = vpop.permute.xlu1 %2515 }
 0x196   :  { %v9569_v9 = vadd.f32 %v9379_v19, %v1418_v31  ;;  %2216 = vadd.xlane.f32.xlu1 %v2013_v13  ;;  %2214 = vadd.xlane.f32.xlu0 %v2012_v0  ;;  %v8032_v10 = vpop.f32.mrb[24].mxu0  ;;  %14878 = vst [vmem:[#allocation72_spill] sm:$0xff] %v9571_v53  ;;  %v2011_v4 = vmul.f32 %v9296_v15, %v1877_v56  ;;  %v1811_v34 = vunpack.c.h.bf16 %v9514_v63  ;;  %v1810_v26 = vunpack.c.l.bf16 %v9514_v63 }
 0x197   :  { %8345 = vtanh.bf16 %v14875_v54  ;;  %v1351_v59 = vadd.f32 %v8032_v10, %v9233_v23  ;;  %v891_v3 = vpop.f32.mrb[25].mxu0  ;;  %v2010_v21 = vmul.f32 %v9296_v15, %v1876_v7  ;;  %v1809_v31 = vunpack.c.h.bf16 %v9521_v12 }
 0x198   :  { %8347 = vtanh.bf16 %v14876_v24  ;;  %v1349_v13 = vadd.f32 %v9233_v23, %v891_v3  ;;  %v8104_v0 = vpop.f32.mrb[36].mxu1  ;;  %v8033_v24 = vpop.f32.mrb[26].mxu0 }
 0x199   :  { %v9588_v10 = vadd.f32 %v9495_v48, %v1351_v59  ;;  %v1423_v56 = vadd.f32 %v8104_v0, %v9233_v23  ;;  %v1352_v50 = vadd.f32 %v8033_v24, %v9233_v23  ;;  %v1179_v53 = vpop.f32.mrb[37].mxu1  ;;  %v894_v51 = vpop.f32.mrb[27].mxu0  ;;  %v1808_v59 = vunpack.c.l.bf16 %v9521_v12 }
 0x19a   :  { %v9578_v54 = vpop.eup %8341  ;;  %v9594_v3 = vadd.f32 %v9495_v48, %v1349_v13  ;;  %v1421_v7 = vadd.f32 %v9233_v23, %v1179_v53  ;;  %v8105_v47 = vpop.f32.mrb[38].mxu1  ;;  %2212 = vadd.xlane.f32.xlu1 %v2011_v4  ;;  %2210 = vadd.xlane.f32.xlu0 %v2010_v21  ;;  %v1350_v63 = vadd.f32 %v9233_v23, %v894_v51 }
 0x19b   :  { %v9585_v52 = vpop.eup %8343  ;;  %v9600_v0 = vadd.f32 %v9379_v19, %v1423_v56  ;;  %v9603_v24 = vadd.f32 %v9495_v48, %v1352_v50  ;;  %v1424_v49 = vadd.f32 %v8105_v47, %v9233_v23  ;;  %v1182_v45 = vpop.f32.mrb[39].mxu1  ;;  %v1945_v13 = vmul.f32 %v9296_v15, %v1811_v34 }
 0x19c   :  { %v9608_v53 = vadd.f32 %v9379_v19, %v1421_v7  ;;  %v9611_v21 = vadd.f32 %v9495_v48, %v1350_v63  ;;  %v1422_v51 = vadd.f32 %v9233_v23, %v1182_v45  ;;  %v1944_v12 = vmul.f32 %v9296_v15, %v1810_v26  ;;  %v9629_v45 = vpop.permute.xlu0 %2530 }
 0x19d   :  { %v14879_v4 = vpack.c.bf16 %v9432_v30, %v9410_v18  ;;  %v9621_v50 = vadd.f32 %v9379_v19, %v1424_v49  ;;  %v9624_v34 = vrot.slane %v1504_v33, %v9086_v17  ;;  %v14880_v56 = vpack.c.bf16 %v9437_v60, %v9420_v6  ;;  %14881 = vst [vmem:[#allocation73_spill] sm:$0xff] %v9629_v45  ;;  %v9636_v49 = vpop.permute.xlu1 %2523 }
 0x19e   :  { %v9634_v18 = vadd.f32 %v9379_v19, %v1422_v51  ;;  %2080 = vadd.xlane.f32.xlu1 %v1945_v13  ;;  %2078 = vadd.xlane.f32.xlu0 %v1944_v12  ;;  %v8036_v30 = vpop.f32.mrb[28].mxu0  ;;  %14882 = vst [vmem:[#allocation74_spill] sm:$0xff] %v9636_v49  ;;  %v1943_v60 = vmul.f32 %v9296_v15, %v1809_v31  ;;  %v1883_v63 = vunpack.c.h.bf16 %v9578_v54  ;;  %v1882_v33 = vunpack.c.l.bf16 %v9578_v54 }
 0x19f   :  { %8349 = vtanh.bf16 %v14879_v4  ;;  %v1355_v7 = vadd.f32 %v8036_v30, %v9233_v23  ;;  %v907_v6 = vpop.f32.mrb[29].mxu0  ;;  %v1881_v19 = vunpack.c.h.bf16 %v9585_v52 }
 0x1a0   :  { %8351 = vtanh.bf16 %v14880_v56  ;;  %v1353_v13 = vadd.f32 %v9233_v23, %v907_v6  ;;  %v8108_v51 = vpop.f32.mrb[40].mxu1  ;;  %v8037_v12 = vpop.f32.mrb[30].mxu0  ;;  %v1942_v56 = vmul.f32 %v9296_v15, %v1808_v59 }
 0x1a1   :  { %v9653_v30 = vadd.f32 %v9495_v48, %v1355_v7  ;;  %v1427_v31 = vadd.f32 %v8108_v51, %v9233_v23  ;;  %v1356_v47 = vadd.f32 %v8037_v12, %v9233_v23  ;;  %v1195_v45 = vpop.f32.mrb[41].mxu1  ;;  %v910_v49 = vpop.f32.mrb[31].mxu0  ;;  %v1880_v7 = vunpack.c.l.bf16 %v9585_v52 }
 0x1a2   :  { %v9643_v4 = vpop.eup %8345  ;;  %v9659_v6 = vadd.f32 %v9495_v48, %v1353_v13  ;;  %v1425_v59 = vadd.f32 %v9233_v23, %v1195_v45  ;;  %v8109_v46 = vpop.f32.mrb[42].mxu1  ;;  %2076 = vadd.xlane.f32.xlu1 %v1943_v60  ;;  %2074 = vadd.xlane.f32.xlu0 %v1942_v56  ;;  %v1354_v54 = vadd.f32 %v9233_v23, %v910_v49 }
 0x1a3   :  { %v9650_v26 = vpop.eup %8347  ;;  %v9665_v51 = vadd.f32 %v9624_v34, %v1427_v31  ;;  %v9668_v12 = vadd.f32 %v9495_v48, %v1356_v47  ;;  %v1428_v43 = vadd.f32 %v8109_v46, %v9233_v23  ;;  %v1198_v44 = vpop.f32.mrb[43].mxu1  ;;  %v2017_v13 = vmul.f32 %v9296_v15, %v1883_v63 }
 0x1a4   :  { %v9673_v45 = vadd.f32 %v9624_v34, %v1425_v59  ;;  %v9676_v60 = vadd.f32 %v9495_v48, %v1354_v54  ;;  %v1426_v49 = vadd.f32 %v9233_v23, %v1198_v44  ;;  %v2016_v52 = vmul.f32 %v9296_v15, %v1882_v33  ;;  %v9693_v44 = vpop.permute.xlu0 %2538 }
 0x1a5   :  { %v14883_v56 = vpack.c.bf16 %v9473_v16, %v9458_v8  ;;  %v9686_v47 = vadd.f32 %v9624_v34, %v1428_v43  ;;  %v1503_v63 = vcombine.high %v9290_v11, %v9290_v11  ;;  %v14884_v31 = vpack.c.bf16 %v9481_v2, %v9464_v22  ;;  %14885 = vst [vmem:[#allocation75_spill] sm:$0xff] %v9693_v44  ;;  %v9700_v43 = vpop.permute.xlu1 %2534 }
 0x1a6   :  { %v9698_v8 = vadd.f32 %v9624_v34, %v1426_v49  ;;  %2224 = vadd.xlane.f32.xlu1 %v2017_v13  ;;  %2222 = vadd.xlane.f32.xlu0 %v2016_v52  ;;  %v8040_v16 = vpop.f32.mrb[32].mxu0  ;;  %14886 = vst [vmem:[#allocation76_spill] sm:$0xff] %v9700_v43  ;;  %v2015_v2 = vmul.f32 %v9296_v15, %v1881_v19  ;;  %v1815_v54 = vunpack.c.h.bf16 %v9643_v4  ;;  %v1814_v11 = vunpack.c.l.bf16 %v9643_v4 }
 0x1a7   :  { %8353 = vtanh.bf16 %v14883_v56  ;;  %v1359_v59 = vadd.f32 %v8040_v16, %v9233_v23  ;;  %v923_v22 = vpop.f32.mrb[33].mxu0  ;;  %v2014_v33 = vmul.f32 %v9296_v15, %v1880_v7  ;;  %v1813_v49 = vunpack.c.h.bf16 %v9650_v26 }
 0x1a8   :  { %8355 = vtanh.bf16 %v14884_v31  ;;  %v1357_v13 = vadd.f32 %v9233_v23, %v923_v22  ;;  %v8112_v52 = vpop.f32.mrb[44].mxu1  ;;  %v8041_v31 = vpop.f32.mrb[34].mxu0 }
 0x1a9   :  { %v9717_v16 = vadd.f32 %v9495_v48, %v1359_v59  ;;  %v1431_v19 = vadd.f32 %v8112_v52, %v9233_v23  ;;  %v1360_v44 = vadd.f32 %v8041_v31, %v9233_v23  ;;  %v1211_v43 = vpop.f32.mrb[45].mxu1  ;;  %v926_v41 = vpop.f32.mrb[35].mxu0  ;;  %v1812_v59 = vunpack.c.l.bf16 %v9650_v26 }
 0x1aa   :  { %v9707_v56 = vpop.eup %8349  ;;  %v9723_v22 = vadd.f32 %v9495_v48, %v1357_v13  ;;  %v1429_v7 = vadd.f32 %v9233_v23, %v1211_v43  ;;  %v8113_v42 = vpop.f32.mrb[46].mxu1  ;;  %2220 = vadd.xlane.f32.xlu1 %v2015_v2  ;;  %2218 = vadd.xlane.f32.xlu0 %v2014_v33  ;;  %v1358_v4 = vadd.f32 %v9233_v23, %v926_v41 }
 0x1ab   :  { %v9714_v46 = vpop.eup %8351  ;;  %v9729_v52 = vadd.f32 %v9624_v34, %v1431_v19  ;;  %v9732_v31 = vadd.f32 %v9495_v48, %v1360_v44  ;;  %v1432_v39 = vadd.f32 %v8113_v42, %v9233_v23  ;;  %v1214_v40 = vpop.f32.mrb[47].mxu1  ;;  %v1949_v13 = vmul.f32 %v9296_v15, %v1815_v54 }
 0x1ac   :  { %v9737_v43 = vadd.f32 %v9624_v34, %v1429_v7  ;;  %v9740_v33 = vadd.f32 %v9495_v48, %v1358_v4  ;;  %v1430_v41 = vadd.f32 %v9233_v23, %v1214_v40  ;;  %v1948_v26 = vmul.f32 %v9296_v15, %v1814_v11  ;;  %v9758_v40 = vpop.permute.xlu0 %2546 }
 0x1ad   :  { %v14887_v2 = vpack.c.bf16 %v9491_v58, %v9470_v35  ;;  %v9750_v44 = vadd.f32 %v9624_v34, %v1432_v39  ;;  %v9753_v54 = vrot.slane %v1503_v63, %v9086_v17  ;;  %v14888_v48 = vpack.c.bf16 %v9505_v5, %v9478_v61  ;;  %14889 = vst [vmem:[#allocation77_spill] sm:$0xff] %v9758_v40  ;;  %v9765_v39 = vpop.permute.xlu1 %2542 }
 0x1ae   :  { %v9763_v35 = vadd.f32 %v9624_v34, %v1430_v41  ;;  %2088 = vadd.xlane.f32.xlu1 %v1949_v13  ;;  %2086 = vadd.xlane.f32.xlu0 %v1948_v26  ;;  %v8044_v58 = vpop.f32.mrb[36].mxu0  ;;  %14890 = vst [vmem:[#allocation78_spill] sm:$0xff] %v9765_v39  ;;  %v1947_v5 = vmul.f32 %v9296_v15, %v1813_v49  ;;  %v1887_v7 = vunpack.c.h.bf16 %v9707_v56  ;;  %v1886_v63 = vunpack.c.l.bf16 %v9707_v56 }
 0x1af   :  { %8357 = vtanh.bf16 %v14887_v2  ;;  %v1363_v19 = vadd.f32 %v8044_v58, %v9233_v23  ;;  %v939_v61 = vpop.f32.mrb[37].mxu0  ;;  %v1885_v41 = vunpack.c.h.bf16 %v9714_v46 }
 0x1b0   :  { %8359 = vtanh.bf16 %v14888_v48  ;;  %v1361_v13 = vadd.f32 %v9233_v23, %v939_v61  ;;  %v8116_v26 = vpop.f32.mrb[48].mxu1  ;;  %v8045_v2 = vpop.f32.mrb[38].mxu0  ;;  %v1946_v48 = vmul.f32 %v9296_v15, %v1812_v59 }
 0x1b1   :  { %v9782_v58 = vadd.f32 %v9753_v54, %v1363_v19  ;;  %v1435_v49 = vadd.f32 %v8116_v26, %v9233_v23  ;;  %v1364_v42 = vadd.f32 %v8045_v2, %v9233_v23  ;;  %v1227_v40 = vpop.f32.mrb[49].mxu1  ;;  %v942_v39 = vpop.f32.mrb[39].mxu0  ;;  %v1884_v19 = vunpack.c.l.bf16 %v9714_v46 }
 0x1b2   :  { %v9772_v4 = vpop.eup %8353  ;;  %v9788_v61 = vadd.f32 %v9753_v54, %v1361_v13  ;;  %v1433_v59 = vadd.f32 %v9233_v23, %v1227_v40  ;;  %v8117_v38 = vpop.f32.mrb[50].mxu1  ;;  %2084 = vadd.xlane.f32.xlu1 %v1947_v5  ;;  %2082 = vadd.xlane.f32.xlu0 %v1946_v48  ;;  %v1362_v56 = vadd.f32 %v9233_v23, %v942_v39 }
 0x1b3   :  { %v9779_v11 = vpop.eup %8355  ;;  %v9794_v26 = vadd.f32 %v9624_v34, %v1435_v49  ;;  %v9797_v2 = vadd.f32 %v9753_v54, %v1364_v42  ;;  %v1436_v37 = vadd.f32 %v8117_v38, %v9233_v23  ;;  %v1230_v36 = vpop.f32.mrb[51].mxu1  ;;  %v2021_v13 = vmul.f32 %v9296_v15, %v1887_v7 }
 0x1b4   :  { %v9802_v40 = vadd.f32 %v9624_v34, %v1433_v59  ;;  %v9805_v5 = vadd.f32 %v9753_v54, %v1362_v56  ;;  %v1434_v39 = vadd.f32 %v9233_v23, %v1230_v36  ;;  %v2020_v46 = vmul.f32 %v9296_v15, %v1886_v63  ;;  %v9822_v36 = vpop.permute.xlu0 %2554 }
 0x1b5   :  { %v14892_v48 = vpack.c.bf16 %v9539_v32, %v9524_v20  ;;  %v9815_v42 = vadd.f32 %v9624_v34, %v1436_v37  ;;  %v1506_v7 = vcombine.high %v9236_v25, %v9236_v25  ;;  %v14893_v49 = vpack.c.bf16 %v9547_v62, %v9530_v27  ;;  %14894 = vst [vmem:[#allocation80_spill] sm:$0xff] %v9822_v36  ;;  %v9829_v37 = vpop.permute.xlu1 %2550  ;;  %v9836_v27 = vld [vmem:[%s14457_s5] ss:$0 sm:$0xff] }
 0x1b6   :  { %14891 = vst [vmem:[#allocation79_spill] sm:$0xff] %v9802_v40  ;;  %v9827_v20 = vadd.f32 %v9624_v34, %v1434_v39  ;;  %2232 = vadd.xlane.f32.xlu1 %v2021_v13  ;;  %2230 = vadd.xlane.f32.xlu0 %v2020_v46  ;;  %v8048_v32 = vpop.f32.mrb[40].mxu0  ;;  %14896 = vst [vmem:[#allocation82_spill] sm:$0xff] %v9829_v37  ;;  %v2019_v59 = vmul.f32 %v9296_v15, %v1885_v41  ;;  %v1819_v56 = vunpack.c.h.bf16 %v9772_v4 }
 0x1b7   :  { %8361 = vtanh.bf16 %v14892_v48  ;;  %v1367_v62 = vadd.f32 %v9836_v27, %v8048_v32  ;;  %v955_v63 = vpop.f32.mrb[41].mxu0  ;;  %v2018_v25 = vmul.f32 %v9296_v15, %v1884_v19  ;;  %v1818_v23 = vunpack.c.l.bf16 %v9772_v4 }
 0x1b8   :  { %8363 = vtanh.bf16 %v14893_v49  ;;  %14895 = vst [vmem:[#allocation81_spill] sm:$0xff] %v9827_v20  ;;  %v1365_v46 = vadd.f32 %v9836_v27, %v955_v63  ;;  %v8120_v48 = vpop.f32.mrb[52].mxu1  ;;  %v8049_v49 = vpop.f32.mrb[42].mxu0  ;;  %v1817_v39 = vunpack.c.h.bf16 %v9779_v11 }
 0x1b9   :  { %v9851_v32 = vadd.f32 %v9753_v54, %v1367_v62  ;;  %v1439_v41 = vadd.f32 %v9836_v27, %v8120_v48  ;;  %v1368_v36 = vadd.f32 %v9836_v27, %v8049_v49  ;;  %v1243_v37 = vpop.f32.mrb[53].mxu1  ;;  %v958_v14 = vpop.f32.mrb[43].mxu0  ;;  %v1816_v62 = vunpack.c.l.bf16 %v9779_v11 }
 0x1ba   :  { %v9841_v13 = vpop.eup %8357  ;;  %v9857_v63 = vadd.f32 %v9753_v54, %v1365_v46  ;;  %v1437_v19 = vadd.f32 %v9836_v27, %v1243_v37  ;;  %v8121_v29 = vpop.f32.mrb[54].mxu1  ;;  %2228 = vadd.xlane.f32.xlu1 %v2019_v59  ;;  %2226 = vadd.xlane.f32.xlu0 %v2018_v25  ;;  %v1366_v4 = vadd.f32 %v9836_v27, %v958_v14 }
 0x1bb   :  { %v9848_v38 = vpop.eup %8359  ;;  %v9863_v48 = vadd.f32 %v9624_v34, %v1439_v41  ;;  %v9866_v49 = vadd.f32 %v9753_v54, %v1368_v36  ;;  %v1440_v40 = vadd.f32 %v9836_v27, %v8121_v29  ;;  %v1246_v20 = vpop.f32.mrb[55].mxu1  ;;  %v1953_v46 = vmul.f32 %v9296_v15, %v1819_v56 }
 0x1bc   :  { %v9871_v37 = vadd.f32 %v9624_v34, %v1437_v19  ;;  %v9874_v25 = vadd.f32 %v9753_v54, %v1366_v4  ;;  %v1438_v14 = vadd.f32 %v9836_v27, %v1246_v20  ;;  %v1952_v11 = vmul.f32 %v9296_v15, %v1818_v23  ;;  %v9892_v20 = vpop.permute.xlu0 %2562 }
 0x1bd   :  { %v14898_v59 = vpack.c.bf16 %v9557_v57, %v9536_v1  ;;  %v9884_v36 = vadd.f32 %v9624_v34, %v1440_v40  ;;  %v9887_v56 = vrot.slane %v1506_v7, %v9086_v17  ;;  %v14899_v41 = vpack.c.bf16 %v9569_v9, %v9544_v55  ;;  %14900 = vst [vmem:[#allocation84_spill] sm:$0xff] %v9892_v20  ;;  %v9899_v40 = vpop.permute.xlu1 %2558 }
 0x1be   :  { %14897 = vst [vmem:[#allocation83_spill] sm:$0xff] %v9871_v37  ;;  %v9897_v1 = vadd.f32 %v9624_v34, %v1438_v14  ;;  %2096 = vadd.xlane.f32.xlu1 %v1953_v46  ;;  %2094 = vadd.xlane.f32.xlu0 %v1952_v11  ;;  %v8052_v57 = vpop.f32.mrb[44].mxu0  ;;  %14901 = vst [vmem:[#allocation85_spill] sm:$0xff] %v9899_v40  ;;  %v1951_v9 = vmul.f32 %v9296_v15, %v1817_v39  ;;  %v1891_v4 = vunpack.c.h.bf16 %v9841_v13 }
 0x1bf   :  { %8365 = vtanh.bf16 %v14898_v59  ;;  %v1371_v19 = vadd.f32 %v9836_v27, %v8052_v57  ;;  %v971_v55 = vpop.f32.mrb[45].mxu0  ;;  %v1890_v7 = vunpack.c.l.bf16 %v9841_v13  ;;  %v1889_v34 = vunpack.c.h.bf16 %v9848_v38 }
 0x1c0   :  { %8367 = vtanh.bf16 %v14899_v41  ;;  %v1369_v46 = vadd.f32 %v9836_v27, %v971_v55  ;;  %v8124_v14 = vpop.f32.mrb[56].mxu1  ;;  %v8053_v11 = vpop.f32.mrb[46].mxu0  ;;  %v1950_v41 = vmul.f32 %v9296_v15, %v1816_v62 }
 0x1c1   :  { %v9916_v57 = vadd.f32 %v9753_v54, %v1371_v19  ;;  %v1443_v39 = vadd.f32 %v9836_v27, %v8124_v14  ;;  %v1372_v29 = vadd.f32 %v9836_v27, %v8053_v11  ;;  %v1259_v17 = vpop.f32.mrb[57].mxu1  ;;  %v974_v20 = vpop.f32.mrb[47].mxu0  ;;  %v1888_v19 = vunpack.c.l.bf16 %v9848_v38 }
 0x1c2   :  { %v9906_v59 = vpop.eup %8361  ;;  %v9922_v55 = vadd.f32 %v9753_v54, %v1369_v46  ;;  %v1441_v15 = vadd.f32 %v9836_v27, %v1259_v17  ;;  %v8125_v62 = vpop.f32.mrb[58].mxu1  ;;  %2092 = vadd.xlane.f32.xlu1 %v1951_v9  ;;  %2090 = vadd.xlane.f32.xlu0 %v1950_v41  ;;  %v1370_v13 = vadd.f32 %v9836_v27, %v974_v20  ;;  %v9937_v17 = vld [vmem:[%s14458_s6] ss:$0 sm:$0xff]  ;;  %s8941_s6 = smov [#allocation12]  }
 0x1c3   :  { %v9913_v23 = vpop.eup %8363  ;;  %v9928_v14 = vadd.f32 %v9887_v56, %v1443_v39  ;;  %v9931_v11 = vadd.f32 %v9753_v54, %v1372_v29  ;;  %v1444_v40 = vadd.f32 %v9836_v27, %v8125_v62  ;;  %v1262_v37 = vpop.f32.mrb[59].mxu1  ;;  %v2025_v9 = vmul.f32 %v9937_v17, %v1891_v4  ;;  %s7796_s26 = sshll.u32 %s8941_s6, 4  ;;  %s7797_s26 = int_to_ptr.vmem [resolvable:$true] %s7796_s26 }
 0x1c4   :  { %14902 = vst [vmem:[#allocation86_spill] sm:$0xff] %v9922_v55  ;;  %v9941_v20 = vadd.f32 %v9887_v56, %v1441_v15  ;;  %v9944_v38 = vadd.f32 %v9753_v54, %v1370_v13  ;;  %v1442_v46 = vadd.f32 %v9836_v27, %v1262_v37  ;;  %v2024_v29 = vmul.f32 %v9937_v17, %v1890_v7  ;;  %v9959_v15 = vpop.permute.xlu0 %2570  ;;  %s8876_s27 = scalar_lea.vmem %s7797_s26, 128  ;;  %p8881_p13 = scmp.lt.s32.totalorder %s7797_s26, %s7797_s26 }
 0x1c5   :  { %14903 = vst [vmem:[#allocation87_spill] sm:$0xff] %v9928_v14  ;;  %v14905_v41 = vpack.c.bf16 %v9603_v24, %v9588_v10  ;;  %v9954_v62 = vadd.f32 %v9887_v56, %v1444_v40  ;;  %v14907_v4 = vpack.c.bf16 %v9611_v21, %v9594_v3  ;;  %14908 = vst [vmem:[#allocation90_spill] sm:$0xff] %v9959_v15  ;;  %v9966_v24 = vpop.permute.xlu1 %2566  ;;  %v1822_v40 = vunpack.c.l.bf16 %v9906_v59  ;;  %p8877_p12 = scmp.ne.s32.totalorder %s7797_s26, %s8876_s27  ;;  %p8882_p0 = scmp.lt.s32.totalorder %s8876_s27, %s8876_s27 }
 0x1c6   :  { %14904 = vst [vmem:[#allocation88_spill] sm:$0xff] %v9941_v20  ;;  %v9964_v7 = vadd.f32 %v9887_v56, %v1442_v46  ;;  %2240 = vadd.xlane.f32.xlu1 %v2025_v9  ;;  %2238 = vadd.xlane.f32.xlu0 %v2024_v29  ;;  %v8056_v10 = vpop.f32.mrb[48].mxu0  ;;  %14910 = vst [vmem:[#allocation92_spill] sm:$0xff] %v9966_v24  ;;  %v2023_v21 = vmul.f32 %v9937_v17, %v1889_v34  ;;  %v1821_v46 = vunpack.c.h.bf16 %v9913_v23 }
 0x1c7   :  { %8369 = vtanh.bf16 %v14905_v41  ;;  %14906 = vst [vmem:[#allocation89_spill] sm:$0xff] %v9954_v62  ;;  %v1375_v13 = vadd.f32 %v9836_v27, %v8056_v10  ;;  %v987_v3 = vpop.f32.mrb[49].mxu0  ;;  %v1823_v41 = vunpack.c.h.bf16 %v9906_v59  ;;  %v2022_v39 = vmul.f32 %v9937_v17, %v1888_v19  ;;  %p8883_p1 = por %p8882_p0, %p8881_p13 }
 0x1c8   :  { %8371 = vtanh.bf16 %v14907_v4  ;;  %14909 = vst [vmem:[#allocation91_spill] sm:$0xff] %v9964_v7  ;;  %v1373_v9 = vadd.f32 %v9836_v27, %v987_v3  ;;  %v8128_v29 = vpop.f32.mrb[60].mxu1  ;;  %v8057_v37 = vpop.f32.mrb[50].mxu0 }
 0x1c9   :  { %v9983_v10 = vadd.f32 %v9753_v54, %v1375_v13  ;;  %v1447_v34 = vadd.f32 %v9836_v27, %v8128_v29  ;;  %v1376_v24 = vadd.f32 %v9836_v27, %v8057_v37  ;;  %v1275_v14 = vpop.f32.mrb[61].mxu1  ;;  %v990_v62 = vpop.f32.mrb[51].mxu0  ;;  %v1820_v13 = vunpack.c.l.bf16 %v9913_v23  ;;  %p8884_p2 = pnand %p8883_p1, %p8877_p12 }
 0x1ca   :  { %v9973_v4 = vpop.eup %8365  ;;  %v9989_v3 = vadd.f32 %v9753_v54, %v1373_v9  ;;  %v1445_v19 = vadd.f32 %v9836_v27, %v1275_v14  ;;  %v8129_v20 = vpop.f32.mrb[62].mxu1  ;;  %2236 = vadd.xlane.f32.xlu1 %v2023_v21  ;;  %2234 = vadd.xlane.f32.xlu0 %v2022_v39  ;;  %v1374_v59 = vadd.f32 %v9836_v27, %v990_v62 }
 0x1cb   :  { %v9980_v15 = vpop.eup %8367  ;;  %v9995_v29 = vadd.f32 %v9887_v56, %v1447_v34  ;;  %v9998_v37 = vadd.f32 %v9753_v54, %v1376_v24  ;;  %v1448_v7 = vadd.f32 %v9836_v27, %v8129_v20  ;;  %v1278_v55 = vpop.f32.mrb[63].mxu1  ;;  %v1957_v9 = vmul.f32 %v9937_v17, %v1823_v41 }
 0x1cc   :  { %14911 = vst [vmem:[#allocation93_spill] sm:$0xff] %v9989_v3  ;;  %v10003_v14 = vadd.f32 %v9887_v56, %v1445_v19  ;;  %v10006_v39 = vadd.f32 %v9753_v54, %v1374_v59  ;;  %v1446_v62 = vadd.f32 %v9836_v27, %v1278_v55  ;;  %v1956_v23 = vmul.f32 %v9937_v17, %v1822_v40  ;;  %v10016_v34 = vpop.permute.xlu0 %2578 }
 0x1cd   :  { %14912 = vst [vmem:[#allocation94_spill] sm:$0xff] %v9995_v29  ;;  %v10013_v24 = vadd.f32 %v9887_v56, %v1448_v7  ;;  %v1895_v20 = vunpack.c.h.bf16 %v9973_v4  ;;  %14915 = vst [vmem:[#allocation97_spill] sm:$0xff] %v10016_v34  ;;  %v1894_v40 = vunpack.c.l.bf16 %v9973_v4  ;;  %v14917_v19 = vpack.c.bf16 %v9621_v50, %v9600_v0  ;;  %v10027_v7 = vpop.permute.xlu1 %2574 }
 0x1ce   :  { %14913 = vst [vmem:[#allocation95_spill] sm:$0xff] %v10003_v14  ;;  %v10021_v54 = vadd.f32 %v9887_v56, %v1446_v62  ;;  %2104 = vadd.xlane.f32.xlu1 %v1957_v9  ;;  %2102 = vadd.xlane.f32.xlu0 %v1956_v23  ;;  %v8060_v55 = vpop.f32.mrb[52].mxu0  ;;  %14918 = vst [vmem:[#allocation99_spill] sm:$0xff] %v10027_v7  ;;  %v1955_v0 = vmul.f32 %v9937_v17, %v1821_v46  ;;  %v1893_v9 = vunpack.c.h.bf16 %v9980_v15 }
 0x1cf   :  { %14914 = vst [vmem:[#allocation96_spill] sm:$0xff] %v10013_v24  ;;  %8373 = vtanh.bf16 %v14917_v19  ;;  %v1379_v21 = vadd.f32 %v9836_v27, %v8060_v55  ;;  %v1003_v41 = vpop.f32.mrb[53].mxu0  ;;  %v1954_v50 = vmul.f32 %v9937_v17, %v1820_v13  ;;  %v2029_v24 = vmul.f32 %v9937_v17, %v1895_v20 }
 0x1d0   :  { %14916 = vst [vmem:[#allocation98_spill] sm:$0xff] %v10021_v54  ;;  %v1377_v62 = vadd.f32 %v9836_v27, %v1003_v41  ;;  %v8132_v4 = vpop.f32.mrb[64].mxu1  ;;  %v8061_v23 = vpop.f32.mrb[54].mxu0  ;;  %v2028_v13 = vmul.f32 %v9937_v17, %v1894_v40  ;;  %v1892_v54 = vunpack.c.l.bf16 %v9980_v15 }
 0x1d1   :  { %v1451_v59 = vadd.f32 %v9836_v27, %v8132_v4  ;;  %v1380_v55 = vadd.f32 %v9836_v27, %v8061_v23  ;;  %v1291_v7 = vpop.f32.mrb[65].mxu1  ;;  %v1006_v29 = vpop.f32.mrb[55].mxu0  ;;  %v10050_v4 = vadd.f32 %v9243_v28, %v1379_v21 }
 0x1d2   :  { %v10032_v34 = vpop.eup %8369  ;;  %v1449_v41 = vadd.f32 %v9836_v27, %v1291_v7  ;;  %v8133_v14 = vpop.f32.mrb[66].mxu1  ;;  %2100 = vadd.xlane.f32.xlu1 %v1955_v0  ;;  %2098 = vadd.xlane.f32.xlu0 %v1954_v50  ;;  %v1378_v46 = vadd.f32 %v9836_v27, %v1006_v29  ;;  %v10060_v0 = vadd.f32 %v9243_v28, %v1377_v62 }
 0x1d3   :  { %v10039_v19 = vpop.eup %8371  ;;  %v10053_v23 = vadd.f32 %v9887_v56, %v1451_v59  ;;  %v10056_v20 = vadd.f32 %v9243_v28, %v1380_v55  ;;  %v1452_v7 = vadd.f32 %v9836_v27, %v8133_v14  ;;  %v1294_v3 = vpop.f32.mrb[67].mxu1  ;;  %v1827_v14 = vunpack.c.h.bf16 %v10032_v34 }
 0x1d4   :  { %v10063_v29 = vadd.f32 %v9887_v56, %v1449_v41  ;;  %v10066_v15 = vadd.f32 %v9243_v28, %v1378_v46  ;;  %v1450_v21 = vadd.f32 %v9836_v27, %v1294_v3  ;;  %v14921_v62 = vpack.c.bf16 %v9634_v18, %v9608_v53  ;;  %v10078_v50 = vpop.permute.xlu0 %2586  ;;  %v10089_v40 = vpop.permute.xlu1 %2582 }
 0x1d5   :  { %14919 = vst [vmem:[#allocation100_spill] sm:$0xff] %v10053_v23  ;;  %v10072_v59 = vadd.f32 %v9887_v56, %v1452_v7  ;;  %14922 = vst [vmem:[#allocation102_spill] sm:$0xff] %v10078_v50  ;;  %v1826_v46 = vunpack.c.l.bf16 %v10032_v34  ;;  %v14924_v7 = vpack.c.bf16 %v9668_v12, %v9653_v30  ;;  %v2027_v34 = vmul.f32 %v9937_v17, %v1893_v9 }
 0x1d6   :  { %14920 = vst [vmem:[#allocation101_spill] sm:$0xff] %v10063_v29  ;;  %8375 = vtanh.bf16 %v14921_v62  ;;  %v10083_v41 = vadd.f32 %v9887_v56, %v1450_v21  ;;  %2248 = vadd.xlane.f32.xlu1 %v2029_v24  ;;  %2246 = vadd.xlane.f32.xlu0 %v2028_v13  ;;  %v8064_v3 = vpop.f32.mrb[56].mxu0  ;;  %14925 = vst [vmem:[#allocation104_spill] sm:$0xff] %v10089_v40  ;;  %v2026_v30 = vmul.f32 %v9937_v17, %v1892_v54 }
 0x1d7   :  { %8377 = vtanh.bf16 %v14924_v7  ;;  %v1383_v18 = vadd.f32 %v9836_v27, %v8064_v3  ;;  %v1019_v62 = vpop.f32.mrb[57].mxu0  ;;  %v1961_v3 = vmul.f32 %v9937_v17, %v1827_v14  ;;  %v1825_v40 = vunpack.c.h.bf16 %v10039_v19 }
 0x1d8   :  { %14923 = vst [vmem:[#allocation103_spill] sm:$0xff] %v10083_v41  ;;  %v1381_v24 = vadd.f32 %v9836_v27, %v1019_v62  ;;  %v8136_v13 = vpop.f32.mrb[68].mxu1  ;;  %v8065_v55 = vpop.f32.mrb[58].mxu0  ;;  %v1960_v54 = vmul.f32 %v9937_v17, %v1826_v46 }
 0x1d9   :  { %v1455_v12 = vadd.f32 %v9836_v27, %v8136_v13  ;;  %v1384_v7 = vadd.f32 %v9836_v27, %v8065_v55  ;;  %v1307_v50 = vpop.f32.mrb[69].mxu1  ;;  %v1022_v53 = vpop.f32.mrb[59].mxu0  ;;  %v1824_v13 = vunpack.c.l.bf16 %v10039_v19  ;;  %v10108_v55 = vadd.f32 %v9243_v28, %v1383_v18  ;;  %v14975_v18 = vld [vmem:[#allocation88_spill] sm:$0xff] }
 0x1da   :  { %v8374_v23 = vpop.eup %8373  ;;  %v1453_v21 = vadd.f32 %v9836_v27, %v1307_v50  ;;  %v8137_v62 = vpop.f32.mrb[70].mxu1  ;;  %2244 = vadd.xlane.f32.xlu1 %v2027_v34  ;;  %2242 = vadd.xlane.f32.xlu0 %v2026_v30  ;;  %v1382_v9 = vadd.f32 %v9836_v27, %v1022_v53  ;;  %v10118_v34 = vadd.f32 %v9243_v28, %v1381_v24 }
 0x1db   :  { %v10111_v29 = vadd.f32 %v9887_v56, %v1455_v12  ;;  %v10114_v14 = vadd.f32 %v9243_v28, %v1384_v7  ;;  %v1456_v50 = vadd.f32 %v9836_v27, %v8137_v62  ;;  %v1310_v41 = vpop.f32.mrb[71].mxu1  ;;  %v14926_v12 = vpack.c.bf16 %v9676_v60, %v9659_v6 }
 0x1dc   :  { %v10121_v53 = vadd.f32 %v9887_v56, %v1453_v21  ;;  %v10124_v19 = vadd.f32 %v9243_v28, %v1382_v9  ;;  %v1454_v46 = vadd.f32 %v9836_v27, %v1310_v41  ;;  %v10140_v28 = vpop.permute.xlu1 %2590  ;;  %v10142_v27 = vpop.permute.xlu0 %2597  ;;  %v1959_v7 = vmul.f32 %v9937_v17, %v1825_v40 }
 0x1dd   :  { %v10130_v30 = vadd.f32 %v9887_v56, %v1456_v50  ;;  %8379 = vtanh.bf16 %v14926_v12  ;;  %14927 = vst [vmem:[#allocation105_spill] sm:$0xff] %v10140_v28  ;;  %14928 = vst [vmem:[#allocation106_spill] sm:$0xff] %v10142_v27  ;;  %v1958_v60 = vmul.f32 %v9937_v17, %v1824_v13  ;;  %v1899_v62 = vunpack.c.h.bf16 %v8374_v23 }
 0x1de   :  { %v10138_v21 = vadd.f32 %v9887_v56, %v1454_v46  ;;  %2112 = vadd.xlane.f32.xlu1 %v1961_v3  ;;  %2110 = vadd.xlane.f32.xlu0 %v1960_v54  ;;  %v1898_v9 = vunpack.c.l.bf16 %v8374_v23  ;;  %v14929_v3 = vpack.c.bf16 %v9686_v47, %v9665_v51  ;;  %v14932_v23 = vpack.c.bf16 %v9698_v8, %v9673_v45 }
 0x1df   :  { %v2033_v54 = vmul.f32 %v9937_v17, %v1899_v62  ;;  %v14933_v62 = vpack.c.bf16 %v9732_v31, %v9717_v16 }
 0x1e0   :  { %8381 = vtanh.bf16 %v14929_v3  ;;  %v2032_v46 = vmul.f32 %v9937_v17, %v1898_v9  ;;  %v10155_v41 = vpop.permute.xlu1 %2601  ;;  %v10157_v6 = vpop.permute.xlu0 %2605 }
 0x1e1   :  { %v8376_v56 = vpop.eup %8375  ;;  %14930 = vst [vmem:[#allocation107_spill] sm:$0xff] %v10155_v41  ;;  %14931 = vst [vmem:[#allocation108_spill] sm:$0xff] %v10157_v6  ;;  %8383 = vtanh.bf16 %v14932_v23 }
 0x1e2   :  { %v8378_v50 = vpop.eup %8377  ;;  %2108 = vadd.xlane.f32.xlu1 %v1959_v7  ;;  %2106 = vadd.xlane.f32.xlu0 %v1958_v60  ;;  %v1897_v40 = vunpack.c.h.bf16 %v8376_v56  ;;  %v1896_v12 = vunpack.c.l.bf16 %v8376_v56  ;;  %8385 = vtanh.bf16 %v14933_v62 }
 0x1e3   :  { %v1831_v13 = vunpack.c.h.bf16 %v8378_v50  ;;  %v1830_v7 = vunpack.c.l.bf16 %v8378_v50  ;;  %v14936_v50 = vpack.c.bf16 %v9740_v33, %v9723_v22 }
 0x1e4   :  { %v2031_v51 = vmul.f32 %v9937_v17, %v1897_v40  ;;  %v2030_v47 = vmul.f32 %v9937_v17, %v1896_v12  ;;  %v10167_v9 = vpop.permute.xlu1 %2609  ;;  %v10169_v56 = vpop.permute.xlu0 %2613 }
 0x1e5   :  { %14934 = vst [vmem:[#allocation109_spill] sm:$0xff] %v10167_v9  ;;  %14935 = vst [vmem:[#allocation110_spill] sm:$0xff] %v10169_v56  ;;  %v1965_v45 = vmul.f32 %v9937_v17, %v1831_v13  ;;  %v1964_v8 = vmul.f32 %v9937_v17, %v1830_v7  ;;  %8387 = vtanh.bf16 %v14936_v50  ;;  %v14939_v13 = vpack.c.bf16 %v9750_v44, %v9729_v52 }
 0x1e6   :  { %2256 = vadd.xlane.f32.xlu1 %v2033_v54  ;;  %2254 = vadd.xlane.f32.xlu0 %v2032_v46 }
 0x1e7   :  { %8389 = vtanh.bf16 %v14939_v13 }
 0x1e8   :  { %v8380_v60 = vpop.eup %8379 }
 0x1e9   :  { %v1829_v3 = vunpack.c.h.bf16 %v8380_v60  ;;  %v1828_v54 = vunpack.c.l.bf16 %v8380_v60 }
 0x1ea   :  { %2252 = vadd.xlane.f32.xlu1 %v2031_v51  ;;  %2250 = vadd.xlane.f32.xlu0 %v2030_v47  ;;  %v10178_v51 = vpop.permute.xlu1 %2617  ;;  %v10180_v47 = vpop.permute.xlu0 %2621 }
 0x1eb   :  { %v8382_v46 = vpop.eup %8381  ;;  %v1963_v16 = vmul.f32 %v9937_v17, %v1829_v3  ;;  %v1962_v31 = vmul.f32 %v9937_v17, %v1828_v54  ;;  %14937 = vst [vmem:[#allocation111_spill] sm:$0xff] %v10178_v51  ;;  %14938 = vst [vmem:[#allocation112_spill] sm:$0xff] %v10180_v47 }
 0x1ec   :  { %v1903_v40 = vunpack.c.h.bf16 %v8382_v46  ;;  %v1902_v12 = vunpack.c.l.bf16 %v8382_v46  ;;  %v8384_v23 = vpop.eup %8383 }
 0x1ed   :  { %v1901_v7 = vunpack.c.h.bf16 %v8384_v23  ;;  %v1900_v60 = vunpack.c.l.bf16 %v8384_v23  ;;  %v8386_v62 = vpop.eup %8385 }
 0x1ee   :  { %2120 = vadd.xlane.f32.xlu1 %v1965_v45  ;;  %2118 = vadd.xlane.f32.xlu0 %v1964_v8  ;;  %v2037_v22 = vmul.f32 %v9937_v17, %v1903_v40  ;;  %v2036_v33 = vmul.f32 %v9937_v17, %v1902_v12  ;;  %v14940_v45 = vpack.c.bf16 %v9763_v35, %v9737_v43  ;;  %v10190_v8 = vpop.permute.xlu1 %2625  ;;  %v10192_v3 = vpop.permute.xlu0 %2629  ;;  %v1835_v54 = vunpack.c.h.bf16 %v8386_v62 }
 0x1ef   :  { %v2035_v52 = vmul.f32 %v9937_v17, %v1901_v7  ;;  %v2034_v44 = vmul.f32 %v9937_v17, %v1900_v60  ;;  %v1834_v46 = vunpack.c.l.bf16 %v8386_v62 }
 0x1f0   :  { %8391 = vtanh.bf16 %v14940_v45  ;;  %v8388_v50 = vpop.eup %8387 }
 0x1f1   :  { %v1968_v40 = vmul.f32 %v9937_v17, %v1834_v46  ;;  %v1833_v12 = vunpack.c.h.bf16 %v8388_v50  ;;  %v1832_v23 = vunpack.c.l.bf16 %v8388_v50 }
 0x1f2   :  { %2116 = vadd.xlane.f32.xlu1 %v1963_v16  ;;  %2114 = vadd.xlane.f32.xlu0 %v1962_v31  ;;  %v14941_v16 = vpack.c.bf16 %v9797_v2, %v9782_v58  ;;  %v1969_v31 = vmul.f32 %v9937_v17, %v1835_v54  ;;  %v8390_v13 = vpop.eup %8389 }
 0x1f3   :  { %v1966_v7 = vmul.f32 %v9937_v17, %v1832_v23  ;;  %v1907_v60 = vunpack.c.h.bf16 %v8390_v13  ;;  %v1906_v62 = vunpack.c.l.bf16 %v8390_v13 }
 0x1f4   :  { %8393 = vtanh.bf16 %v14941_v16 }
 0x1f5   :  { %v2040_v54 = vmul.f32 %v9937_v17, %v1906_v62 }
 0x1f6   :  { %2264 = vadd.xlane.f32.xlu1 %v2037_v22  ;;  %2262 = vadd.xlane.f32.xlu0 %v2036_v33  ;;  %v14942_v22 = vpack.c.bf16 %v9805_v5, %v9788_v61  ;;  %v1967_v33 = vmul.f32 %v9937_v17, %v1833_v12 }
 0x1f8   :  { %8395 = vtanh.bf16 %v14942_v22 }
 0x1fa   :  { %2260 = vadd.xlane.f32.xlu1 %v2035_v52  ;;  %2258 = vadd.xlane.f32.xlu0 %v2034_v44  ;;  %v14945_v52 = vpack.c.bf16 %v9815_v42, %v9794_v26  ;;  %v2041_v44 = vmul.f32 %v9937_v17, %v1907_v60  ;;  %v14953_v60 = vpack.c.bf16 %v9866_v49, %v9851_v32 }
 0x1fb   :  { %v10199_v43 = vpop.xlane.xlu1 %2180  ;;  %v10201_v35 = vpop.xlane.xlu0 %2178 }
 0x1fc   :  { %v8392_v45 = vpop.eup %8391  ;;  %8397 = vtanh.bf16 %v14945_v52 }
 0x1fd   :  { %v1905_v46 = vunpack.c.h.bf16 %v8392_v45  ;;  %v1904_v50 = vunpack.c.l.bf16 %v8392_v45 }
 0x1fe   :  { %2128 = vadd.xlane.f32.xlu1 %v1969_v31  ;;  %2126 = vadd.xlane.f32.xlu0 %v1968_v40  ;;  %v14948_v31 = vld [vmem:[#allocation81_spill] sm:$0xff]  ;;  %v14949_v40 = vld [vmem:[#allocation79_spill] sm:$0xff] }
 0x1ff   :  { %v10208_v58 = vpop.xlane.xlu1 %2184  ;;  %v10210_v2 = vpop.xlane.xlu0 %2182  ;;  %v14950_v12 = vpack.c.bf16 %v14948_v31, %v14949_v40  ;;  %v2039_v23 = vmul.f32 %v9937_v17, %v1905_v46  ;;  %v2038_v13 = vmul.f32 %v9937_v17, %v1904_v50 }
 0x200   :  { %14943 = vst [vmem:[#allocation113_spill] sm:$0xff] %v10208_v58  ;;  %14944 = vst [vmem:[#allocation114_spill] sm:$0xff] %v10210_v2  ;;  %v8394_v16 = vpop.eup %8393 }
 0x201   :  { %8399 = vtanh.bf16 %v14950_v12  ;;  %v1839_v22 = vunpack.c.h.bf16 %v8394_v16 }
 0x202   :  { %2124 = vadd.xlane.f32.xlu1 %v1967_v33  ;;  %2122 = vadd.xlane.f32.xlu0 %v1966_v7  ;;  %v1838_v33 = vunpack.c.l.bf16 %v8394_v16  ;;  %8401 = vtanh.bf16 %v14953_v60  ;;  %v14956_v16 = vpack.c.bf16 %v9874_v25, %v9857_v63 }
 0x203   :  { %v10217_v61 = vpop.xlane.xlu1 %2192  ;;  %v10219_v5 = vpop.xlane.xlu0 %2190  ;;  %v1973_v52 = vmul.f32 %v9937_v17, %v1839_v22  ;;  %v14959_v22 = vpack.c.bf16 %v9884_v36, %v9863_v48 }
 0x204   :  { %14946 = vst [vmem:[#allocation115_spill] sm:$0xff] %v10217_v61  ;;  %14947 = vst [vmem:[#allocation116_spill] sm:$0xff] %v10219_v5  ;;  %v8396_v7 = vpop.eup %8395  ;;  %8403 = vtanh.bf16 %v14956_v16  ;;  %v15051_v5 = vld [vmem:[#allocation26_spill] sm:$0xff] }
 0x205   :  { %v1836_v46 = vunpack.c.l.bf16 %v8396_v7  ;;  %8405 = vtanh.bf16 %v14959_v22 }
 0x206   :  { %2272 = vadd.xlane.f32.xlu1 %v2041_v44  ;;  %2270 = vadd.xlane.f32.xlu0 %v2040_v54  ;;  %v1972_v44 = vmul.f32 %v9937_v17, %v1838_v33  ;;  %v1837_v54 = vunpack.c.h.bf16 %v8396_v7 }
 0x207   :  { %v10226_v26 = vpop.xlane.xlu1 %2188  ;;  %v10228_v42 = vpop.xlane.xlu0 %2186  ;;  %v1970_v12 = vmul.f32 %v9937_v17, %v1836_v46  ;;  %v14962_v46 = vld [vmem:[#allocation83_spill] sm:$0xff] }
 0x208   :  { %14951 = vst [vmem:[#allocation81_spill] sm:$0xff] %v10226_v26  ;;  %14952 = vst [vmem:[#allocation79_spill] sm:$0xff] %v10228_v42  ;;  %v8398_v50 = vpop.eup %8397  ;;  %v1971_v40 = vmul.f32 %v9937_v17, %v1837_v54  ;;  %v15053_v42 = vld [vmem:[#allocation27_spill] sm:$0xff] }
 0x20a   :  { %2268 = vadd.xlane.f32.xlu1 %v2039_v23  ;;  %2266 = vadd.xlane.f32.xlu0 %v2038_v13  ;;  %v1911_v23 = vunpack.c.h.bf16 %v8398_v50  ;;  %v1910_v13 = vunpack.c.l.bf16 %v8398_v50  ;;  %v14963_v50 = vpack.c.bf16 %v9897_v1, %v14962_v46 }
 0x20b   :  { %v10235_v62 = vpop.xlane.xlu1 %2200  ;;  %v10237_v45 = vpop.xlane.xlu0 %2198 }
 0x20c   :  { %14954 = vst [vmem:[#allocation117_spill] sm:$0xff] %v10235_v62  ;;  %14955 = vst [vmem:[#allocation118_spill] sm:$0xff] %v10237_v45  ;;  %v8400_v31 = vpop.eup %8399  ;;  %v2045_v60 = vmul.f32 %v9937_v17, %v1911_v23  ;;  %8407 = vtanh.bf16 %v14963_v50 }
 0x20d   :  { %v1909_v33 = vunpack.c.h.bf16 %v8400_v31  ;;  %v8402_v54 = vpop.eup %8401 }
 0x20e   :  { %2136 = vadd.xlane.f32.xlu1 %v1973_v52  ;;  %2134 = vadd.xlane.f32.xlu0 %v1972_v44  ;;  %v2044_v52 = vmul.f32 %v9937_v17, %v1910_v13  ;;  %v1908_v44 = vunpack.c.l.bf16 %v8400_v31  ;;  %v14966_v31 = vpack.c.bf16 %v9931_v11, %v9916_v57 }
 0x20f   :  { %v10244_v32 = vpop.xlane.xlu1 %2196  ;;  %v10246_v49 = vpop.xlane.xlu0 %2194  ;;  %v2043_v16 = vmul.f32 %v9937_v17, %v1909_v33 }
 0x210   :  { %14957 = vst [vmem:[#allocation119_spill] sm:$0xff] %v10244_v32  ;;  %14958 = vst [vmem:[#allocation120_spill] sm:$0xff] %v10246_v49  ;;  %v8404_v23 = vpop.eup %8403  ;;  %8409 = vtanh.bf16 %v14966_v31 }
 0x211   :  { %v1841_v33 = vunpack.c.h.bf16 %v8404_v23 }
 0x212   :  { %2132 = vadd.xlane.f32.xlu1 %v1971_v40  ;;  %2130 = vadd.xlane.f32.xlu0 %v1970_v12  ;;  %v1843_v40 = vunpack.c.h.bf16 %v8402_v54  ;;  %v1842_v12 = vunpack.c.l.bf16 %v8402_v54 }
 0x213   :  { %v2209_v63 = vpop.xlane.xlu1 %2208  ;;  %v10253_v25 = vpop.xlane.xlu0 %2206  ;;  %v1975_v50 = vmul.f32 %v9937_v17, %v1841_v33 }
 0x214   :  { %14960 = vst [vmem:[#allocation121_spill] sm:$0xff] %v10253_v25  ;;  %v10256_v7 = vadd.f32 %v10190_v8, %v2209_v63  ;;  %v2042_v8 = vmul.f32 %v9937_v17, %v1908_v44  ;;  %v1977_v22 = vmul.f32 %v9937_v17, %v1843_v40  ;;  %v1976_v63 = vmul.f32 %v9937_v17, %v1842_v12  ;;  %v14967_v44 = vld [vmem:[#allocation86_spill] sm:$0xff]  ;;  %v14969_v12 = vld [vmem:[#allocation89_spill] sm:$0xff] }
 0x215   :  { %v14968_v54 = vpack.c.bf16 %v9944_v38, %v14967_v44 }
 0x216   :  { %14961 = vst [vmem:[#allocation122_spill] sm:$0xff] %v10256_v7  ;;  %2280 = vadd.xlane.f32.xlu1 %v2045_v60  ;;  %2278 = vadd.xlane.f32.xlu0 %v2044_v52  ;;  %v1840_v60 = vunpack.c.l.bf16 %v8404_v23  ;;  %v8406_v52 = vpop.eup %8405  ;;  %v14970_v23 = vld [vmem:[#allocation87_spill] sm:$0xff] }
 0x217   :  { %v10263_v48 = vpop.xlane.xlu1 %2204  ;;  %v10265_v36 = vpop.xlane.xlu0 %2202  ;;  %8411 = vtanh.bf16 %v14968_v54  ;;  %v1914_v40 = vunpack.c.l.bf16 %v8406_v52  ;;  %v14971_v31 = vpack.c.bf16 %v14969_v12, %v14970_v23 }
 0x218   :  { %14964 = vst [vmem:[#allocation83_spill] sm:$0xff] %v10263_v48  ;;  %14965 = vst [vmem:[#allocation123_spill] sm:$0xff] %v10265_v36  ;;  %v8408_v46 = vpop.eup %8407 }
 0x219   :  { %8413 = vtanh.bf16 %v14971_v31  ;;  %v2048_v54 = vmul.f32 %v9937_v17, %v1914_v40  ;;  %v1912_v33 = vunpack.c.l.bf16 %v8408_v46 }
 0x21a   :  { %2276 = vadd.xlane.f32.xlu1 %v2043_v16  ;;  %2274 = vadd.xlane.f32.xlu0 %v2042_v8  ;;  %v1974_v16 = vmul.f32 %v9937_v17, %v1840_v60  ;;  %v1915_v8 = vunpack.c.h.bf16 %v8406_v52  ;;  %v14974_v60 = vld [vmem:[#allocation91_spill] sm:$0xff] }
 0x21b   :  { %v10272_v1 = vpop.xlane.xlu1 %2070  ;;  %v10274_v13 = vpop.xlane.xlu0 %2066  ;;  %v14976_v52 = vpack.c.bf16 %v14974_v60, %v14975_v18 }
 0x21c   :  { %v2049_v44 = vmul.f32 %v9937_v17, %v1915_v8  ;;  %v8410_v24 = vpop.eup %8409  ;;  %v2046_v8 = vmul.f32 %v9937_v17, %v1912_v33  ;;  %v10596_v58 = vadd.f32 %v15053_v42, %v10274_v13 }
 0x21d   :  { %8415 = vtanh.bf16 %v14976_v52  ;;  %v1847_v31 = vunpack.c.h.bf16 %v8410_v24  ;;  %v1846_v40 = vunpack.c.l.bf16 %v8410_v24  ;;  %v14980_v24 = vld [vmem:[#allocation93_spill] sm:$0xff] }
 0x21e   :  { %2144 = vadd.xlane.f32.xlu1 %v1977_v22  ;;  %2142 = vadd.xlane.f32.xlu0 %v1976_v63  ;;  %v1913_v63 = vunpack.c.h.bf16 %v8408_v46  ;;  %v14981_v52 = vpack.c.bf16 %v10006_v39, %v14980_v24  ;;  %15054 = vst [vmem:[#allocation27_spill] sm:$0xff] %v10596_v58 }
 0x21f   :  { %v10281_v57 = vpop.xlane.xlu1 %2072  ;;  %v10283_v11 = vpop.xlane.xlu0 %2068 }
 0x220   :  { %v10592_v26 = vadd.f32 %v15051_v5, %v10283_v11  ;;  %v15059_v11 = vld [vmem:[#allocation29_spill] sm:$0xff] }
 0x222   :  { %2140 = vadd.xlane.f32.xlu1 %v1975_v50  ;;  %2138 = vadd.xlane.f32.xlu0 %v1974_v16  ;;  %v2047_v16 = vmul.f32 %v9937_v17, %v1913_v63  ;;  %v8412_v46 = vpop.eup %8411  ;;  %v1981_v63 = vmul.f32 %v9937_v17, %v1847_v31  ;;  %15052 = vst [vmem:[#allocation26_spill] sm:$0xff] %v10592_v26 }
 0x223   :  { %v10290_v38 = vpop.xlane.xlu1 %2216  ;;  %v10292_v22 = vpop.xlane.xlu0 %2214  ;;  %v1844_v60 = vunpack.c.l.bf16 %v8412_v46 }
 0x224   :  { %14972 = vst [vmem:[#allocation86_spill] sm:$0xff] %v10290_v38  ;;  %14973 = vst [vmem:[#allocation89_spill] sm:$0xff] %v10292_v22  ;;  %v14979_v38 = vpack.c.bf16 %v9998_v37, %v9983_v10  ;;  %v8414_v33 = vpop.eup %8413 }
 0x226   :  { %2288 = vadd.xlane.f32.xlu1 %v2049_v44  ;;  %2286 = vadd.xlane.f32.xlu0 %v2048_v54  ;;  %8417 = vtanh.bf16 %v14979_v38  ;;  %v1845_v54 = vunpack.c.h.bf16 %v8412_v46  ;;  %v14983_v46 = vld [vmem:[#allocation94_spill] sm:$0xff] }
 0x227   :  { %v10299_v12 = vpop.xlane.xlu1 %2212  ;;  %v2211_v50 = vpop.xlane.xlu0 %2210  ;;  %8419 = vtanh.bf16 %v14981_v52 }
 0x228   :  { %14977 = vst [vmem:[#allocation87_spill] sm:$0xff] %v10299_v12  ;;  %v10303_v23 = vadd.f32 %v10192_v3, %v2211_v50  ;;  %v1980_v3 = vmul.f32 %v9937_v17, %v1846_v40  ;;  %v1979_v38 = vmul.f32 %v9937_v17, %v1845_v54  ;;  %v1978_v50 = vmul.f32 %v9937_v17, %v1844_v60  ;;  %v8416_v31 = vpop.eup %8415  ;;  %v14982_v40 = vld [vmem:[#allocation96_spill] sm:$0xff] }
 0x229   :  { %v14984_v22 = vpack.c.bf16 %v14982_v40, %v14983_v46  ;;  %v1917_v54 = vunpack.c.h.bf16 %v8416_v31  ;;  %v1916_v52 = vunpack.c.l.bf16 %v8416_v31  ;;  %v14992_v31 = vpack.c.bf16 %v10056_v20, %v10050_v4 }
 0x22a   :  { %14978 = vst [vmem:[#allocation91_spill] sm:$0xff] %v10303_v23  ;;  %2284 = vadd.xlane.f32.xlu1 %v2047_v16  ;;  %2282 = vadd.xlane.f32.xlu0 %v2046_v8  ;;  %v1919_v16 = vunpack.c.h.bf16 %v8414_v33  ;;  %v1918_v8 = vunpack.c.l.bf16 %v8414_v33  ;;  %v14987_v23 = vld [vmem:[#allocation98_spill] sm:$0xff]  ;;  %v14988_v33 = vld [vmem:[#allocation95_spill] sm:$0xff] }
 0x22b   :  { %v10309_v18 = vpop.xlane.xlu1 %2080  ;;  %v10311_v44 = vpop.xlane.xlu0 %2078  ;;  %8421 = vtanh.bf16 %v14984_v22  ;;  %v14989_v12 = vpack.c.bf16 %v14987_v23, %v14988_v33  ;;  %v2050_v40 = vmul.f32 %v9937_v17, %v1916_v52 }
 0x22c   :  { %v2052_v24 = vmul.f32 %v9937_v17, %v1918_v8 }
 0x22d   :  { %8423 = vtanh.bf16 %v14989_v12 }
 0x22e   :  { %2152 = vadd.xlane.f32.xlu1 %v1981_v63  ;;  %2150 = vadd.xlane.f32.xlu0 %v1980_v3  ;;  %v2053_v3 = vmul.f32 %v9937_v17, %v1919_v16  ;;  %8425 = vtanh.bf16 %v14992_v31 }
 0x22f   :  { %v10318_v10 = vpop.xlane.xlu1 %2076  ;;  %v10320_v37 = vpop.xlane.xlu0 %2074 }
 0x231   :  { %v8418_v60 = vpop.eup %8417 }
 0x232   :  { %2148 = vadd.xlane.f32.xlu1 %v1979_v38  ;;  %2146 = vadd.xlane.f32.xlu0 %v1978_v50  ;;  %v2051_v50 = vmul.f32 %v9937_v17, %v1917_v54  ;;  %v1851_v16 = vunpack.c.h.bf16 %v8418_v60  ;;  %v1850_v46 = vunpack.c.l.bf16 %v8418_v60  ;;  %v8420_v8 = vpop.eup %8419  ;;  %v14993_v60 = vpack.c.bf16 %v10066_v15, %v10060_v0 }
 0x233   :  { %v10327_v39 = vpop.xlane.xlu1 %2224  ;;  %v10329_v63 = vpop.xlane.xlu0 %2222  ;;  %v1849_v54 = vunpack.c.h.bf16 %v8420_v8  ;;  %v1848_v33 = vunpack.c.l.bf16 %v8420_v8  ;;  %v14994_v8 = vld [vmem:[#allocation100_spill] sm:$0xff] }
 0x234   :  { %14985 = vst [vmem:[#allocation88_spill] sm:$0xff] %v10327_v39  ;;  %14986 = vst [vmem:[#allocation93_spill] sm:$0xff] %v10329_v63  ;;  %8427 = vtanh.bf16 %v14993_v60  ;;  %v14995_v39 = vpack.c.bf16 %v10072_v59, %v14994_v8  ;;  %v14998_v63 = vld [vmem:[#allocation103_spill] sm:$0xff] }
 0x236   :  { %2296 = vadd.xlane.f32.xlu1 %v2053_v3  ;;  %2294 = vadd.xlane.f32.xlu0 %v2052_v24  ;;  %v1985_v3 = vmul.f32 %v9937_v17, %v1851_v16  ;;  %v1984_v24 = vmul.f32 %v9937_v17, %v1850_v46  ;;  %v8422_v52 = vpop.eup %8421  ;;  %8429 = vtanh.bf16 %v14995_v39 }
 0x237   :  { %v10336_v22 = vpop.xlane.xlu1 %2220  ;;  %v10338_v38 = vpop.xlane.xlu0 %2218  ;;  %v1923_v16 = vunpack.c.h.bf16 %v8422_v52  ;;  %v1922_v31 = vunpack.c.l.bf16 %v8422_v52  ;;  %v14999_v52 = vld [vmem:[#allocation101_spill] sm:$0xff] }
 0x238   :  { %14990 = vst [vmem:[#allocation96_spill] sm:$0xff] %v10336_v22  ;;  %14991 = vst [vmem:[#allocation94_spill] sm:$0xff] %v10338_v38  ;;  %v8424_v46 = vpop.eup %8423  ;;  %v15000_v22 = vpack.c.bf16 %v14998_v63, %v14999_v52 }
 0x239   :  { %v1920_v60 = vunpack.c.l.bf16 %v8424_v46 }
 0x23a   :  { %2292 = vadd.xlane.f32.xlu1 %v2051_v50  ;;  %2290 = vadd.xlane.f32.xlu0 %v2050_v40  ;;  %v1983_v50 = vmul.f32 %v9937_v17, %v1849_v54  ;;  %v1982_v40 = vmul.f32 %v9937_v17, %v1848_v33  ;;  %v1921_v54 = vunpack.c.h.bf16 %v8424_v46  ;;  %v8426_v33 = vpop.eup %8425  ;;  %8431 = vtanh.bf16 %v15000_v22 }
 0x23b   :  { %v10345_v12 = vpop.xlane.xlu1 %2088  ;;  %v10347_v23 = vpop.xlane.xlu0 %2086  ;;  %v1854_v8 = vunpack.c.l.bf16 %v8426_v33  ;;  %v15003_v46 = vpack.c.bf16 %v10114_v14, %v10108_v55 }
 0x23d   :  { %8433 = vtanh.bf16 %v15003_v46 }
 0x23e   :  { %2160 = vadd.xlane.f32.xlu1 %v1985_v3  ;;  %2158 = vadd.xlane.f32.xlu0 %v1984_v24  ;;  %v2057_v3 = vmul.f32 %v9937_v17, %v1923_v16  ;;  %v2056_v24 = vmul.f32 %v9937_v17, %v1922_v31  ;;  %v1855_v16 = vunpack.c.h.bf16 %v8426_v33  ;;  %v15004_v33 = vpack.c.bf16 %v10124_v19, %v10118_v34 }
 0x23f   :  { %v10354_v4 = vpop.xlane.xlu1 %2084  ;;  %v10356_v20 = vpop.xlane.xlu0 %2082 }
 0x240   :  { %v8428_v31 = vpop.eup %8427  ;;  %8435 = vtanh.bf16 %v15004_v33 }
 0x241   :  { %v1852_v52 = vunpack.c.l.bf16 %v8428_v31 }
 0x242   :  { %2156 = vadd.xlane.f32.xlu1 %v1983_v50  ;;  %2154 = vadd.xlane.f32.xlu0 %v1982_v40  ;;  %v2055_v50 = vmul.f32 %v9937_v17, %v1921_v54  ;;  %v2054_v40 = vmul.f32 %v9937_v17, %v1920_v60  ;;  %v1853_v54 = vunpack.c.h.bf16 %v8428_v31  ;;  %v8430_v60 = vpop.eup %8429  ;;  %v15005_v31 = vpack.c.bf16 %v10130_v30, %v10111_v29 }
 0x243   :  { %v10363_v0 = vpop.xlane.xlu1 %2232  ;;  %v10365_v15 = vpop.xlane.xlu0 %2230  ;;  %v1926_v46 = vunpack.c.l.bf16 %v8430_v60 }
 0x244   :  { %14996 = vst [vmem:[#allocation98_spill] sm:$0xff] %v10363_v0  ;;  %14997 = vst [vmem:[#allocation95_spill] sm:$0xff] %v10365_v15  ;;  %8437 = vtanh.bf16 %v15005_v31  ;;  %v10479_v0 = vld [vmem:[#allocation7] sm:$0xff] }
 0x246   :  { %2304 = vadd.xlane.f32.xlu1 %v2057_v3  ;;  %2302 = vadd.xlane.f32.xlu0 %v2056_v24  ;;  %v1989_v3 = vmul.f32 %v9937_v17, %v1855_v16  ;;  %v1988_v24 = vmul.f32 %v9937_v17, %v1854_v8  ;;  %v1927_v16 = vunpack.c.h.bf16 %v8430_v60  ;;  %v8432_v8 = vpop.eup %8431  ;;  %v15008_v60 = vpack.c.bf16 %v10138_v21, %v10121_v53 }
 0x247   :  { %v10372_v59 = vpop.xlane.xlu1 %2228  ;;  %v10374_v39 = vpop.xlane.xlu0 %2226  ;;  %v1924_v33 = vunpack.c.l.bf16 %v8432_v8 }
 0x248   :  { %15001 = vst [vmem:[#allocation100_spill] sm:$0xff] %v10372_v59  ;;  %15002 = vst [vmem:[#allocation103_spill] sm:$0xff] %v10374_v39  ;;  %8439 = vtanh.bf16 %v15008_v60 }
 0x24a   :  { %2300 = vadd.xlane.f32.xlu1 %v2055_v50  ;;  %2298 = vadd.xlane.f32.xlu0 %v2054_v40  ;;  %v1987_v50 = vmul.f32 %v9937_v17, %v1853_v54  ;;  %v1986_v40 = vmul.f32 %v9937_v17, %v1852_v52  ;;  %v1925_v54 = vunpack.c.h.bf16 %v8432_v8  ;;  %v8434_v52 = vpop.eup %8433 }
 0x24b   :  { %v10381_v63 = vpop.xlane.xlu1 %2096  ;;  %v10383_v22 = vpop.xlane.xlu0 %2094  ;;  %v1858_v31 = vunpack.c.l.bf16 %v8434_v52 }
 0x24d   :  { %v1992_v21 = vmul.f32 %v9937_v17, %v1858_v31 }
 0x24e   :  { %2168 = vadd.xlane.f32.xlu1 %v1989_v3  ;;  %2166 = vadd.xlane.f32.xlu0 %v1988_v24  ;;  %v2061_v3 = vmul.f32 %v9937_v17, %v1927_v16  ;;  %v2060_v24 = vmul.f32 %v9937_v17, %v1926_v46  ;;  %v1859_v16 = vunpack.c.h.bf16 %v8434_v52  ;;  %v8436_v46 = vpop.eup %8435 }
 0x24f   :  { %v10390_v55 = vpop.xlane.xlu1 %2092  ;;  %v10392_v14 = vpop.xlane.xlu0 %2090 }
 0x250   :  { %v1993_v53 = vmul.f32 %v9937_v17, %v1859_v16  ;;  %v8438_v60 = vpop.eup %8437 }
 0x252   :  { %2164 = vadd.xlane.f32.xlu1 %v1987_v50  ;;  %2162 = vadd.xlane.f32.xlu0 %v1986_v40  ;;  %v2059_v50 = vmul.f32 %v9937_v17, %v1925_v54  ;;  %v2058_v40 = vmul.f32 %v9937_v17, %v1924_v33 }
 0x253   :  { %v10399_v34 = vpop.xlane.xlu1 %2240  ;;  %v10401_v19 = vpop.xlane.xlu0 %2238 }
 0x254   :  { %15006 = vst [vmem:[#allocation101_spill] sm:$0xff] %v10399_v34  ;;  %15007 = vst [vmem:[#allocation124_spill] sm:$0xff] %v10401_v19  ;;  %v1930_v19 = vunpack.c.l.bf16 %v8438_v60 }
 0x256   :  { %2312 = vadd.xlane.f32.xlu1 %v2061_v3  ;;  %2310 = vadd.xlane.f32.xlu0 %v2060_v24  ;;  %v1857_v3 = vunpack.c.h.bf16 %v8436_v46  ;;  %v1856_v24 = vunpack.c.l.bf16 %v8436_v46 }
 0x257   :  { %v10408_v29 = vpop.xlane.xlu1 %2236  ;;  %v10410_v30 = vpop.xlane.xlu0 %2234 }
 0x258   :  { %15009 = vst [vmem:[#allocation125_spill] sm:$0xff] %v10408_v29  ;;  %15010 = vst [vmem:[#allocation126_spill] sm:$0xff] %v10410_v30  ;;  %v1991_v52 = vmul.f32 %v9937_v17, %v1857_v3  ;;  %v8440_v29 = vpop.eup %8439 }
 0x259   :  { %v1928_v30 = vunpack.c.l.bf16 %v8440_v29 }
 0x25a   :  { %2308 = vadd.xlane.f32.xlu1 %v2059_v50  ;;  %2306 = vadd.xlane.f32.xlu0 %v2058_v40  ;;  %v1990_v50 = vmul.f32 %v9937_v17, %v1856_v24  ;;  %v1931_v40 = vunpack.c.h.bf16 %v8438_v60 }
 0x25b   :  { %v10414_v8 = vpop.xlane.xlu1 %2104  ;;  %v10416_v34 = vpop.xlane.xlu0 %2102 }
 0x25c   :  { %v2065_v46 = vmul.f32 %v9937_v17, %v1931_v40 }
 0x25e   :  { %2176 = vadd.xlane.f32.xlu1 %v1993_v53  ;;  %2174 = vadd.xlane.f32.xlu0 %v1992_v21  ;;  %v2064_v53 = vmul.f32 %v9937_v17, %v1930_v19  ;;  %v1929_v21 = vunpack.c.h.bf16 %v8440_v29 }
 0x25f   :  { %v10420_v54 = vpop.xlane.xlu1 %2100  ;;  %v10422_v33 = vpop.xlane.xlu0 %2098 }
 0x260   :  { %v2063_v60 = vmul.f32 %v9937_v17, %v1929_v21 }
 0x262   :  { %2172 = vadd.xlane.f32.xlu1 %v1991_v52  ;;  %2170 = vadd.xlane.f32.xlu0 %v1990_v50  ;;  %v2062_v52 = vmul.f32 %v9937_v17, %v1928_v30  ;;  %v8940_v50 = vmov 0  }
 0x263   :  { %v10426_v16 = vpop.xlane.xlu1 %2248  ;;  %v10428_v31 = vpop.xlane.xlu0 %2246  ;;  %8168 = vset.pattern.permute.xlu1 %v8940_v50  ;;  %8167 = vset.pattern.permute.xlu0 %v8940_v50 }
 0x264   :  { %15011 = vst [vmem:[#allocation127_spill] sm:$0xff] %v10426_v16  ;;  %15012 = vst [vmem:[#allocation128_spill] sm:$0xff] %v10428_v31 }
 0x266   :  { %2320 = vadd.xlane.f32.xlu1 %v2065_v46  ;;  %2318 = vadd.xlane.f32.xlu0 %v2064_v53 }
 0x267   :  { %v10432_v3 = vpop.xlane.xlu1 %2244  ;;  %v10434_v24 = vpop.xlane.xlu0 %2242 }
 0x268   :  { %15013 = vst [vmem:[#allocation129_spill] sm:$0xff] %v10432_v3  ;;  %15014 = vst [vmem:[#allocation130_spill] sm:$0xff] %v10434_v24 }
 0x26a   :  { %2316 = vadd.xlane.f32.xlu1 %v2063_v60  ;;  %2314 = vadd.xlane.f32.xlu0 %v2062_v52  ;;  %v15019_v52 = vld [vmem:[#allocation25_spill] sm:$0xff] }
 0x26b   :  { %v10438_v40 = vpop.xlane.xlu1 %2112  ;;  %v10440_v19 = vpop.xlane.xlu0 %2110 }
 0x26f   :  { %v10442_v29 = vpop.xlane.xlu1 %2108  ;;  %v10444_v46 = vpop.xlane.xlu0 %2106 }
 0x273   :  { %v10446_v53 = vpop.xlane.xlu1 %2256  ;;  %v10448_v16 = vpop.xlane.xlu0 %2254 }
 0x274   :  { %15015 = vst [vmem:[#allocation131_spill] sm:$0xff] %v10446_v53  ;;  %15016 = vst [vmem:[#allocation132_spill] sm:$0xff] %v10448_v16 }
 0x277   :  { %v10450_v21 = vpop.xlane.xlu1 %2252  ;;  %v10452_v17 = vpop.xlane.xlu0 %2250 }
 0x278   :  { %15017 = vst [vmem:[#allocation133_spill] sm:$0xff] %v10450_v21  ;;  %15018 = vst [vmem:[#allocation134_spill] sm:$0xff] %v10452_v17  ;;  %v15022_v21 = vld [vmem:[#allocation19_spill] sm:$0xff] }
 0x279   :  { %v10471_v17 = vsub.s32 5, %v15022_v21 }
 0x27b   :  { %v10454_v30 = vpop.xlane.xlu1 %2120  ;;  %v10456_v60 = vpop.xlane.xlu0 %2118  ;;  %2633 = vbcast.lane.b32.xlu1 %v15019_v52, 328  ;;  %15023 = vst [vmem:[#allocation136_spill] sm:$0xff] %v10471_v17 }
 0x27f   :  { %v10459_v50 = vpop.xlane.xlu1 %2116  ;;  %v10461_v31 = vpop.xlane.xlu0 %2114  ;;  %2641 = vbcast.lane.b32.xlu1 %v15019_v52, 344 }
 0x280   :  { %2637 = vbcast.lane.b32.xlu0 %v15019_v52, 336 }
 0x283   :  { %v10465_v53 = vpop.xlane.xlu1 %2264  ;;  %v10467_v16 = vpop.xlane.xlu0 %2262  ;;  %2649 = vbcast.lane.b32.xlu1 %v15019_v52, 360 }
 0x284   :  { %15020 = vst [vmem:[#allocation25_spill] sm:$0xff] %v10465_v53  ;;  %15021 = vst [vmem:[#allocation135_spill] sm:$0xff] %v10467_v16  ;;  %2645 = vbcast.lane.b32.xlu0 %v15019_v52, 352  ;;  %v2662_v53 = vrot.slane %v10479_v0, %v10471_v17 }
 0x287   :  { %v10474_v3 = vpop.xlane.xlu1 %2260  ;;  %v10476_v24 = vpop.xlane.xlu0 %2258  ;;  %2657 = vbcast.lane.b32.xlu1 %v15019_v52, 376 }
 0x288   :  { %15024 = vst [vmem:[#allocation137_spill] sm:$0xff] %v10474_v3  ;;  %15025 = vst [vmem:[#allocation138_spill] sm:$0xff] %v10476_v24  ;;  %2653 = vbcast.lane.b32.xlu0 %v15019_v52, 368 }
 0x28b   :  { %v10484_v16 = vpop.xlane.xlu1 %2128  ;;  %v10486_v15 = vpop.xlane.xlu0 %2126  ;;  %2668 = vbcast.lane.b32.xlu1 %v2662_v53, 264 }
 0x28c   :  { %2664 = vbcast.lane.b32.xlu0 %v2662_v53, 256 }
 0x28f   :  { %v10488_v59 = vpop.xlane.xlu1 %2124  ;;  %v10490_v3 = vpop.xlane.xlu0 %2122  ;;  %2676 = vbcast.lane.b32.xlu1 %v2662_v53, 280 }
 0x290   :  { %2672 = vbcast.lane.b32.xlu0 %v2662_v53, 272 }
 0x293   :  { %v10492_v24 = vpop.xlane.xlu1 %2272  ;;  %v10494_v39 = vpop.xlane.xlu0 %2270  ;;  %2684 = vbcast.lane.b32.xlu1 %v2662_v53, 296 }
 0x294   :  { %15026 = vst [vmem:[#allocation139_spill] sm:$0xff] %v10492_v24  ;;  %15027 = vst [vmem:[#allocation140_spill] sm:$0xff] %v10494_v39  ;;  %2680 = vbcast.lane.b32.xlu0 %v2662_v53, 288 }
 0x297   :  { %v10496_v17 = vpop.xlane.xlu1 %2268  ;;  %v10498_v52 = vpop.xlane.xlu0 %2266  ;;  %2692 = vbcast.lane.b32.xlu1 %v2662_v53, 312 }
 0x298   :  { %15028 = vst [vmem:[#allocation141_spill] sm:$0xff] %v10496_v17  ;;  %15029 = vst [vmem:[#allocation142_spill] sm:$0xff] %v10498_v52  ;;  %2688 = vbcast.lane.b32.xlu0 %v2662_v53, 304  ;;  %v10513_v17 = vsub.s32 6, %v15022_v21 }
 0x29a   :  { %15032 = vst [vmem:[#allocation145_spill] sm:$0xff] %v10513_v17  ;;  %v2729_v48 = vrot.slane %v10479_v0, %v10513_v17 }
 0x29b   :  { %v10500_v38 = vpop.xlane.xlu1 %2136  ;;  %v10502_v7 = vpop.xlane.xlu0 %2134  ;;  %2700 = vbcast.lane.b32.xlu1 %v2662_v53, 328 }
 0x29c   :  { %2696 = vbcast.lane.b32.xlu0 %v2662_v53, 320 }
 0x29f   :  { %v10504_v47 = vpop.xlane.xlu1 %2132  ;;  %v10506_v25 = vpop.xlane.xlu0 %2130  ;;  %2708 = vbcast.lane.b32.xlu1 %v2662_v53, 344 }
 0x2a0   :  { %2704 = vbcast.lane.b32.xlu0 %v2662_v53, 336 }
 0x2a3   :  { %v10508_v24 = vpop.xlane.xlu1 %2280  ;;  %v10510_v39 = vpop.xlane.xlu0 %2278  ;;  %2716 = vbcast.lane.b32.xlu1 %v2662_v53, 360 }
 0x2a4   :  { %15030 = vst [vmem:[#allocation143_spill] sm:$0xff] %v10508_v24  ;;  %15031 = vst [vmem:[#allocation144_spill] sm:$0xff] %v10510_v39  ;;  %2712 = vbcast.lane.b32.xlu0 %v2662_v53, 352 }
 0x2a7   :  { %v10515_v52 = vpop.xlane.xlu1 %2276  ;;  %v10517_v51 = vpop.xlane.xlu0 %2274  ;;  %2724 = vbcast.lane.b32.xlu1 %v2662_v53, 376 }
 0x2a8   :  { %15033 = vst [vmem:[#allocation146_spill] sm:$0xff] %v10515_v52  ;;  %15034 = vst [vmem:[#allocation147_spill] sm:$0xff] %v10517_v51  ;;  %2720 = vbcast.lane.b32.xlu0 %v2662_v53, 368 }
 0x2ab   :  { %v10521_v56 = vpop.xlane.xlu1 %2144  ;;  %v10523_v36 = vpop.xlane.xlu0 %2142  ;;  %2735 = vbcast.lane.b32.xlu1 %v2729_v48, 264 }
 0x2ac   :  { %2731 = vbcast.lane.b32.xlu0 %v2729_v48, 256 }
 0x2af   :  { %v10525_v24 = vpop.xlane.xlu1 %2140  ;;  %v10527_v39 = vpop.xlane.xlu0 %2138  ;;  %2743 = vbcast.lane.b32.xlu1 %v2729_v48, 280 }
 0x2b0   :  { %2739 = vbcast.lane.b32.xlu0 %v2729_v48, 272 }
 0x2b3   :  { %v10529_v52 = vpop.xlane.xlu1 %2288  ;;  %v10531_v51 = vpop.xlane.xlu0 %2286  ;;  %2751 = vbcast.lane.b32.xlu1 %v2729_v48, 296 }
 0x2b4   :  { %15035 = vst [vmem:[#allocation148_spill] sm:$0xff] %v10529_v52  ;;  %15036 = vst [vmem:[#allocation149_spill] sm:$0xff] %v10531_v51  ;;  %2747 = vbcast.lane.b32.xlu0 %v2729_v48, 288 }
 0x2b7   :  { %v10533_v17 = vpop.xlane.xlu1 %2284  ;;  %v10535_v53 = vpop.xlane.xlu0 %2282  ;;  %2759 = vbcast.lane.b32.xlu1 %v2729_v48, 312 }
 0x2b8   :  { %15037 = vst [vmem:[#allocation150_spill] sm:$0xff] %v10533_v17  ;;  %15038 = vst [vmem:[#allocation151_spill] sm:$0xff] %v10535_v53  ;;  %2755 = vbcast.lane.b32.xlu0 %v2729_v48, 304  ;;  %v10550_v17 = vsub.s32 7, %v15022_v21 }
 0x2ba   :  { %15041 = vst [vmem:[#allocation154_spill] sm:$0xff] %v10550_v17  ;;  %v2796_v32 = vrot.slane %v10479_v0, %v10550_v17 }
 0x2bb   :  { %v10537_v9 = vpop.xlane.xlu1 %2152  ;;  %v10539_v62 = vpop.xlane.xlu0 %2150  ;;  %2767 = vbcast.lane.b32.xlu1 %v2729_v48, 328 }
 0x2bc   :  { %2763 = vbcast.lane.b32.xlu0 %v2729_v48, 320 }
 0x2bf   :  { %v10541_v6 = vpop.xlane.xlu1 %2148  ;;  %v10543_v45 = vpop.xlane.xlu0 %2146  ;;  %2775 = vbcast.lane.b32.xlu1 %v2729_v48, 344 }
 0x2c0   :  { %2771 = vbcast.lane.b32.xlu0 %v2729_v48, 336 }
 0x2c3   :  { %v10545_v52 = vpop.xlane.xlu1 %2296  ;;  %v10547_v51 = vpop.xlane.xlu0 %2294  ;;  %2783 = vbcast.lane.b32.xlu1 %v2729_v48, 360 }
 0x2c4   :  { %15039 = vst [vmem:[#allocation152_spill] sm:$0xff] %v10545_v52  ;;  %15040 = vst [vmem:[#allocation153_spill] sm:$0xff] %v10547_v51  ;;  %2779 = vbcast.lane.b32.xlu0 %v2729_v48, 352 }
 0x2c7   :  { %v10552_v53 = vpop.xlane.xlu1 %2292  ;;  %v10554_v41 = vpop.xlane.xlu0 %2290  ;;  %2791 = vbcast.lane.b32.xlu1 %v2729_v48, 376 }
 0x2c8   :  { %15042 = vst [vmem:[#allocation155_spill] sm:$0xff] %v10552_v53  ;;  %15043 = vst [vmem:[#allocation156_spill] sm:$0xff] %v10554_v41  ;;  %2787 = vbcast.lane.b32.xlu0 %v2729_v48, 368 }
 0x2cb   :  { %v10558_v27 = vpop.xlane.xlu1 %2160  ;;  %v10560_v49 = vpop.xlane.xlu0 %2158  ;;  %2802 = vbcast.lane.b32.xlu1 %v2796_v32, 264 }
 0x2cc   :  { %2798 = vbcast.lane.b32.xlu0 %v2796_v32, 256 }
 0x2cf   :  { %v10562_v52 = vpop.xlane.xlu1 %2156  ;;  %v10564_v21 = vpop.xlane.xlu0 %2154  ;;  %2810 = vbcast.lane.b32.xlu1 %v2796_v32, 280 }
 0x2d0   :  { %2806 = vbcast.lane.b32.xlu0 %v2796_v32, 272 }
 0x2d3   :  { %v10566_v51 = vpop.xlane.xlu1 %2304  ;;  %v10568_v53 = vpop.xlane.xlu0 %2302  ;;  %2818 = vbcast.lane.b32.xlu1 %v2796_v32, 296 }
 0x2d4   :  { %15044 = vst [vmem:[#allocation157_spill] sm:$0xff] %v10566_v51  ;;  %15045 = vst [vmem:[#allocation158_spill] sm:$0xff] %v10568_v53  ;;  %2814 = vbcast.lane.b32.xlu0 %v2796_v32, 288 }
 0x2d7   :  { %v10570_v0 = vpop.xlane.xlu1 %2300  ;;  %v10572_v48 = vpop.xlane.xlu0 %2298  ;;  %2826 = vbcast.lane.b32.xlu1 %v2796_v32, 312 }
 0x2d8   :  { %15046 = vst [vmem:[#allocation159_spill] sm:$0xff] %v10570_v0  ;;  %15047 = vst [vmem:[#allocation160_spill] sm:$0xff] %v10572_v48  ;;  %2822 = vbcast.lane.b32.xlu0 %v2796_v32, 304 }
 0x2db   :  { %v10574_v17 = vpop.xlane.xlu1 %2168  ;;  %v10576_v41 = vpop.xlane.xlu0 %2166  ;;  %2834 = vbcast.lane.b32.xlu1 %v2796_v32, 328 }
 0x2dc   :  { %2830 = vbcast.lane.b32.xlu0 %v2796_v32, 320 }
 0x2df   :  { %v10578_v28 = vpop.xlane.xlu1 %2164  ;;  %v10580_v61 = vpop.xlane.xlu0 %2162  ;;  %2842 = vbcast.lane.b32.xlu1 %v2796_v32, 344 }
 0x2e0   :  { %2838 = vbcast.lane.b32.xlu0 %v2796_v32, 336 }
 0x2e3   :  { %v10582_v51 = vpop.xlane.xlu1 %2312  ;;  %v10584_v53 = vpop.xlane.xlu0 %2310  ;;  %2850 = vbcast.lane.b32.xlu1 %v2796_v32, 360 }
 0x2e4   :  { %15048 = vst [vmem:[#allocation161_spill] sm:$0xff] %v10582_v51  ;;  %15049 = vst [vmem:[#allocation162_spill] sm:$0xff] %v10584_v53  ;;  %2846 = vbcast.lane.b32.xlu0 %v2796_v32, 352  ;;  %v15055_v53 = vld [vmem:[#allocation28_spill] sm:$0xff] }
 0x2e7   :  { %v10586_v0 = vpop.xlane.xlu1 %2308  ;;  %v10588_v48 = vpop.xlane.xlu0 %2306  ;;  %2858 = vbcast.lane.b32.xlu1 %v2796_v32, 376 }
 0x2e8   :  { %15050 = vst [vmem:[#allocation163_spill] sm:$0xff] %v10586_v0  ;;  %2854 = vbcast.lane.b32.xlu0 %v2796_v32, 368  ;;  %v10606_v0 = vadd.f32 %v15055_v53, %v10272_v1  ;;  %v15057_v32 = vld [vmem:[#allocation30_spill] sm:$0xff] }
 0x2e9   :  { %v10610_v5 = vadd.f32 %v15057_v32, %v10281_v57  ;;  %v15065_v32 = vld [vmem:[#allocation31_spill] sm:$0xff] }
 0x2ea   :  { %15056 = vst [vmem:[#allocation28_spill] sm:$0xff] %v10606_v0 }
 0x2eb   :  { %v10598_v2 = vpop.xlane.xlu1 %2176  ;;  %v10600_v51 = vpop.xlane.xlu0 %2174  ;;  %3248 = vperm.xlu1 %8168, %v10592_v26   ;;  %15058 = vst [vmem:[#allocation30_spill] sm:$0xff] %v10610_v5  ;;  %v10620_v26 = vadd.f32 %v15059_v11, %v10320_v37  ;;  %v15071_v11 = vld [vmem:[#allocation33_spill] sm:$0xff] }
 0x2ec   :  { %3245 = vperm.xlu0 %8167, %v10596_v58   ;;  %v15061_v58 = vld [vmem:[#allocation32_spill] sm:$0xff] }
 0x2ed   :  { %15060 = vst [vmem:[#allocation29_spill] sm:$0xff] %v10620_v26  ;;  %v10624_v1 = vadd.f32 %v15061_v58, %v10318_v10 }
 0x2ef   :  { %3251 = vperm.xlu1 %8168, %v10606_v0   ;;  %v10613_v42 = vpop.xlane.xlu1 %2172  ;;  %v10615_v13 = vpop.xlane.xlu0 %2170  ;;  %15062 = vst [vmem:[#allocation32_spill] sm:$0xff] %v10624_v1  ;;  %v10634_v0 = vadd.f32 %v15065_v32, %v10311_v44  ;;  %v15075_v32 = vld [vmem:[#allocation35_spill] sm:$0xff] }
 0x2f0   :  { %3254 = vperm.xlu0 %8167, %v10610_v5   ;;  %v15067_v5 = vld [vmem:[#allocation34_spill] sm:$0xff] }
 0x2f1   :  { %15066 = vst [vmem:[#allocation31_spill] sm:$0xff] %v10634_v0  ;;  %v10638_v37 = vadd.f32 %v15067_v5, %v10309_v18 }
 0x2f3   :  { %3257 = vperm.xlu1 %8168, %v10620_v26   ;;  %v10627_v57 = vpop.xlane.xlu1 %2320  ;;  %v10629_v53 = vpop.xlane.xlu0 %2318  ;;  %15068 = vst [vmem:[#allocation34_spill] sm:$0xff] %v10638_v37  ;;  %v10648_v26 = vadd.f32 %v15071_v11, %v10356_v20  ;;  %v15079_v11 = vld [vmem:[#allocation37_spill] sm:$0xff] }
 0x2f4   :  { %15063 = vst [vmem:[#allocation164_spill] sm:$0xff] %v10627_v57  ;;  %15064 = vst [vmem:[#allocation165_spill] sm:$0xff] %v10629_v53  ;;  %3260 = vperm.xlu0 %8167, %v10624_v1   ;;  %v15073_v1 = vld [vmem:[#allocation36_spill] sm:$0xff]  ;;  %v15175_v53 = vld [vmem:[#allocation99_spill] sm:$0xff] }
 0x2f5   :  { %15072 = vst [vmem:[#allocation33_spill] sm:$0xff] %v10648_v26  ;;  %v10652_v44 = vadd.f32 %v15073_v1, %v10354_v4 }
 0x2f7   :  { %3263 = vperm.xlu1 %8168, %v10634_v0   ;;  %v10641_v58 = vpop.xlane.xlu1 %2316  ;;  %v10643_v10 = vpop.xlane.xlu0 %2314  ;;  %15074 = vst [vmem:[#allocation36_spill] sm:$0xff] %v10652_v44  ;;  %v10662_v0 = vadd.f32 %v15075_v32, %v10347_v23  ;;  %v15083_v32 = vld [vmem:[#allocation39_spill] sm:$0xff] }
 0x2f8   :  { %15069 = vst [vmem:[#allocation166_spill] sm:$0xff] %v10641_v58  ;;  %15070 = vst [vmem:[#allocation167_spill] sm:$0xff] %v10643_v10  ;;  %3266 = vperm.xlu0 %8167, %v10638_v37   ;;  %v15077_v37 = vld [vmem:[#allocation38_spill] sm:$0xff]  ;;  %v15183_v10 = vld [vmem:[#allocation104_spill] sm:$0xff] }
 0x2f9   :  { %15076 = vst [vmem:[#allocation35_spill] sm:$0xff] %v10662_v0  ;;  %v10666_v20 = vadd.f32 %v15077_v37, %v10345_v12 }
 0x2fb   :  { %3269 = vperm.xlu1 %8168, %v10648_v26   ;;  %v10655_v18 = vpop.permute.xlu1 %2633  ;;  %v10657_v5 = vpop.permute.xlu0 %2637  ;;  %15078 = vst [vmem:[#allocation38_spill] sm:$0xff] %v10666_v20  ;;  %v10676_v26 = vadd.f32 %v15079_v11, %v10392_v14  ;;  %v15087_v11 = vld [vmem:[#allocation41_spill] sm:$0xff] }
 0x2fc   :  { %3272 = vperm.xlu0 %8167, %v10652_v44   ;;  %v15081_v44 = vld [vmem:[#allocation40_spill] sm:$0xff] }
 0x2fd   :  { %15080 = vst [vmem:[#allocation37_spill] sm:$0xff] %v10676_v26  ;;  %v10680_v23 = vadd.f32 %v15081_v44, %v10390_v55 }
 0x2ff   :  { %3275 = vperm.xlu1 %8168, %v10662_v0   ;;  %v10669_v4 = vpop.permute.xlu1 %2641  ;;  %v10671_v1 = vpop.permute.xlu0 %2645  ;;  %15082 = vst [vmem:[#allocation40_spill] sm:$0xff] %v10680_v23  ;;  %v10690_v0 = vadd.f32 %v15083_v32, %v10383_v22  ;;  %v15091_v32 = vld [vmem:[#allocation43_spill] sm:$0xff] }
 0x300   :  { %3278 = vperm.xlu0 %8167, %v10666_v20   ;;  %v15085_v20 = vld [vmem:[#allocation42_spill] sm:$0xff] }
 0x301   :  { %15084 = vst [vmem:[#allocation39_spill] sm:$0xff] %v10690_v0  ;;  %v10694_v14 = vadd.f32 %v15085_v20, %v10381_v63 }
 0x303   :  { %3281 = vperm.xlu1 %8168, %v10676_v26   ;;  %v10683_v12 = vpop.permute.xlu1 %2649  ;;  %v10685_v37 = vpop.permute.xlu0 %2653  ;;  %15086 = vst [vmem:[#allocation42_spill] sm:$0xff] %v10694_v14  ;;  %v10704_v26 = vadd.f32 %v15087_v11, %v10422_v33  ;;  %v15095_v11 = vld [vmem:[#allocation45_spill] sm:$0xff] }
 0x304   :  { %3284 = vperm.xlu0 %8167, %v10680_v23   ;;  %v15089_v23 = vld [vmem:[#allocation44_spill] sm:$0xff] }
 0x305   :  { %15088 = vst [vmem:[#allocation41_spill] sm:$0xff] %v10704_v26  ;;  %v10708_v22 = vadd.f32 %v15089_v23, %v10420_v54 }
 0x307   :  { %3287 = vperm.xlu1 %8168, %v10690_v0   ;;  %v10697_v55 = vpop.permute.xlu1 %2657  ;;  %v10699_v44 = vpop.permute.xlu0 %2664  ;;  %15090 = vst [vmem:[#allocation44_spill] sm:$0xff] %v10708_v22  ;;  %v10718_v0 = vadd.f32 %v15091_v32, %v10416_v34  ;;  %v15099_v32 = vld [vmem:[#allocation47_spill] sm:$0xff] }
 0x308   :  { %3290 = vperm.xlu0 %8167, %v10694_v14   ;;  %v15093_v14 = vld [vmem:[#allocation46_spill] sm:$0xff] }
 0x309   :  { %15092 = vst [vmem:[#allocation43_spill] sm:$0xff] %v10718_v0  ;;  %v10722_v33 = vadd.f32 %v15093_v14, %v10414_v8 }
 0x30b   :  { %3293 = vperm.xlu1 %8168, %v10704_v26   ;;  %v10711_v63 = vpop.permute.xlu1 %2668  ;;  %v10713_v20 = vpop.permute.xlu0 %2672  ;;  %15094 = vst [vmem:[#allocation46_spill] sm:$0xff] %v10722_v33  ;;  %v10732_v26 = vadd.f32 %v15095_v11, %v10444_v46  ;;  %v15103_v11 = vld [vmem:[#allocation49_spill] sm:$0xff] }
 0x30c   :  { %3296 = vperm.xlu0 %8167, %v10708_v22   ;;  %v15097_v22 = vld [vmem:[#allocation48_spill] sm:$0xff] }
 0x30d   :  { %15096 = vst [vmem:[#allocation45_spill] sm:$0xff] %v10732_v26  ;;  %v10736_v34 = vadd.f32 %v15097_v22, %v10442_v29 }
 0x30f   :  { %3299 = vperm.xlu1 %8168, %v10718_v0   ;;  %v10725_v54 = vpop.permute.xlu1 %2676  ;;  %v10727_v23 = vpop.permute.xlu0 %2680  ;;  %15098 = vst [vmem:[#allocation48_spill] sm:$0xff] %v10736_v34  ;;  %v10746_v0 = vadd.f32 %v15099_v32, %v10440_v19  ;;  %v15107_v32 = vld [vmem:[#allocation51_spill] sm:$0xff] }
 0x310   :  { %3302 = vperm.xlu0 %8167, %v10722_v33   ;;  %v15101_v33 = vld [vmem:[#allocation50_spill] sm:$0xff] }
 0x311   :  { %15100 = vst [vmem:[#allocation47_spill] sm:$0xff] %v10746_v0  ;;  %v10750_v46 = vadd.f32 %v15101_v33, %v10438_v40 }
 0x313   :  { %3305 = vperm.xlu1 %8168, %v10732_v26   ;;  %v10739_v8 = vpop.permute.xlu1 %2684  ;;  %v10741_v14 = vpop.permute.xlu0 %2688  ;;  %15102 = vst [vmem:[#allocation50_spill] sm:$0xff] %v10750_v46  ;;  %v10760_v26 = vadd.f32 %v15103_v11, %v10461_v31  ;;  %v15111_v11 = vld [vmem:[#allocation53_spill] sm:$0xff] }
 0x314   :  { %3308 = vperm.xlu0 %8167, %v10736_v34   ;;  %v15105_v34 = vld [vmem:[#allocation52_spill] sm:$0xff] }
 0x315   :  { %15104 = vst [vmem:[#allocation49_spill] sm:$0xff] %v10760_v26  ;;  %v10764_v19 = vadd.f32 %v15105_v34, %v10459_v50 }
 0x317   :  { %3311 = vperm.xlu1 %8168, %v10746_v0   ;;  %v10753_v29 = vpop.permute.xlu1 %2692  ;;  %v10755_v22 = vpop.permute.xlu0 %2696  ;;  %15106 = vst [vmem:[#allocation52_spill] sm:$0xff] %v10764_v19  ;;  %v10774_v0 = vadd.f32 %v15107_v32, %v10456_v60  ;;  %v15115_v32 = vld [vmem:[#allocation55_spill] sm:$0xff] }
 0x318   :  { %3314 = vperm.xlu0 %8167, %v10750_v46   ;;  %v15109_v46 = vld [vmem:[#allocation54_spill] sm:$0xff] }
 0x319   :  { %15108 = vst [vmem:[#allocation51_spill] sm:$0xff] %v10774_v0  ;;  %v10778_v31 = vadd.f32 %v15109_v46, %v10454_v30 }
 0x31b   :  { %3317 = vperm.xlu1 %8168, %v10760_v26   ;;  %v10767_v40 = vpop.permute.xlu1 %2700  ;;  %v10769_v33 = vpop.permute.xlu0 %2704  ;;  %15110 = vst [vmem:[#allocation54_spill] sm:$0xff] %v10778_v31  ;;  %v10788_v26 = vadd.f32 %v15111_v11, %v10490_v3  ;;  %v15119_v11 = vld [vmem:[#allocation57_spill] sm:$0xff] }
 0x31c   :  { %3320 = vperm.xlu0 %8167, %v10764_v19   ;;  %v15113_v19 = vld [vmem:[#allocation56_spill] sm:$0xff] }
 0x31d   :  { %15112 = vst [vmem:[#allocation53_spill] sm:$0xff] %v10788_v26  ;;  %v10792_v60 = vadd.f32 %v15113_v19, %v10488_v59 }
 0x31f   :  { %3323 = vperm.xlu1 %8168, %v10774_v0   ;;  %v10781_v50 = vpop.permute.xlu1 %2708  ;;  %v10783_v34 = vpop.permute.xlu0 %2712  ;;  %15114 = vst [vmem:[#allocation56_spill] sm:$0xff] %v10792_v60  ;;  %v10802_v0 = vadd.f32 %v15115_v32, %v10486_v15  ;;  %v15123_v32 = vld [vmem:[#allocation59_spill] sm:$0xff] }
 0x320   :  { %3326 = vperm.xlu0 %8167, %v10778_v31   ;;  %v15117_v31 = vld [vmem:[#allocation58_spill] sm:$0xff] }
 0x321   :  { %15116 = vst [vmem:[#allocation55_spill] sm:$0xff] %v10802_v0  ;;  %v10806_v3 = vadd.f32 %v15117_v31, %v10484_v16 }
 0x323   :  { %3329 = vperm.xlu1 %8168, %v10788_v26   ;;  %v10795_v30 = vpop.permute.xlu1 %2716  ;;  %v10797_v46 = vpop.permute.xlu0 %2720  ;;  %15118 = vst [vmem:[#allocation58_spill] sm:$0xff] %v10806_v3  ;;  %v10816_v26 = vadd.f32 %v15119_v11, %v10506_v25  ;;  %v15127_v11 = vld [vmem:[#allocation61_spill] sm:$0xff] }
 0x324   :  { %3332 = vperm.xlu0 %8167, %v10792_v60   ;;  %v15121_v60 = vld [vmem:[#allocation60_spill] sm:$0xff] }
 0x325   :  { %15120 = vst [vmem:[#allocation57_spill] sm:$0xff] %v10816_v26  ;;  %v10820_v15 = vadd.f32 %v15121_v60, %v10504_v47 }
 0x327   :  { %3335 = vperm.xlu1 %8168, %v10802_v0   ;;  %v10809_v59 = vpop.permute.xlu1 %2724  ;;  %v10811_v19 = vpop.permute.xlu0 %2731  ;;  %15122 = vst [vmem:[#allocation60_spill] sm:$0xff] %v10820_v15  ;;  %v10830_v0 = vadd.f32 %v15123_v32, %v10502_v7  ;;  %v15131_v32 = vld [vmem:[#allocation63_spill] sm:$0xff] }
 0x328   :  { %3338 = vperm.xlu0 %8167, %v10806_v3   ;;  %v15125_v3 = vld [vmem:[#allocation62_spill] sm:$0xff] }
 0x329   :  { %15124 = vst [vmem:[#allocation59_spill] sm:$0xff] %v10830_v0  ;;  %v10834_v25 = vadd.f32 %v15125_v3, %v10500_v38 }
 0x32b   :  { %3341 = vperm.xlu1 %8168, %v10816_v26   ;;  %v10823_v16 = vpop.permute.xlu1 %2735  ;;  %v10825_v31 = vpop.permute.xlu0 %2739  ;;  %15126 = vst [vmem:[#allocation62_spill] sm:$0xff] %v10834_v25  ;;  %v10844_v26 = vadd.f32 %v15127_v11, %v10527_v39  ;;  %v15135_v11 = vld [vmem:[#allocation65_spill] sm:$0xff] }
 0x32c   :  { %3344 = vperm.xlu0 %8167, %v10820_v15   ;;  %v15129_v15 = vld [vmem:[#allocation64_spill] sm:$0xff] }
 0x32d   :  { %15128 = vst [vmem:[#allocation61_spill] sm:$0xff] %v10844_v26  ;;  %v10848_v7 = vadd.f32 %v15129_v15, %v10525_v24 }
 0x32f   :  { %3347 = vperm.xlu1 %8168, %v10830_v0   ;;  %v10837_v47 = vpop.permute.xlu1 %2743  ;;  %v10839_v60 = vpop.permute.xlu0 %2747  ;;  %15130 = vst [vmem:[#allocation64_spill] sm:$0xff] %v10848_v7  ;;  %v10858_v0 = vadd.f32 %v15131_v32, %v10523_v36  ;;  %v15139_v32 = vld [vmem:[#allocation67_spill] sm:$0xff] }
 0x330   :  { %3350 = vperm.xlu0 %8167, %v10834_v25   ;;  %v15133_v25 = vld [vmem:[#allocation66_spill] sm:$0xff] }
 0x331   :  { %15132 = vst [vmem:[#allocation63_spill] sm:$0xff] %v10858_v0  ;;  %v10862_v39 = vadd.f32 %v15133_v25, %v10521_v56 }
 0x333   :  { %3353 = vperm.xlu1 %8168, %v10844_v26   ;;  %v10851_v38 = vpop.permute.xlu1 %2751  ;;  %v10853_v3 = vpop.permute.xlu0 %2755  ;;  %15134 = vst [vmem:[#allocation66_spill] sm:$0xff] %v10862_v39  ;;  %v10872_v26 = vadd.f32 %v15135_v11, %v10543_v45  ;;  %v15143_v11 = vld [vmem:[#allocation69_spill] sm:$0xff] }
 0x334   :  { %3356 = vperm.xlu0 %8167, %v10848_v7   ;;  %v15137_v7 = vld [vmem:[#allocation68_spill] sm:$0xff] }
 0x335   :  { %15136 = vst [vmem:[#allocation65_spill] sm:$0xff] %v10872_v26  ;;  %v10876_v36 = vadd.f32 %v15137_v7, %v10541_v6 }
 0x337   :  { %3359 = vperm.xlu1 %8168, %v10858_v0   ;;  %v10865_v24 = vpop.permute.xlu1 %2759  ;;  %v10867_v15 = vpop.permute.xlu0 %2763  ;;  %15138 = vst [vmem:[#allocation68_spill] sm:$0xff] %v10876_v36  ;;  %v10886_v0 = vadd.f32 %v15139_v32, %v10539_v62  ;;  %v15147_v32 = vld [vmem:[#allocation71_spill] sm:$0xff] }
 0x338   :  { %3362 = vperm.xlu0 %8167, %v10862_v39   ;;  %v15141_v39 = vld [vmem:[#allocation70_spill] sm:$0xff] }
 0x339   :  { %15140 = vst [vmem:[#allocation67_spill] sm:$0xff] %v10886_v0  ;;  %v10890_v45 = vadd.f32 %v15141_v39, %v10537_v9 }
 0x33b   :  { %3365 = vperm.xlu1 %8168, %v10872_v26   ;;  %v10879_v56 = vpop.permute.xlu1 %2767  ;;  %v10881_v25 = vpop.permute.xlu0 %2771  ;;  %15142 = vst [vmem:[#allocation70_spill] sm:$0xff] %v10890_v45  ;;  %v10900_v26 = vadd.f32 %v15143_v11, %v10564_v21  ;;  %v15151_v11 = vld [vmem:[#allocation73_spill] sm:$0xff] }
 0x33c   :  { %3368 = vperm.xlu0 %8167, %v10876_v36   ;;  %v15145_v36 = vld [vmem:[#allocation72_spill] sm:$0xff] }
 0x33d   :  { %15144 = vst [vmem:[#allocation69_spill] sm:$0xff] %v10900_v26  ;;  %v10904_v62 = vadd.f32 %v15145_v36, %v10562_v52 }
 0x33f   :  { %3371 = vperm.xlu1 %8168, %v10886_v0   ;;  %v10893_v6 = vpop.permute.xlu1 %2775  ;;  %v10895_v7 = vpop.permute.xlu0 %2779  ;;  %15146 = vst [vmem:[#allocation72_spill] sm:$0xff] %v10904_v62  ;;  %v10914_v0 = vadd.f32 %v15147_v32, %v10560_v49  ;;  %v15155_v32 = vld [vmem:[#allocation75_spill] sm:$0xff] }
 0x340   :  { %3374 = vperm.xlu0 %8167, %v10890_v45   ;;  %v15149_v45 = vld [vmem:[#allocation74_spill] sm:$0xff] }
 0x341   :  { %15148 = vst [vmem:[#allocation71_spill] sm:$0xff] %v10914_v0  ;;  %v10918_v21 = vadd.f32 %v15149_v45, %v10558_v27 }
 0x343   :  { %3377 = vperm.xlu1 %8168, %v10900_v26   ;;  %v10907_v9 = vpop.permute.xlu1 %2783  ;;  %v10909_v39 = vpop.permute.xlu0 %2787  ;;  %15150 = vst [vmem:[#allocation74_spill] sm:$0xff] %v10918_v21  ;;  %v10928_v26 = vadd.f32 %v15151_v11, %v10580_v61  ;;  %v15159_v11 = vld [vmem:[#allocation77_spill] sm:$0xff] }
 0x344   :  { %3380 = vperm.xlu0 %8167, %v10904_v62   ;;  %v15153_v62 = vld [vmem:[#allocation76_spill] sm:$0xff] }
 0x345   :  { %15152 = vst [vmem:[#allocation73_spill] sm:$0xff] %v10928_v26  ;;  %v10932_v49 = vadd.f32 %v15153_v62, %v10578_v28 }
 0x347   :  { %3383 = vperm.xlu1 %8168, %v10914_v0   ;;  %v10921_v52 = vpop.permute.xlu1 %2791  ;;  %v10923_v36 = vpop.permute.xlu0 %2798  ;;  %15154 = vst [vmem:[#allocation76_spill] sm:$0xff] %v10932_v49  ;;  %v10942_v0 = vadd.f32 %v15155_v32, %v10576_v41 }
 0x348   :  { %3386 = vperm.xlu0 %8167, %v10918_v21   ;;  %v15157_v21 = vld [vmem:[#allocation78_spill] sm:$0xff] }
 0x349   :  { %15156 = vst [vmem:[#allocation75_spill] sm:$0xff] %v10942_v0  ;;  %v10946_v61 = vadd.f32 %v15157_v21, %v10574_v17  ;;  %v15163_v21 = vld [vmem:[#allocation80_spill] sm:$0xff] }
 0x34b   :  { %3389 = vperm.xlu1 %8168, %v10928_v26   ;;  %v10935_v27 = vpop.permute.xlu1 %2802  ;;  %v10937_v45 = vpop.permute.xlu0 %2806  ;;  %15158 = vst [vmem:[#allocation78_spill] sm:$0xff] %v10946_v61  ;;  %v10956_v26 = vadd.f32 %v15159_v11, %v10615_v13 }
 0x34c   :  { %3392 = vperm.xlu0 %8167, %v10932_v49   ;;  %v15161_v49 = vld [vmem:[#allocation82_spill] sm:$0xff] }
 0x34d   :  { %15160 = vst [vmem:[#allocation77_spill] sm:$0xff] %v10956_v26  ;;  %v10960_v41 = vadd.f32 %v15161_v49, %v10613_v42  ;;  %v15167_v49 = vld [vmem:[#allocation84_spill] sm:$0xff] }
 0x34f   :  { %3395 = vperm.xlu1 %8168, %v10942_v0   ;;  %v10949_v28 = vpop.permute.xlu1 %2810  ;;  %v10951_v62 = vpop.permute.xlu0 %2814  ;;  %15162 = vst [vmem:[#allocation82_spill] sm:$0xff] %v10960_v41  ;;  %v10970_v0 = vadd.f32 %v15163_v21, %v10600_v51 }
 0x350   :  { %3398 = vperm.xlu0 %8167, %v10946_v61   ;;  %v15165_v61 = vld [vmem:[#allocation85_spill] sm:$0xff] }
 0x351   :  { %15164 = vst [vmem:[#allocation80_spill] sm:$0xff] %v10970_v0  ;;  %v10974_v13 = vadd.f32 %v15165_v61, %v10598_v2  ;;  %v15171_v61 = vld [vmem:[#allocation114_spill] sm:$0xff] }
 0x353   :  { %v10962_v32 = vpop.permute.xlu1 %2818  ;;  %3401 = vperm.xlu1 %8168, %v10956_v26   ;;  %v10965_v17 = vpop.permute.xlu0 %2822  ;;  %15166 = vst [vmem:[#allocation85_spill] sm:$0xff] %v10974_v13  ;;  %v10984_v26 = vadd.f32 %v15167_v49, %v10201_v35 }
 0x354   :  { %3404 = vperm.xlu0 %8167, %v10960_v41   ;;  %v15169_v41 = vld [vmem:[#allocation92_spill] sm:$0xff] }
 0x355   :  { %15168 = vst [vmem:[#allocation84_spill] sm:$0xff] %v10984_v26  ;;  %v10988_v51 = vadd.f32 %v15169_v41, %v10199_v43  ;;  %v15178_v43 = vld [vmem:[#allocation79_spill] sm:$0xff]  ;;  %v15179_v41 = vld [vmem:[#allocation97_spill] sm:$0xff] }
 0x357   :  { %v10976_v11 = vpop.permute.xlu1 %2826  ;;  %3407 = vperm.xlu1 %8168, %v10970_v0   ;;  %v10979_v42 = vpop.permute.xlu0 %2830  ;;  %15170 = vst [vmem:[#allocation92_spill] sm:$0xff] %v10988_v51  ;;  %v15172_v0 = vld [vmem:[#allocation90_spill] sm:$0xff] }
 0x358   :  { %3410 = vperm.xlu0 %8167, %v10974_v13   ;;  %v10998_v57 = vadd.f32 %v15172_v0, %v15171_v61  ;;  %v15174_v13 = vld [vmem:[#allocation113_spill] sm:$0xff] }
 0x359   :  { %v11002_v35 = vadd.f32 %v15175_v53, %v15174_v13  ;;  %v15186_v53 = vld [vmem:[#allocation116_spill] sm:$0xff]  ;;  %v15187_v13 = vld [vmem:[#allocation102_spill] sm:$0xff] }
 0x35a   :  { %15173 = vst [vmem:[#allocation114_spill] sm:$0xff] %v10998_v57 }
 0x35b   :  { %v10990_v21 = vpop.permute.xlu1 %2834  ;;  %3413 = vperm.xlu1 %8168, %v10984_v26   ;;  %v10993_v2 = vpop.permute.xlu0 %2838  ;;  %15176 = vst [vmem:[#allocation90_spill] sm:$0xff] %v11002_v35  ;;  %v11010_v26 = vadd.f32 %v15179_v41, %v15178_v43 }
 0x35c   :  { %3416 = vperm.xlu0 %8167, %v10988_v51   ;;  %v15182_v51 = vld [vmem:[#allocation81_spill] sm:$0xff] }
 0x35d   :  { %15180 = vst [vmem:[#allocation99_spill] sm:$0xff] %v11010_v26  ;;  %v11016_v0 = vadd.f32 %v15183_v10, %v15182_v51  ;;  %v15194_v10 = vld [vmem:[#allocation120_spill] sm:$0xff]  ;;  %v15195_v51 = vld [vmem:[#allocation106_spill] sm:$0xff] }
 0x35f   :  { %v11004_v49 = vpop.permute.xlu1 %2842  ;;  %3419 = vperm.xlu1 %8168, %v10998_v57   ;;  %v11012_v58 = vpop.permute.xlu0 %2846  ;;  %15184 = vst [vmem:[#allocation97_spill] sm:$0xff] %v11016_v0  ;;  %v11024_v57 = vadd.f32 %v15187_v13, %v15186_v53 }
 0x360   :  { %15177 = vst [vmem:[#allocation113_spill] sm:$0xff] %v11004_v49  ;;  %3422 = vperm.xlu0 %8167, %v11002_v35   ;;  %15181 = vst [vmem:[#allocation79_spill] sm:$0xff] %v11012_v58  ;;  %v15189_v35 = vld [vmem:[#allocation115_spill] sm:$0xff]  ;;  %v15190_v49 = vld [vmem:[#allocation105_spill] sm:$0xff] }
 0x361   :  { %15188 = vst [vmem:[#allocation104_spill] sm:$0xff] %v11024_v57  ;;  %v11028_v43 = vadd.f32 %v15190_v49, %v15189_v35  ;;  %v15202_v49 = vld [vmem:[#allocation118_spill] sm:$0xff] }
 0x363   :  { %v11018_v61 = vpop.permute.xlu1 %2850  ;;  %3425 = vperm.xlu1 %8168, %v11010_v26   ;;  %15191 = vst [vmem:[#allocation116_spill] sm:$0xff] %v11028_v43  ;;  %v11030_v41 = vpop.permute.xlu0 %2854  ;;  %v11038_v26 = vadd.f32 %v15195_v51, %v15194_v10 }
 0x364   :  { %15185 = vst [vmem:[#allocation81_spill] sm:$0xff] %v11018_v61  ;;  %3428 = vperm.xlu0 %8167, %v11016_v0   ;;  %15192 = vst [vmem:[#allocation102_spill] sm:$0xff] %v11030_v41  ;;  %v15197_v0 = vld [vmem:[#allocation119_spill] sm:$0xff]  ;;  %v15206_v41 = vld [vmem:[#allocation109_spill] sm:$0xff] }
 0x365   :  { %15196 = vst [vmem:[#allocation105_spill] sm:$0xff] %v11038_v26  ;;  %v15198_v61 = vld [vmem:[#allocation107_spill] sm:$0xff] }
 0x366   :  { %v11042_v53 = vadd.f32 %v15198_v61, %v15197_v0  ;;  %v15209_v61 = vld [vmem:[#allocation123_spill] sm:$0xff] }
 0x367   :  { %v11032_v58 = vpop.permute.xlu1 %2858  ;;  %3431 = vperm.xlu1 %8168, %v11024_v57   ;;  %v15203_v57 = vld [vmem:[#allocation108_spill] sm:$0xff] }
 0x368   :  { %15193 = vst [vmem:[#allocation115_spill] sm:$0xff] %v11032_v58  ;;  %3434 = vperm.xlu0 %8167, %v11028_v43   ;;  %15199 = vst [vmem:[#allocation120_spill] sm:$0xff] %v11042_v53  ;;  %v11052_v58 = vadd.f32 %v15203_v57, %v15202_v49  ;;  %v15205_v43 = vld [vmem:[#allocation117_spill] sm:$0xff] }
 0x369   :  { %v11056_v10 = vadd.f32 %v15206_v41, %v15205_v43  ;;  %v15216_v41 = vld [vmem:[#allocation121_spill] sm:$0xff] }
 0x36a   :  { %15204 = vst [vmem:[#allocation107_spill] sm:$0xff] %v11052_v58 }
 0x36b   :  { %v11044_v13 = vpop.permute.xlu1 %3248  ;;  %3437 = vperm.xlu1 %8168, %v11038_v26   ;;  %v11047_v35 = vpop.permute.xlu0 %3245  ;;  %15207 = vst [vmem:[#allocation118_spill] sm:$0xff] %v11056_v10  ;;  %v15210_v26 = vld [vmem:[#allocation110_spill] sm:$0xff] }
 0x36c   :  { %15200 = vst [vmem:[#allocation106_spill] sm:$0xff] %v11044_v13  ;;  %15201 = vst [vmem:[#allocation119_spill] sm:$0xff] %v11047_v35  ;;  %3440 = vperm.xlu0 %8167, %v11042_v53   ;;  %v11066_v35 = vadd.f32 %v15210_v26, %v15209_v61  ;;  %v15212_v53 = vld [vmem:[#allocation83_spill] sm:$0xff] }
 0x36d   :  { %v15213_v13 = vld [vmem:[#allocation111_spill] sm:$0xff] }
 0x36e   :  { %15211 = vst [vmem:[#allocation117_spill] sm:$0xff] %v11066_v35  ;;  %v11070_v57 = vadd.f32 %v15213_v13, %v15212_v53  ;;  %v15220_v53 = vld [vmem:[#allocation122_spill] sm:$0xff]  ;;  %v15221_v13 = vld [vmem:[#allocation87_spill] sm:$0xff] }
 0x36f   :  { %v11058_v51 = vpop.permute.xlu1 %3251  ;;  %3443 = vperm.xlu1 %8168, %v11052_v58   ;;  %v11061_v0 = vpop.permute.xlu0 %3254  ;;  %v15217_v58 = vld [vmem:[#allocation112_spill] sm:$0xff]  ;;  %v11090_v61 = vadd.f32 %v10655_v18, %v15221_v13  ;;  %v15228_v13 = vld [vmem:[#allocation94_spill] sm:$0xff] }
 0x370   :  { %15208 = vst [vmem:[#allocation108_spill] sm:$0xff] %v11061_v0  ;;  %3446 = vperm.xlu0 %8167, %v11056_v10   ;;  %15214 = vst [vmem:[#allocation109_spill] sm:$0xff] %v11070_v57  ;;  %v11080_v0 = vadd.f32 %v15217_v58, %v15216_v41  ;;  %v15224_v58 = vld [vmem:[#allocation89_spill] sm:$0xff] }
 0x371   :  { %15222 = vst [vmem:[#allocation111_spill] sm:$0xff] %v11090_v61  ;;  %v11100_v41 = vadd.f32 %v10657_v5, %v15224_v58 }
 0x372   :  { %15218 = vst [vmem:[#allocation110_spill] sm:$0xff] %v11080_v0 }
 0x373   :  { %v11072_v49 = vpop.permute.xlu1 %3257  ;;  %3449 = vperm.xlu1 %8168, %v11066_v35   ;;  %v11075_v43 = vpop.permute.xlu0 %3260  ;;  %15225 = vst [vmem:[#allocation121_spill] sm:$0xff] %v11100_v41 }
 0x374   :  { %15215 = vst [vmem:[#allocation123_spill] sm:$0xff] %v11075_v43  ;;  %3452 = vperm.xlu0 %8167, %v11070_v57   ;;  %v15223_v43 = vld [vmem:[#allocation91_spill] sm:$0xff] }
 0x377   :  { %v11082_v10 = vpop.permute.xlu1 %3263  ;;  %3455 = vperm.xlu1 %8168, %v11080_v0   ;;  %v11085_v26 = vpop.permute.xlu0 %3266  ;;  %v15226_v0 = vld [vmem:[#allocation86_spill] sm:$0xff] }
 0x378   :  { %15219 = vst [vmem:[#allocation83_spill] sm:$0xff] %v11085_v26  ;;  %3458 = vperm.xlu0 %8167, %v15220_v53   ;;  %v11104_v26 = vadd.f32 %v10669_v4, %v15226_v0  ;;  %v15232_v0 = vld [vmem:[#allocation93_spill] sm:$0xff] }
 0x37a   :  { %15227 = vst [vmem:[#allocation112_spill] sm:$0xff] %v11104_v26 }
 0x37b   :  { %v11092_v35 = vpop.permute.xlu1 %3269  ;;  %3461 = vperm.xlu1 %8168, %v15223_v43   ;;  %v11095_v57 = vpop.permute.xlu0 %3272  ;;  %v11114_v43 = vadd.f32 %v10671_v1, %v15228_v13 }
 0x37c   :  { %3464 = vperm.xlu0 %8167, %v11090_v61   ;;  %v15230_v61 = vld [vmem:[#allocation96_spill] sm:$0xff] }
 0x37d   :  { %15229 = vst [vmem:[#allocation87_spill] sm:$0xff] %v11114_v43  ;;  %v11118_v5 = vadd.f32 %v10683_v12, %v15230_v61  ;;  %v15237_v61 = vld [vmem:[#allocation103_spill] sm:$0xff] }
 0x37f   :  { %v11106_v53 = vpop.permute.xlu1 %3275  ;;  %3467 = vperm.xlu1 %8168, %v11100_v41   ;;  %v11109_v18 = vpop.permute.xlu0 %3278  ;;  %15231 = vst [vmem:[#allocation89_spill] sm:$0xff] %v11118_v5  ;;  %v11128_v41 = vadd.f32 %v10685_v37, %v15232_v0 }
 0x380   :  { %3470 = vperm.xlu0 %8167, %v11104_v26   ;;  %v15234_v26 = vld [vmem:[#allocation88_spill] sm:$0xff] }
 0x381   :  { %15233 = vst [vmem:[#allocation86_spill] sm:$0xff] %v11128_v41  ;;  %v11132_v1 = vadd.f32 %v10697_v55, %v15234_v26  ;;  %v15241_v26 = vld [vmem:[#allocation95_spill] sm:$0xff] }
 0x383   :  { %v11120_v58 = vpop.permute.xlu1 %3281  ;;  %3473 = vperm.xlu1 %8168, %v11114_v43   ;;  %v11123_v4 = vpop.permute.xlu0 %3284  ;;  %15235 = vst [vmem:[#allocation94_spill] sm:$0xff] %v11132_v1  ;;  %v11142_v43 = vadd.f32 %v10699_v44, %v15237_v61 }
 0x384   :  { %3476 = vperm.xlu0 %8167, %v11118_v5   ;;  %v15239_v5 = vld [vmem:[#allocation100_spill] sm:$0xff] }
 0x385   :  { %15238 = vst [vmem:[#allocation93_spill] sm:$0xff] %v11142_v43  ;;  %v11146_v37 = vadd.f32 %v10711_v63, %v15239_v5  ;;  %v15245_v5 = vld [vmem:[#allocation126_spill] sm:$0xff] }
 0x387   :  { %v11134_v13 = vpop.permute.xlu1 %3287  ;;  %3479 = vperm.xlu1 %8168, %v11128_v41   ;;  %v11137_v12 = vpop.permute.xlu0 %3290  ;;  %15240 = vst [vmem:[#allocation88_spill] sm:$0xff] %v11146_v37  ;;  %v11156_v41 = vadd.f32 %v10713_v20, %v15241_v26 }
 0x388   :  { %15236 = vst [vmem:[#allocation96_spill] sm:$0xff] %v11137_v12  ;;  %3482 = vperm.xlu0 %8167, %v11132_v1   ;;  %v15243_v1 = vld [vmem:[#allocation98_spill] sm:$0xff] }
 0x389   :  { %15242 = vst [vmem:[#allocation103_spill] sm:$0xff] %v11156_v41  ;;  %v11160_v44 = vadd.f32 %v10725_v54, %v15243_v1  ;;  %v15249_v1 = vld [vmem:[#allocation124_spill] sm:$0xff] }
 0x38b   :  { %v11148_v0 = vpop.permute.xlu1 %3293  ;;  %3485 = vperm.xlu1 %8168, %v11142_v43   ;;  %v11151_v55 = vpop.permute.xlu0 %3296  ;;  %15244 = vst [vmem:[#allocation100_spill] sm:$0xff] %v11160_v44  ;;  %v11170_v43 = vadd.f32 %v10727_v23, %v15245_v5 }
 0x38c   :  { %3488 = vperm.xlu0 %8167, %v11146_v37   ;;  %v15247_v37 = vld [vmem:[#allocation125_spill] sm:$0xff] }
 0x38d   :  { %15246 = vst [vmem:[#allocation95_spill] sm:$0xff] %v11170_v43  ;;  %v11174_v20 = vadd.f32 %v10739_v8, %v15247_v37  ;;  %v15253_v37 = vld [vmem:[#allocation130_spill] sm:$0xff] }
 0x38f   :  { %v11162_v61 = vpop.permute.xlu1 %3299  ;;  %3491 = vperm.xlu1 %8168, %v11156_v41   ;;  %v11165_v63 = vpop.permute.xlu0 %3302  ;;  %15248 = vst [vmem:[#allocation98_spill] sm:$0xff] %v11174_v20  ;;  %v11184_v41 = vadd.f32 %v10741_v14, %v15249_v1 }
 0x390   :  { %3494 = vperm.xlu0 %8167, %v11160_v44   ;;  %v15251_v44 = vld [vmem:[#allocation101_spill] sm:$0xff] }
 0x391   :  { %15250 = vst [vmem:[#allocation126_spill] sm:$0xff] %v11184_v41  ;;  %v11188_v23 = vadd.f32 %v10753_v29, %v15251_v44  ;;  %v15257_v44 = vld [vmem:[#allocation128_spill] sm:$0xff] }
 0x393   :  { %v11176_v26 = vpop.permute.xlu1 %3305  ;;  %3497 = vperm.xlu1 %8168, %v11170_v43   ;;  %v11179_v54 = vpop.permute.xlu0 %3308  ;;  %15252 = vst [vmem:[#allocation125_spill] sm:$0xff] %v11188_v23  ;;  %v11198_v43 = vadd.f32 %v10755_v22, %v15253_v37 }
 0x394   :  { %3500 = vperm.xlu0 %8167, %v11174_v20   ;;  %v15255_v20 = vld [vmem:[#allocation129_spill] sm:$0xff] }
 0x395   :  { %15254 = vst [vmem:[#allocation124_spill] sm:$0xff] %v11198_v43  ;;  %v11202_v14 = vadd.f32 %v10767_v40, %v15255_v20  ;;  %v15261_v20 = vld [vmem:[#allocation134_spill] sm:$0xff] }
 0x397   :  { %v11190_v5 = vpop.permute.xlu1 %3311  ;;  %3503 = vperm.xlu1 %8168, %v11184_v41   ;;  %v11193_v8 = vpop.permute.xlu0 %3314  ;;  %15256 = vst [vmem:[#allocation101_spill] sm:$0xff] %v11202_v14  ;;  %v11212_v41 = vadd.f32 %v10769_v33, %v15257_v44 }
 0x398   :  { %3506 = vperm.xlu0 %8167, %v11188_v23   ;;  %v15259_v23 = vld [vmem:[#allocation127_spill] sm:$0xff] }
 0x399   :  { %15258 = vst [vmem:[#allocation130_spill] sm:$0xff] %v11212_v41  ;;  %v11216_v22 = vadd.f32 %v10781_v50, %v15259_v23  ;;  %v15266_v23 = vld [vmem:[#allocation132_spill] sm:$0xff] }
 0x39b   :  { %v11204_v1 = vpop.permute.xlu1 %3317  ;;  %3509 = vperm.xlu1 %8168, %v11198_v43   ;;  %v11207_v29 = vpop.permute.xlu0 %3320  ;;  %15260 = vst [vmem:[#allocation129_spill] sm:$0xff] %v11216_v22  ;;  %v11226_v43 = vadd.f32 %v10783_v34, %v15261_v20 }
 0x39c   :  { %3512 = vperm.xlu0 %8167, %v11202_v14   ;;  %v15263_v14 = vld [vmem:[#allocation133_spill] sm:$0xff] }
 0x39d   :  { %15262 = vst [vmem:[#allocation128_spill] sm:$0xff] %v11226_v43  ;;  %v11230_v33 = vadd.f32 %v10795_v30, %v15263_v14  ;;  %v15272_v14 = vld [vmem:[#allocation138_spill] sm:$0xff] }
 0x39f   :  { %v11218_v37 = vpop.permute.xlu1 %3323  ;;  %3515 = vperm.xlu1 %8168, %v11212_v41   ;;  %v11221_v40 = vpop.permute.xlu0 %3326  ;;  %15264 = vst [vmem:[#allocation127_spill] sm:$0xff] %v11230_v33  ;;  %v11240_v41 = vadd.f32 %v10797_v46, %v15266_v23 }
 0x3a0   :  { %3518 = vperm.xlu0 %8167, %v11216_v22   ;;  %v15268_v22 = vld [vmem:[#allocation131_spill] sm:$0xff] }
 0x3a1   :  { %15267 = vst [vmem:[#allocation133_spill] sm:$0xff] %v11240_v41  ;;  %v11244_v34 = vadd.f32 %v10809_v59, %v15268_v22  ;;  %v15276_v22 = vld [vmem:[#allocation135_spill] sm:$0xff] }
 0x3a3   :  { %v11232_v44 = vpop.permute.xlu1 %3329  ;;  %3521 = vperm.xlu1 %8168, %v11226_v43   ;;  %v11235_v50 = vpop.permute.xlu0 %3332  ;;  %15269 = vst [vmem:[#allocation132_spill] sm:$0xff] %v11244_v34  ;;  %v11254_v43 = vadd.f32 %v10811_v19, %v15272_v14 }
 0x3a4   :  { %15265 = vst [vmem:[#allocation134_spill] sm:$0xff] %v11235_v50  ;;  %3524 = vperm.xlu0 %8167, %v11230_v33   ;;  %v15274_v33 = vld [vmem:[#allocation137_spill] sm:$0xff] }
 0x3a5   :  { %15273 = vst [vmem:[#allocation138_spill] sm:$0xff] %v11254_v43  ;;  %v11258_v46 = vadd.f32 %v10823_v16, %v15274_v33  ;;  %v15280_v33 = vld [vmem:[#allocation142_spill] sm:$0xff] }
 0x3a7   :  { %v11246_v20 = vpop.permute.xlu1 %3335  ;;  %3527 = vperm.xlu1 %8168, %v11240_v41   ;;  %v11249_v30 = vpop.permute.xlu0 %3338  ;;  %15275 = vst [vmem:[#allocation137_spill] sm:$0xff] %v11258_v46  ;;  %v11268_v41 = vadd.f32 %v10825_v31, %v15276_v22 }
 0x3a8   :  { %15270 = vst [vmem:[#allocation131_spill] sm:$0xff] %v11246_v20  ;;  %15271 = vst [vmem:[#allocation168_spill] sm:$0xff] %v11249_v30  ;;  %3530 = vperm.xlu0 %8167, %v11244_v34   ;;  %v15278_v34 = vld [vmem:[#allocation25_spill] sm:$0xff] }
 0x3a9   :  { %15277 = vst [vmem:[#allocation135_spill] sm:$0xff] %v11268_v41  ;;  %v11272_v19 = vadd.f32 %v10837_v47, %v15278_v34  ;;  %v15284_v34 = vld [vmem:[#allocation140_spill] sm:$0xff] }
 0x3ab   :  { %v11260_v23 = vpop.permute.xlu1 %3341  ;;  %3533 = vperm.xlu1 %8168, %v11254_v43   ;;  %v11263_v59 = vpop.permute.xlu0 %3344  ;;  %15279 = vst [vmem:[#allocation25_spill] sm:$0xff] %v11272_v19  ;;  %v11282_v43 = vadd.f32 %v10839_v60, %v15280_v33 }
 0x3ac   :  { %3536 = vperm.xlu0 %8167, %v11258_v46   ;;  %v15282_v46 = vld [vmem:[#allocation141_spill] sm:$0xff] }
 0x3ad   :  { %15281 = vst [vmem:[#allocation142_spill] sm:$0xff] %v11282_v43  ;;  %v11286_v31 = vadd.f32 %v10851_v38, %v15282_v46  ;;  %v15288_v46 = vld [vmem:[#allocation147_spill] sm:$0xff] }
 0x3af   :  { %v11274_v14 = vpop.permute.xlu1 %3347  ;;  %3539 = vperm.xlu1 %8168, %v11268_v41   ;;  %v11277_v16 = vpop.permute.xlu0 %3350  ;;  %15283 = vst [vmem:[#allocation141_spill] sm:$0xff] %v11286_v31  ;;  %v11296_v41 = vadd.f32 %v10853_v3, %v15284_v34 }
 0x3b0   :  { %3542 = vperm.xlu0 %8167, %v11272_v19   ;;  %v15286_v19 = vld [vmem:[#allocation139_spill] sm:$0xff] }
 0x3b1   :  { %15285 = vst [vmem:[#allocation140_spill] sm:$0xff] %v11296_v41  ;;  %v11300_v60 = vadd.f32 %v10865_v24, %v15286_v19  ;;  %v15292_v19 = vld [vmem:[#allocation144_spill] sm:$0xff] }
 0x3b3   :  { %v11288_v22 = vpop.permute.xlu1 %3353  ;;  %3545 = vperm.xlu1 %8168, %v11282_v43   ;;  %v11291_v47 = vpop.permute.xlu0 %3356  ;;  %15287 = vst [vmem:[#allocation139_spill] sm:$0xff] %v11300_v60  ;;  %v11310_v43 = vadd.f32 %v10867_v15, %v15288_v46 }
 0x3b4   :  { %3548 = vperm.xlu0 %8167, %v11286_v31   ;;  %v15290_v31 = vld [vmem:[#allocation146_spill] sm:$0xff] }
 0x3b5   :  { %15289 = vst [vmem:[#allocation147_spill] sm:$0xff] %v11310_v43  ;;  %v11314_v3 = vadd.f32 %v10879_v56, %v15290_v31  ;;  %v15297_v31 = vld [vmem:[#allocation151_spill] sm:$0xff] }
 0x3b7   :  { %v11302_v33 = vpop.permute.xlu1 %3359  ;;  %3551 = vperm.xlu1 %8168, %v11296_v41   ;;  %v11305_v38 = vpop.permute.xlu0 %3362  ;;  %15291 = vst [vmem:[#allocation146_spill] sm:$0xff] %v11314_v3  ;;  %v11324_v41 = vadd.f32 %v10881_v25, %v15292_v19 }
 0x3b8   :  { %3554 = vperm.xlu0 %8167, %v11300_v60   ;;  %v15294_v60 = vld [vmem:[#allocation143_spill] sm:$0xff] }
 0x3b9   :  { %15293 = vst [vmem:[#allocation144_spill] sm:$0xff] %v11324_v41  ;;  %v11328_v15 = vadd.f32 %v10893_v6, %v15294_v60  ;;  %v15303_v60 = vld [vmem:[#allocation149_spill] sm:$0xff] }
 0x3bb   :  { %v11316_v34 = vpop.permute.xlu1 %3365  ;;  %3557 = vperm.xlu1 %8168, %v11310_v43   ;;  %v11319_v24 = vpop.permute.xlu0 %3368  ;;  %15295 = vst [vmem:[#allocation143_spill] sm:$0xff] %v11328_v15  ;;  %v11338_v43 = vadd.f32 %v10895_v7, %v15297_v31 }
 0x3bc   :  { %3560 = vperm.xlu0 %8167, %v11314_v3   ;;  %v15299_v3 = vld [vmem:[#allocation150_spill] sm:$0xff] }
 0x3bd   :  { %15298 = vst [vmem:[#allocation151_spill] sm:$0xff] %v11338_v43  ;;  %v11342_v25 = vadd.f32 %v10907_v9, %v15299_v3  ;;  %v15309_v3 = vld [vmem:[#allocation156_spill] sm:$0xff] }
 0x3bf   :  { %v11330_v46 = vpop.permute.xlu1 %3371  ;;  %3563 = vperm.xlu1 %8168, %v11324_v41   ;;  %v11333_v56 = vpop.permute.xlu0 %3374  ;;  %15300 = vst [vmem:[#allocation150_spill] sm:$0xff] %v11342_v25  ;;  %v11352_v41 = vadd.f32 %v10909_v39, %v15303_v60 }
 0x3c0   :  { %15296 = vst [vmem:[#allocation169_spill] sm:$0xff] %v11333_v56  ;;  %3566 = vperm.xlu0 %8167, %v11328_v15   ;;  %v15305_v15 = vld [vmem:[#allocation148_spill] sm:$0xff] }
 0x3c1   :  { %15304 = vst [vmem:[#allocation149_spill] sm:$0xff] %v11352_v41  ;;  %v11356_v7 = vadd.f32 %v10921_v52, %v15305_v15  ;;  %v15313_v15 = vld [vmem:[#allocation153_spill] sm:$0xff] }
 0x3c3   :  { %v11344_v19 = vpop.permute.xlu1 %3377  ;;  %3569 = vperm.xlu1 %8168, %v11338_v43   ;;  %v11347_v6 = vpop.permute.xlu0 %3380  ;;  %15306 = vst [vmem:[#allocation148_spill] sm:$0xff] %v11356_v7  ;;  %v11366_v43 = vadd.f32 %v10923_v36, %v15309_v3 }
 0x3c4   :  { %15301 = vst [vmem:[#allocation170_spill] sm:$0xff] %v11344_v19  ;;  %15302 = vst [vmem:[#allocation171_spill] sm:$0xff] %v11347_v6  ;;  %3572 = vperm.xlu0 %8167, %v11342_v25   ;;  %v15311_v25 = vld [vmem:[#allocation155_spill] sm:$0xff] }
 0x3c5   :  { %15310 = vst [vmem:[#allocation156_spill] sm:$0xff] %v11366_v43  ;;  %v11370_v39 = vadd.f32 %v10935_v27, %v15311_v25  ;;  %v15317_v25 = vld [vmem:[#allocation160_spill] sm:$0xff] }
 0x3c7   :  { %v11358_v31 = vpop.permute.xlu1 %3383  ;;  %3575 = vperm.xlu1 %8168, %v11352_v41   ;;  %v11361_v9 = vpop.permute.xlu0 %3386  ;;  %15312 = vst [vmem:[#allocation155_spill] sm:$0xff] %v11370_v39  ;;  %v11380_v41 = vadd.f32 %v10937_v45, %v15313_v15 }
 0x3c8   :  { %15307 = vst [vmem:[#allocation172_spill] sm:$0xff] %v11358_v31  ;;  %15308 = vst [vmem:[#allocation173_spill] sm:$0xff] %v11361_v9  ;;  %3578 = vperm.xlu0 %8167, %v11356_v7   ;;  %v15315_v7 = vld [vmem:[#allocation152_spill] sm:$0xff]  ;;  %v15343_v31 = vld [vmem:[#allocation81_spill] sm:$0xff] }
 0x3c9   :  { %15314 = vst [vmem:[#allocation153_spill] sm:$0xff] %v11380_v41  ;;  %v11384_v36 = vadd.f32 %v10949_v28, %v15315_v7  ;;  %v15321_v7 = vld [vmem:[#allocation158_spill] sm:$0xff] }
 0x3cb   :  { %v11372_v60 = vpop.permute.xlu1 %3389  ;;  %3581 = vperm.xlu1 %8168, %v11366_v43   ;;  %v11375_v52 = vpop.permute.xlu0 %3392  ;;  %15316 = vst [vmem:[#allocation152_spill] sm:$0xff] %v11384_v36  ;;  %v11394_v43 = vadd.f32 %v10951_v62, %v15317_v25 }
 0x3cc   :  { %3584 = vperm.xlu0 %8167, %v11370_v39   ;;  %v15319_v39 = vld [vmem:[#allocation159_spill] sm:$0xff] }
 0x3cd   :  { %15318 = vst [vmem:[#allocation160_spill] sm:$0xff] %v11394_v43  ;;  %v11398_v45 = vadd.f32 %v10962_v32, %v15319_v39  ;;  %v11422_v39 = vadd.f32 %v10979_v42, %v10588_v48 }
 0x3cf   :  { %v11386_v3 = vpop.permute.xlu1 %3395  ;;  %3587 = vperm.xlu1 %8168, %v11380_v41   ;;  %v11389_v27 = vpop.permute.xlu0 %3398  ;;  %15320 = vst [vmem:[#allocation159_spill] sm:$0xff] %v11398_v45  ;;  %v11408_v41 = vadd.f32 %v10965_v17, %v15321_v7  ;;  %15327 = vst [vmem:[#allocation176_spill] sm:$0xff] %v11422_v39 }
 0x3d0   :  { %3590 = vperm.xlu0 %8167, %v11384_v36   ;;  %v15323_v36 = vld [vmem:[#allocation157_spill] sm:$0xff] }
 0x3d1   :  { %15322 = vst [vmem:[#allocation158_spill] sm:$0xff] %v11408_v41  ;;  %v11412_v62 = vadd.f32 %v10976_v11, %v15323_v36  ;;  %v15332_v36 = vld [vmem:[#allocation162_spill] sm:$0xff] }
 0x3d3   :  { %v11400_v15 = vpop.permute.xlu1 %3401  ;;  %3593 = vperm.xlu1 %8168, %v11394_v43   ;;  %v11403_v28 = vpop.permute.xlu0 %3404  ;;  %15324 = vst [vmem:[#allocation157_spill] sm:$0xff] %v11412_v62  ;;  %v15328_v43 = vld [vmem:[#allocation163_spill] sm:$0xff] }
 0x3d4   :  { %3596 = vperm.xlu0 %8167, %v11398_v45   ;;  %v11426_v17 = vadd.f32 %v10990_v21, %v15328_v43  ;;  %v15335_v45 = vld [vmem:[#allocation113_spill] sm:$0xff]  ;;  %v15339_v43 = vld [vmem:[#allocation167_spill] sm:$0xff] }
 0x3d6   :  { %15329 = vst [vmem:[#allocation163_spill] sm:$0xff] %v11426_v17 }
 0x3d7   :  { %v11414_v25 = vpop.permute.xlu1 %3407  ;;  %3599 = vperm.xlu1 %8168, %v11408_v41   ;;  %v11417_v32 = vpop.permute.xlu0 %3410  ;;  %v11436_v41 = vadd.f32 %v10993_v2, %v15332_v36 }
 0x3d8   :  { %15325 = vst [vmem:[#allocation174_spill] sm:$0xff] %v11414_v25  ;;  %15326 = vst [vmem:[#allocation175_spill] sm:$0xff] %v11417_v32  ;;  %3602 = vperm.xlu0 %8167, %v11412_v62   ;;  %v15334_v62 = vld [vmem:[#allocation161_spill] sm:$0xff] }
 0x3d9   :  { %15333 = vst [vmem:[#allocation162_spill] sm:$0xff] %v11436_v41  ;;  %v11440_v48 = vadd.f32 %v15335_v45, %v15334_v62  ;;  %v15347_v62 = vld [vmem:[#allocation165_spill] sm:$0xff] }
 0x3db   :  { %v11428_v7 = vpop.permute.xlu1 %3413  ;;  %3605 = vperm.xlu1 %8168, %v11422_v39   ;;  %v11431_v11 = vpop.permute.xlu0 %3416  ;;  %15336 = vst [vmem:[#allocation161_spill] sm:$0xff] %v11440_v48  ;;  %v15340_v39 = vld [vmem:[#allocation79_spill] sm:$0xff] }
 0x3dc   :  { %15330 = vst [vmem:[#allocation177_spill] sm:$0xff] %v11428_v7  ;;  %15331 = vst [vmem:[#allocation178_spill] sm:$0xff] %v11431_v11  ;;  %3608 = vperm.xlu0 %8167, %v11426_v17   ;;  %v11450_v9 = vadd.f32 %v15340_v39, %v15339_v43  ;;  %v15342_v17 = vld [vmem:[#allocation166_spill] sm:$0xff] }
 0x3dd   :  { %v11454_v2 = vadd.f32 %v15343_v31, %v15342_v17 }
 0x3de   :  { %15341 = vst [vmem:[#allocation167_spill] sm:$0xff] %v11450_v9 }
 0x3df   :  { %v11442_v42 = vpop.permute.xlu1 %3419  ;;  %3611 = vperm.xlu1 %8168, %v11436_v41   ;;  %v11445_v21 = vpop.permute.xlu0 %3422  ;;  %15344 = vst [vmem:[#allocation79_spill] sm:$0xff] %v11454_v2  ;;  %v15348_v41 = vld [vmem:[#allocation102_spill] sm:$0xff] }
 0x3e0   :  { %15337 = vst [vmem:[#allocation113_spill] sm:$0xff] %v11442_v42  ;;  %15338 = vst [vmem:[#allocation179_spill] sm:$0xff] %v11445_v21  ;;  %3614 = vperm.xlu0 %8167, %v11440_v48   ;;  %v11464_v21 = vadd.f32 %v15348_v41, %v15347_v62  ;;  %v15350_v48 = vld [vmem:[#allocation164_spill] sm:$0xff]  ;;  %v15351_v42 = vld [vmem:[#allocation115_spill] sm:$0xff] }
 0x3e1   :  { %v11468_v39 = vadd.f32 %v15351_v42, %v15350_v48 }
 0x3e2   :  { %15349 = vst [vmem:[#allocation165_spill] sm:$0xff] %v11464_v21 }
 0x3e3   :  { %v11456_v36 = vpop.permute.xlu1 %3425  ;;  %3617 = vperm.xlu1 %8168, %v11450_v9   ;;  %v11459_v45 = vpop.permute.xlu0 %3428  ;;  %15352 = vst [vmem:[#allocation102_spill] sm:$0xff] %v11468_v39 }
 0x3e4   :  { %15345 = vst [vmem:[#allocation166_spill] sm:$0xff] %v11456_v36  ;;  %15346 = vst [vmem:[#allocation81_spill] sm:$0xff] %v11459_v45  ;;  %3620 = vperm.xlu0 %8167, %v11454_v2  }
 0x3e7   :  { %v11470_v43 = vpop.permute.xlu1 %3431  ;;  %3623 = vperm.xlu1 %8168, %v11464_v21   ;;  %v11473_v31 = vpop.permute.xlu0 %3434 }
 0x3e8   :  { %15353 = vst [vmem:[#allocation164_spill] sm:$0xff] %v11470_v43  ;;  %15354 = vst [vmem:[#allocation115_spill] sm:$0xff] %v11473_v31  ;;  %3626 = vperm.xlu0 %8167, %v11468_v39  }
 0x3eb   :  { %v11476_v17 = vpop.permute.xlu1 %3437  ;;  %v11478_v9 = vpop.permute.xlu0 %3440 }
 0x3ec   :  { %15355 = vst [vmem:[#allocation180_spill] sm:$0xff] %v11476_v17  ;;  %15356 = vst [vmem:[#allocation181_spill] sm:$0xff] %v11478_v9 }
 0x3ef   :  { %v11480_v2 = vpop.permute.xlu1 %3443  ;;  %v11482_v41 = vpop.permute.xlu0 %3446 }
 0x3f0   :  { %15357 = vst [vmem:[#allocation182_spill] sm:$0xff] %v11480_v2  ;;  %15358 = vst [vmem:[#allocation183_spill] sm:$0xff] %v11482_v41 }
 0x3f3   :  { %v11484_v62 = vpop.permute.xlu1 %3449  ;;  %v11486_v48 = vpop.permute.xlu0 %3452 }
 0x3f4   :  { %15359 = vst [vmem:[#allocation184_spill] sm:$0xff] %v11484_v62  ;;  %15360 = vst [vmem:[#allocation185_spill] sm:$0xff] %v11486_v48 }
 0x3f7   :  { %v11488_v42 = vpop.permute.xlu1 %3455  ;;  %v11490_v43 = vpop.permute.xlu0 %3458 }
 0x3f8   :  { %15361 = vst [vmem:[#allocation186_spill] sm:$0xff] %v11488_v42  ;;  %15362 = vst [vmem:[#allocation187_spill] sm:$0xff] %v11490_v43 }
 0x3fb   :  { %v11492_v21 = vpop.permute.xlu1 %3461  ;;  %v11494_v31 = vpop.permute.xlu0 %3464 }
 0x3fc   :  { %15363 = vst [vmem:[#allocation188_spill] sm:$0xff] %v11492_v21  ;;  %15364 = vst [vmem:[#allocation189_spill] sm:$0xff] %v11494_v31 }
 0x3ff   :  { %v11496_v39 = vpop.permute.xlu1 %3467  ;;  %v11498_v45 = vpop.permute.xlu0 %3470 }
 0x400   :  { %15365 = vst [vmem:[#allocation190_spill] sm:$0xff] %v11496_v39  ;;  %15366 = vst [vmem:[#allocation191_spill] sm:$0xff] %v11498_v45  ;;  %v15377_v45 = vlaneseq }
 0x403   :  { %v11500_v36 = vpop.permute.xlu1 %3473  ;;  %v11502_v11 = vpop.permute.xlu0 %3476 }
 0x404   :  { %15367 = vst [vmem:[#allocation192_spill] sm:$0xff] %v11500_v36  ;;  %15368 = vst [vmem:[#allocation193_spill] sm:$0xff] %v11502_v11  ;;  %v11521_v36 = vand.u32 127, %v15377_v45 }
 0x406   :  { %v3648_v45 = vadd.s32 4294967272, %v11521_v36  ;;  %v3690_v32 = vadd.s32 4294967224, %v11521_v36 }
 0x407   :  { %v11504_v41 = vpop.permute.xlu1 %3479  ;;  %v11506_v62 = vpop.permute.xlu0 %3482 }
 0x408   :  { %15369 = vst [vmem:[#allocation194_spill] sm:$0xff] %v11504_v41  ;;  %15370 = vst [vmem:[#allocation195_spill] sm:$0xff] %v11506_v62  ;;  %v3634_v62 = vadd.s32 4294967288, %v11521_v36 }
 0x40b   :  { %v11508_v48 = vpop.permute.xlu1 %3485  ;;  %v11510_v42 = vpop.permute.xlu0 %3488 }
 0x40c   :  { %15371 = vst [vmem:[#allocation196_spill] sm:$0xff] %v11508_v48  ;;  %15372 = vst [vmem:[#allocation197_spill] sm:$0xff] %v11510_v42  ;;  %v3641_v48 = vadd.s32 4294967280, %v11521_v36 }
 0x40f   :  { %v11512_v43 = vpop.permute.xlu1 %3491  ;;  %v11514_v21 = vpop.permute.xlu0 %3494 }
 0x410   :  { %15373 = vst [vmem:[#allocation198_spill] sm:$0xff] %v11512_v43  ;;  %15374 = vst [vmem:[#allocation199_spill] sm:$0xff] %v11514_v21  ;;  %v15382_v21 = vld [vmem:[#allocation19_spill] sm:$0xff] }
 0x411   :  { %v11534_v2 = vsub.s32 %v3634_v62, %v15382_v21  ;;  %v15388_v62 = vld [vmem:[#allocation106_spill] sm:$0xff]  ;;  %v11554_v17 = vsub.s32 %v3648_v45, %v15382_v21  ;;  %v3683_v45 = vadd.s32 4294967232, %v11521_v36 }
 0x413   :  { %v11516_v31 = vpop.permute.xlu1 %3497  ;;  %v11518_v39 = vpop.permute.xlu0 %3500  ;;  %15383 = vst [vmem:[#allocation19_spill] sm:$0xff] %v11534_v2  ;;  %15390 = vst [vmem:[#allocation106_spill] sm:$0xff] %v11554_v17 }
 0x414   :  { %15375 = vst [vmem:[#allocation200_spill] sm:$0xff] %v11516_v31  ;;  %15376 = vst [vmem:[#allocation201_spill] sm:$0xff] %v11518_v39  ;;  %v11538_v39 = vsub.s32 %v11521_v36, %v15382_v21 }
 0x416   :  { %15384 = vst [vmem:[#allocation206_spill] sm:$0xff] %v11538_v39 }
 0x417   :  { %v11523_v11 = vpop.permute.xlu1 %3503  ;;  %v11525_v41 = vpop.permute.xlu0 %3506 }
 0x418   :  { %15378 = vst [vmem:[#allocation202_spill] sm:$0xff] %v11523_v11  ;;  %15379 = vst [vmem:[#allocation203_spill] sm:$0xff] %v11525_v41  ;;  %v11542_v11 = vsub.s32 %v3641_v48, %v15382_v21  ;;  %v3655_v41 = vadd.s32 4294967264, %v11521_v36  ;;  %v3662_v48 = vadd.s32 4294967256, %v11521_v36 }
 0x41a   :  { %15385 = vst [vmem:[#allocation207_spill] sm:$0xff] %v11542_v11  ;;  %v3645_v7 = vrot.slane %v11058_v51, %v11542_v11  ;;  %v3742_v51 = vrot.slane %v11148_v0, %v11538_v39  ;;  %v11578_v56 = vsub.s32 %v3662_v48, %v15382_v21  ;;  %v3751_v12 = vrot.slane %v11162_v61, %v11542_v11 }
 0x41b   :  { %v11529_v42 = vpop.permute.xlu1 %3509  ;;  %v11531_v43 = vpop.permute.xlu0 %3512  ;;  %v3697_v61 = vadd.s32 4294967216, %v11521_v36 }
 0x41c   :  { %15380 = vst [vmem:[#allocation204_spill] sm:$0xff] %v11529_v42  ;;  %15381 = vst [vmem:[#allocation205_spill] sm:$0xff] %v11531_v43  ;;  %v3638_v43 = vrot.slane %v15388_v62, %v11534_v2  ;;  %v15389_v42 = vld [vmem:[#allocation119_spill] sm:$0xff] }
 0x41d   :  { %v3633_v9 = vrot.slane %v15389_v42, %v11538_v39  ;;  %v3676_v42 = vadd.s32 4294967240, %v11521_v36 }
 0x41f   :  { %v11545_v31 = vpop.permute.xlu1 %3515  ;;  %v11547_v6 = vpop.permute.xlu0 %3518  ;;  %v3640_v19 = vsel %vm3639_vm1, %v3638_v43, %v3633_v9  ;;  %v11596_v43 = vsub.s32 %v3683_v45, %v15382_v21 }
 0x420   :  { %15386 = vst [vmem:[#allocation208_spill] sm:$0xff] %v11545_v31  ;;  %15387 = vst [vmem:[#allocation209_spill] sm:$0xff] %v11547_v6  ;;  %v11560_v31 = vsub.s32 %v3655_v41, %v15382_v21  ;;  %v3669_v6 = vadd.s32 4294967248, %v11521_v36  ;;  %v3746_v41 = vrot.slane %v11151_v55, %v11534_v2  ;;  %v3647_v20 = vsel %vm3646_vm2, %v3645_v7, %v3640_v19 }
 0x421   :  { %v11600_v19 = vsub.s32 %v3690_v32, %v15382_v21  ;;  %v3756_v7 = vrot.slane %v11165_v63, %v11554_v17  ;;  %v3825_v63 = vrot.slane %v11263_v59, %v11534_v2  ;;  %v3725_v59 = vadd.s32 4294967184, %v11521_v36 }
 0x422   :  { %15391 = vst [vmem:[#allocation119_spill] sm:$0xff] %v11560_v31  ;;  %v3659_v25 = vrot.slane %v11072_v49, %v11560_v31  ;;  %v11586_v0 = vsub.s32 %v3669_v6, %v15382_v21  ;;  %v3704_v49 = vadd.s32 4294967208, %v11521_v36  ;;  %v3747_v6 = vsel %vm3639_vm1, %v3746_v41, %v3742_v51 }
 0x423   :  { %v11563_v30 = vpop.permute.xlu1 %3521  ;;  %v11565_v62 = vpop.permute.xlu0 %3524  ;;  %v3752_v45 = vsel %vm3646_vm2, %v3751_v12, %v3747_v6  ;;  %v3821_v51 = vrot.slane %v11260_v23, %v11538_v39  ;;  %v11624_v12 = vsub.s32 %v3697_v61, %v15382_v21  ;;  %v3766_v6 = vrot.slane %v11179_v54, %v11578_v56 }
 0x424   :  { %15392 = vst [vmem:[#allocation210_spill] sm:$0xff] %v11563_v30  ;;  %15393 = vst [vmem:[#allocation211_spill] sm:$0xff] %v11565_v62  ;;  %v15394_v30 = vld [vmem:[#allocation108_spill] sm:$0xff]  ;;  %v3673_v50 = vrot.slane %v11082_v10, %v11586_v0  ;;  %v3830_v10 = vrot.slane %v11274_v14, %v11542_v11  ;;  %v11631_v23 = vsub.s32 %v3704_v49, %v15382_v21 }
 0x425   :  { %v3652_v62 = vrot.slane %v15394_v30, %v11554_v17  ;;  %v11593_v30 = vsub.s32 %v3676_v42, %v15382_v21  ;;  %v15397_v42 = vld [vmem:[#allocation123_spill] sm:$0xff]  ;;  %v3757_v41 = vsel %vm3653_vm3, %v3756_v7, %v3752_v45  ;;  %v3771_v14 = vrot.slane %v11190_v5, %v11586_v0 }
 0x426   :  { %v3826_v7 = vsel %vm3639_vm1, %v3825_v63, %v3821_v51  ;;  %v3835_v54 = vrot.slane %v11277_v16, %v11554_v17  ;;  %v3732_v16 = vadd.s32 4294967176, %v11521_v36 }
 0x427   :  { %v11588_v55 = vpop.permute.xlu1 %3527  ;;  %v11590_v9 = vpop.permute.xlu0 %3530  ;;  %v3654_v48 = vsel %vm3653_vm3, %v3652_v62, %v3647_v20  ;;  %v3776_v63 = vrot.slane %v11193_v8, %v11593_v30  ;;  %v3845_v8 = vrot.slane %v11291_v47, %v11578_v56 }
 0x428   :  { %15395 = vst [vmem:[#allocation108_spill] sm:$0xff] %v11588_v55  ;;  %15396 = vst [vmem:[#allocation212_spill] sm:$0xff] %v11590_v9  ;;  %v3666_v9 = vrot.slane %v15397_v42, %v11578_v56  ;;  %v3761_v55 = vrot.slane %v11176_v26, %v11560_v31  ;;  %v3661_v32 = vsel %vm3660_vm4, %v3659_v25, %v3654_v48  ;;  %v3711_v26 = vadd.s32 4294967200, %v11521_v36  ;;  %v15400_v48 = vld [vmem:[#allocation83_spill] sm:$0xff] }
 0x429   :  { %v3718_v25 = vadd.s32 4294967192, %v11521_v36  ;;  %v3680_v42 = vrot.slane %v15400_v48, %v11593_v30  ;;  %v3701_v36 = vrot.slane %v11106_v53, %v11624_v12  ;;  %v3904_v53 = vrot.slane %v11375_v52, %v11534_v2 }
 0x42a   :  { %v3668_v61 = vsel %vm14628_vm5, %v3666_v9, %v3661_v32  ;;  %v11663_v32 = vsub.s32 %v3725_v59, %v15382_v21  ;;  %v3786_v48 = vrot.slane %v11207_v29, %v11600_v19  ;;  %v3791_v52 = vrot.slane %v11218_v37, %v11624_v12 }
 0x42b   :  { %v11619_v20 = vpop.permute.xlu1 %3533  ;;  %v11621_v62 = vpop.permute.xlu0 %3536  ;;  %v3675_v49 = vsel %vm14629_vm6, %v3673_v50, %v3668_v61  ;;  %v11657_v5 = vsub.s32 %v3718_v25, %v15382_v21  ;;  %v3831_v50 = vsel %vm3646_vm2, %v3830_v10, %v3826_v7  ;;  %v3694_v25 = vrot.slane %v11095_v57, %v11600_v19 }
 0x42c   :  { %15398 = vst [vmem:[#allocation123_spill] sm:$0xff] %v11619_v20  ;;  %15399 = vst [vmem:[#allocation213_spill] sm:$0xff] %v11621_v62  ;;  %v3762_v62 = vsel %vm3660_vm4, %v3761_v55, %v3757_v41  ;;  %v3687_v20 = vrot.slane %v11092_v35, %v11596_v43  ;;  %v11654_v55 = vsub.s32 %v3711_v26, %v15382_v21 }
 0x42d   :  { %15401 = vst [vmem:[#allocation83_spill] sm:$0xff] %v11657_v5  ;;  %v3840_v35 = vrot.slane %v11288_v22, %v11560_v31  ;;  %15402 = vst [vmem:[#allocation214_spill] sm:$0xff] %v11663_v32  ;;  %v3767_v51 = vsel %vm14628_vm5, %v3766_v6, %v3762_v62  ;;  %v3682_v26 = vsel %vm3681_vm7, %v3680_v42, %v3675_v49 }
 0x42e   :  { %v3772_v10 = vsel %vm14629_vm6, %v3771_v14, %v3767_v51  ;;  %v3781_v22 = vrot.slane %v11204_v1, %v11596_v43  ;;  %v3689_v59 = vsel %vm14632_vm8, %v3687_v20, %v3682_v26  ;;  %v3836_v62 = vsel %vm3653_vm3, %v3835_v54, %v3831_v50 }
 0x42f   :  { %v11649_v9 = vpop.permute.xlu1 %3539  ;;  %v11651_v45 = vpop.permute.xlu0 %3542  ;;  %v3841_v57 = vsel %vm3660_vm4, %v3840_v35, %v3836_v62  ;;  %v3850_v1 = vrot.slane %v11302_v33, %v11586_v0  ;;  %v3900_v20 = vrot.slane %v11372_v60, %v11538_v39  ;;  %v11693_v61 = vsub.s32 %v3732_v16, %v15382_v21 }
 0x430   :  { %v3777_v47 = vsel %vm3681_vm7, %v3776_v63, %v3772_v10  ;;  %v3909_v42 = vrot.slane %v11386_v3, %v11542_v11  ;;  %v3696_v14 = vsel %vm14631_vm9, %v3694_v25, %v3689_v59  ;;  %v3708_v33 = vrot.slane %v11109_v18, %v11631_v23 }
 0x431   :  { %15403 = vst [vmem:[#allocation215_spill] sm:$0xff] %v11693_v61  ;;  %v3782_v60 = vsel %vm14632_vm8, %v3781_v22, %v3777_v47  ;;  %v3703_v21 = vsel %vm14630_vm10, %v3701_v36, %v3696_v14  ;;  %v3715_v49 = vrot.slane %v11120_v58, %v11654_v55  ;;  %v3846_v29 = vsel %vm14628_vm5, %v3845_v8, %v3841_v57  ;;  %v15404_v8 = vld [vmem:[#allocation134_spill] sm:$0xff]  ;;  %v15406_v47 = vld [vmem:[#allocation131_spill] sm:$0xff] }
 0x432   :  { %v3855_v3 = vrot.slane %v11305_v38, %v11593_v30  ;;  %v3851_v18 = vsel %vm14629_vm6, %v3850_v1, %v3846_v29  ;;  %v3860_v50 = vrot.slane %v11316_v34, %v11596_v43  ;;  %v3905_v37 = vsel %vm3639_vm1, %v3904_v53, %v3900_v20  ;;  %v15405_v1 = vld [vmem:[#allocation174_spill] sm:$0xff] }
 0x433   :  { %v11681_v41 = vpop.permute.xlu1 %3545  ;;  %v11683_v6 = vpop.permute.xlu0 %3548  ;;  %v3914_v35 = vrot.slane %v11389_v27, %v11554_v17  ;;  %v3787_v58 = vsel %vm14631_vm9, %v3786_v48, %v3782_v60  ;;  %v3796_v16 = vrot.slane %v11221_v40, %v11631_v23  ;;  %v3910_v38 = vsel %vm3646_vm2, %v3909_v42, %v3905_v37  ;;  %v15407_v42 = vld [vmem:[#allocation96_spill] sm:$0xff]  ;;  %v15408_v60 = vld [vmem:[#allocation169_spill] sm:$0xff]  ;;  %v15410_v37 = vld [vmem:[#allocation175_spill] sm:$0xff] }
 0x434   :  { %v3919_v51 = vrot.slane %v11400_v15, %v11560_v31  ;;  %v3710_v63 = vsel %vm3709_vm11, %v3708_v33, %v3703_v21  ;;  %v3722_v34 = vrot.slane %v11123_v4, %v11657_v5  ;;  %v3792_v26 = vsel %vm14630_vm10, %v3791_v52, %v3787_v58 }
 0x435   :  { %v3801_v27 = vrot.slane %v11232_v44, %v11654_v55  ;;  %v3717_v25 = vsel %vm3716_vm12, %v3715_v49, %v3710_v63  ;;  %v3729_v40 = vrot.slane %v11134_v13, %v11663_v32  ;;  %v3856_v10 = vsel %vm3681_vm7, %v3855_v3, %v3851_v18  ;;  %v15409_v3 = vld [vmem:[#allocation170_spill] sm:$0xff]  ;;  %v15412_v63 = vld [vmem:[#allocation177_spill] sm:$0xff] }
 0x436   :  { %v3865_v15 = vrot.slane %v11319_v24, %v11600_v19  ;;  %v3861_v4 = vsel %vm14632_vm8, %v3860_v50, %v3856_v10  ;;  %v3870_v36 = vrot.slane %v11330_v46, %v11624_v12  ;;  %v3915_v44 = vsel %vm3653_vm3, %v3914_v35, %v3910_v38 }
 0x437   :  { %v11712_v7 = vpop.permute.xlu1 %3551  ;;  %v11714_v54 = vpop.permute.xlu0 %3554  ;;  %v3924_v62 = vrot.slane %v11403_v28, %v11578_v56  ;;  %v3797_v13 = vsel %vm3709_vm11, %v3796_v16, %v3792_v26  ;;  %v3806_v57 = vrot.slane %v15404_v8, %v11657_v5  ;;  %v3920_v24 = vsel %vm3660_vm4, %v3919_v51, %v3915_v44  ;;  %v15411_v16 = vld [vmem:[#allocation168_spill] sm:$0xff]  ;;  %v15416_v44 = vld [vmem:[#allocation182_spill] sm:$0xff] }
 0x438   :  { %v3929_v20 = vrot.slane %v15405_v1, %v11586_v0  ;;  %v3724_v53 = vsel %vm3723_vm13, %v3722_v34, %v3717_v25  ;;  %v3802_v46 = vsel %vm3716_vm12, %v3801_v27, %v3797_v13  ;;  %v3811_v48 = vrot.slane %v15406_v47, %v11663_v32  ;;  %v15413_v27 = vld [vmem:[#allocation180_spill] sm:$0xff] }
 0x439   :  { %v3731_v28 = vsel %vm3730_vm14, %v3729_v40, %v3724_v53  ;;  %v3736_v14 = vrot.slane %v15407_v42, %v11693_v61  ;;  %v3866_v33 = vsel %vm14631_vm9, %v3865_v15, %v3861_v4  ;;  %v3875_v52 = vrot.slane %v15408_v60, %v11631_v23  ;;  %v15414_v40 = vld [vmem:[#allocation181_spill] sm:$0xff]  ;;  %v15415_v4 = vld [vmem:[#allocation171_spill] sm:$0xff]  ;;  %v15418_v47 = vld [vmem:[#allocation172_spill] sm:$0xff] }
 0x43a   :  { %v3871_v29 = vsel %vm14630_vm10, %v3870_v36, %v3866_v33  ;;  %v3880_v18 = vrot.slane %v15409_v3, %v11654_v55  ;;  %v3925_v50 = vsel %vm14628_vm5, %v3924_v62, %v3920_v24  ;;  %v3934_v35 = vrot.slane %v15410_v37, %v11593_v30  ;;  %v15419_v33 = vld [vmem:[#allocation113_spill] sm:$0xff] }
 0x43b   :  { %v11740_v22 = vpop.permute.xlu1 %3557  ;;  %v11742_v59 = vpop.permute.xlu0 %3560  ;;  %v3807_v58 = vsel %vm3723_vm13, %v3806_v57, %v3802_v46  ;;  %v3816_v38 = vrot.slane %v15411_v16, %v11693_v61  ;;  %v3930_v51 = vsel %vm14629_vm6, %v3929_v20, %v3925_v50  ;;  %v3939_v34 = vrot.slane %v15412_v63, %v11596_v43  ;;  %v15417_v20 = vld [vmem:[#allocation178_spill] sm:$0xff] }
 0x43c   :  { %v3812_v26 = vsel %vm3730_vm14, %v3811_v48, %v3807_v58  ;;  %v3979_v25 = vrot.slane %v15413_v27, %v11538_v39  ;;  %v3983_v10 = vrot.slane %v15414_v40, %v11534_v2  ;;  %v3876_v15 = vsel %vm3709_vm11, %v3875_v52, %v3871_v29  ;;  %v15421_v29 = vld [vmem:[#allocation196_spill] sm:$0xff]  ;;  %v15425_v27 = vld [vmem:[#allocation179_spill] sm:$0xff] }
 0x43d   :  { %v3885_v36 = vrot.slane %v15415_v4, %v11657_v5  ;;  %v3988_v62 = vrot.slane %v15416_v44, %v11542_v11  ;;  %v11797_v57 = vsel %vm3737_vm15, %v3736_v14, %v3731_v28  ;;  %v3881_v24 = vsel %vm3716_vm12, %v3880_v18, %v3876_v15  ;;  %v15420_v14 = vld [vmem:[#allocation183_spill] sm:$0xff]  ;;  %v15422_v18 = vld [vmem:[#allocation197_spill] sm:$0xff]  ;;  %v15423_v58 = vld [vmem:[#allocation184_spill] sm:$0xff] }
 0x43e   :  { %v3935_v1 = vsel %vm3681_vm7, %v3934_v35, %v3930_v51  ;;  %v3944_v53 = vrot.slane %v15417_v20, %v11600_v19  ;;  %v11804_v46 = vsel %vm3737_vm15, %v3816_v38, %v3812_v26  ;;  %v3890_v48 = vrot.slane %v15418_v47, %v11663_v32  ;;  %v15424_v38 = vld [vmem:[#allocation198_spill] sm:$0xff]  ;;  %v15426_v40 = vld [vmem:[#allocation123_spill] sm:$0xff]  ;;  %v15427_v15 = vld [vmem:[#allocation213_spill] sm:$0xff] }
 0x43f   :  { %v11766_v21 = vpop.permute.xlu1 %3563  ;;  %v11768_v49 = vpop.permute.xlu0 %3566  ;;  %v3940_v42 = vsel %vm14632_vm8, %v3939_v34, %v3935_v1  ;;  %v3949_v60 = vrot.slane %v15419_v33, %v11624_v12  ;;  %v3984_v28 = vsel %vm3639_vm1, %v3983_v10, %v3979_v25  ;;  %v3993_v52 = vrot.slane %v15420_v14, %v11554_v17  ;;  %v15428_v44 = vld [vmem:[#allocation173_spill] sm:$0xff]  ;;  %v15430_v33 = vld [vmem:[#allocation199_spill] sm:$0xff]  ;;  %v15431_v14 = vld [vmem:[#allocation186_spill] sm:$0xff] }
 0x440   :  { %v4058_v3 = vrot.slane %v15421_v29, %v11538_v39  ;;  %v4062_v50 = vrot.slane %v15422_v18, %v11534_v2  ;;  %v3886_v37 = vsel %vm3723_vm13, %v3885_v36, %v3881_v24  ;;  %v3989_v35 = vsel %vm3646_vm2, %v3988_v62, %v3984_v28  ;;  %v15432_v18 = vld [vmem:[#allocation200_spill] sm:$0xff] }
 0x441   :  { %v3998_v16 = vrot.slane %v15423_v58, %v11560_v31  ;;  %v4067_v51 = vrot.slane %v15424_v38, %v11542_v11  ;;  %v3945_v26 = vsel %vm14631_vm9, %v3944_v53, %v3940_v42  ;;  %v3954_v25 = vrot.slane %v15425_v27, %v11631_v23  ;;  %v15429_v53 = vld [vmem:[#allocation185_spill] sm:$0xff]  ;;  %v15433_v58 = vld [vmem:[#allocation166_spill] sm:$0xff] }
 0x442   :  { %v4137_v10 = vrot.slane %v15426_v40, %v11538_v39  ;;  %v4141_v4 = vrot.slane %v15427_v15, %v11534_v2  ;;  %v11836_v36 = vsel %vm3730_vm14, %v3890_v48, %v3886_v37  ;;  %v3895_v62 = vrot.slane %v15428_v44, %v11693_v61  ;;  %v15434_v40 = vld [vmem:[#allocation81_spill] sm:$0xff] }
 0x443   :  { %v11792_v13 = vpop.permute.xlu1 %3569  ;;  %v11794_v8 = vpop.permute.xlu0 %3572  ;;  %v3950_v24 = vsel %vm14630_vm10, %v3949_v60, %v3945_v26  ;;  %v4146_v1 = vrot.slane %v11649_v9, %v11542_v11  ;;  %v3994_v20 = vsel %vm3653_vm3, %v3993_v52, %v3989_v35  ;;  %v4003_v47 = vrot.slane %v15429_v53, %v11578_v56  ;;  %v15437_v53 = vld [vmem:[#allocation202_spill] sm:$0xff] }
 0x444   :  { %v4063_v42 = vsel %vm3639_vm1, %v4062_v50, %v4058_v3  ;;  %v4072_v28 = vrot.slane %v15430_v33, %v11554_v17  ;;  %v3999_v48 = vsel %vm3660_vm4, %v3998_v16, %v3994_v20  ;;  %v4008_v29 = vrot.slane %v15431_v14, %v11586_v0 }
 0x445   :  { %v4068_v60 = vsel %vm3646_vm2, %v4067_v51, %v4063_v42  ;;  %v4077_v9 = vrot.slane %v15432_v18, %v11560_v31  ;;  %v3955_v35 = vsel %vm3709_vm11, %v3954_v25, %v3950_v24  ;;  %v3959_v3 = vrot.slane %v15433_v58, %v11654_v55  ;;  %v15438_v18 = vld [vmem:[#allocation188_spill] sm:$0xff] }
 0x446   :  { %v4142_v50 = vsel %vm3639_vm1, %v4141_v4, %v4137_v10  ;;  %v4151_v16 = vrot.slane %v11651_v45, %v11554_v17  ;;  %v4156_v51 = vrot.slane %v11681_v41, %v11560_v31  ;;  %v3964_v25 = vrot.slane %v15434_v40, %v11657_v5  ;;  %v15435_v10 = vld [vmem:[#allocation201_spill] sm:$0xff] }
 0x447   :  { %v11824_v63 = vpop.permute.xlu1 %3575  ;;  %v11826_v34 = vpop.permute.xlu0 %3578  ;;  %v4147_v38 = vsel %vm3646_vm2, %v4146_v1, %v4142_v50  ;;  %v4004_v15 = vsel %vm14628_vm5, %v4003_v47, %v3999_v48  ;;  %v4073_v24 = vsel %vm3653_vm3, %v4072_v28, %v4068_v60  ;;  %v4082_v4 = vrot.slane %v15435_v10, %v11578_v56  ;;  %v15436_v1 = vld [vmem:[#allocation187_spill] sm:$0xff] }
 0x448   :  { %v4009_v45 = vsel %vm14629_vm6, %v4008_v29, %v4004_v15  ;;  %v4013_v20 = vrot.slane %v15436_v1, %v11593_v30  ;;  %v4078_v41 = vsel %vm3660_vm4, %v4077_v9, %v4073_v24  ;;  %v4087_v42 = vrot.slane %v15437_v53, %v11586_v0 }
 0x449   :  { %v4018_v47 = vrot.slane %v15438_v18, %v11596_v43  ;;  %v4152_v28 = vsel %vm3653_vm3, %v4151_v16, %v4147_v38  ;;  %v4161_v48 = vrot.slane %v11683_v6, %v11578_v56  ;;  %v4166_v9 = vrot.slane %v11712_v7, %v11586_v0  ;;  %v15439_v16 = vld [vmem:[#allocation203_spill] sm:$0xff] }
 0x44a   :  { %v4157_v60 = vsel %vm3660_vm4, %v4156_v51, %v4152_v28  ;;  %v3960_v58 = vsel %vm3716_vm12, %v3959_v3, %v3955_v35  ;;  %v4083_v50 = vsel %vm14628_vm5, %v4082_v4, %v4078_v41  ;;  %v4092_v38 = vrot.slane %v15439_v16, %v11593_v30  ;;  %v15440_v51 = vld [vmem:[#allocation189_spill] sm:$0xff] }
 0x44b   :  { %v3582_v37 = vpop.permute.xlu1 %3581  ;;  %v3585_v52 = vpop.permute.xlu0 %3584  ;;  %v4014_v40 = vsel %vm3681_vm7, %v4013_v20, %v4009_v45  ;;  %v4023_v15 = vrot.slane %v15440_v51, %v11600_v19  ;;  %v4088_v7 = vsel %vm14629_vm6, %v4087_v42, %v4083_v50  ;;  %v4162_v3 = vsel %vm14628_vm5, %v4161_v48, %v4157_v60  ;;  %v15444_v48 = vld [vmem:[#allocation190_spill] sm:$0xff]  ;;  %v15445_v60 = vld [vmem:[#allocation208_spill] sm:$0xff] }
 0x44c   :  { %v4216_v26 = vrot.slane %v3582_v37, %v11538_v39  ;;  %v4220_v27 = vrot.slane %v3585_v52, %v11534_v2  ;;  %v4019_v35 = vsel %vm14632_vm8, %v4018_v47, %v4014_v40  ;;  %v4171_v4 = vrot.slane %v11714_v54, %v11593_v30  ;;  %v15443_v47 = vld [vmem:[#allocation164_spill] sm:$0xff] }
 0x44d   :  { %v4167_v45 = vsel %vm14629_vm6, %v4166_v9, %v4162_v3  ;;  %v4176_v20 = vrot.slane %v11740_v22, %v11596_v43  ;;  %v3965_v42 = vsel %vm3723_vm13, %v3964_v25, %v3960_v58  ;;  %v3969_v28 = vrot.slane %v15443_v47, %v11663_v32 }
 0x44e   :  { %v4221_v37 = vsel %vm3639_vm1, %v4220_v27, %v4216_v26  ;;  %v15441_v26 = vld [vmem:[#allocation204_spill] sm:$0xff]  ;;  %v4107_v9 = vrot.slane %v15445_v60, %v11624_v12  ;;  %v4172_v58 = vsel %vm3681_vm7, %v4171_v4, %v4167_v45  ;;  %v4181_v50 = vrot.slane %v11742_v59, %v11600_v19  ;;  %v15449_v4 = vld [vmem:[#allocation210_spill] sm:$0xff]  ;;  %v15451_v60 = vld [vmem:[#allocation193_spill] sm:$0xff] }
 0x44f   :  { %v3588_v33 = vpop.permute.xlu1 %3587  ;;  %v3591_v14 = vpop.permute.xlu0 %3590  ;;  %v4097_v27 = vrot.slane %v15441_v26, %v11596_v43  ;;  %v4196_v47 = vrot.slane %v11792_v13, %v11654_v55 }
 0x450   :  { %v4225_v29 = vrot.slane %v3588_v33, %v11542_v11  ;;  %v4230_v52 = vrot.slane %v3591_v14, %v11554_v17  ;;  %v4093_v33 = vsel %vm3681_vm7, %v4092_v38, %v4088_v7  ;;  %v15442_v14 = vld [vmem:[#allocation205_spill] sm:$0xff]  ;;  %v4177_v38 = vsel %vm14632_vm8, %v4176_v20, %v4172_v58  ;;  %v15446_v7 = vld [vmem:[#allocation191_spill] sm:$0xff] }
 0x451   :  { %v4102_v18 = vrot.slane %v15442_v14, %v11600_v19  ;;  %v4098_v22 = vsel %vm14632_vm8, %v4097_v27, %v4093_v33  ;;  %v4033_v26 = vrot.slane %v15446_v7, %v11631_v23  ;;  %v15447_v27 = vld [vmem:[#allocation209_spill] sm:$0xff]  ;;  %v4182_v33 = vsel %vm14631_vm9, %v4181_v50, %v4177_v38  ;;  %v15453_v50 = vld [vmem:[#allocation211_spill] sm:$0xff] }
 0x452   :  { %v4226_v6 = vsel %vm3646_vm2, %v4225_v29, %v4221_v37  ;;  %v4028_v29 = vrot.slane %v15444_v48, %v11624_v12  ;;  %v4191_v14 = vrot.slane %v11768_v49, %v11631_v23 }
 0x453   :  { %v3594_v24 = vpop.permute.xlu1 %3593  ;;  %v3597_v10 = vpop.permute.xlu0 %3596  ;;  %v4231_v41 = vsel %vm3653_vm3, %v4230_v52, %v4226_v6  ;;  %v4024_v52 = vsel %vm14631_vm9, %v4023_v15, %v4019_v35  ;;  %v4186_v6 = vrot.slane %v11766_v21, %v11624_v12  ;;  %v4103_v15 = vsel %vm14631_vm9, %v4102_v18, %v4098_v22  ;;  %v15448_v35 = vld [vmem:[#allocation192_spill] sm:$0xff] }
 0x454   :  { %v4235_v1 = vrot.slane %v3594_v24, %v11560_v31  ;;  %v4240_v53 = vrot.slane %v3597_v10, %v11578_v56  ;;  %v4112_v24 = vrot.slane %v15447_v27, %v11631_v23  ;;  %v4029_v10 = vsel %vm14630_vm10, %v4028_v29, %v4024_v52  ;;  %v15452_v52 = vld [vmem:[#allocation194_spill] sm:$0xff] }
 0x455   :  { %v4038_v21 = vrot.slane %v15448_v35, %v11654_v55  ;;  %v4108_v3 = vsel %vm14630_vm10, %v4107_v9, %v4103_v15  ;;  %v4034_v22 = vsel %vm3709_vm11, %v4033_v26, %v4029_v10  ;;  %v4043_v9 = vrot.slane %v15451_v60, %v11657_v5 }
 0x456   :  { %v4236_v54 = vsel %vm3660_vm4, %v4235_v1, %v4231_v41  ;;  %v4117_v1 = vrot.slane %v15449_v4, %v11654_v55  ;;  %v15450_v41 = vld [vmem:[#allocation115_spill] sm:$0xff]  ;;  %v4048_v58 = vrot.slane %v15452_v52, %v11663_v32  ;;  %v4201_v26 = vrot.slane %v11794_v8, %v11657_v5 }
 0x457   :  { %v3600_v37 = vpop.permute.xlu1 %3599  ;;  %v3603_v25 = vpop.permute.xlu0 %3602  ;;  %v4241_v40 = vsel %vm14628_vm5, %v4240_v53, %v4236_v54  ;;  %vm4294_vm5 = vcmask 1042434   ;;  %v3974_v53 = vrot.slane %v15450_v41, %v11693_v61  ;;  %v4187_v54 = vsel %vm14630_vm10, %v4186_v6, %v4182_v33 }
 0x458   :  { %v4245_v16 = vrot.slane %v3600_v37, %v11586_v0  ;;  %v4250_v51 = vrot.slane %v3603_v25, %v11593_v30  ;;  %v4113_v37 = vsel %vm3709_vm11, %v4112_v24, %v4108_v3  ;;  %v4039_v25 = vsel %vm3716_vm12, %v4038_v21, %v4034_v22  ;;  %v15455_v3 = vld [vmem:[#allocation195_spill] sm:$0xff] }
 0x459   :  { %v4118_v13 = vsel %vm3716_vm12, %v4117_v1, %v4113_v37  ;;  %v4192_v7 = vsel %vm3709_vm11, %v4191_v14, %v4187_v54  ;;  %v4206_v24 = vrot.slane %v11824_v63, %v11663_v32  ;;  %v3970_v35 = vsel %vm3730_vm14, %v3969_v28, %v3965_v42 }
 0x45a   :  { %v4246_v59 = vsel %vm14629_vm6, %v4245_v16, %v4241_v40  ;;  %vm14777_vm6 = vcmask 1043459   ;;  %v4122_v16 = vrot.slane %v15453_v50, %v11657_v5  ;;  %v15454_v40 = vld [vmem:[#allocation108_spill] sm:$0xff]  ;;  %v4197_v27 = vsel %vm3716_vm12, %v4196_v47, %v4192_v7  ;;  %v15458_v7 = vld [vmem:[#allocation21_spill] sm:$0xff] }
 0x45b   :  { %v3606_v45 = vpop.permute.xlu1 %3605  ;;  %v3609_v20 = vpop.permute.xlu0 %3608  ;;  %v4251_v48 = vsel %vm3681_vm7, %v4250_v51, %v4246_v59  ;;  %v4127_v51 = vrot.slane %v15454_v40, %v11663_v32  ;;  %v4044_v21 = vsel %vm3723_vm13, %v4043_v9, %v4039_v25  ;;  %v4053_v4 = vrot.slane %v15455_v3, %v11693_v61  ;;  %v15457_v40 = vld [vmem:[#allocation20_spill] sm:$0xff] }
 0x45c   :  { %v4255_v18 = vrot.slane %v3606_v45, %v11596_v43  ;;  %v4260_v29 = vrot.slane %v3609_v20, %v11600_v19  ;;  %v3896_v1 = vsel %vm3737_vm15, %v3895_v62, %v11836_v36  ;;  %v4049_v63 = vsel %vm3730_vm14, %v4048_v58, %v4044_v21  ;;  %v15456_v20 = vld [vmem:[#allocation212_spill] sm:$0xff]  ;;  %v15462_v21 = vld [vmem:[#allocation26_spill] sm:$0xff] }
 0x45d   :  { %v4123_v45 = vsel %vm3723_vm13, %v4122_v16, %v4118_v13  ;;  %v4132_v42 = vrot.slane %v15456_v20, %v11693_v61  ;;  %v4202_v14 = vsel %vm3723_vm13, %v4201_v26, %v4197_v27  ;;  %v3975_v36 = vsel %vm3737_vm15, %v3974_v53, %v3970_v35 }
 0x45e   :  { %v4256_v49 = vsel %vm14632_vm8, %v4255_v18, %v4251_v48  ;;  %v4128_v33 = vsel %vm3730_vm14, %v4127_v51, %v4123_v45  ;;  %v4211_v18 = vrot.slane %v11826_v34, %v11693_v61  ;;  %v4207_v62 = vsel %vm3730_vm14, %v4206_v24, %v4202_v14  ;;  %v15460_v24 = vld [vmem:[#allocation27_spill] sm:$0xff] }
 0x45f   :  { %v3612_v38 = vpop.permute.xlu1 %3611  ;;  %v3615_v6 = vpop.permute.xlu0 %3614  ;;  %v4261_v59 = vsel %vm14631_vm9, %v4260_v29, %v4256_v49  ;;  %v4293_v48 = vsel %vm14633_vm0, %v11804_v46, %v11797_v57  ;;  %v4054_v29 = vsel %vm3737_vm15, %v4053_v4, %v4049_v63  ;;  %v4133_v60 = vsel %vm3737_vm15, %v4132_v42, %v4128_v33  ;;  %v15463_v63 = vld [vmem:[#allocation44_spill] sm:$0xff]  ;;  %v15465_v33 = vld [vmem:[#allocation46_spill] sm:$0xff] }
 0x460   :  { %v4265_v15 = vrot.slane %v3612_v38, %v11624_v12  ;;  %v4270_v10 = vrot.slane %v3615_v6, %v11631_v23  ;;  %v4295_v34 = vsel %vm4294_vm5, %v3896_v1, %v4293_v48  ;;  %vm14775_vm9 = vcmask 1045509   ;;  %v15464_v42 = vld [vmem:[#allocation28_spill] sm:$0xff] }
 0x461   :  { %vm14774_vm8 = vcmask 1046534   ;;  %v4297_v37 = vsel %vm14777_vm6, %v3975_v36, %v4295_v34  ;;  %v4212_v57 = vsel %vm3737_vm15, %v4211_v18, %v4207_v62  ;;  %vm14773_vm0 = vcmask 1047559  }
 0x462   :  { %v4266_v8 = vsel %vm14630_vm10, %v4265_v15, %v4261_v59  ;;  %vm14776_vm10 = vcmask 1044484   ;;  %v15459_v15 = vld [vmem:[#allocation36_spill] sm:$0xff]  ;;  %vm15790_vm6 = vcmask 458112  }
 0x463   :  { %v3618_v28 = vpop.permute.xlu1 %3617  ;;  %v3621_v41 = vpop.permute.xlu0 %3620  ;;  %v4271_v54 = vsel %vm3709_vm11, %v4270_v10, %v4266_v8  ;;  %v4299_v52 = vsel %vm14776_vm10, %v4054_v29, %v4297_v37  ;;  %v15461_v10 = vld [vmem:[#allocation42_spill] sm:$0xff]  ;;  %v15468_v29 = vld [vmem:[#allocation29_spill] sm:$0xff]  ;;  %vm15789_vm10 = vcmask 720512  }
 0x464   :  { %v4275_v44 = vrot.slane %v3618_v28, %v11654_v55  ;;  %v4280_v47 = vrot.slane %v3621_v41, %v11657_v5  ;;  %v4301_v13 = vsel %vm14775_vm9, %v4133_v60, %v4299_v52  ;;  %vm15781_vm9 = vcmask 458112  }
 0x465   :  { %v4303_v16 = vsel %vm14774_vm8, %v4212_v57, %v4301_v13  ;;  %v15475_v13 = vld [vmem:[#allocation52_spill] sm:$0xff] }
 0x466   :  { %v4276_v22 = vsel %vm3716_vm12, %v4275_v44, %v4271_v54  ;;  %v15466_v44 = vld [vmem:[#allocation30_spill] sm:$0xff]  ;;  %v15467_v54 = vld [vmem:[#allocation48_spill] sm:$0xff] }
 0x467   :  { %v3624_v53 = vpop.permute.xlu1 %3623  ;;  %v3627_v9 = vpop.permute.xlu0 %3626  ;;  %v4281_v46 = vsel %vm3723_vm13, %v4280_v47, %v4276_v22 }
 0x468   :  { %v4285_v49 = vrot.slane %v3624_v53, %v11663_v32  ;;  %v4290_v25 = vrot.slane %v3627_v9, %v11693_v61  ;;  %v15471_v9 = vld [vmem:[#allocation50_spill] sm:$0xff] }
 0x46a   :  { %v4286_v58 = vsel %vm3730_vm14, %v4285_v49, %v4281_v46 }
 0x46b   :  { %v4291_v50 = vsel %vm3737_vm15, %v4290_v25, %v4286_v58  ;;  %v15472_v25 = vld [vmem:[#allocation32_spill] sm:$0xff] }
 0x46c   :  { %v4305_v38 = vsel %vm14773_vm0, %v4291_v50, %v4303_v16  ;;  %vm15779_vm0 = vcmask 392512  }
 0x46d   :  { %4307 = vmax.xlane.f32.xlu1 %v4305_v38  ;;  %v15476_v38 = vld [vmem:[#allocation31_spill] sm:$0xff]  ;;  %vm15780_vm8 = vmmov %vm15779_vm0 }
 0x4fa   :  { %v12018_v6 = vpop.xlane.xlu1 %4307 }
 0x4fb   :  { %v12022_v51 = vrot.slane %v12018_v6, %v15457_v40  ;;  %v12026_v26 = vrot.slane %v12018_v6, %v15458_v7 }
 0x4fd   :  { %v4359_v27 = vsub.f32 %v15459_v15, %v12022_v51  ;;  %v4350_v59 = vsub.f32 %v15460_v24, %v12022_v51  ;;  %v4365_v35 = vsub.f32 %v15461_v10, %v12022_v51  ;;  %v4351_v3 = vsub.f32 %v15462_v21, %v12022_v51  ;;  %v15479_v10 = vld [vmem:[#allocation54_spill] sm:$0xff] }
 0x4fe   :  { %v4367_v45 = vsub.f32 %v15463_v63, %v12026_v26  ;;  %v4352_v28 = vsub.f32 %v15464_v42, %v12022_v51  ;;  %v4369_v14 = vsub.f32 %v15465_v33, %v12026_v26  ;;  %v4353_v36 = vsub.f32 %v15466_v44, %v12022_v51 }
 0x4ff   :  { %v4496_v4 = vmul.f32 1.442695, %v4359_v27  ;;  %v4478_v8 = vmul.f32 1.442695, %v4350_v59  ;;  %v4508_v1 = vmul.f32 1.442695, %v4365_v35  ;;  %v4371_v47 = vsub.f32 %v15467_v54, %v12026_v26 }
 0x500   :  { %v4480_v20 = vmul.f32 1.442695, %v4351_v3  ;;  %v4512_v41 = vmul.f32 1.442695, %v4367_v45  ;;  %v4482_v18 = vmul.f32 1.442695, %v4352_v28  ;;  %v4354_v22 = vsub.f32 %v15468_v29, %v12022_v51 }
 0x501   :  { %8441 = vpow2.f32 %v4496_v4  ;;  %v4516_v62 = vmul.f32 1.442695, %v4369_v14  ;;  %v4484_v48 = vmul.f32 1.442695, %v4353_v36  ;;  %v4520_v53 = vmul.f32 1.442695, %v4371_v47 }
 0x502   :  { %8443 = vpow2.f32 %v4478_v8  ;;  %v4373_v37 = vsub.f32 %v15471_v9, %v12026_v26  ;;  %v4486_v49 = vmul.f32 1.442695, %v4354_v22  ;;  %v4355_v57 = vsub.f32 %v15472_v25, %v12022_v51  ;;  %v15480_v3 = vld [vmem:[#allocation34_spill] sm:$0xff]  ;;  %v15483_v45 = vld [vmem:[#allocation56_spill] sm:$0xff]  ;;  %v15484_v28 = vld [vmem:[#allocation33_spill] sm:$0xff] }
 0x503   :  { %8445 = vpow2.f32 %v4508_v1  ;;  %v4375_v50 = vsub.f32 %v15475_v13, %v12026_v26  ;;  %v4356_v15 = vsub.f32 %v15476_v38, %v12022_v51  ;;  %v4377_v35 = vsub.f32 %v15479_v10, %v12026_v26  ;;  %v15496_v38 = vld [vmem:[#allocation62_spill] sm:$0xff]  ;;  %v15497_v10 = vld [vmem:[#allocation37_spill] sm:$0xff] }
 0x504   :  { %8447 = vpow2.f32 %v4480_v20  ;;  %v4524_v58 = vmul.f32 1.442695, %v4373_v37  ;;  %v4488_v16 = vmul.f32 1.442695, %v4355_v57  ;;  %v4357_v4 = vsub.f32 %v15480_v3, %v12022_v51  ;;  %v15492_v37 = vld [vmem:[#allocation60_spill] sm:$0xff]  ;;  %v15493_v57 = vld [vmem:[#allocation38_spill] sm:$0xff] }
 0x505   :  { %8449 = vpow2.f32 %v4512_v41  ;;  %v4528_v59 = vmul.f32 1.442695, %v4375_v50  ;;  %v4490_v21 = vmul.f32 1.442695, %v4356_v15  ;;  %v4532_v63 = vmul.f32 1.442695, %v4377_v35 }
 0x506   :  { %8451 = vpow2.f32 %v4482_v18  ;;  %v4379_v20 = vsub.f32 %v15483_v45, %v12026_v26  ;;  %v4492_v42 = vmul.f32 1.442695, %v4357_v4  ;;  %v4358_v41 = vsub.f32 %v15484_v28, %v12022_v51  ;;  %v15487_v18 = vld [vmem:[#allocation22_spill] sm:$0xff] }
 0x507   :  { %8453 = vpow2.f32 %v4516_v62  ;;  %v12095_v44 = vrot.slane %v12018_v6, %v15487_v18  ;;  %v15488_v62 = vld [vmem:[#allocation58_spill] sm:$0xff]  ;;  %v4362_v35 = vsub.f32 %v15497_v10, %v12022_v51 }
 0x508   :  { %8455 = vpow2.f32 %v4484_v48  ;;  %v4536_v36 = vmul.f32 1.442695, %v4379_v20  ;;  %v4381_v54 = vsub.f32 %v15488_v62, %v12026_v26  ;;  %v4494_v47 = vmul.f32 1.442695, %v4358_v41  ;;  %v15489_v48 = vld [vmem:[#allocation35_spill] sm:$0xff] }
 0x509   :  { %8457 = vpow2.f32 %v4520_v53  ;;  %v4360_v29 = vsub.f32 %v15489_v48, %v12022_v51  ;;  %v4385_v15 = vsub.f32 %v15496_v38, %v12095_v44  ;;  %v4502_v20 = vmul.f32 1.442695, %v4362_v35  ;;  %v15509_v38 = vld [vmem:[#allocation41_spill] sm:$0xff]  ;;  %v15512_v35 = vld [vmem:[#allocation70_spill] sm:$0xff] }
 0x50a   :  { %8459 = vpow2.f32 %v4486_v49  ;;  %v4540_v9 = vmul.f32 1.442695, %v4381_v54  ;;  %v4383_v49 = vsub.f32 %v15492_v37, %v12095_v44  ;;  %v15504_v54 = vld [vmem:[#allocation66_spill] sm:$0xff] }
 0x50b   :  { %v12048_v34 = vpop.eup %8441  ;;  %8461 = vpow2.f32 %v4524_v58  ;;  %v4498_v25 = vmul.f32 1.442695, %v4360_v29  ;;  %v4361_v58 = vsub.f32 %v15493_v57, %v12022_v51  ;;  %v4548_v4 = vmul.f32 1.442695, %v4385_v15  ;;  %v15505_v29 = vld [vmem:[#allocation39_spill] sm:$0xff]  ;;  %v15508_v57 = vld [vmem:[#allocation68_spill] sm:$0xff] }
 0x50c   :  { %15469 = vst [vmem:[#allocation134_spill] sm:$0xff] %v12048_v34  ;;  %v12050_v60 = vpop.eup %8443  ;;  %4890 = vperm.xlu1 %8168, %v12048_v34   ;;  %8463 = vpow2.f32 %v4488_v16  ;;  %v4544_v16 = vmul.f32 1.442695, %v4383_v49  ;;  %v4366_v15 = vsub.f32 %v15509_v38, %v12026_v26 }
 0x50d   :  { %15470 = vst [vmem:[#allocation174_spill] sm:$0xff] %v12050_v60  ;;  %4863 = vperm.xlu0 %8167, %v12050_v60   ;;  %v12058_v46 = vpop.eup %8445  ;;  %8465 = vpow2.f32 %v4528_v59  ;;  %v4500_v59 = vmul.f32 1.442695, %v4361_v58  ;;  %v4391_v58 = vsub.f32 %v15508_v57, %v12095_v44 }
 0x50e   :  { %15473 = vst [vmem:[#allocation131_spill] sm:$0xff] %v12058_v46  ;;  %v12060_v52 = vpop.eup %8447  ;;  %8467 = vpow2.f32 %v4490_v21 }
 0x50f   :  { %15474 = vst [vmem:[#allocation96_spill] sm:$0xff] %v12060_v52  ;;  %v12068_v27 = vpop.eup %8449  ;;  %8469 = vpow2.f32 %v4532_v63  ;;  %v15500_v63 = vld [vmem:[#allocation64_spill] sm:$0xff]  ;;  %v4560_v10 = vmul.f32 1.442695, %v4391_v58  ;;  %v15520_v58 = vld [vmem:[#allocation23_spill] sm:$0xff] }
 0x510   :  { %4908 = vperm.xlu1 %8168, %v12058_v46   ;;  %15477 = vst [vmem:[#allocation169_spill] sm:$0xff] %v12068_v27  ;;  %v12070_v24 = vpop.eup %8451  ;;  %8471 = vpow2.f32 %v4492_v42  ;;  %v4387_v45 = vsub.f32 %v15500_v63, %v12095_v44  ;;  %v15501_v42 = vld [vmem:[#allocation40_spill] sm:$0xff]  ;;  %v4510_v63 = vmul.f32 1.442695, %v4366_v15  ;;  %v15521_v15 = vld [vmem:[#allocation74_spill] sm:$0xff] }
 0x511   :  { %4866 = vperm.xlu0 %8167, %v12060_v52   ;;  %15478 = vst [vmem:[#allocation170_spill] sm:$0xff] %v12070_v24  ;;  %v12078_v8 = vpop.eup %8453  ;;  %8473 = vpow2.f32 %v4536_v36  ;;  %v4363_v28 = vsub.f32 %v15501_v42, %v12022_v51 }
 0x512   :  { %15481 = vst [vmem:[#allocation175_spill] sm:$0xff] %v12078_v8  ;;  %v12080_v1 = vpop.eup %8455  ;;  %8475 = vpow2.f32 %v4494_v47  ;;  %v4552_v62 = vmul.f32 1.442695, %v4387_v45  ;;  %v4389_v47 = vsub.f32 %v15504_v54, %v12095_v44  ;;  %v15513_v45 = vld [vmem:[#allocation43_spill] sm:$0xff]  ;;  %v15516_v54 = vld [vmem:[#allocation72_spill] sm:$0xff] }
 0x513   :  { %15482 = vst [vmem:[#allocation168_spill] sm:$0xff] %v12080_v1  ;;  %v12088_v33 = vpop.eup %8457  ;;  %8477 = vpow2.f32 %v4540_v9  ;;  %v4504_v48 = vmul.f32 1.442695, %v4363_v28  ;;  %v4364_v9 = vsub.f32 %v15505_v29, %v12022_v51  ;;  %v15517_v29 = vld [vmem:[#allocation45_spill] sm:$0xff] }
 0x514   :  { %4914 = vperm.xlu1 %8168, %v12068_v27   ;;  %15485 = vst [vmem:[#allocation177_spill] sm:$0xff] %v12088_v33  ;;  %v12090_v14 = vpop.eup %8459  ;;  %8479 = vpow2.f32 %v4498_v25  ;;  %v4556_v25 = vmul.f32 1.442695, %v4389_v47  ;;  %v4395_v47 = vsub.f32 %v15516_v54, %v12095_v44 }
 0x515   :  { %4869 = vperm.xlu0 %8167, %v12070_v24   ;;  %15486 = vst [vmem:[#allocation180_spill] sm:$0xff] %v12090_v14  ;;  %v12102_v22 = vpop.eup %8461  ;;  %8481 = vpow2.f32 %v4544_v16  ;;  %v4506_v16 = vmul.f32 1.442695, %v4364_v9  ;;  %v4370_v9 = vsub.f32 %v15517_v29, %v12026_v26 }
 0x516   :  { %15490 = vst [vmem:[#allocation181_spill] sm:$0xff] %v12102_v22  ;;  %v12104_v53 = vpop.eup %8463  ;;  %8483 = vpow2.f32 %v4500_v59  ;;  %v4568_v38 = vmul.f32 1.442695, %v4395_v47 }
 0x517   :  { %15491 = vst [vmem:[#allocation171_spill] sm:$0xff] %v12104_v53  ;;  %v12112_v13 = vpop.eup %8465  ;;  %8485 = vpow2.f32 %v4548_v4  ;;  %v4393_v4 = vsub.f32 %v15512_v35, %v12095_v44  ;;  %v4518_v35 = vmul.f32 1.442695, %v4370_v9 }
 0x518   :  { %4920 = vperm.xlu1 %8168, %v12078_v8   ;;  %15494 = vst [vmem:[#allocation182_spill] sm:$0xff] %v12112_v13  ;;  %v12114_v50 = vpop.eup %8467  ;;  %8487 = vpow2.f32 %v4502_v20  ;;  %v4368_v20 = vsub.f32 %v15513_v45, %v12026_v26 }
 0x519   :  { %4872 = vperm.xlu0 %8167, %v12080_v1   ;;  %15495 = vst [vmem:[#allocation178_spill] sm:$0xff] %v12114_v50  ;;  %v12122_v21 = vpop.eup %8469  ;;  %8489 = vpow2.f32 %v4552_v62  ;;  %v4564_v62 = vmul.f32 1.442695, %v4393_v4  ;;  %v15522_v4 = vld [vmem:[#allocation47_spill] sm:$0xff] }
 0x51a   :  { %15498 = vst [vmem:[#allocation172_spill] sm:$0xff] %v12122_v21  ;;  %v12124_v3 = vpop.eup %8471  ;;  %8491 = vpow2.f32 %v4504_v48  ;;  %v4514_v48 = vmul.f32 1.442695, %v4368_v20 }
 0x51b   :  { %15499 = vst [vmem:[#allocation113_spill] sm:$0xff] %v12124_v3  ;;  %v12132_v41 = vpop.eup %8473  ;;  %8493 = vpow2.f32 %v4556_v25 }
 0x51c   :  { %4926 = vperm.xlu1 %8168, %v12088_v33   ;;  %15502 = vst [vmem:[#allocation183_spill] sm:$0xff] %v12132_v41  ;;  %v12134_v36 = vpop.eup %8475  ;;  %8495 = vpow2.f32 %v4506_v16  ;;  %v12179_v16 = vrot.slane %v12018_v6, %v15520_v58 }
 0x51d   :  { %4875 = vperm.xlu0 %8167, %v12090_v14   ;;  %15503 = vst [vmem:[#allocation196_spill] sm:$0xff] %v12134_v36  ;;  %v12142_v37 = vpop.eup %8477  ;;  %8497 = vpow2.f32 %v4560_v10  ;;  %v4397_v10 = vsub.f32 %v15521_v15, %v12095_v44 }
 0x51e   :  { %15506 = vst [vmem:[#allocation197_spill] sm:$0xff] %v12142_v37  ;;  %v12144_v49 = vpop.eup %8479  ;;  %8499 = vpow2.f32 %v4510_v63  ;;  %v4372_v63 = vsub.f32 %v15522_v4, %v12026_v26 }
 0x51f   :  { %15507 = vst [vmem:[#allocation184_spill] sm:$0xff] %v12144_v49  ;;  %v12152_v59 = vpop.eup %8481  ;;  %8501 = vpow2.f32 %v4564_v62  ;;  %v4572_v54 = vmul.f32 1.442695, %v4397_v10  ;;  %v15525_v62 = vld [vmem:[#allocation76_spill] sm:$0xff] }
 0x520   :  { %4932 = vperm.xlu1 %8168, %v12102_v22   ;;  %15510 = vst [vmem:[#allocation198_spill] sm:$0xff] %v12152_v59  ;;  %v12154_v51 = vpop.eup %8483  ;;  %8503 = vpow2.f32 %v4514_v48  ;;  %v4399_v47 = vsub.f32 %v15525_v62, %v12179_v16  ;;  %v4522_v29 = vmul.f32 1.442695, %v4372_v63  ;;  %v15526_v48 = vld [vmem:[#allocation49_spill] sm:$0xff] }
 0x521   :  { %4878 = vperm.xlu0 %8167, %v12104_v53   ;;  %15511 = vst [vmem:[#allocation179_spill] sm:$0xff] %v12154_v51  ;;  %v12162_v42 = vpop.eup %8485  ;;  %8505 = vpow2.f32 %v4568_v38  ;;  %v4374_v9 = vsub.f32 %v15526_v48, %v12026_v26  ;;  %v15529_v38 = vld [vmem:[#allocation78_spill] sm:$0xff] }
 0x522   :  { %15514 = vst [vmem:[#allocation123_spill] sm:$0xff] %v12162_v42  ;;  %v12164_v28 = vpop.eup %8487  ;;  %8507 = vpow2.f32 %v4518_v35  ;;  %v4576_v58 = vmul.f32 1.442695, %v4399_v47  ;;  %v4401_v10 = vsub.f32 %v15529_v38, %v12179_v16  ;;  %v15530_v35 = vld [vmem:[#allocation51_spill] sm:$0xff] }
 0x523   :  { %15515 = vst [vmem:[#allocation213_spill] sm:$0xff] %v12164_v28  ;;  %v12172_v25 = vpop.eup %8489  ;;  %8509 = vpow2.f32 %v4572_v54  ;;  %v4526_v62 = vmul.f32 1.442695, %v4374_v9  ;;  %v4376_v63 = vsub.f32 %v15530_v35, %v12026_v26  ;;  %v15533_v54 = vld [vmem:[#allocation82_spill] sm:$0xff] }
 0x524   :  { %4938 = vperm.xlu1 %8168, %v12112_v13   ;;  %15518 = vst [vmem:[#allocation173_spill] sm:$0xff] %v12172_v25  ;;  %v12174_v57 = vpop.eup %8491  ;;  %8511 = vpow2.f32 %v4522_v29  ;;  %v4403_v47 = vsub.f32 %v15533_v54, %v12179_v16  ;;  %v15534_v29 = vld [vmem:[#allocation53_spill] sm:$0xff] }
 0x525   :  { %4881 = vperm.xlu0 %8167, %v12114_v50   ;;  %15519 = vst [vmem:[#allocation185_spill] sm:$0xff] %v12174_v57  ;;  %v12186_v45 = vpop.eup %8493  ;;  %8513 = vpow2.f32 %v4576_v58  ;;  %v4530_v38 = vmul.f32 1.442695, %v4376_v63  ;;  %v4378_v9 = vsub.f32 %v15534_v29, %v12026_v26  ;;  %v15537_v58 = vld [vmem:[#allocation85_spill] sm:$0xff] }
 0x526   :  { %15523 = vst [vmem:[#allocation199_spill] sm:$0xff] %v12186_v45  ;;  %v12188_v20 = vpop.eup %8495  ;;  %8515 = vpow2.f32 %v4526_v62  ;;  %v15538_v62 = vld [vmem:[#allocation55_spill] sm:$0xff] }
 0x527   :  { %15524 = vst [vmem:[#allocation186_spill] sm:$0xff] %v12188_v20  ;;  %v12196_v15 = vpop.eup %8497  ;;  %v4534_v54 = vmul.f32 1.442695, %v4378_v9  ;;  %v4380_v63 = vsub.f32 %v15538_v62, %v12026_v26 }
 0x528   :  { %4944 = vperm.xlu1 %8168, %v12122_v21   ;;  %15527 = vst [vmem:[#allocation200_spill] sm:$0xff] %v12196_v15  ;;  %v12198_v4 = vpop.eup %8499 }
 0x529   :  { %4884 = vperm.xlu0 %8167, %v12124_v3   ;;  %15528 = vst [vmem:[#allocation166_spill] sm:$0xff] %v12198_v4 }
 0x52c   :  { %4950 = vperm.xlu1 %8168, %v12132_v41  }
 0x52d   :  { %4887 = vperm.xlu0 %8167, %v12134_v36  }
 0x530   :  { %4956 = vperm.xlu1 %8168, %v12142_v37  }
 0x531   :  { %4893 = vperm.xlu0 %8167, %v12144_v49  }
 0x534   :  { %4962 = vperm.xlu1 %8168, %v12152_v59  }
 0x535   :  { %4896 = vperm.xlu0 %8167, %v12154_v51  }
 0x538   :  { %4968 = vperm.xlu1 %8168, %v12162_v42  }
 0x539   :  { %4899 = vperm.xlu0 %8167, %v12164_v28  }
 0x53c   :  { %4974 = vperm.xlu1 %8168, %v12172_v25  }
 0x53d   :  { %4902 = vperm.xlu0 %8167, %v12174_v57  }
 0x540   :  { %4980 = vperm.xlu1 %8168, %v12186_v45  }
 0x541   :  { %4905 = vperm.xlu0 %8167, %v12188_v20   ;;  %v12206_v20 = vpop.eup %8501 }
 0x542   :  { %15531 = vst [vmem:[#allocation81_spill] sm:$0xff] %v12206_v20  ;;  %v12208_v48 = vpop.eup %8503 }
 0x543   :  { %15532 = vst [vmem:[#allocation201_spill] sm:$0xff] %v12208_v48 }
 0x544   :  { %4986 = vperm.xlu1 %8168, %v12196_v15   ;;  %v12216_v15 = vpop.eup %8505 }
 0x545   :  { %4911 = vperm.xlu0 %8167, %v12198_v4   ;;  %v4580_v4 = vmul.f32 1.442695, %v4401_v10  ;;  %15535 = vst [vmem:[#allocation187_spill] sm:$0xff] %v12216_v15  ;;  %v12218_v35 = vpop.eup %8507  ;;  %v4405_v10 = vsub.f32 %v15537_v58, %v12179_v16  ;;  %v4538_v58 = vmul.f32 1.442695, %v4380_v63 }
 0x546   :  { %15536 = vst [vmem:[#allocation202_spill] sm:$0xff] %v12218_v35 }
 0x547   :  { %8517 = vpow2.f32 %v4580_v4  ;;  %v15541_v4 = vld [vmem:[#allocation92_spill] sm:$0xff] }
 0x548   :  { %4992 = vperm.xlu1 %8168, %v12206_v20   ;;  %8519 = vpow2.f32 %v4530_v38  ;;  %v12226_v20 = vpop.eup %8509  ;;  %v15542_v38 = vld [vmem:[#allocation57_spill] sm:$0xff] }
 0x549   :  { %4917 = vperm.xlu0 %8167, %v12208_v48   ;;  %v4584_v48 = vmul.f32 1.442695, %v4403_v47  ;;  %15539 = vst [vmem:[#allocation188_spill] sm:$0xff] %v12226_v20  ;;  %v12228_v29 = vpop.eup %8511  ;;  %v4407_v47 = vsub.f32 %v15541_v4, %v12179_v16  ;;  %v4382_v9 = vsub.f32 %v15542_v38, %v12095_v44 }
 0x54a   :  { %15540 = vst [vmem:[#allocation203_spill] sm:$0xff] %v12228_v29 }
 0x54b   :  { %8521 = vpow2.f32 %v4584_v48  ;;  %v4592_v62 = vmul.f32 1.442695, %v4407_v47  ;;  %v15545_v48 = vld [vmem:[#allocation90_spill] sm:$0xff]  ;;  %v4542_v4 = vmul.f32 1.442695, %v4382_v9 }
 0x54c   :  { %4998 = vperm.xlu1 %8168, %v12216_v15   ;;  %8523 = vpow2.f32 %v4534_v54  ;;  %v12236_v15 = vpop.eup %8513  ;;  %v15546_v54 = vld [vmem:[#allocation59_spill] sm:$0xff] }
 0x54d   :  { %4923 = vperm.xlu0 %8167, %v12218_v35   ;;  %v4588_v35 = vmul.f32 1.442695, %v4405_v10  ;;  %15543 = vst [vmem:[#allocation189_spill] sm:$0xff] %v12236_v15  ;;  %v12238_v26 = vpop.eup %8515  ;;  %v4409_v10 = vsub.f32 %v15545_v48, %v12179_v16  ;;  %v4384_v63 = vsub.f32 %v15546_v54, %v12095_v44 }
 0x54e   :  { %15544 = vst [vmem:[#allocation204_spill] sm:$0xff] %v12238_v26 }
 0x54f   :  { %8525 = vpow2.f32 %v4588_v35  ;;  %v15549_v35 = vld [vmem:[#allocation97_spill] sm:$0xff]  ;;  %v4546_v48 = vmul.f32 1.442695, %v4384_v63 }
 0x550   :  { %5004 = vperm.xlu1 %8168, %v12226_v20   ;;  %8527 = vpow2.f32 %v4538_v58  ;;  %v4411_v47 = vsub.f32 %v15549_v35, %v12179_v16  ;;  %v15550_v58 = vld [vmem:[#allocation61_spill] sm:$0xff]  ;;  %v15553_v20 = vld [vmem:[#allocation24_spill] sm:$0xff]  ;;  %v15555_v35 = vld [vmem:[#allocation63_spill] sm:$0xff] }
 0x551   :  { %4929 = vperm.xlu0 %8167, %v12228_v29   ;;  %v12246_v29 = vpop.eup %8517  ;;  %8529 = vpow2.f32 %v4592_v62  ;;  %v4386_v9 = vsub.f32 %v15550_v58, %v12095_v44  ;;  %v4388_v58 = vsub.f32 %v15555_v35, %v12095_v44 }
 0x552   :  { %15547 = vst [vmem:[#allocation205_spill] sm:$0xff] %v12246_v29  ;;  %v12248_v38 = vpop.eup %8519  ;;  %8531 = vpow2.f32 %v4542_v4  ;;  %v4600_v62 = vmul.f32 1.442695, %v4411_v47 }
 0x553   :  { %15548 = vst [vmem:[#allocation164_spill] sm:$0xff] %v12248_v38  ;;  %v4550_v63 = vmul.f32 1.442695, %v4386_v9 }
 0x554   :  { %5010 = vperm.xlu1 %8168, %v12236_v15  }
 0x555   :  { %4935 = vperm.xlu0 %8167, %v12238_v26   ;;  %v4596_v26 = vmul.f32 1.442695, %v4409_v10  ;;  %v12256_v15 = vpop.eup %8521  ;;  %v15554_v10 = vld [vmem:[#allocation116_spill] sm:$0xff] }
 0x556   :  { %15551 = vst [vmem:[#allocation190_spill] sm:$0xff] %v12256_v15  ;;  %v12258_v54 = vpop.eup %8523  ;;  %v4413_v4 = vsub.f32 %v15554_v10, %v12179_v16  ;;  %v4554_v10 = vmul.f32 1.442695, %v4388_v58 }
 0x557   :  { %15552 = vst [vmem:[#allocation208_spill] sm:$0xff] %v12258_v54  ;;  %8533 = vpow2.f32 %v4596_v26  ;;  %v15558_v26 = vld [vmem:[#allocation120_spill] sm:$0xff] }
 0x558   :  { %5016 = vperm.xlu1 %8168, %v12246_v29   ;;  %v12263_v29 = vrot.slane %v12018_v6, %v15553_v20  ;;  %8535 = vpow2.f32 %v4546_v48  ;;  %v4604_v20 = vmul.f32 1.442695, %v4413_v4  ;;  %v15559_v48 = vld [vmem:[#allocation65_spill] sm:$0xff] }
 0x559   :  { %4941 = vperm.xlu0 %8167, %v12248_v38   ;;  %v12270_v38 = vpop.eup %8525  ;;  %8537 = vpow2.f32 %v4600_v62  ;;  %v4390_v9 = vsub.f32 %v15559_v48, %v12095_v44  ;;  %v15562_v62 = vld [vmem:[#allocation118_spill] sm:$0xff] }
 0x55a   :  { %15556 = vst [vmem:[#allocation191_spill] sm:$0xff] %v12270_v38  ;;  %v12272_v45 = vpop.eup %8527  ;;  %v4415_v47 = vsub.f32 %v15558_v26, %v12263_v29  ;;  %8539 = vpow2.f32 %v4550_v63  ;;  %v4417_v4 = vsub.f32 %v15562_v62, %v12263_v29  ;;  %v15563_v63 = vld [vmem:[#allocation67_spill] sm:$0xff] }
 0x55b   :  { %15557 = vst [vmem:[#allocation209_spill] sm:$0xff] %v12272_v45  ;;  %8541 = vpow2.f32 %v4604_v20  ;;  %v4558_v26 = vmul.f32 1.442695, %v4390_v9  ;;  %v4392_v58 = vsub.f32 %v15563_v63, %v12095_v44  ;;  %v15566_v20 = vld [vmem:[#allocation109_spill] sm:$0xff] }
 0x55c   :  { %5022 = vperm.xlu1 %8168, %v12256_v15   ;;  %8543 = vpow2.f32 %v4554_v10  ;;  %v15567_v10 = vld [vmem:[#allocation69_spill] sm:$0xff] }
 0x55d   :  { %4947 = vperm.xlu0 %8167, %v12258_v54   ;;  %v12280_v54 = vpop.eup %8529  ;;  %v4562_v62 = vmul.f32 1.442695, %v4392_v58  ;;  %v4394_v9 = vsub.f32 %v15567_v10, %v12095_v44 }
 0x55e   :  { %15560 = vst [vmem:[#allocation192_spill] sm:$0xff] %v12280_v54  ;;  %v12282_v35 = vpop.eup %8531 }
 0x55f   :  { %15561 = vst [vmem:[#allocation210_spill] sm:$0xff] %v12282_v35 }
 0x560   :  { %5028 = vperm.xlu1 %8168, %v12270_v38  }
 0x561   :  { %4953 = vperm.xlu0 %8167, %v12272_v45   ;;  %v4608_v45 = vmul.f32 1.442695, %v4415_v47  ;;  %v12290_v38 = vpop.eup %8533  ;;  %v4419_v47 = vsub.f32 %v15566_v20, %v12263_v29  ;;  %v4566_v20 = vmul.f32 1.442695, %v4394_v9 }
 0x562   :  { %15564 = vst [vmem:[#allocation115_spill] sm:$0xff] %v12290_v38  ;;  %v12292_v48 = vpop.eup %8535 }
 0x563   :  { %15565 = vst [vmem:[#allocation193_spill] sm:$0xff] %v12292_v48  ;;  %8545 = vpow2.f32 %v4608_v45  ;;  %v15570_v45 = vld [vmem:[#allocation122_spill] sm:$0xff] }
 0x564   :  { %5034 = vperm.xlu1 %8168, %v12280_v54   ;;  %8547 = vpow2.f32 %v4558_v26  ;;  %v12300_v54 = vpop.eup %8537  ;;  %v15571_v26 = vld [vmem:[#allocation71_spill] sm:$0xff] }
 0x565   :  { %4959 = vperm.xlu0 %8167, %v12282_v35   ;;  %v4612_v35 = vmul.f32 1.442695, %v4417_v4  ;;  %15568 = vst [vmem:[#allocation194_spill] sm:$0xff] %v12300_v54  ;;  %v12302_v63 = vpop.eup %8539  ;;  %v4421_v4 = vsub.f32 %v15570_v45, %v12263_v29  ;;  %v4396_v58 = vsub.f32 %v15571_v26, %v12095_v44 }
 0x566   :  { %15569 = vst [vmem:[#allocation211_spill] sm:$0xff] %v12302_v63 }
 0x567   :  { %8549 = vpow2.f32 %v4612_v35  ;;  %v15574_v35 = vld [vmem:[#allocation111_spill] sm:$0xff]  ;;  %v4570_v45 = vmul.f32 1.442695, %v4396_v58 }
 0x568   :  { %5040 = vperm.xlu1 %8168, %v12290_v38   ;;  %8551 = vpow2.f32 %v4562_v62  ;;  %v12310_v38 = vpop.eup %8541  ;;  %v15575_v62 = vld [vmem:[#allocation73_spill] sm:$0xff] }
 0x569   :  { %4965 = vperm.xlu0 %8167, %v12292_v48   ;;  %v4616_v48 = vmul.f32 1.442695, %v4419_v47  ;;  %15572 = vst [vmem:[#allocation108_spill] sm:$0xff] %v12310_v38  ;;  %v12312_v10 = vpop.eup %8543  ;;  %v4423_v47 = vsub.f32 %v15574_v35, %v12263_v29  ;;  %v4398_v9 = vsub.f32 %v15575_v62, %v12179_v16 }
 0x56a   :  { %15573 = vst [vmem:[#allocation195_spill] sm:$0xff] %v12312_v10 }
 0x56b   :  { %8553 = vpow2.f32 %v4616_v48  ;;  %v4624_v26 = vmul.f32 1.442695, %v4423_v47  ;;  %v15578_v48 = vld [vmem:[#allocation112_spill] sm:$0xff]  ;;  %v4574_v35 = vmul.f32 1.442695, %v4398_v9 }
 0x56c   :  { %5046 = vperm.xlu1 %8168, %v12300_v54   ;;  %8555 = vpow2.f32 %v4566_v20  ;;  %v15579_v20 = vld [vmem:[#allocation75_spill] sm:$0xff] }
 0x56d   :  { %4971 = vperm.xlu0 %8167, %v12302_v63   ;;  %v4620_v63 = vmul.f32 1.442695, %v4421_v4  ;;  %v12320_v54 = vpop.eup %8545  ;;  %v4425_v4 = vsub.f32 %v15578_v48, %v12263_v29  ;;  %v4400_v58 = vsub.f32 %v15579_v20, %v12179_v16 }
 0x56e   :  { %15576 = vst [vmem:[#allocation212_spill] sm:$0xff] %v12320_v54  ;;  %v12322_v44 = vpop.eup %8547 }
 0x56f   :  { %15577 = vst [vmem:[#allocation36_spill] sm:$0xff] %v12322_v44  ;;  %8557 = vpow2.f32 %v4620_v63  ;;  %v15582_v63 = vld [vmem:[#allocation89_spill] sm:$0xff]  ;;  %v4578_v48 = vmul.f32 1.442695, %v4400_v58 }
 0x570   :  { %5052 = vperm.xlu1 %8168, %v12310_v38   ;;  %8559 = vpow2.f32 %v4570_v45  ;;  %v4427_v47 = vsub.f32 %v15582_v63, %v12263_v29  ;;  %v15583_v45 = vld [vmem:[#allocation77_spill] sm:$0xff]  ;;  %v15586_v38 = vld [vmem:[#allocation136_spill] sm:$0xff] }
 0x571   :  { %4977 = vperm.xlu0 %8167, %v12312_v10   ;;  %v12330_v10 = vpop.eup %8549  ;;  %8561 = vpow2.f32 %v4624_v26  ;;  %v4402_v9 = vsub.f32 %v15583_v45, %v12179_v16  ;;  %v15588_v63 = vld [vmem:[#allocation80_spill] sm:$0xff] }
 0x572   :  { %15580 = vst [vmem:[#allocation27_spill] sm:$0xff] %v12330_v10  ;;  %v12332_v62 = vpop.eup %8551  ;;  %8563 = vpow2.f32 %v4574_v35  ;;  %v4632_v26 = vmul.f32 1.442695, %v4427_v47  ;;  %v4404_v45 = vsub.f32 %v15588_v63, %v12179_v16 }
 0x573   :  { %15581 = vst [vmem:[#allocation42_spill] sm:$0xff] %v12332_v62  ;;  %v4582_v58 = vmul.f32 1.442695, %v4402_v9 }
 0x574   :  { %5058 = vperm.xlu1 %8168, %v12320_v54  }
 0x575   :  { %4983 = vperm.xlu0 %8167, %v12322_v44   ;;  %v4628_v44 = vmul.f32 1.442695, %v4425_v4  ;;  %v12340_v54 = vpop.eup %8553  ;;  %v15587_v4 = vld [vmem:[#allocation94_spill] sm:$0xff] }
 0x576   :  { %15584 = vst [vmem:[#allocation26_spill] sm:$0xff] %v12340_v54  ;;  %v12342_v20 = vpop.eup %8555  ;;  %v4429_v35 = vsub.f32 %v15587_v4, %v12263_v29  ;;  %v4586_v4 = vmul.f32 1.442695, %v4404_v45 }
 0x577   :  { %15585 = vst [vmem:[#allocation44_spill] sm:$0xff] %v12342_v20  ;;  %8565 = vpow2.f32 %v4628_v44  ;;  %v15591_v44 = vld [vmem:[#allocation88_spill] sm:$0xff] }
 0x578   :  { %5064 = vperm.xlu1 %8168, %v12330_v10   ;;  %v12347_v10 = vrot.slane %v12018_v6, %v15586_v38  ;;  %8567 = vpow2.f32 %v4578_v48  ;;  %v4636_v38 = vmul.f32 1.442695, %v4429_v35  ;;  %v15592_v48 = vld [vmem:[#allocation84_spill] sm:$0xff] }
 0x579   :  { %4989 = vperm.xlu0 %8167, %v12332_v62   ;;  %v12354_v62 = vpop.eup %8557  ;;  %8569 = vpow2.f32 %v4632_v26  ;;  %v4406_v9 = vsub.f32 %v15592_v48, %v12179_v16  ;;  %v15595_v26 = vld [vmem:[#allocation100_spill] sm:$0xff] }
 0x57a   :  { %15589 = vst [vmem:[#allocation28_spill] sm:$0xff] %v12354_v62  ;;  %v12356_v15 = vpop.eup %8559  ;;  %v4431_v47 = vsub.f32 %v15591_v44, %v12347_v10  ;;  %8571 = vpow2.f32 %v4582_v58  ;;  %v4433_v35 = vsub.f32 %v15595_v26, %v12347_v10  ;;  %v15596_v58 = vld [vmem:[#allocation114_spill] sm:$0xff] }
 0x57b   :  { %15590 = vst [vmem:[#allocation46_spill] sm:$0xff] %v12356_v15  ;;  %8573 = vpow2.f32 %v4636_v38  ;;  %v4590_v44 = vmul.f32 1.442695, %v4406_v9  ;;  %v4408_v45 = vsub.f32 %v15596_v58, %v12179_v16  ;;  %v15599_v38 = vld [vmem:[#allocation98_spill] sm:$0xff] }
 0x57c   :  { %5070 = vperm.xlu1 %8168, %v12340_v54   ;;  %8575 = vpow2.f32 %v4586_v4  ;;  %v15600_v4 = vld [vmem:[#allocation99_spill] sm:$0xff] }
 0x57d   :  { %4995 = vperm.xlu0 %8167, %v12342_v20   ;;  %v12364_v20 = vpop.eup %8561  ;;  %v4594_v26 = vmul.f32 1.442695, %v4408_v45  ;;  %v4410_v9 = vsub.f32 %v15600_v4, %v12179_v16 }
 0x57e   :  { %15593 = vst [vmem:[#allocation30_spill] sm:$0xff] %v12364_v20  ;;  %v12366_v63 = vpop.eup %8563 }
 0x57f   :  { %15594 = vst [vmem:[#allocation48_spill] sm:$0xff] %v12366_v63  ;;  %v4598_v45 = vmul.f32 1.442695, %v4410_v9 }
 0x580   :  { %5076 = vperm.xlu1 %8168, %v12354_v62  }
 0x581   :  { %5001 = vperm.xlu0 %8167, %v12356_v15   ;;  %v4640_v15 = vmul.f32 1.442695, %v4431_v47  ;;  %v12374_v62 = vpop.eup %8565  ;;  %v4435_v47 = vsub.f32 %v15599_v38, %v12347_v10  ;;  %v15604_v38 = vld [vmem:[#allocation104_spill] sm:$0xff] }
 0x582   :  { %15597 = vst [vmem:[#allocation29_spill] sm:$0xff] %v12374_v62  ;;  %v12376_v48 = vpop.eup %8567  ;;  %v4412_v4 = vsub.f32 %v15604_v38, %v12179_v16  ;;  %v15609_v16 = vld [vmem:[#allocation105_spill] sm:$0xff] }
 0x583   :  { %15598 = vst [vmem:[#allocation50_spill] sm:$0xff] %v12376_v48  ;;  %8577 = vpow2.f32 %v4640_v15  ;;  %v4648_v15 = vmul.f32 1.442695, %v4435_v47  ;;  %v15608_v47 = vld [vmem:[#allocation101_spill] sm:$0xff] }
 0x584   :  { %5082 = vperm.xlu1 %8168, %v12364_v20   ;;  %8579 = vpow2.f32 %v4590_v44  ;;  %v12384_v20 = vpop.eup %8569  ;;  %v4602_v9 = vmul.f32 1.442695, %v4412_v4 }
 0x585   :  { %5007 = vperm.xlu0 %8167, %v12366_v63   ;;  %v4644_v63 = vmul.f32 1.442695, %v4433_v35  ;;  %15601 = vst [vmem:[#allocation32_spill] sm:$0xff] %v12384_v20  ;;  %v12388_v54 = vpop.eup %8571  ;;  %v15603_v35 = vld [vmem:[#allocation125_spill] sm:$0xff] }
 0x586   :  { %15602 = vst [vmem:[#allocation52_spill] sm:$0xff] %v12388_v54  ;;  %v4437_v44 = vsub.f32 %v15603_v35, %v12347_v10  ;;  %v4414_v35 = vsub.f32 %v15609_v16, %v12263_v29 }
 0x587   :  { %8581 = vpow2.f32 %v4644_v63 }
 0x588   :  { %5088 = vperm.xlu1 %8168, %v12374_v62   ;;  %8583 = vpow2.f32 %v4594_v26  ;;  %v4652_v63 = vmul.f32 1.442695, %v4437_v44  ;;  %v4439_v26 = vsub.f32 %v15608_v47, %v12347_v10  ;;  %v15612_v44 = vld [vmem:[#allocation129_spill] sm:$0xff]  ;;  %v4606_v4 = vmul.f32 1.442695, %v4414_v35  ;;  %v15613_v47 = vld [vmem:[#allocation107_spill] sm:$0xff] }
 0x589   :  { %5013 = vperm.xlu0 %8167, %v12376_v48   ;;  %v12398_v48 = vpop.eup %8573  ;;  %8585 = vpow2.f32 %v4648_v15  ;;  %v4416_v16 = vsub.f32 %v15613_v47, %v12263_v29 }
 0x58a   :  { %15605 = vst [vmem:[#allocation31_spill] sm:$0xff] %v12398_v48  ;;  %v12402_v25 = vpop.eup %8575  ;;  %8587 = vpow2.f32 %v4598_v45  ;;  %v4656_v15 = vmul.f32 1.442695, %v4439_v26  ;;  %v4441_v45 = vsub.f32 %v15612_v44, %v12347_v10  ;;  %v15616_v26 = vld [vmem:[#allocation127_spill] sm:$0xff]  ;;  %v15617_v44 = vld [vmem:[#allocation117_spill] sm:$0xff] }
 0x58b   :  { %v12386_v58 = vpop.permute.xlu1 %4890  ;;  %15607 = vst [vmem:[#allocation34_spill] sm:$0xff] %v12402_v25  ;;  %8589 = vpow2.f32 %v4652_v63  ;;  %v4610_v35 = vmul.f32 1.442695, %v4416_v16  ;;  %v4418_v47 = vsub.f32 %v15617_v44, %v12263_v29  ;;  %v15621_v16 = vld [vmem:[#allocation132_spill] sm:$0xff] }
 0x58c   :  { %v12390_v57 = vpop.permute.xlu0 %4863  ;;  %5094 = vperm.xlu1 %8168, %v12384_v20   ;;  %8591 = vpow2.f32 %v4602_v9  ;;  %v4660_v63 = vmul.f32 1.442695, %v4441_v45  ;;  %v4443_v9 = vsub.f32 %v15616_v26, %v12347_v10  ;;  %v4445_v26 = vsub.f32 %v15621_v16, %v12347_v10 }
 0x58d   :  { %5019 = vperm.xlu0 %8167, %v12388_v54   ;;  %v12412_v38 = vpop.eup %8577  ;;  %8593 = vpow2.f32 %v4656_v15  ;;  %v15620_v15 = vld [vmem:[#allocation145_spill] sm:$0xff]  ;;  %v4614_v44 = vmul.f32 1.442695, %v4418_v47 }
 0x58e   :  { %15610 = vst [vmem:[#allocation56_spill] sm:$0xff] %v12412_v38  ;;  %v12416_v20 = vpop.eup %8579  ;;  %8595 = vpow2.f32 %v4606_v4  ;;  %v12451_v45 = vrot.slane %v12018_v6, %v15620_v15  ;;  %v4664_v4 = vmul.f32 1.442695, %v4443_v9  ;;  %v15625_v9 = vld [vmem:[#allocation137_spill] sm:$0xff] }
 0x58f   :  { %v12400_v62 = vpop.permute.xlu1 %4908  ;;  %15611 = vst [vmem:[#allocation33_spill] sm:$0xff] %v12416_v20  ;;  %8597 = vpow2.f32 %v4660_v63  ;;  %v4668_v63 = vmul.f32 1.442695, %v4445_v26  ;;  %v15629_v26 = vld [vmem:[#allocation25_spill] sm:$0xff] }
 0x590   :  { %15606 = vst [vmem:[#allocation54_spill] sm:$0xff] %v12400_v62  ;;  %v12404_v28 = vpop.permute.xlu0 %4866  ;;  %5100 = vperm.xlu1 %8168, %v12398_v48   ;;  %8599 = vpow2.f32 %v4610_v35  ;;  %v4447_v35 = vsub.f32 %v15625_v9, %v12451_v45  ;;  %v15630_v9 = vld [vmem:[#allocation121_spill] sm:$0xff] }
 0x591   :  { %5025 = vperm.xlu0 %8167, %v12402_v25   ;;  %v12426_v25 = vpop.eup %8581  ;;  %8601 = vpow2.f32 %v4664_v4 }
 0x592   :  { %15614 = vst [vmem:[#allocation58_spill] sm:$0xff] %v12426_v25  ;;  %v12430_v51 = vpop.eup %8583  ;;  %8603 = vpow2.f32 %v4614_v44  ;;  %v4672_v4 = vmul.f32 1.442695, %v4447_v35  ;;  %v15633_v35 = vld [vmem:[#allocation141_spill] sm:$0xff] }
 0x593   :  { %v12414_v54 = vpop.permute.xlu1 %4914  ;;  %15615 = vst [vmem:[#allocation35_spill] sm:$0xff] %v12430_v51  ;;  %8605 = vpow2.f32 %v4668_v63 }
 0x594   :  { %v12418_v42 = vpop.permute.xlu0 %4869  ;;  %5106 = vperm.xlu1 %8168, %v12412_v38  }
 0x595   :  { %5031 = vperm.xlu0 %8167, %v12416_v20   ;;  %v12440_v20 = vpop.eup %8585 }
 0x596   :  { %15618 = vst [vmem:[#allocation60_spill] sm:$0xff] %v12440_v20  ;;  %v12444_v18 = vpop.eup %8587 }
 0x597   :  { %v12428_v48 = vpop.permute.xlu1 %4920  ;;  %15619 = vst [vmem:[#allocation38_spill] sm:$0xff] %v12444_v18  ;;  %v12458_v37 = vpop.eup %8589 }
 0x598   :  { %v12432_v59 = vpop.permute.xlu0 %4872  ;;  %5112 = vperm.xlu1 %8168, %v12426_v25   ;;  %15623 = vst [vmem:[#allocation62_spill] sm:$0xff] %v12458_v37 }
 0x599   :  { %5037 = vperm.xlu0 %8167, %v12430_v51   ;;  %v15622_v51 = vld [vmem:[#allocation110_spill] sm:$0xff] }
 0x59a   :  { %v4420_v25 = vsub.f32 %v15622_v51, %v12263_v29  ;;  %v15626_v51 = vld [vmem:[#allocation91_spill] sm:$0xff] }
 0x59b   :  { %v12442_v38 = vpop.permute.xlu1 %4926  ;;  %v4422_v16 = vsub.f32 %v15626_v51, %v12263_v29  ;;  %v4424_v51 = vsub.f32 %v15630_v9, %v12263_v29 }
 0x59c   :  { %v12446_v49 = vpop.permute.xlu0 %4875  ;;  %5118 = vperm.xlu1 %8168, %v12440_v20   ;;  %v12462_v20 = vpop.eup %8591  ;;  %v4618_v47 = vmul.f32 1.442695, %v4420_v25  ;;  %v4449_v25 = vsub.f32 %v15629_v26, %v12451_v45  ;;  %v15634_v26 = vld [vmem:[#allocation87_spill] sm:$0xff] }
 0x59d   :  { %5043 = vperm.xlu0 %8167, %v12444_v18   ;;  %15624 = vst [vmem:[#allocation37_spill] sm:$0xff] %v12462_v20  ;;  %v12472_v18 = vpop.eup %8593  ;;  %v4622_v44 = vmul.f32 1.442695, %v4422_v16  ;;  %v4626_v16 = vmul.f32 1.442695, %v4424_v51  ;;  %v4426_v9 = vsub.f32 %v15634_v26, %v12263_v29 }
 0x59e   :  { %15627 = vst [vmem:[#allocation64_spill] sm:$0xff] %v12472_v18  ;;  %v12476_v3 = vpop.eup %8595  ;;  %8607 = vpow2.f32 %v4618_v47  ;;  %v4676_v63 = vmul.f32 1.442695, %v4449_v25  ;;  %v4451_v47 = vsub.f32 %v15633_v35, %v12451_v45  ;;  %v15638_v25 = vld [vmem:[#allocation139_spill] sm:$0xff]  ;;  %v15639_v35 = vld [vmem:[#allocation86_spill] sm:$0xff] }
 0x59f   :  { %v12460_v34 = vpop.permute.xlu1 %4932  ;;  %15628 = vst [vmem:[#allocation40_spill] sm:$0xff] %v12476_v3  ;;  %8609 = vpow2.f32 %v4672_v4  ;;  %v4630_v51 = vmul.f32 1.442695, %v4426_v9  ;;  %v4428_v26 = vsub.f32 %v15639_v35, %v12263_v29  ;;  %v15644_v29 = vld [vmem:[#allocation93_spill] sm:$0xff] }
 0x5a0   :  { %v12464_v15 = vpop.permute.xlu0 %4878  ;;  %5124 = vperm.xlu1 %8168, %v12458_v37   ;;  %8611 = vpow2.f32 %v4622_v44  ;;  %v4680_v4 = vmul.f32 1.442695, %v4451_v47  ;;  %v4453_v44 = vsub.f32 %v15638_v25, %v12451_v45  ;;  %v15643_v47 = vld [vmem:[#allocation146_spill] sm:$0xff]  ;;  %v4430_v25 = vsub.f32 %v15644_v29, %v12347_v10 }
 0x5a1   :  { %5049 = vperm.xlu0 %8167, %v12462_v20   ;;  %v12486_v20 = vpop.eup %8597  ;;  %8613 = vpow2.f32 %v4676_v63  ;;  %v4634_v9 = vmul.f32 1.442695, %v4428_v26 }
 0x5a2   :  { %15631 = vst [vmem:[#allocation66_spill] sm:$0xff] %v12486_v20  ;;  %v12490_v50 = vpop.eup %8599  ;;  %8615 = vpow2.f32 %v4626_v16  ;;  %v4684_v63 = vmul.f32 1.442695, %v4453_v44  ;;  %v4455_v16 = vsub.f32 %v15643_v47, %v12451_v45  ;;  %v15647_v44 = vld [vmem:[#allocation143_spill] sm:$0xff]  ;;  %v4638_v26 = vmul.f32 1.442695, %v4430_v25 }
 0x5a3   :  { %v12474_v41 = vpop.permute.xlu1 %4938  ;;  %15632 = vst [vmem:[#allocation39_spill] sm:$0xff] %v12490_v50  ;;  %8617 = vpow2.f32 %v4680_v4  ;;  %v15648_v47 = vld [vmem:[#allocation103_spill] sm:$0xff] }
 0x5a4   :  { %v12478_v21 = vpop.permute.xlu0 %4881  ;;  %5130 = vperm.xlu1 %8168, %v12472_v18   ;;  %8619 = vpow2.f32 %v4630_v51  ;;  %v4688_v4 = vmul.f32 1.442695, %v4455_v16  ;;  %v4457_v51 = vsub.f32 %v15647_v44, %v12451_v45  ;;  %v4432_v29 = vsub.f32 %v15648_v47, %v12347_v10  ;;  %v15651_v16 = vld [vmem:[#allocation150_spill] sm:$0xff]  ;;  %v15652_v44 = vld [vmem:[#allocation95_spill] sm:$0xff] }
 0x5a5   :  { %5055 = vperm.xlu0 %8167, %v12476_v3   ;;  %v12500_v3 = vpop.eup %8601  ;;  %8621 = vpow2.f32 %v4684_v63  ;;  %v4434_v47 = vsub.f32 %v15652_v44, %v12347_v10 }
 0x5a6   :  { %15635 = vst [vmem:[#allocation68_spill] sm:$0xff] %v12500_v3  ;;  %v12504_v53 = vpop.eup %8603  ;;  %8623 = vpow2.f32 %v4634_v9  ;;  %v4692_v63 = vmul.f32 1.442695, %v4457_v51  ;;  %v4459_v9 = vsub.f32 %v15651_v16, %v12451_v45  ;;  %v4642_v25 = vmul.f32 1.442695, %v4432_v29  ;;  %v15656_v29 = vld [vmem:[#allocation148_spill] sm:$0xff] }
 0x5a7   :  { %v12488_v37 = vpop.permute.xlu1 %4944  ;;  %15637 = vst [vmem:[#allocation70_spill] sm:$0xff] %v12504_v53  ;;  %8625 = vpow2.f32 %v4688_v4  ;;  %v15655_v4 = vld [vmem:[#allocation154_spill] sm:$0xff]  ;;  %v4461_v16 = vsub.f32 %v15656_v29, %v12451_v45  ;;  %v4646_v44 = vmul.f32 1.442695, %v4434_v47 }
 0x5a8   :  { %v12492_v13 = vpop.permute.xlu0 %4884  ;;  %5136 = vperm.xlu1 %8168, %v12486_v20   ;;  %8627 = vpow2.f32 %v4638_v26  ;;  %v12567_v51 = vrot.slane %v12018_v6, %v15655_v4  ;;  %v4696_v26 = vmul.f32 1.442695, %v4459_v9  ;;  %v15661_v9 = vld [vmem:[#allocation155_spill] sm:$0xff] }
 0x5a9   :  { %5061 = vperm.xlu0 %8167, %v12490_v50   ;;  %v12514_v50 = vpop.eup %8605  ;;  %8629 = vpow2.f32 %v4692_v63  ;;  %v4700_v63 = vmul.f32 1.442695, %v4461_v16  ;;  %v15666_v16 = vld [vmem:[#allocation152_spill] sm:$0xff] }
 0x5aa   :  { %15640 = vst [vmem:[#allocation43_spill] sm:$0xff] %v12514_v50  ;;  %v12518_v14 = vpop.eup %8607  ;;  %8631 = vpow2.f32 %v4642_v25  ;;  %v4463_v25 = vsub.f32 %v15661_v9, %v12567_v51  ;;  %v15667_v9 = vld [vmem:[#allocation130_spill] sm:$0xff] }
 0x5ab   :  { %v12502_v18 = vpop.permute.xlu1 %4950  ;;  %15642 = vst [vmem:[#allocation45_spill] sm:$0xff] %v12518_v14  ;;  %v12528_v35 = vpop.eup %8609  ;;  %8633 = vpow2.f32 %v4696_v26 }
 0x5ac   :  { %15636 = vst [vmem:[#allocation41_spill] sm:$0xff] %v12502_v18  ;;  %v12506_v22 = vpop.permute.xlu0 %4887  ;;  %5142 = vperm.xlu1 %8168, %v12500_v3   ;;  %15645 = vst [vmem:[#allocation74_spill] sm:$0xff] %v12528_v35  ;;  %v12532_v3 = vpop.eup %8611  ;;  %8635 = vpow2.f32 %v4646_v44  ;;  %v4704_v26 = vmul.f32 1.442695, %v4463_v25  ;;  %v15671_v25 = vld [vmem:[#allocation159_spill] sm:$0xff] }
 0x5ad   :  { %5067 = vperm.xlu0 %8167, %v12504_v53   ;;  %15646 = vst [vmem:[#allocation47_spill] sm:$0xff] %v12532_v3  ;;  %8637 = vpow2.f32 %v4700_v63 }
 0x5af   :  { %v12516_v20 = vpop.permute.xlu1 %4956 }
 0x5b0   :  { %15641 = vst [vmem:[#allocation72_spill] sm:$0xff] %v12516_v20  ;;  %v12520_v33 = vpop.permute.xlu0 %4893  ;;  %5148 = vperm.xlu1 %8168, %v12514_v50  }
 0x5b1   :  { %5073 = vperm.xlu0 %8167, %v12518_v14   ;;  %v12542_v14 = vpop.eup %8613 }
 0x5b2   :  { %15649 = vst [vmem:[#allocation76_spill] sm:$0xff] %v12542_v14  ;;  %v12546_v8 = vpop.eup %8615 }
 0x5b3   :  { %v12530_v53 = vpop.permute.xlu1 %4962  ;;  %15650 = vst [vmem:[#allocation49_spill] sm:$0xff] %v12546_v8 }
 0x5b4   :  { %v12534_v1 = vpop.permute.xlu0 %4896  ;;  %5154 = vperm.xlu1 %8168, %v12528_v35  }
 0x5b5   :  { %5079 = vperm.xlu0 %8167, %v12532_v3   ;;  %v12556_v3 = vpop.eup %8617 }
 0x5b6   :  { %15653 = vst [vmem:[#allocation78_spill] sm:$0xff] %v12556_v3  ;;  %v12560_v27 = vpop.eup %8619 }
 0x5b7   :  { %v12544_v50 = vpop.permute.xlu1 %4968  ;;  %15654 = vst [vmem:[#allocation51_spill] sm:$0xff] %v12560_v27  ;;  %v12574_v52 = vpop.eup %8621 }
 0x5b8   :  { %v12548_v24 = vpop.permute.xlu0 %4899  ;;  %5160 = vperm.xlu1 %8168, %v12542_v14   ;;  %15658 = vst [vmem:[#allocation82_spill] sm:$0xff] %v12574_v52 }
 0x5b9   :  { %5085 = vperm.xlu0 %8167, %v12546_v8   ;;  %v15657_v8 = vld [vmem:[#allocation126_spill] sm:$0xff] }
 0x5ba   :  { %v4436_v14 = vsub.f32 %v15657_v8, %v12347_v10  ;;  %v15662_v8 = vld [vmem:[#allocation124_spill] sm:$0xff] }
 0x5bb   :  { %v12558_v35 = vpop.permute.xlu1 %4974  ;;  %v4438_v29 = vsub.f32 %v15662_v8, %v12347_v10  ;;  %v4440_v8 = vsub.f32 %v15667_v9, %v12347_v10 }
 0x5bc   :  { %v12562_v7 = vpop.permute.xlu0 %4902  ;;  %5166 = vperm.xlu1 %8168, %v12556_v3   ;;  %v12578_v3 = vpop.eup %8623  ;;  %v4650_v47 = vmul.f32 1.442695, %v4436_v14  ;;  %v4465_v14 = vsub.f32 %v15666_v16, %v12567_v51  ;;  %v15672_v16 = vld [vmem:[#allocation128_spill] sm:$0xff] }
 0x5bd   :  { %5091 = vperm.xlu0 %8167, %v12560_v27   ;;  %15659 = vst [vmem:[#allocation53_spill] sm:$0xff] %v12578_v3  ;;  %v12588_v27 = vpop.eup %8625  ;;  %v4654_v44 = vmul.f32 1.442695, %v4438_v29  ;;  %v4658_v29 = vmul.f32 1.442695, %v4440_v8  ;;  %v4442_v9 = vsub.f32 %v15672_v16, %v12347_v10 }
 0x5be   :  { %15663 = vst [vmem:[#allocation55_spill] sm:$0xff] %v12588_v27  ;;  %v12592_v60 = vpop.eup %8627  ;;  %8639 = vpow2.f32 %v4650_v47  ;;  %v4708_v63 = vmul.f32 1.442695, %v4465_v14  ;;  %v4467_v47 = vsub.f32 %v15671_v25, %v12567_v51  ;;  %v15676_v14 = vld [vmem:[#allocation157_spill] sm:$0xff] }
 0x5bf   :  { %v12576_v46 = vpop.permute.xlu1 %4980  ;;  %15665 = vst [vmem:[#allocation57_spill] sm:$0xff] %v12592_v60  ;;  %8641 = vpow2.f32 %v4704_v26  ;;  %v4662_v8 = vmul.f32 1.442695, %v4442_v9  ;;  %v15677_v25 = vld [vmem:[#allocation133_spill] sm:$0xff] }
 0x5c0   :  { %v12580_v6 = vpop.permute.xlu0 %4905  ;;  %5172 = vperm.xlu1 %8168, %v12574_v52   ;;  %v12602_v52 = vpop.eup %8629  ;;  %8643 = vpow2.f32 %v4654_v44  ;;  %v4712_v26 = vmul.f32 1.442695, %v4467_v47  ;;  %v4469_v44 = vsub.f32 %v15676_v14, %v12567_v51  ;;  %v4444_v16 = vsub.f32 %v15677_v25, %v12347_v10  ;;  %v15681_v47 = vld [vmem:[#allocation163_spill] sm:$0xff]  ;;  %v15682_v10 = vld [vmem:[#allocation138_spill] sm:$0xff] }
 0x5c1   :  { %15660 = vst [vmem:[#allocation85_spill] sm:$0xff] %v12580_v6  ;;  %5097 = vperm.xlu0 %8167, %v12578_v3   ;;  %15668 = vst [vmem:[#allocation90_spill] sm:$0xff] %v12602_v52  ;;  %v12606_v40 = vpop.eup %8631  ;;  %8645 = vpow2.f32 %v4708_v63  ;;  %v4446_v14 = vsub.f32 %v15682_v10, %v12451_v45 }
 0x5c2   :  { %15670 = vst [vmem:[#allocation97_spill] sm:$0xff] %v12606_v40  ;;  %8647 = vpow2.f32 %v4658_v29  ;;  %v4716_v63 = vmul.f32 1.442695, %v4469_v44  ;;  %v4471_v29 = vsub.f32 %v15681_v47, %v12567_v51  ;;  %v4666_v9 = vmul.f32 1.442695, %v4444_v16  ;;  %v15686_v44 = vld [vmem:[#allocation161_spill] sm:$0xff] }
 0x5c3   :  { %v12590_v4 = vpop.permute.xlu1 %4986  ;;  %8649 = vpow2.f32 %v4712_v26  ;;  %v4670_v16 = vmul.f32 1.442695, %v4446_v14  ;;  %v15687_v47 = vld [vmem:[#allocation135_spill] sm:$0xff] }
 0x5c4   :  { %15664 = vst [vmem:[#allocation92_spill] sm:$0xff] %v12590_v4  ;;  %v12594_v36 = vpop.permute.xlu0 %4911  ;;  %5178 = vperm.xlu1 %8168, %v12588_v27   ;;  %v12616_v27 = vpop.eup %8633  ;;  %8651 = vpow2.f32 %v4662_v8  ;;  %v4720_v26 = vmul.f32 1.442695, %v4471_v29  ;;  %v4473_v8 = vsub.f32 %v15686_v44, %v12567_v51  ;;  %v4448_v10 = vsub.f32 %v15687_v47, %v12451_v45  ;;  %v15691_v29 = vld [vmem:[#allocation79_spill] sm:$0xff]  ;;  %v15692_v44 = vld [vmem:[#allocation142_spill] sm:$0xff] }
 0x5c5   :  { %5103 = vperm.xlu0 %8167, %v12592_v60   ;;  %15673 = vst [vmem:[#allocation61_spill] sm:$0xff] %v12616_v27  ;;  %8653 = vpow2.f32 %v4716_v63  ;;  %v4450_v47 = vsub.f32 %v15692_v44, %v12451_v45 }
 0x5c6   :  { %8655 = vpow2.f32 %v4666_v9  ;;  %v4724_v63 = vmul.f32 1.442695, %v4473_v8  ;;  %v4475_v9 = vsub.f32 %v15691_v29, %v12567_v51  ;;  %v4674_v14 = vmul.f32 1.442695, %v4448_v10  ;;  %v15696_v8 = vld [vmem:[#allocation102_spill] sm:$0xff]  ;;  %v15697_v29 = vld [vmem:[#allocation140_spill] sm:$0xff] }
 0x5c7   :  { %v12604_v3 = vpop.permute.xlu1 %4992  ;;  %8657 = vpow2.f32 %v4720_v26  ;;  %v4678_v10 = vmul.f32 1.442695, %v4450_v47  ;;  %v4452_v44 = vsub.f32 %v15697_v29, %v12451_v45 }
 0x5c8   :  { %15669 = vst [vmem:[#allocation59_spill] sm:$0xff] %v12604_v3  ;;  %v12608_v20 = vpop.permute.xlu0 %4917  ;;  %5184 = vperm.xlu1 %8168, %v12602_v52   ;;  %v12620_v3 = vpop.eup %8635  ;;  %8659 = vpow2.f32 %v4670_v16  ;;  %v4728_v26 = vmul.f32 1.442695, %v4475_v9  ;;  %v4477_v16 = vsub.f32 %v15696_v8, %v12567_v51 }
 0x5c9   :  { %5109 = vperm.xlu0 %8167, %v12606_v40   ;;  %15675 = vst [vmem:[#allocation63_spill] sm:$0xff] %v12620_v3  ;;  %v12630_v52 = vpop.eup %8637  ;;  %8661 = vpow2.f32 %v4724_v63  ;;  %v4682_v9 = vmul.f32 1.442695, %v4452_v44 }
 0x5ca   :  { %15678 = vst [vmem:[#allocation120_spill] sm:$0xff] %v12630_v52  ;;  %8663 = vpow2.f32 %v4674_v14  ;;  %v4732_v63 = vmul.f32 1.442695, %v4477_v16  ;;  %v15702_v14 = vld [vmem:[#allocation147_spill] sm:$0xff]  ;;  %v15706_v16 = vld [vmem:[#allocation144_spill] sm:$0xff] }
 0x5cb   :  { %v12618_v60 = vpop.permute.xlu1 %4998  ;;  %8665 = vpow2.f32 %v4728_v26  ;;  %v4454_v47 = vsub.f32 %v15702_v14, %v12451_v45 }
 0x5cc   :  { %15674 = vst [vmem:[#allocation116_spill] sm:$0xff] %v12618_v60  ;;  %v12622_v62 = vpop.permute.xlu0 %4923  ;;  %5190 = vperm.xlu1 %8168, %v12616_v27   ;;  %v12634_v60 = vpop.eup %8639  ;;  %8667 = vpow2.f32 %v4678_v10  ;;  %v4456_v10 = vsub.f32 %v15706_v16, %v12451_v45 }
 0x5cd   :  { %5115 = vperm.xlu0 %8167, %v12620_v3   ;;  %15680 = vst [vmem:[#allocation118_spill] sm:$0xff] %v12634_v60  ;;  %v12644_v25 = vpop.eup %8641  ;;  %8669 = vpow2.f32 %v4732_v63  ;;  %v4686_v26 = vmul.f32 1.442695, %v4454_v47  ;;  %v15710_v63 = vld [vmem:[#allocation151_spill] sm:$0xff] }
 0x5ce   :  { %15683 = vst [vmem:[#allocation67_spill] sm:$0xff] %v12644_v25  ;;  %v12648_v3 = vpop.eup %8643  ;;  %8671 = vpow2.f32 %v4682_v9  ;;  %v4458_v9 = vsub.f32 %v15710_v63, %v12451_v45 }
 0x5cf   :  { %v12632_v40 = vpop.permute.xlu1 %5004  ;;  %15685 = vst [vmem:[#allocation69_spill] sm:$0xff] %v12648_v3  ;;  %8673 = vpow2.f32 %v4686_v26  ;;  %v15714_v26 = vld [vmem:[#allocation149_spill] sm:$0xff] }
 0x5d0   :  { %15679 = vst [vmem:[#allocation65_spill] sm:$0xff] %v12632_v40  ;;  %v12636_v61 = vpop.permute.xlu0 %4929  ;;  %5196 = vperm.xlu1 %8168, %v12630_v52   ;;  %v12658_v52 = vpop.eup %8645 }
 0x5d1   :  { %5121 = vperm.xlu0 %8167, %v12634_v60   ;;  %15688 = vst [vmem:[#allocation122_spill] sm:$0xff] %v12658_v52  ;;  %v12662_v4 = vpop.eup %8647 }
 0x5d2   :  { %15690 = vst [vmem:[#allocation111_spill] sm:$0xff] %v12662_v4 }
 0x5d3   :  { %v12646_v27 = vpop.permute.xlu1 %5010 }
 0x5d4   :  { %15684 = vst [vmem:[#allocation109_spill] sm:$0xff] %v12646_v27  ;;  %v12650_v40 = vpop.permute.xlu0 %4935  ;;  %5202 = vperm.xlu1 %8168, %v12644_v25   ;;  %v12672_v25 = vpop.eup %8649 }
 0x5d5   :  { %5127 = vperm.xlu0 %8167, %v12648_v3   ;;  %15693 = vst [vmem:[#allocation73_spill] sm:$0xff] %v12672_v25 }
 0x5d7   :  { %v12660_v60 = vpop.permute.xlu1 %5016 }
 0x5d8   :  { %15689 = vst [vmem:[#allocation71_spill] sm:$0xff] %v12660_v60  ;;  %v12664_v18 = vpop.permute.xlu0 %4941  ;;  %5208 = vperm.xlu1 %8168, %v12658_v52   ;;  %v12676_v60 = vpop.eup %8651 }
 0x5d9   :  { %5133 = vperm.xlu0 %8167, %v12662_v4   ;;  %15695 = vst [vmem:[#allocation75_spill] sm:$0xff] %v12676_v60  ;;  %v12686_v52 = vpop.eup %8653 }
 0x5da   :  { %15698 = vst [vmem:[#allocation89_spill] sm:$0xff] %v12686_v52 }
 0x5db   :  { %v12674_v3 = vpop.permute.xlu1 %5022 }
 0x5dc   :  { %15694 = vst [vmem:[#allocation112_spill] sm:$0xff] %v12674_v3  ;;  %v12678_v27 = vpop.permute.xlu0 %4947  ;;  %5214 = vperm.xlu1 %8168, %v12672_v25   ;;  %v12690_v3 = vpop.eup %8655 }
 0x5dd   :  { %5139 = vperm.xlu0 %8167, %v12676_v60   ;;  %15700 = vst [vmem:[#allocation94_spill] sm:$0xff] %v12690_v3  ;;  %v12698_v8 = vpop.eup %8657 }
 0x5de   :  { %15703 = vst [vmem:[#allocation88_spill] sm:$0xff] %v12698_v8  ;;  %v12702_v60 = vpop.eup %8659 }
 0x5df   :  { %v12688_v4 = vpop.permute.xlu1 %5028  ;;  %15705 = vst [vmem:[#allocation100_spill] sm:$0xff] %v12702_v60  ;;  %v12710_v44 = vpop.eup %8661 }
 0x5e0   :  { %15699 = vst [vmem:[#allocation77_spill] sm:$0xff] %v12688_v4  ;;  %v12692_v6 = vpop.permute.xlu0 %4953  ;;  %5220 = vperm.xlu1 %8168, %v12686_v52   ;;  %15707 = vst [vmem:[#allocation114_spill] sm:$0xff] %v12710_v44  ;;  %v15721_v4 = vld [vmem:[#allocation153_spill] sm:$0xff] }
 0x5e1   :  { %15701 = vst [vmem:[#allocation80_spill] sm:$0xff] %v12692_v6  ;;  %5145 = vperm.xlu0 %8167, %v12690_v3   ;;  %v12714_v3 = vpop.eup %8663 }
 0x5e2   :  { %15709 = vst [vmem:[#allocation99_spill] sm:$0xff] %v12714_v3  ;;  %v12722_v47 = vpop.eup %8665 }
 0x5e3   :  { %v12700_v29 = vpop.permute.xlu1 %5034  ;;  %15711 = vst [vmem:[#allocation125_spill] sm:$0xff] %v12722_v47 }
 0x5e4   :  { %15704 = vst [vmem:[#allocation84_spill] sm:$0xff] %v12700_v29  ;;  %v12704_v25 = vpop.permute.xlu0 %4959  ;;  %5226 = vperm.xlu1 %8168, %v12698_v8   ;;  %v12726_v8 = vpop.eup %8667 }
 0x5e5   :  { %5151 = vperm.xlu0 %8167, %v12702_v60   ;;  %v4690_v60 = vmul.f32 1.442695, %v4456_v10  ;;  %15713 = vst [vmem:[#allocation101_spill] sm:$0xff] %v12726_v8  ;;  %v4460_v10 = vsub.f32 %v15714_v26, %v12451_v45 }
 0x5e7   :  { %v12712_v14 = vpop.permute.xlu1 %5040  ;;  %8675 = vpow2.f32 %v4690_v60  ;;  %v15718_v60 = vld [vmem:[#allocation156_spill] sm:$0xff] }
 0x5e8   :  { %15708 = vst [vmem:[#allocation98_spill] sm:$0xff] %v12712_v14  ;;  %v12716_v52 = vpop.permute.xlu0 %4965  ;;  %5232 = vperm.xlu1 %8168, %v12710_v44   ;;  %v4694_v44 = vmul.f32 1.442695, %v4458_v9  ;;  %v4462_v9 = vsub.f32 %v15718_v60, %v12567_v51 }
 0x5e9   :  { %5157 = vperm.xlu0 %8167, %v12714_v3   ;;  %v12734_v3 = vpop.eup %8669 }
 0x5ea   :  { %15715 = vst [vmem:[#allocation105_spill] sm:$0xff] %v12734_v3  ;;  %v12738_v29 = vpop.eup %8671  ;;  %8677 = vpow2.f32 %v4694_v44 }
 0x5eb   :  { %v12724_v16 = vpop.permute.xlu1 %5046  ;;  %15717 = vst [vmem:[#allocation107_spill] sm:$0xff] %v12738_v29  ;;  %v12748_v45 = vpop.eup %8673 }
 0x5ec   :  { %15712 = vst [vmem:[#allocation104_spill] sm:$0xff] %v12724_v16  ;;  %v12728_v14 = vpop.permute.xlu0 %4971  ;;  %5238 = vperm.xlu1 %8168, %v12722_v47   ;;  %v4698_v47 = vmul.f32 1.442695, %v4460_v10  ;;  %15720 = vst [vmem:[#allocation117_spill] sm:$0xff] %v12748_v45 }
 0x5ed   :  { %5163 = vperm.xlu0 %8167, %v12726_v8  }
 0x5ee   :  { %8679 = vpow2.f32 %v4698_v47 }
 0x5ef   :  { %v12736_v63 = vpop.permute.xlu1 %5052 }
 0x5f0   :  { %15716 = vst [vmem:[#allocation129_spill] sm:$0xff] %v12736_v63  ;;  %v12740_v16 = vpop.permute.xlu0 %4977  ;;  %5244 = vperm.xlu1 %8168, %v12734_v3   ;;  %v4702_v63 = vmul.f32 1.442695, %v4462_v9  ;;  %v4464_v3 = vsub.f32 %v15721_v4, %v12567_v51 }
 0x5f1   :  { %5169 = vperm.xlu0 %8167, %v12738_v29   ;;  %v12757_v44 = vpop.eup %8675  ;;  %v15725_v29 = vld [vmem:[#allocation160_spill] sm:$0xff] }
 0x5f2   :  { %15723 = vst [vmem:[#allocation110_spill] sm:$0xff] %v12757_v44  ;;  %8681 = vpow2.f32 %v4702_v63  ;;  %v4706_v60 = vmul.f32 1.442695, %v4464_v3 }
 0x5f3   :  { %v12746_v8 = vpop.permute.xlu1 %5058 }
 0x5f4   :  { %15719 = vst [vmem:[#allocation127_spill] sm:$0xff] %v12746_v8  ;;  %v12750_v26 = vpop.permute.xlu0 %4983  ;;  %v4466_v8 = vsub.f32 %v15725_v29, %v12567_v51  ;;  %v12766_v47 = vpop.eup %8677  ;;  %8683 = vpow2.f32 %v4706_v60 }
 0x5f5   :  { %5175 = vperm.xlu0 %8167, %v12748_v45   ;;  %15727 = vst [vmem:[#allocation25_spill] sm:$0xff] %v12766_v47  ;;  %v15729_v45 = vld [vmem:[#allocation158_spill] sm:$0xff] }
 0x5f6   :  { %v4710_v4 = vmul.f32 1.442695, %v4466_v8 }
 0x5f7   :  { %v12755_v6 = vpop.permute.xlu1 %5064 }
 0x5f8   :  { %15722 = vst [vmem:[#allocation132_spill] sm:$0xff] %v12755_v6  ;;  %v12759_v10 = vpop.permute.xlu0 %4989  ;;  %v4468_v6 = vsub.f32 %v15729_v45, %v12567_v51  ;;  %v12775_v63 = vpop.eup %8679  ;;  %8685 = vpow2.f32 %v4710_v4 }
 0x5f9   :  { %15724 = vst [vmem:[#allocation137_spill] sm:$0xff] %v12759_v10  ;;  %5181 = vperm.xlu0 %8167, %v12757_v44   ;;  %15731 = vst [vmem:[#allocation87_spill] sm:$0xff] %v12775_v63  ;;  %v15733_v44 = vld [vmem:[#allocation176_spill] sm:$0xff] }
 0x5fa   :  { %v4714_v29 = vmul.f32 1.442695, %v4468_v6 }
 0x5fb   :  { %v12764_v32 = vpop.permute.xlu1 %5070 }
 0x5fc   :  { %15726 = vst [vmem:[#allocation91_spill] sm:$0xff] %v12764_v32  ;;  %v12768_v9 = vpop.permute.xlu0 %4995  ;;  %v4470_v32 = vsub.f32 %v15733_v44, %v12567_v51  ;;  %v12784_v60 = vpop.eup %8681  ;;  %8687 = vpow2.f32 %v4714_v29 }
 0x5fd   :  { %15728 = vst [vmem:[#allocation121_spill] sm:$0xff] %v12768_v9  ;;  %5187 = vperm.xlu0 %8167, %v12766_v47   ;;  %15735 = vst [vmem:[#allocation146_spill] sm:$0xff] %v12784_v60  ;;  %v15737_v47 = vld [vmem:[#allocation162_spill] sm:$0xff] }
 0x5fe   :  { %v4718_v45 = vmul.f32 1.442695, %v4470_v32  ;;  %v12793_v4 = vpop.eup %8683 }
 0x5ff   :  { %v12773_v10 = vpop.permute.xlu1 %5076  ;;  %15739 = vst [vmem:[#allocation103_spill] sm:$0xff] %v12793_v4 }
 0x600   :  { %15730 = vst [vmem:[#allocation141_spill] sm:$0xff] %v12773_v10  ;;  %v12777_v3 = vpop.permute.xlu0 %5001  ;;  %v4472_v10 = vsub.f32 %v15737_v47, %v12567_v51  ;;  %8689 = vpow2.f32 %v4718_v45 }
 0x601   :  { %15732 = vst [vmem:[#allocation139_spill] sm:$0xff] %v12777_v3  ;;  %5193 = vperm.xlu0 %8167, %v12775_v63   ;;  %v15741_v63 = vld [vmem:[#allocation167_spill] sm:$0xff] }
 0x602   :  { %v4722_v44 = vmul.f32 1.442695, %v4472_v10  ;;  %v12802_v29 = vpop.eup %8685 }
 0x603   :  { %v12782_v9 = vpop.permute.xlu1 %5082  ;;  %15743 = vst [vmem:[#allocation148_spill] sm:$0xff] %v12802_v29 }
 0x604   :  { %15734 = vst [vmem:[#allocation86_spill] sm:$0xff] %v12782_v9  ;;  %v12786_v8 = vpop.permute.xlu0 %5007  ;;  %v4474_v9 = vsub.f32 %v15741_v63, %v12567_v51  ;;  %8691 = vpow2.f32 %v4722_v44 }
 0x605   :  { %15736 = vst [vmem:[#allocation93_spill] sm:$0xff] %v12786_v8  ;;  %5199 = vperm.xlu0 %8167, %v12784_v60   ;;  %v15744_v60 = vld [vmem:[#allocation165_spill] sm:$0xff] }
 0x606   :  { %v4726_v47 = vmul.f32 1.442695, %v4474_v9  ;;  %v12811_v45 = vpop.eup %8687 }
 0x607   :  { %v12791_v3 = vpop.permute.xlu1 %5088  ;;  %15746 = vst [vmem:[#allocation155_spill] sm:$0xff] %v12811_v45 }
 0x608   :  { %15738 = vst [vmem:[#allocation143_spill] sm:$0xff] %v12791_v3  ;;  %v12795_v6 = vpop.permute.xlu0 %5013  ;;  %v4476_v3 = vsub.f32 %v15744_v60, %v12567_v51  ;;  %8693 = vpow2.f32 %v4726_v47 }
 0x609   :  { %15740 = vst [vmem:[#allocation150_spill] sm:$0xff] %v12795_v6  ;;  %5205 = vperm.xlu0 %8167, %v12793_v4  }
 0x60a   :  { %v4730_v63 = vmul.f32 1.442695, %v4476_v3  ;;  %v12816_v4 = vpop.eup %8689 }
 0x60b   :  { %v12800_v8 = vpop.permute.xlu1 %5094  ;;  %15747 = vst [vmem:[#allocation124_spill] sm:$0xff] %v12816_v4 }
 0x60c   :  { %15742 = vst [vmem:[#allocation95_spill] sm:$0xff] %v12800_v8  ;;  %v12804_v32 = vpop.permute.xlu0 %5019  ;;  %8695 = vpow2.f32 %v4730_v63 }
 0x60d   :  { %5211 = vperm.xlu0 %8167, %v12802_v29  }
 0x60e   :  { %v12823_v51 = vpop.eup %8691 }
 0x60f   :  { %v12809_v6 = vpop.permute.xlu1 %5100  ;;  %15749 = vst [vmem:[#allocation130_spill] sm:$0xff] %v12823_v51 }
 0x610   :  { %15745 = vst [vmem:[#allocation126_spill] sm:$0xff] %v12809_v6  ;;  %v12813_v10 = vpop.permute.xlu0 %5025 }
 0x611   :  { %5217 = vperm.xlu0 %8167, %v12811_v45  }
 0x612   :  { %v12830_v44 = vpop.eup %8693 }
 0x613   :  { %v12820_v29 = vpop.permute.xlu1 %5106  ;;  %15752 = vst [vmem:[#allocation157_spill] sm:$0xff] %v12830_v44 }
 0x614   :  { %v12818_v8 = vpop.permute.xlu0 %5031  ;;  %15748 = vst [vmem:[#allocation152_spill] sm:$0xff] %v12820_v29 }
 0x615   :  { %5223 = vperm.xlu0 %8167, %v12816_v4  }
 0x616   :  { %v12835_v47 = vpop.eup %8695 }
 0x617   :  { %v12828_v60 = vpop.permute.xlu1 %5112  ;;  %15754 = vst [vmem:[#allocation163_spill] sm:$0xff] %v12835_v47 }
 0x618   :  { %v12825_v9 = vpop.permute.xlu0 %5037  ;;  %15751 = vst [vmem:[#allocation128_spill] sm:$0xff] %v12828_v60 }
 0x619   :  { %15750 = vst [vmem:[#allocation159_spill] sm:$0xff] %v12825_v9  ;;  %5229 = vperm.xlu0 %8167, %v12823_v51  }
 0x61b   :  { %v12839_v4 = vpop.permute.xlu1 %5118 }
 0x61c   :  { %v12832_v3 = vpop.permute.xlu0 %5043  ;;  %15756 = vst [vmem:[#allocation161_spill] sm:$0xff] %v12839_v4 }
 0x61d   :  { %15753 = vst [vmem:[#allocation133_spill] sm:$0xff] %v12832_v3  ;;  %5235 = vperm.xlu0 %8167, %v12830_v44  }
 0x61f   :  { %v12844_v6 = vpop.permute.xlu1 %5124 }
 0x620   :  { %v12837_v45 = vpop.permute.xlu0 %5049  ;;  %15758 = vst [vmem:[#allocation79_spill] sm:$0xff] %v12844_v6 }
 0x621   :  { %15755 = vst [vmem:[#allocation138_spill] sm:$0xff] %v12837_v45  ;;  %5241 = vperm.xlu0 %8167, %v12835_v47  }
 0x623   :  { %v12850_v9 = vpop.permute.xlu1 %5130 }
 0x624   :  { %v12842_v63 = vpop.permute.xlu0 %5055  ;;  %15761 = vst [vmem:[#allocation140_spill] sm:$0xff] %v12850_v9 }
 0x625   :  { %15757 = vst [vmem:[#allocation135_spill] sm:$0xff] %v12842_v63 }
 0x627   :  { %v12854_v44 = vpop.permute.xlu1 %5136 }
 0x628   :  { %v12846_v51 = vpop.permute.xlu0 %5061  ;;  %15763 = vst [vmem:[#allocation144_spill] sm:$0xff] %v12854_v44 }
 0x629   :  { %15759 = vst [vmem:[#allocation142_spill] sm:$0xff] %v12846_v51 }
 0x62b   :  { %v12860_v4 = vpop.permute.xlu1 %5142 }
 0x62c   :  { %v12848_v60 = vpop.permute.xlu0 %5067  ;;  %15766 = vst [vmem:[#allocation156_spill] sm:$0xff] %v12860_v4 }
 0x62d   :  { %15760 = vst [vmem:[#allocation102_spill] sm:$0xff] %v12848_v60 }
 0x62f   :  { %v12864_v63 = vpop.permute.xlu1 %5148 }
 0x630   :  { %v12852_v3 = vpop.permute.xlu0 %5073  ;;  %15768 = vst [vmem:[#allocation160_spill] sm:$0xff] %v12864_v63 }
 0x631   :  { %15762 = vst [vmem:[#allocation147_spill] sm:$0xff] %v12852_v3 }
 0x633   :  { %v12870_v60 = vpop.permute.xlu1 %5154 }
 0x634   :  { %v12856_v29 = vpop.permute.xlu0 %5079  ;;  %15770 = vst [vmem:[#allocation176_spill] sm:$0xff] %v12870_v60 }
 0x635   :  { %15764 = vst [vmem:[#allocation151_spill] sm:$0xff] %v12856_v29 }
 0x637   :  { %v12874_v3 = vpop.permute.xlu1 %5160 }
 0x638   :  { %v12858_v45 = vpop.permute.xlu0 %5085  ;;  %15772 = vst [vmem:[#allocation167_spill] sm:$0xff] %v12874_v3  ;;  %v5337_v3 = vrot.slane %v12608_v20, %v11542_v11  ;;  %v5347_v20 = vrot.slane %v12622_v62, %v11560_v31 }
 0x639   :  { %15765 = vst [vmem:[#allocation149_spill] sm:$0xff] %v12858_v45 }
 0x63b   :  { %v12880_v45 = vpop.permute.xlu1 %5166 }
 0x63c   :  { %v12862_v47 = vpop.permute.xlu0 %5091  ;;  %15774 = vst [vmem:[#allocation216_spill] sm:$0xff] %v12880_v45 }
 0x63d   :  { %15767 = vst [vmem:[#allocation153_spill] sm:$0xff] %v12862_v47 }
 0x63f   :  { %v12884_v47 = vpop.permute.xlu1 %5172 }
 0x640   :  { %v12866_v6 = vpop.permute.xlu0 %5097  ;;  %15776 = vst [vmem:[#allocation218_spill] sm:$0xff] %v12884_v47 }
 0x641   :  { %15769 = vst [vmem:[#allocation158_spill] sm:$0xff] %v12866_v6  ;;  %v5328_v6 = vrot.slane %v12594_v36, %v11538_v39  ;;  %v5258_v36 = vrot.slane %v12418_v42, %v11542_v11 }
 0x644   :  { %v12868_v51 = vpop.permute.xlu0 %5103 }
 0x648   :  { %v12872_v9 = vpop.permute.xlu0 %5109 }
 0x649   :  { %15771 = vst [vmem:[#allocation162_spill] sm:$0xff] %v12872_v9  ;;  %v12894_v9 = vpop.permute.xlu1 %5178 }
 0x64a   :  { %15778 = vst [vmem:[#allocation220_spill] sm:$0xff] %v12894_v9  ;;  %v5249_v9 = vrot.slane %v12390_v57, %v11538_v39  ;;  %v5407_v57 = vrot.slane %v12704_v25, %v11538_v39  ;;  %v5278_v25 = vrot.slane %v12478_v21, %v11586_v0 }
 0x64c   :  { %v12876_v44 = vpop.permute.xlu0 %5115 }
 0x650   :  { %v12878_v29 = vpop.permute.xlu0 %5121 }
 0x651   :  { %15773 = vst [vmem:[#allocation165_spill] sm:$0xff] %v12878_v29  ;;  %v5332_v29 = vrot.slane %v12414_v54, %v11534_v2  ;;  %v5342_v54 = vrot.slane %v12428_v48, %v11554_v17 }
 0x653   :  { %v5333_v47 = vsel %vm3639_vm1, %v5332_v29, %v5328_v6  ;;  %v5268_v6 = vrot.slane %v12446_v49, %v11560_v31  ;;  %v12916_v29 = vpop.permute.xlu1 %5184  ;;  %v5357_v49 = vrot.slane %v12636_v61, %v11586_v0 }
 0x654   :  { %v12882_v4 = vpop.permute.xlu0 %5127 }
 0x655   :  { %15775 = vst [vmem:[#allocation217_spill] sm:$0xff] %v12882_v4  ;;  %v5253_v4 = vrot.slane %v12404_v28, %v11534_v2  ;;  %v5263_v28 = vrot.slane %v12432_v59, %v11554_v17 }
 0x657   :  { %v5254_v42 = vsel %vm3639_vm1, %v5253_v4, %v5249_v9  ;;  %v5416_v4 = vrot.slane %v12716_v52, %v11542_v11  ;;  %v5288_v52 = vrot.slane %v12506_v22, %v11596_v43  ;;  %v5362_v22 = vrot.slane %v12460_v34, %v11593_v30 }
 0x658   :  { %v12886_v63 = vpop.permute.xlu0 %5133  ;;  %v5259_v48 = vsel %vm3646_vm2, %v5258_v36, %v5254_v42  ;;  %v12955_v42 = vpop.permute.xlu1 %5190  ;;  %v5377_v34 = vrot.slane %v12664_v18, %v11624_v12  ;;  %v5382_v18 = vrot.slane %v12488_v37, %v11631_v23  ;;  %v5387_v37 = vrot.slane %v12678_v27, %v11654_v55  ;;  %v15794_v27 = vld [vmem:[#allocation85_spill] sm:$0xff] }
 0x659   :  { %v5264_v9 = vsel %vm3653_vm3, %v5263_v28, %v5259_v48 }
 0x65a   :  { %v5269_v36 = vsel %vm3660_vm4, %v5268_v6, %v5264_v9  ;;  %v5293_v9 = vrot.slane %v12386_v58, %v11600_v19  ;;  %v5308_v58 = vrot.slane %v12548_v24, %v11654_v55  ;;  %v5313_v24 = vrot.slane %v12562_v7, %v11657_v5 }
 0x65c   :  { %v12890_v60 = vpop.permute.xlu0 %5139 }
 0x65d   :  { %15777 = vst [vmem:[#allocation219_spill] sm:$0xff] %v12890_v60  ;;  %v5338_v60 = vsel %vm3646_vm2, %v5337_v3, %v5333_v47  ;;  %v5273_v3 = vrot.slane %v12464_v15, %v11578_v56  ;;  %v5352_v15 = vrot.slane %v12442_v38, %v11578_v56 }
 0x65e   :  { %v5343_v62 = vsel %vm3653_vm3, %v5342_v54, %v5338_v60  ;;  %v5411_v60 = vrot.slane %v12530_v53, %v11534_v2  ;;  %v5367_v53 = vrot.slane %v12650_v40, %v11596_v43 }
 0x65f   :  { %v5348_v59 = vsel %vm3660_vm4, %v5347_v20, %v5343_v62  ;;  %v5283_v20 = vrot.slane %v12492_v13, %v11593_v30  ;;  %v5274_v61 = vsel %vm15779_vm0, %v5273_v3, %v5269_v36  ;;  %v5426_v13 = vrot.slane %v12728_v14, %v11560_v31 }
 0x660   :  { %v12901_v45 = vpop.permute.xlu0 %5145  ;;  %v5353_v54 = vsel %vm15780_vm8, %v5352_v15, %v5348_v59  ;;  %v5412_v38 = vsel %vm3639_vm1, %v5411_v60, %v5407_v57  ;;  %vm15782_vm8 = vmmov %vm15781_vm9  ;;  %v5421_v62 = vrot.slane %v12544_v50, %v11554_v17  ;;  %v5436_v50 = vrot.slane %v12740_v16, %v11586_v0 }
 0x661   :  { %v5358_v21 = vsel %vm15781_vm9, %v5357_v49, %v5353_v54  ;;  %v5417_v6 = vsel %vm3646_vm2, %v5416_v4, %v5412_v38  ;;  %v5279_v3 = vsel %vm15782_vm8, %v5278_v25, %v5274_v61  ;;  %vm15783_vm9 = vcmask 589312  }
 0x662   :  { %v5284_v57 = vsel %vm3681_vm7, %v5283_v20, %v5279_v3  ;;  %v5363_v40 = vsel %vm3681_vm7, %v5362_v22, %v5358_v21  ;;  %v5422_v59 = vsel %vm3653_vm3, %v5421_v62, %v5417_v6  ;;  %vm15784_vm0 = vmmov %vm15783_vm9  ;;  %v5372_v15 = vrot.slane %v12474_v41, %v11600_v19  ;;  %v12986_v20 = vpop.permute.xlu1 %5196  ;;  %v15792_v21 = vld [vmem:[#allocation93_spill] sm:$0xff]  ;;  %v15795_v3 = vld [vmem:[#allocation150_spill] sm:$0xff] }
 0x663   :  { %v5289_v48 = vsel %vm15783_vm9, %v5288_v52, %v5284_v57  ;;  %v5368_v14 = vsel %vm15784_vm0, %v5367_v53, %v5363_v40  ;;  %v5427_v4 = vsel %vm3660_vm4, %v5426_v13, %v5422_v59  ;;  %v5298_v25 = vrot.slane %v12520_v33, %v11624_v12  ;;  %15785 = vst [vmem:[#allocation221_spill] sm:$0xff] %v12986_v20  ;;  %v15793_v13 = vld [vmem:[#allocation214_spill] sm:$0xff]  ;;  %v15796_v57 = vld [vmem:[#allocation109_spill] sm:$0xff] }
 0x664   :  { %v12924_v47 = vpop.permute.xlu0 %5151  ;;  %v5431_v60 = vrot.slane %v12558_v35, %v11578_v56  ;;  %v5303_v36 = vrot.slane %v12534_v1, %v11631_v23  ;;  %vm15786_vm8 = vcmask 654912   ;;  %vm15788_vm0 = vcmask 392512  }
 0x665   :  { %v5294_v16 = vsel %vm15786_vm8, %v5293_v9, %v5289_v48  ;;  %vm15787_vm9 = vmmov %vm15786_vm8  ;;  %v5446_v52 = vrot.slane %v12750_v26, %v11596_v43  ;;  %v5441_v38 = vrot.slane %v12576_v46, %v11593_v30  ;;  %v5486_v53 = vrot.slane %v15792_v21, %v11538_v39 }
 0x666   :  { %v5373_v41 = vsel %vm15787_vm9, %v5372_v15, %v5368_v14  ;;  %v5432_v33 = vsel %vm15788_vm0, %v5431_v60, %v5427_v4  ;;  %vm15791_vm8 = vmmov %vm15789_vm10  ;;  %v5318_v22 = vrot.slane %v15794_v27, %v15793_v13  ;;  %v5495_v62 = vrot.slane %v15795_v3, %v11542_v11  ;;  %v15797_v14 = vld [vmem:[#allocation80_spill] sm:$0xff]  ;;  %v13026_v15 = vpop.permute.xlu1 %5202 }
 0x667   :  { %v5378_v35 = vsel %vm15789_vm10, %v5377_v34, %v5373_v41  ;;  %v5437_v1 = vsel %vm15790_vm6, %v5436_v50, %v5432_v33  ;;  %v5299_v54 = vsel %vm15791_vm8, %v5298_v25, %v5294_v16  ;;  %v5490_v48 = vrot.slane %v15796_v57, %v11534_v2  ;;  %v15799_v50 = vld [vmem:[#allocation137_spill] sm:$0xff]  ;;  %vm15805_vm10 = vmmov %vm15787_vm9  ;;  %v15810_v57 = vld [vmem:[#allocation59_spill] sm:$0xff] }
 0x668   :  { %v12947_v28 = vpop.permute.xlu0 %5157  ;;  %v5304_v6 = vsel %vm3709_vm11, %v5303_v36, %v5299_v54  ;;  %v5383_v7 = vsel %vm3709_vm11, %v5382_v18, %v5378_v35  ;;  %v5442_v46 = vsel %vm3681_vm7, %v5441_v38, %v5437_v1  ;;  %v5397_v34 = vrot.slane %v15797_v14, %v15793_v13  ;;  %v15800_v25 = vld [vmem:[#allocation41_spill] sm:$0xff]  ;;  %v15801_v36 = vld [vmem:[#allocation92_spill] sm:$0xff]  ;;  %v15803_v1 = vld [vmem:[#allocation54_spill] sm:$0xff] }
 0x669   :  { %v5309_v26 = vsel %vm3716_vm12, %v5308_v58, %v5304_v6  ;;  %v5388_v59 = vsel %vm3716_vm12, %v5387_v37, %v5383_v7  ;;  %vm15798_vm6 = vcmask 589312   ;;  %v5456_v9 = vrot.slane %v15799_v50, %v11624_v12  ;;  %v15802_v37 = vld [vmem:[#allocation215_spill] sm:$0xff]  ;;  %vm15807_vm9 = vmmov %vm15791_vm8  ;;  %v15811_v7 = vld [vmem:[#allocation116_spill] sm:$0xff] }
 0x66a   :  { %v5447_v4 = vsel %vm15798_vm6, %v5446_v52, %v5442_v46  ;;  %v5392_v60 = vrot.slane %v15800_v25, %v11657_v5  ;;  %v5314_v18 = vsel %vm3723_vm13, %v5313_v24, %v5309_v26  ;;  %v5451_v16 = vrot.slane %v15801_v36, %v11600_v19  ;;  %v15804_v54 = vld [vmem:[#allocation71_spill] sm:$0xff]  ;;  %v15812_v14 = vld [vmem:[#allocation65_spill] sm:$0xff] }
 0x66b   :  { %v5491_v58 = vsel %vm3639_vm1, %v5490_v48, %v5486_v53  ;;  %v5319_v41 = vsel %vm3730_vm14, %v5318_v22, %v5314_v18  ;;  %v5505_v35 = vrot.slane %v12804_v32, %v11560_v31  ;;  %v5323_v52 = vrot.slane %v15803_v1, %v15802_v37  ;;  %v15806_v53 = vld [vmem:[#allocation72_spill] sm:$0xff]  ;;  %v15808_v32 = vld [vmem:[#allocation121_spill] sm:$0xff] }
 0x66c   :  { %v12966_v49 = vpop.permute.xlu0 %5163  ;;  %v5496_v33 = vsel %vm3646_vm2, %v5495_v62, %v5491_v58  ;;  %v5500_v38 = vrot.slane %v15804_v54, %v11554_v17  ;;  %v5393_v24 = vsel %vm3723_vm13, %v5392_v60, %v5388_v59  ;;  %v5452_v21 = vsel %vm15805_vm10, %v5451_v16, %v5447_v4  ;;  %v13067_v60 = vpop.permute.xlu1 %5208  ;;  %v15814_v18 = vld [vmem:[#allocation77_spill] sm:$0xff]  ;;  %v15816_v58 = vld [vmem:[#allocation84_spill] sm:$0xff] }
 0x66d   :  { %v5402_v27 = vrot.slane %v15806_v53, %v15802_v37  ;;  %v5398_v22 = vsel %vm3730_vm14, %v5397_v34, %v5393_v24  ;;  %v5457_v3 = vsel %vm15807_vm9, %v5456_v9, %v5452_v21  ;;  %v5466_v62 = vrot.slane %v15808_v32, %v11654_v55  ;;  %v15813_v34 = vld [vmem:[#allocation112_spill] sm:$0xff]  ;;  %v15819_v24 = vld [vmem:[#allocation139_spill] sm:$0xff]  ;;  %v15820_v53 = vld [vmem:[#allocation129_spill] sm:$0xff] }
 0x66e   :  { %v13053_v26 = vsel %vm3737_vm15, %v5323_v52, %v5319_v41  ;;  %v5461_v48 = vrot.slane %v15810_v57, %v11631_v23  ;;  %v5471_v46 = vrot.slane %v15811_v7, %v11657_v5  ;;  %v5501_v59 = vsel %vm3653_vm3, %v5500_v38, %v5496_v33  ;;  %v15823_v7 = vld [vmem:[#allocation91_spill] sm:$0xff] }
 0x66f   :  { %15809 = vst [vmem:[#allocation93_spill] sm:$0xff] %v13053_v26  ;;  %v5510_v50 = vrot.slane %v15813_v34, %v11578_v56  ;;  %v5506_v9 = vsel %vm3660_vm4, %v5505_v35, %v5501_v59  ;;  %v5515_v25 = vrot.slane %v12813_v10, %v11586_v0  ;;  %v5520_v36 = vrot.slane %v15814_v18, %v11593_v30  ;;  %v15817_v35 = vld [vmem:[#allocation98_spill] sm:$0xff]  ;;  %v15818_v10 = vld [vmem:[#allocation104_spill] sm:$0xff]  ;;  %v15825_v18 = vld [vmem:[#allocation135_spill] sm:$0xff] }
 0x670   :  { %v12993_v61 = vpop.permute.xlu0 %5169  ;;  %v13072_v16 = vsel %vm3737_vm15, %v5402_v27, %v5398_v22  ;;  %v5530_v41 = vrot.slane %v15816_v58, %v11600_v19  ;;  %v5462_v33 = vsel %vm3709_vm11, %v5461_v48, %v5457_v3  ;;  %v5540_v52 = vrot.slane %v15817_v35, %v11631_v23  ;;  %v15821_v22 = vld [vmem:[#allocation127_spill] sm:$0xff]  ;;  %v15822_v3 = vld [vmem:[#allocation132_spill] sm:$0xff]  ;;  %v13116_v27 = vpop.permute.xlu1 %5214 }
 0x671   :  { %15815 = vst [vmem:[#allocation85_spill] sm:$0xff] %v13072_v16  ;;  %v5467_v38 = vsel %vm3716_vm12, %v5466_v62, %v5462_v33  ;;  %v5476_v21 = vrot.slane %v15819_v24, %v15793_v13  ;;  %v5569_v32 = vrot.slane %v15821_v22, %v11534_v2  ;;  %v5579_v57 = vrot.slane %v15822_v3, %v11554_v17  ;;  %v15826_v33 = vld [vmem:[#allocation141_spill] sm:$0xff]  ;;  %v15827_v22 = vld [vmem:[#allocation142_spill] sm:$0xff] }
 0x672   :  { %v5511_v48 = vsel %vm15788_vm0, %v5510_v50, %v5506_v9  ;;  %v5589_v59 = vrot.slane %v15823_v7, %v11578_v56  ;;  %vm15824_vm8 = vcmask 458112   ;;  %v5525_v62 = vrot.slane %v12818_v8, %v11596_v43  ;;  %v15828_v8 = vld [vmem:[#allocation86_spill] sm:$0xff] }
 0x673   :  { %v5516_v34 = vsel %vm15824_vm8, %v5515_v25, %v5511_v48  ;;  %v5565_v58 = vrot.slane %v15825_v18, %v11538_v39  ;;  %v5472_v24 = vsel %vm3723_vm13, %v5471_v46, %v5467_v38  ;;  %v5574_v3 = vrot.slane %v15827_v22, %v11542_v11  ;;  %v15829_v7 = vld [vmem:[#allocation162_spill] sm:$0xff]  ;;  %v15830_v38 = vld [vmem:[#allocation143_spill] sm:$0xff] }
 0x674   :  { %v13018_v40 = vpop.permute.xlu0 %5175  ;;  %v5644_v50 = vrot.slane %v12868_v51, %v11538_v39  ;;  %v13110_v25 = vsel %vm3730_vm14, %v5476_v21, %v5472_v24  ;;  %v5653_v18 = vrot.slane %v15829_v7, %v11542_v11  ;;  %v5723_v46 = vrot.slane %v12924_v47, %v11538_v39  ;;  %v15831_v51 = vld [vmem:[#allocation152_spill] sm:$0xff]  ;;  %v15832_v7 = vld [vmem:[#allocation159_spill] sm:$0xff] }
 0x675   :  { %v5648_v4 = vrot.slane %v15831_v51, %v11534_v2  ;;  %v5521_v21 = vsel %vm3681_vm7, %v5520_v36, %v5516_v34  ;;  %v5732_v24 = vrot.slane %v12947_v28, %v11542_v11  ;;  %v5535_v54 = vrot.slane %v15832_v7, %v11624_v12  ;;  %v15833_v47 = vld [vmem:[#allocation176_spill] sm:$0xff]  ;;  %v15834_v22 = vld [vmem:[#allocation95_spill] sm:$0xff]  ;;  %v15835_v36 = vld [vmem:[#allocation102_spill] sm:$0xff] }
 0x676   :  { %v5526_v48 = vsel %vm15798_vm6, %v5525_v62, %v5521_v21  ;;  %v5570_v35 = vsel %vm3639_vm1, %v5569_v32, %v5565_v58  ;;  %v5727_v20 = vrot.slane %v15833_v47, %v11534_v2  ;;  %v5629_v16 = vrot.slane %v15834_v22, %v11657_v5  ;;  %v15836_v62 = vld [vmem:[#allocation128_spill] sm:$0xff]  ;;  %vm15844_vm6 = vmmov %vm15788_vm0 }
 0x677   :  { %v5575_v51 = vsel %vm3646_vm2, %v5574_v3, %v5570_v35  ;;  %v5584_v34 = vrot.slane %v15835_v36, %v11560_v31  ;;  %v5649_v28 = vsel %vm3639_vm1, %v5648_v4, %v5644_v50  ;;  %v5658_v21 = vrot.slane %v15836_v62, %v11554_v17  ;;  %v15837_v36 = vld [vmem:[#allocation161_spill] sm:$0xff] }
 0x678   :  { %v13044_v6 = vpop.permute.xlu0 %5181  ;;  %v5654_v7 = vsel %vm3646_vm2, %v5653_v18, %v5649_v28  ;;  %v5663_v32 = vrot.slane %v12876_v44, %v11560_v31  ;;  %v5728_v58 = vsel %vm3639_vm1, %v5727_v20, %v5723_v46  ;;  %v5531_v47 = vsel %vm15805_vm10, %v5530_v41, %v5526_v48  ;;  %v15838_v44 = vld [vmem:[#allocation167_spill] sm:$0xff]  ;;  %v13156_v20 = vpop.permute.xlu1 %5220  ;;  %vm15845_vm10 = vmmov %vm15824_vm8 }
 0x679   :  { %v5733_v35 = vsel %vm3646_vm2, %v5732_v24, %v5728_v58  ;;  %v5742_v3 = vrot.slane %v12966_v49, %v11560_v31  ;;  %v5536_v50 = vsel %vm15807_vm9, %v5535_v54, %v5531_v47  ;;  %v5668_v62 = vrot.slane %v15837_v36, %v11578_v56  ;;  %v15839_v48 = vld [vmem:[#allocation147_spill] sm:$0xff]  ;;  %vm15847_vm9 = vmmov %vm15788_vm0 }
 0x67a   :  { %v5580_v18 = vsel %vm3653_vm3, %v5579_v57, %v5575_v51  ;;  %v5737_v28 = vrot.slane %v15838_v44, %v11554_v17  ;;  %v5594_v46 = vrot.slane %v15839_v48, %v11586_v0  ;;  %v5659_v49 = vsel %vm3653_vm3, %v5658_v21, %v5654_v7  ;;  %v15840_v57 = vld [vmem:[#allocation165_spill] sm:$0xff]  ;;  %v15842_v44 = vld [vmem:[#allocation216_spill] sm:$0xff] }
 0x67b   :  { %v5585_v41 = vsel %vm3660_vm4, %v5584_v34, %v5580_v18  ;;  %v5664_v24 = vsel %vm3660_vm4, %v5663_v32, %v5659_v49  ;;  %v5673_v51 = vrot.slane %v15840_v57, %v11586_v0  ;;  %v5541_v34 = vsel %vm3709_vm11, %v5540_v52, %v5536_v50  ;;  %v15843_v52 = vld [vmem:[#allocation151_spill] sm:$0xff] }
 0x67c   :  { %v13077_v1 = vpop.permute.xlu0 %5187  ;;  %v5738_v58 = vsel %vm3653_vm3, %v5737_v28, %v5733_v35  ;;  %v5752_v21 = vrot.slane %v12993_v61, %v11586_v0  ;;  %v5590_v32 = vsel %vm15788_vm0, %v5589_v59, %v5585_v41  ;;  %v5747_v48 = vrot.slane %v15842_v44, %v11578_v56  ;;  %v15846_v59 = vld [vmem:[#allocation217_spill] sm:$0xff]  ;;  %vm15849_vm0 = vmmov %vm15824_vm8 }
 0x67d   :  { %v5743_v36 = vsel %vm3660_vm4, %v5742_v3, %v5738_v58  ;;  %v5595_v28 = vsel %vm15824_vm8, %v5594_v46, %v5590_v32  ;;  %v5604_v3 = vrot.slane %v15843_v52, %v11596_v43  ;;  %v5669_v50 = vsel %vm15844_vm6, %v5668_v62, %v5664_v24  ;;  %v15848_v46 = vld [vmem:[#allocation79_spill] sm:$0xff] }
 0x67e   :  { %v5816_v61 = vrot.slane %v13067_v60, %v11554_v17  ;;  %v5674_v49 = vsel %vm15845_vm10, %v5673_v51, %v5669_v50  ;;  %v5683_v41 = vrot.slane %v15846_v59, %v11596_v43  ;;  %v5678_v58 = vrot.slane %v15848_v46, %v11593_v30 }
 0x67f   :  { %v5762_v62 = vrot.slane %v13018_v40, %v11596_v43  ;;  %v15850_v51 = vrot.slane %v15826_v33, %v11593_v30  ;;  %vm15852_vm8 = vcmask 589312  }
 0x680   :  { %v13107_v9 = vpop.permute.xlu0 %5193  ;;  %v5679_v40 = vsel %vm3681_vm7, %v5678_v58, %v5674_v49  ;;  %vm15854_vm6 = vmmov %vm15852_vm8  ;;  %v15857_v49 = vrot.slane %v15818_v10, %v11657_v5 }
 0x681   :  { %v5684_v33 = vsel %vm15854_vm6, %v5683_v41, %v5679_v40  ;;  %vm15856_vm10 = vmmov %vm15854_vm6  ;;  %vm15862_vm6 = vcmask 720512   ;;  %v15869_v40 = vld [vmem:[#allocation138_spill] sm:$0xff] }
 0x684   :  { %v5200_v26 = vpop.permute.xlu0 %5199 }
 0x685   :  { %v5802_v4 = vrot.slane %v5200_v26, %v11538_v39  ;;  %v5806_v26 = vrot.slane %v13026_v15, %v11534_v2  ;;  %v15841_v15 = vld [vmem:[#allocation133_spill] sm:$0xff] }
 0x686   :  { %v5545_v18 = vrot.slane %v15841_v15, %v11654_v55 }
 0x687   :  { %v5807_v7 = vsel %vm3639_vm1, %v5806_v26, %v5802_v4  ;;  %v5227_v26 = vpop.permute.xlu1 %5226 }
 0x688   :  { %v5206_v54 = vpop.permute.xlu0 %5205  ;;  %v5546_v24 = vsel %vm3716_vm12, %v5545_v18, %v5541_v34  ;;  %v5826_v34 = vrot.slane %v13116_v27, %v11578_v56 }
 0x689   :  { %v5811_v47 = vrot.slane %v5206_v54, %v11542_v11  ;;  %v5748_v54 = vsel %vm15847_vm9, %v5747_v48, %v5743_v36  ;;  %v15851_v36 = vld [vmem:[#allocation218_spill] sm:$0xff]  ;;  %v5551_v59 = vsel %vm3723_vm13, %v15857_v49, %v5546_v24 }
 0x68a   :  { %v5757_v15 = vrot.slane %v15851_v36, %v11593_v30 }
 0x68b   :  { %v5812_v35 = vsel %vm3646_vm2, %v5811_v47, %v5807_v7  ;;  %v5753_v47 = vsel %vm15849_vm0, %v5752_v21, %v5748_v54  ;;  %v5600_v7 = vsel %vm3681_vm7, %v15850_v51, %v5595_v28  ;;  %v15853_v21 = vld [vmem:[#allocation149_spill] sm:$0xff]  ;;  %vm15859_vm0 = vcmask 654912   ;;  %v15860_v54 = vld [vmem:[#allocation220_spill] sm:$0xff]  ;;  %v5233_v46 = vpop.permute.xlu1 %5232  ;;  %v15866_v51 = vld [vmem:[#allocation219_spill] sm:$0xff] }
 0x68c   :  { %v5212_v4 = vpop.permute.xlu0 %5211  ;;  %v5817_v60 = vsel %vm3653_vm3, %v5816_v61, %v5812_v35  ;;  %v5605_v44 = vsel %vm15852_vm8, %v5604_v3, %v5600_v7  ;;  %v5614_v48 = vrot.slane %v15853_v21, %v11624_v12  ;;  %v5693_v35 = vrot.slane %v12886_v63, %v11624_v12  ;;  %v15855_v3 = vld [vmem:[#allocation140_spill] sm:$0xff] }
 0x68d   :  { %v5821_v57 = vrot.slane %v5212_v4, %v11560_v31  ;;  %v5758_v28 = vsel %vm3681_vm7, %v5757_v15, %v5753_v47  ;;  %v5688_v50 = vrot.slane %v15855_v3, %v11600_v19  ;;  %v5772_v4 = vrot.slane %v13044_v6, %v11624_v12  ;;  %v15863_v47 = vld [vmem:[#allocation153_spill] sm:$0xff]  ;;  %v15872_v3 = vld [vmem:[#allocation158_spill] sm:$0xff] }
 0x68e   :  { %v5763_v61 = vsel %vm15856_vm10, %v5762_v62, %v5758_v28  ;;  %v15858_v63 = vrot.slane %v15828_v8, %v11600_v19  ;;  %vm15861_vm8 = vcmask 458112   ;;  %v5624_v62 = vrot.slane %v15863_v47, %v11654_v55  ;;  %vm15864_vm10 = vmmov %vm15859_vm0 }
 0x68f   :  { %v5822_v32 = vsel %vm3660_vm4, %v5821_v57, %v5817_v60  ;;  %v5767_v57 = vrot.slane %v15860_v54, %v11600_v19  ;;  %v5689_v10 = vsel %vm15864_vm10, %v5688_v50, %v5684_v33  ;;  %v5836_v60 = vrot.slane %v13156_v20, %v11593_v30  ;;  %v5239_v49 = vpop.permute.xlu1 %5238  ;;  %vm15874_vm10 = vmmov %vm15859_vm0 }
 0x690   :  { %v5218_v18 = vpop.permute.xlu0 %5217  ;;  %v5827_v27 = vsel %vm15847_vm9, %v5826_v34, %v5822_v32  ;;  %v5610_v41 = vsel %vm15859_vm0, %v15858_v63, %v5605_v44  ;;  %vm15865_vm9 = vmmov %vm15862_vm6  ;;  %v5703_v7 = vrot.slane %v15866_v51, %v11654_v55  ;;  %v15867_v32 = vld [vmem:[#allocation144_spill] sm:$0xff]  ;;  %v5555_v34 = vrot.slane %v15869_v40, %v15793_v13  ;;  %v15883_v40 = vld [vmem:[#allocation221_spill] sm:$0xff] }
 0x691   :  { %v5831_v52 = vrot.slane %v5218_v18, %v11586_v0  ;;  %v5615_v6 = vsel %vm15862_vm6, %v5614_v48, %v5610_v41  ;;  %v5694_v8 = vsel %vm15865_vm9, %v5693_v35, %v5689_v10  ;;  %v5768_v36 = vsel %vm15859_vm0, %v5767_v57, %v5763_v61  ;;  %v15873_v41 = vld [vmem:[#allocation156_spill] sm:$0xff] }
 0x692   :  { %v5698_v44 = vrot.slane %v15867_v32, %v11631_v23  ;;  %v5782_v48 = vrot.slane %v13077_v1, %v11654_v55  ;;  %v15870_v18 = vrot.slane %v15830_v38, %v11631_v23  ;;  %v5777_v35 = vrot.slane %v12916_v29, %v11631_v23 }
 0x693   :  { %v5832_v58 = vsel %vm15861_vm8, %v5831_v52, %v5827_v27  ;;  %vm15868_vm8 = vmmov %vm15862_vm6  ;;  %vm15871_vm6 = vcmask 589312   ;;  %v5634_v1 = vrot.slane %v15872_v3, %v15793_v13  ;;  %v5846_v61 = vrot.slane %v5227_v26, %v11600_v19 }
 0x694   :  { %v5224_v24 = vpop.permute.xlu0 %5223  ;;  %v5773_v21 = vsel %vm15868_vm8, %v5772_v4, %v5768_v36  ;;  %v5837_v20 = vsel %vm3681_vm7, %v5836_v60, %v5832_v58  ;;  %v5620_v33 = vsel %vm3709_vm11, %v15870_v18, %v5615_v6  ;;  %v5699_v50 = vsel %vm3709_vm11, %v5698_v44, %v5694_v8  ;;  %vm15875_vm9 = vmmov %vm15868_vm8  ;;  %v15879_v36 = vld [vmem:[#allocation160_spill] sm:$0xff]  ;;  %v15880_v44 = vld [vmem:[#allocation93_spill] sm:$0xff]  ;;  %v5245_v18 = vpop.permute.xlu1 %5244 }
 0x695   :  { %v5841_v15 = vrot.slane %v5224_v24, %v11596_v43  ;;  %v5625_v52 = vsel %vm3716_vm12, %v5624_v62, %v5620_v33  ;;  %v5704_v27 = vsel %vm3716_vm12, %v5703_v7, %v5699_v50  ;;  %v5713_v38 = vrot.slane %v12901_v45, %v15793_v13 }
 0x696   :  { %v5778_v29 = vsel %vm3709_vm11, %v5777_v35, %v5773_v21  ;;  %v5708_v54 = vrot.slane %v15873_v41, %v11657_v5  ;;  %v5792_v58 = vrot.slane %v13107_v9, %v15793_v13  ;;  %v5556_v6 = vsel %vm3730_vm14, %v5555_v34, %v5551_v59  ;;  %v15881_v21 = vld [vmem:[#allocation85_spill] sm:$0xff] }
 0x697   :  { %v5842_v28 = vsel %vm15871_vm6, %v5841_v15, %v5837_v20  ;;  %v5783_v57 = vsel %vm3716_vm12, %v5782_v48, %v5778_v29  ;;  %v5630_v45 = vsel %vm3723_vm13, %v5629_v16, %v5625_v52  ;;  %v5787_v47 = vrot.slane %v12955_v42, %v11657_v5  ;;  %v15877_v16 = vld [vmem:[#allocation126_spill] sm:$0xff] }
 0x698   :  { %v5230_v4 = vpop.permute.xlu0 %5229  ;;  %v5847_v26 = vsel %vm15874_vm10, %v5846_v61, %v5842_v28  ;;  %v15876_v10 = vrot.slane %v15812_v14, %v15802_v37  ;;  %v5635_v60 = vsel %vm3730_vm14, %v5634_v1, %v5630_v45  ;;  %v5709_v59 = vsel %vm3723_vm13, %v5708_v54, %v5704_v27 }
 0x699   :  { %v5851_v63 = vrot.slane %v5230_v4, %v11624_v12  ;;  %v5856_v24 = vrot.slane %v5233_v46, %v11631_v23  ;;  %v5639_v8 = vrot.slane %v15877_v16, %v15802_v37  ;;  %v5714_v42 = vsel %vm3730_vm14, %v5713_v38, %v5709_v59  ;;  %v15895_v16 = vld [vmem:[#allocation169_spill] sm:$0xff] }
 0x69a   :  { %v5482_v9 = vsel %vm3737_vm15, %v15876_v10, %v13110_v25  ;;  %v5788_v51 = vsel %vm3723_vm13, %v5787_v47, %v5783_v57  ;;  %v15878_v14 = vrot.slane %v15820_v53, %v15802_v37  ;;  %v5718_v15 = vrot.slane %v15879_v36, %v15802_v37  ;;  %v15891_v47 = vld [vmem:[#allocation174_spill] sm:$0xff]  ;;  %v15892_v10 = vld [vmem:[#allocation131_spill] sm:$0xff] }
 0x69b   :  { %v5852_v62 = vsel %vm15875_vm9, %v5851_v63, %v5847_v26  ;;  %v5793_v46 = vsel %vm3730_vm14, %v5792_v58, %v5788_v51  ;;  %vm15882_vm0 = vcmask 1041409   ;;  %v5640_v20 = vsel %vm3737_vm15, %v5639_v8, %v5635_v60  ;;  %v15889_v58 = vld [vmem:[#allocation20_spill] sm:$0xff] }
 0x69c   :  { %v5236_v22 = vpop.permute.xlu0 %5235  ;;  %v5561_v25 = vsel %vm3737_vm15, %v15878_v14, %v5556_v6  ;;  %v5857_v32 = vsel %vm3709_vm11, %v5856_v24, %v5852_v62  ;;  %v5878_v48 = vsel %vm15882_vm0, %v15881_v21, %v15880_v44  ;;  %v5797_v34 = vrot.slane %v15883_v40, %v15802_v37  ;;  %v15890_v6 = vld [vmem:[#allocation196_spill] sm:$0xff]  ;;  %v15894_v24 = vld [vmem:[#allocation21_spill] sm:$0xff] }
 0x69d   :  { %v5861_v7 = vrot.slane %v5236_v22, %v11654_v55  ;;  %v5879_v33 = vsel %vm4294_vm5, %v5482_v9, %v5878_v48  ;;  %v5866_v35 = vrot.slane %v5239_v49, %v11657_v5  ;;  %v5719_v52 = vsel %vm3737_vm15, %v5718_v15, %v5714_v42  ;;  %v15893_v60 = vld [vmem:[#allocation96_spill] sm:$0xff]  ;;  %v15896_v42 = vld [vmem:[#allocation170_spill] sm:$0xff]  ;;  %v15899_v15 = vld [vmem:[#allocation177_spill] sm:$0xff] }
 0x69e   :  { %v5798_v1 = vsel %vm3737_vm15, %v5797_v34, %v5793_v46  ;;  %vm15884_vm8 = vcmask 1043459   ;;  %v5876_v61 = vrot.slane %v5245_v18, %v15802_v37  ;;  %vm15885_vm6 = vcmask 1044484   ;;  %v15901_v21 = vld [vmem:[#allocation181_spill] sm:$0xff]  ;;  %v15903_v34 = vld [vmem:[#allocation182_spill] sm:$0xff] }
 0x69f   :  { %v5862_v53 = vsel %vm3716_vm12, %v5861_v7, %v5857_v32  ;;  %v5880_v50 = vsel %vm15884_vm8, %v5561_v25, %v5879_v33  ;;  %vm15886_vm10 = vcmask 1045509   ;;  %vm15887_vm9 = vcmask 1046534   ;;  %v15897_v7 = vld [vmem:[#allocation175_spill] sm:$0xff]  ;;  %v15898_v25 = vld [vmem:[#allocation168_spill] sm:$0xff] }
 0x6a0   :  { %v5242_v28 = vpop.permute.xlu0 %5241  ;;  %v5867_v4 = vsel %vm3723_vm13, %v5866_v35, %v5862_v53  ;;  %v5881_v27 = vsel %vm15885_vm6, %v5640_v20, %v5880_v50  ;;  %vm15888_vm0 = vcmask 1047559   ;;  %v15900_v32 = vld [vmem:[#allocation180_spill] sm:$0xff]  ;;  %v15902_v20 = vld [vmem:[#allocation171_spill] sm:$0xff]  ;;  %v15904_v53 = vld [vmem:[#allocation178_spill] sm:$0xff]  ;;  %vm16041_vm8 = vcmask 392512  }
 0x6a1   :  { %v5871_v3 = vrot.slane %v5242_v28, %v15793_v13  ;;  %v5882_v29 = vsel %vm15886_vm10, %v5719_v52, %v5881_v27  ;;  %v15905_v35 = vld [vmem:[#allocation172_spill] sm:$0xff]  ;;  %v15906_v52 = vld [vmem:[#allocation113_spill] sm:$0xff]  ;;  %vm16044_vm6 = vcmask 458112   ;;  %vm16051_vm10 = vcmask 589312  }
 0x6a2   :  { %v5883_v63 = vsel %vm15887_vm9, %v5798_v1, %v5882_v29  ;;  %v15907_v1 = vld [vmem:[#allocation183_spill] sm:$0xff]  ;;  %v15909_v27 = vld [vmem:[#allocation197_spill] sm:$0xff]  ;;  %v15910_v29 = vld [vmem:[#allocation184_spill] sm:$0xff]  ;;  %vm16055_vm9 = vcmask 654912  }
 0x6a3   :  { %v5872_v38 = vsel %vm3730_vm14, %v5871_v3, %v5867_v4 }
 0x6a4   :  { %v5877_v49 = vsel %vm3737_vm15, %v5876_v61, %v5872_v38  ;;  %v15908_v61 = vld [vmem:[#allocation134_spill] sm:$0xff] }
 0x6a5   :  { %v5884_v41 = vsel %vm15888_vm0, %v5877_v49, %v5883_v63  ;;  %v15911_v63 = vld [vmem:[#allocation22_spill] sm:$0xff]  ;;  %vm16058_vm0 = vcmask 720512  }
 0x6a6   :  { %5886 = vadd.xlane.f32.xlu0 %v5884_v41 }
 0x733   :  { %v5887_v54 = vpop.xlane.xlu0 %5886 }
 0x734   :  { %8697 = vrcp.f32 %v5887_v54  ;;  %v15912_v54 = vld [vmem:[#allocation198_spill] sm:$0xff] }
 0x73e   :  { %v13325_v57 = vpop.eup %8697 }
 0x73f   :  { %v5893_v26 = vrot.slane %v13325_v57, %v15889_v58  ;;  %v13335_v22 = vrot.slane %v13325_v57, %v15894_v24  ;;  %v13363_v41 = vrot.slane %v13325_v57, %v15911_v63  ;;  %v15917_v24 = vld [vmem:[#allocation185_spill] sm:$0xff]  ;;  %v15934_v63 = vld [vmem:[#allocation208_spill] sm:$0xff] }
 0x741   :  { %v5938_v45 = vmul.f32 %v15890_v6, %v5893_v26  ;;  %v5930_v62 = vmul.f32 %v15891_v47, %v5893_v26  ;;  %v5945_v9 = vmul.f32 %v15892_v10, %v5893_v26  ;;  %v5931_v59 = vmul.f32 %v15893_v60, %v5893_v26  ;;  %v15913_v6 = vld [vmem:[#allocation179_spill] sm:$0xff]  ;;  %v15915_v10 = vld [vmem:[#allocation213_spill] sm:$0xff] }
 0x742   :  { %v5947_v8 = vmul.f32 %v15895_v16, %v13335_v22  ;;  %v5932_v51 = vmul.f32 %v15896_v42, %v5893_v26  ;;  %v5949_v14 = vmul.f32 %v15897_v7, %v13335_v22  ;;  %v5933_v36 = vmul.f32 %v15898_v25, %v5893_v26  ;;  %v15914_v47 = vld [vmem:[#allocation123_spill] sm:$0xff]  ;;  %v15916_v60 = vld [vmem:[#allocation173_spill] sm:$0xff] }
 0x743   :  { %6228 = vperm.xlu0 %8167, %v5938_v45   ;;  %6188 = vperm.xlu1 %8168, %v5930_v62   ;;  %v5951_v46 = vmul.f32 %v15899_v15, %v13335_v22  ;;  %v5934_v44 = vmul.f32 %v15900_v32, %v5893_v26  ;;  %v5953_v48 = vmul.f32 %v15901_v21, %v13335_v22 }
 0x744   :  { %v5935_v40 = vmul.f32 %v15902_v20, %v5893_v26  ;;  %v5955_v18 = vmul.f32 %v15903_v34, %v13335_v22  ;;  %v5936_v33 = vmul.f32 %v15904_v53, %v5893_v26  ;;  %v5957_v28 = vmul.f32 %v15905_v35, %v13335_v22  ;;  %v15925_v20 = vld [vmem:[#allocation202_spill] sm:$0xff]  ;;  %v15926_v34 = vld [vmem:[#allocation188_spill] sm:$0xff]  ;;  %v15927_v53 = vld [vmem:[#allocation203_spill] sm:$0xff] }
 0x745   :  { %v5937_v3 = vmul.f32 %v15906_v52, %v5893_v26  ;;  %v5959_v50 = vmul.f32 %v15907_v1, %v13335_v22  ;;  %v5939_v4 = vmul.f32 %v15908_v61, %v5893_v26  ;;  %v5961_v38 = vmul.f32 %v15909_v27, %v13335_v22  ;;  %v15928_v35 = vld [vmem:[#allocation23_spill] sm:$0xff]  ;;  %v15929_v52 = vld [vmem:[#allocation189_spill] sm:$0xff]  ;;  %v15930_v1 = vld [vmem:[#allocation204_spill] sm:$0xff] }
 0x746   :  { %v5940_v49 = vmul.f32 %v15910_v29, %v5893_v26  ;;  %v5963_v58 = vmul.f32 %v15912_v54, %v13363_v41  ;;  %v5941_v45 = vmul.f32 %v15913_v6, %v5893_v26  ;;  %v5965_v62 = vmul.f32 %v15914_v47, %v13363_v41  ;;  %v15931_v61 = vld [vmem:[#allocation205_spill] sm:$0xff]  ;;  %v15932_v27 = vld [vmem:[#allocation164_spill] sm:$0xff]  ;;  %v15933_v29 = vld [vmem:[#allocation190_spill] sm:$0xff] }
 0x747   :  { %6263 = vperm.xlu0 %8167, %v5945_v9   ;;  %6193 = vperm.xlu1 %8168, %v5931_v59   ;;  %v5942_v9 = vmul.f32 %v15915_v10, %v5893_v26  ;;  %v5967_v59 = vmul.f32 %v15916_v60, %v13363_v41  ;;  %v5943_v16 = vmul.f32 %v15917_v24, %v5893_v26 }
 0x748   :  { %v5958_v54 = vmul.f32 %v15934_v63, %v13335_v22 }
 0x74b   :  { %6273 = vperm.xlu0 %8167, %v5947_v8   ;;  %6198 = vperm.xlu1 %8168, %v5932_v51   ;;  %v15918_v8 = vld [vmem:[#allocation199_spill] sm:$0xff]  ;;  %v15919_v51 = vld [vmem:[#allocation186_spill] sm:$0xff] }
 0x74c   :  { %v5969_v42 = vmul.f32 %v15918_v8, %v13363_v41  ;;  %v5944_v7 = vmul.f32 %v15919_v51, %v5893_v26  ;;  %v15924_v26 = vld [vmem:[#allocation187_spill] sm:$0xff] }
 0x74d   :  { %v15942_v51 = vld [vmem:[#allocation211_spill] sm:$0xff] }
 0x74f   :  { %6283 = vperm.xlu0 %8167, %v5949_v14   ;;  %6203 = vperm.xlu1 %8168, %v5933_v36   ;;  %v15920_v14 = vld [vmem:[#allocation200_spill] sm:$0xff]  ;;  %v15921_v36 = vld [vmem:[#allocation166_spill] sm:$0xff] }
 0x750   :  { %v5971_v25 = vmul.f32 %v15920_v14, %v13363_v41  ;;  %v5946_v15 = vmul.f32 %v15921_v36, %v13335_v22  ;;  %v15943_v14 = vld [vmem:[#allocation108_spill] sm:$0xff]  ;;  %v15944_v36 = vld [vmem:[#allocation195_spill] sm:$0xff] }
 0x753   :  { %6293 = vperm.xlu0 %8167, %v5951_v46   ;;  %6208 = vperm.xlu1 %8168, %v5934_v44   ;;  %v15922_v46 = vld [vmem:[#allocation81_spill] sm:$0xff] }
 0x754   :  { %v5973_v32 = vmul.f32 %v15922_v46, %v13363_v41  ;;  %v15923_v44 = vld [vmem:[#allocation201_spill] sm:$0xff]  ;;  %v15945_v46 = vld [vmem:[#allocation24_spill] sm:$0xff] }
 0x755   :  { %v5948_v21 = vmul.f32 %v15923_v44, %v13335_v22  ;;  %v15946_v44 = vld [vmem:[#allocation212_spill] sm:$0xff] }
 0x757   :  { %6303 = vperm.xlu0 %8167, %v5953_v48   ;;  %6213 = vperm.xlu1 %8168, %v5935_v40   ;;  %v5975_v48 = vmul.f32 %v15924_v26, %v13363_v41  ;;  %v5950_v40 = vmul.f32 %v15925_v20, %v13335_v22  ;;  %v15947_v26 = vld [vmem:[#allocation36_spill] sm:$0xff]  ;;  %v15948_v20 = vld [vmem:[#allocation27_spill] sm:$0xff] }
 0x75b   :  { %6313 = vperm.xlu0 %8167, %v5955_v18   ;;  %6218 = vperm.xlu1 %8168, %v5936_v33   ;;  %v5977_v18 = vmul.f32 %v15926_v34, %v13363_v41  ;;  %v5952_v33 = vmul.f32 %v15927_v53, %v13335_v22  ;;  %v15949_v34 = vld [vmem:[#allocation42_spill] sm:$0xff] }
 0x75c   :  { %v15950_v53 = vld [vmem:[#allocation26_spill] sm:$0xff] }
 0x75f   :  { %6323 = vperm.xlu0 %8167, %v5957_v28   ;;  %6223 = vperm.xlu1 %8168, %v5937_v3   ;;  %v13395_v28 = vrot.slane %v13325_v57, %v15928_v35  ;;  %v15951_v35 = vld [vmem:[#allocation44_spill] sm:$0xff] }
 0x761   :  { %v5979_v3 = vmul.f32 %v15929_v52, %v13395_v28  ;;  %v5974_v52 = vmul.f32 %v15951_v35, %v13363_v41 }
 0x763   :  { %6333 = vperm.xlu0 %8167, %v5959_v50   ;;  %6233 = vperm.xlu1 %8168, %v5939_v4   ;;  %v5954_v50 = vmul.f32 %v15930_v1, %v13335_v22  ;;  %v5981_v4 = vmul.f32 %v15931_v61, %v13395_v28 }
 0x767   :  { %6343 = vperm.xlu0 %8167, %v5961_v38   ;;  %6238 = vperm.xlu1 %8168, %v5940_v49   ;;  %v5956_v38 = vmul.f32 %v15932_v27, %v13335_v22  ;;  %v5983_v49 = vmul.f32 %v15933_v29, %v13395_v28 }
 0x76b   :  { %6353 = vperm.xlu0 %8167, %v5963_v58   ;;  %6243 = vperm.xlu1 %8168, %v5941_v45   ;;  %v15935_v58 = vld [vmem:[#allocation191_spill] sm:$0xff]  ;;  %v15936_v45 = vld [vmem:[#allocation209_spill] sm:$0xff] }
 0x76c   :  { %v5985_v6 = vmul.f32 %v15935_v58, %v13395_v28  ;;  %v5960_v47 = vmul.f32 %v15936_v45, %v13335_v22  ;;  %v15941_v22 = vld [vmem:[#allocation194_spill] sm:$0xff] }
 0x76f   :  { %6363 = vperm.xlu0 %8167, %v5965_v62   ;;  %6248 = vperm.xlu1 %8168, %v5942_v9   ;;  %v15937_v62 = vld [vmem:[#allocation192_spill] sm:$0xff]  ;;  %v15938_v9 = vld [vmem:[#allocation210_spill] sm:$0xff] }
 0x770   :  { %v5987_v10 = vmul.f32 %v15937_v62, %v13395_v28  ;;  %v5962_v60 = vmul.f32 %v15938_v9, %v13363_v41  ;;  %v15960_v62 = vld [vmem:[#allocation52_spill] sm:$0xff]  ;;  %v15961_v9 = vld [vmem:[#allocation31_spill] sm:$0xff] }
 0x773   :  { %6373 = vperm.xlu0 %8167, %v5967_v59   ;;  %6253 = vperm.xlu1 %8168, %v5943_v16   ;;  %v15939_v59 = vld [vmem:[#allocation115_spill] sm:$0xff]  ;;  %v15940_v16 = vld [vmem:[#allocation193_spill] sm:$0xff] }
 0x774   :  { %v5989_v24 = vmul.f32 %v15939_v59, %v13395_v28  ;;  %v5964_v8 = vmul.f32 %v15940_v16, %v13363_v41  ;;  %v15962_v59 = vld [vmem:[#allocation136_spill] sm:$0xff] }
 0x777   :  { %6383 = vperm.xlu0 %8167, %v5969_v42   ;;  %6258 = vperm.xlu1 %8168, %v5944_v7   ;;  %v5991_v42 = vmul.f32 %v15941_v22, %v13395_v28  ;;  %v5966_v7 = vmul.f32 %v15942_v51, %v13363_v41  ;;  %v15964_v22 = vld [vmem:[#allocation34_spill] sm:$0xff]  ;;  %v15965_v51 = vld [vmem:[#allocation56_spill] sm:$0xff] }
 0x77b   :  { %6393 = vperm.xlu0 %8167, %v5971_v25   ;;  %6268 = vperm.xlu1 %8168, %v5946_v15   ;;  %v5993_v25 = vmul.f32 %v15943_v14, %v13395_v28  ;;  %v5968_v15 = vmul.f32 %v15944_v36, %v13363_v41  ;;  %v15966_v36 = vld [vmem:[#allocation33_spill] sm:$0xff] }
 0x77f   :  { %6403 = vperm.xlu0 %8167, %v5973_v32   ;;  %6278 = vperm.xlu1 %8168, %v5948_v21   ;;  %v13431_v32 = vrot.slane %v13325_v57, %v15945_v46  ;;  %v15967_v46 = vld [vmem:[#allocation58_spill] sm:$0xff] }
 0x781   :  { %v5995_v21 = vmul.f32 %v15946_v44, %v13431_v32 }
 0x783   :  { %6413 = vperm.xlu0 %8167, %v5975_v48   ;;  %6288 = vperm.xlu1 %8168, %v5950_v40   ;;  %v5970_v48 = vmul.f32 %v15947_v26, %v13363_v41  ;;  %v5997_v40 = vmul.f32 %v15948_v20, %v13431_v32 }
 0x787   :  { %6423 = vperm.xlu0 %8167, %v5977_v18   ;;  %6298 = vperm.xlu1 %8168, %v5952_v33   ;;  %v5972_v18 = vmul.f32 %v15949_v34, %v13363_v41  ;;  %v5999_v33 = vmul.f32 %v15950_v53, %v13431_v32 }
 0x78b   :  { %6433 = vperm.xlu0 %8167, %v5979_v3   ;;  %6308 = vperm.xlu1 %8168, %v5954_v50   ;;  %v15952_v3 = vld [vmem:[#allocation28_spill] sm:$0xff]  ;;  %v15953_v50 = vld [vmem:[#allocation46_spill] sm:$0xff] }
 0x78c   :  { %v6001_v1 = vmul.f32 %v15952_v3, %v13431_v32  ;;  %v5976_v61 = vmul.f32 %v15953_v50, %v13363_v41  ;;  %v15958_v41 = vld [vmem:[#allocation32_spill] sm:$0xff] }
 0x78f   :  { %6443 = vperm.xlu0 %8167, %v5981_v4   ;;  %6318 = vperm.xlu1 %8168, %v5956_v38   ;;  %v15954_v4 = vld [vmem:[#allocation30_spill] sm:$0xff]  ;;  %v15955_v38 = vld [vmem:[#allocation48_spill] sm:$0xff] }
 0x790   :  { %v6003_v27 = vmul.f32 %v15954_v4, %v13431_v32  ;;  %v5978_v29 = vmul.f32 %v15955_v38, %v13395_v28 }
 0x793   :  { %6453 = vperm.xlu0 %8167, %v5983_v49   ;;  %6328 = vperm.xlu1 %8168, %v5958_v54   ;;  %v15956_v49 = vld [vmem:[#allocation29_spill] sm:$0xff]  ;;  %v15957_v54 = vld [vmem:[#allocation50_spill] sm:$0xff] }
 0x794   :  { %v6005_v63 = vmul.f32 %v15956_v49, %v13431_v32  ;;  %v5980_v58 = vmul.f32 %v15957_v54, %v13395_v28 }
 0x797   :  { %6463 = vperm.xlu0 %8167, %v5985_v6   ;;  %6338 = vperm.xlu1 %8168, %v5960_v47   ;;  %v6007_v6 = vmul.f32 %v15958_v41, %v13431_v32 }
 0x79b   :  { %6473 = vperm.xlu0 %8167, %v5987_v10   ;;  %6348 = vperm.xlu1 %8168, %v5962_v60   ;;  %v5982_v10 = vmul.f32 %v15960_v62, %v13395_v28  ;;  %v6009_v60 = vmul.f32 %v15961_v9, %v13431_v32  ;;  %v15976_v62 = vld [vmem:[#allocation39_spill] sm:$0xff]  ;;  %v15977_v9 = vld [vmem:[#allocation68_spill] sm:$0xff] }
 0x79f   :  { %6483 = vperm.xlu0 %8167, %v5989_v24   ;;  %6358 = vperm.xlu1 %8168, %v5964_v8   ;;  %v13469_v24 = vrot.slane %v13325_v57, %v15962_v59 }
 0x7a1   :  { %v6013_v44 = vmul.f32 %v15967_v46, %v13469_v24 }
 0x7a3   :  { %6493 = vperm.xlu0 %8167, %v5991_v42   ;;  %6368 = vperm.xlu1 %8168, %v5966_v7   ;;  %v5984_v42 = vmul.f32 %v15964_v22, %v13395_v28  ;;  %v6011_v7 = vmul.f32 %v15965_v51, %v13469_v24 }
 0x7a7   :  { %6503 = vperm.xlu0 %8167, %v5993_v25   ;;  %6378 = vperm.xlu1 %8168, %v5968_v15   ;;  %v5986_v15 = vmul.f32 %v15966_v36, %v13395_v28 }
 0x7ab   :  { %6513 = vperm.xlu0 %8167, %v5995_v21   ;;  %6388 = vperm.xlu1 %8168, %v5970_v48   ;;  %v15968_v48 = vld [vmem:[#allocation35_spill] sm:$0xff] }
 0x7ac   :  { %v5988_v20 = vmul.f32 %v15968_v48, %v13395_v28 }
 0x7af   :  { %6523 = vperm.xlu0 %8167, %v5997_v40   ;;  %6398 = vperm.xlu1 %8168, %v5972_v18   ;;  %v15969_v40 = vld [vmem:[#allocation60_spill] sm:$0xff] }
 0x7b0   :  { %v6015_v34 = vmul.f32 %v15969_v40, %v13469_v24 }
 0x7b3   :  { %6533 = vperm.xlu0 %8167, %v5999_v33   ;;  %6408 = vperm.xlu1 %8168, %v5974_v52   ;;  %v15970_v33 = vld [vmem:[#allocation38_spill] sm:$0xff] }
 0x7b4   :  { %v5990_v35 = vmul.f32 %v15970_v33, %v13395_v28  ;;  %v15971_v52 = vld [vmem:[#allocation62_spill] sm:$0xff] }
 0x7b5   :  { %v6017_v3 = vmul.f32 %v15971_v52, %v13469_v24 }
 0x7b7   :  { %6543 = vperm.xlu0 %8167, %v6001_v1   ;;  %6418 = vperm.xlu1 %8168, %v5976_v61   ;;  %v15972_v61 = vld [vmem:[#allocation37_spill] sm:$0xff] }
 0x7b8   :  { %v5992_v4 = vmul.f32 %v15972_v61, %v13395_v28 }
 0x7bb   :  { %6553 = vperm.xlu0 %8167, %v6003_v27   ;;  %6428 = vperm.xlu1 %8168, %v5978_v29   ;;  %v15973_v27 = vld [vmem:[#allocation64_spill] sm:$0xff] }
 0x7bc   :  { %v6019_v38 = vmul.f32 %v15973_v27, %v13469_v24 }
 0x7bf   :  { %6563 = vperm.xlu0 %8167, %v6005_v63   ;;  %6438 = vperm.xlu1 %8168, %v5980_v58   ;;  %v15974_v63 = vld [vmem:[#allocation40_spill] sm:$0xff]  ;;  %v15975_v58 = vld [vmem:[#allocation66_spill] sm:$0xff] }
 0x7c0   :  { %v5994_v54 = vmul.f32 %v15974_v63, %v13431_v32  ;;  %v6021_v41 = vmul.f32 %v15975_v58, %v13469_v24 }
 0x7c2   :  { %v13459_v45 = vpop.permute.xlu0 %6228  ;;  %v13461_v47 = vpop.permute.xlu1 %6188 }
 0x7c3   :  { %15959 = vst [vmem:[#allocation150_spill] sm:$0xff] %v13459_v45  ;;  %6573 = vperm.xlu0 %8167, %v6007_v6   ;;  %6448 = vperm.xlu1 %8168, %v5982_v10   ;;  %v5996_v10 = vmul.f32 %v15976_v62, %v13431_v32 }
 0x7c6   :  { %v13471_v16 = vpop.permute.xlu0 %6263  ;;  %v13473_v8 = vpop.permute.xlu1 %6193 }
 0x7c7   :  { %15963 = vst [vmem:[#allocation109_spill] sm:$0xff] %v13471_v16  ;;  %6583 = vperm.xlu0 %8167, %v6009_v60   ;;  %6458 = vperm.xlu1 %8168, %v5984_v42   ;;  %v6023_v60 = vmul.f32 %v15977_v9, %v13469_v24  ;;  %v15980_v42 = vld [vmem:[#allocation70_spill] sm:$0xff] }
 0x7c8   :  { %v5998_v51 = vmul.f32 %v15980_v42, %v13431_v32 }
 0x7ca   :  { %v13479_v14 = vpop.permute.xlu0 %6273  ;;  %v13481_v25 = vpop.permute.xlu1 %6198 }
 0x7cb   :  { %6593 = vperm.xlu0 %8167, %v6011_v7   ;;  %6468 = vperm.xlu1 %8168, %v5986_v15   ;;  %v15981_v7 = vld [vmem:[#allocation43_spill] sm:$0xff]  ;;  %v15982_v15 = vld [vmem:[#allocation145_spill] sm:$0xff] }
 0x7cc   :  { %v6025_v36 = vmul.f32 %v15981_v7, %v13469_v24  ;;  %v13537_v46 = vrot.slane %v13325_v57, %v15982_v15  ;;  %v15999_v7 = vld [vmem:[#allocation103_spill] sm:$0xff]  ;;  %v13575_v15 = vld [vmem:[#allocation5 + $0xe0] sm:$0xff]  }
 0x7cd   :  { %16000 = vst [vmem:[#allocation65_spill] sm:$0xff] %v13575_v15 }
 0x7ce   :  { %v13487_v21 = vpop.permute.xlu0 %6283  ;;  %v13489_v26 = vpop.permute.xlu1 %6203 }
 0x7cf   :  { %6603 = vperm.xlu0 %8167, %v6013_v44   ;;  %6478 = vperm.xlu1 %8168, %v5988_v20   ;;  %v15985_v20 = vld [vmem:[#allocation45_spill] sm:$0xff] }
 0x7d0   :  { %v6000_v40 = vmul.f32 %v15985_v20, %v13431_v32 }
 0x7d2   :  { %v13495_v18 = vpop.permute.xlu0 %6293  ;;  %v13497_v53 = vpop.permute.xlu1 %6208 }
 0x7d3   :  { %6613 = vperm.xlu0 %8167, %v6015_v34   ;;  %6488 = vperm.xlu1 %8168, %v5990_v35   ;;  %v15986_v34 = vld [vmem:[#allocation74_spill] sm:$0xff] }
 0x7d4   :  { %v6027_v33 = vmul.f32 %v15986_v34, %v13537_v46 }
 0x7d6   :  { %v13503_v1 = vpop.permute.xlu0 %6303  ;;  %v13505_v50 = vpop.permute.xlu1 %6213 }
 0x7d7   :  { %6623 = vperm.xlu0 %8167, %v6017_v3   ;;  %6498 = vperm.xlu1 %8168, %v5992_v4   ;;  %v15989_v3 = vld [vmem:[#allocation47_spill] sm:$0xff]  ;;  %v15990_v4 = vld [vmem:[#allocation76_spill] sm:$0xff] }
 0x7d8   :  { %v6002_v61 = vmul.f32 %v15989_v3, %v13431_v32  ;;  %v6029_v27 = vmul.f32 %v15990_v4, %v13537_v46 }
 0x7da   :  { %v13511_v29 = vpop.permute.xlu0 %6313  ;;  %v13513_v49 = vpop.permute.xlu1 %6218 }
 0x7db   :  { %6633 = vperm.xlu0 %8167, %v6019_v38   ;;  %6508 = vperm.xlu1 %8168, %v5994_v54   ;;  %v15991_v38 = vld [vmem:[#allocation154_spill] sm:$0xff] }
 0x7dc   :  { %v13557_v63 = vrot.slane %v13325_v57, %v15991_v38  ;;  %v13598_v38 = vld [vmem:[#allocation5 + $0x50] sm:$0xff]  }
 0x7de   :  { %v13519_v6 = vpop.permute.xlu0 %6323  ;;  %v13521_v28 = vpop.permute.xlu1 %6223 }
 0x7df   :  { %6643 = vperm.xlu0 %8167, %v6021_v41   ;;  %6518 = vperm.xlu1 %8168, %v5996_v10   ;;  %v15994_v41 = vld [vmem:[#allocation49_spill] sm:$0xff]  ;;  %v15995_v10 = vld [vmem:[#allocation146_spill] sm:$0xff] }
 0x7e0   :  { %v6004_v62 = vmul.f32 %v15994_v41, %v13431_v32  ;;  %v6042_v9 = vmul.f32 %v15995_v10, %v13557_v63  ;;  %v13590_v41 = vld [vmem:[#allocation5 + $0x38] sm:$0xff]   ;;  %v8706_v10 = vld [vmem:[#allocation5 + $0x40] sm:$0xff]  }
 0x7e1   :  { %16004 = vst [vmem:[#allocation84_spill] sm:$0xff] %v13590_v41 }
 0x7e2   :  { %v13527_v59 = vpop.permute.xlu0 %6333  ;;  %v13529_v22 = vpop.permute.xlu1 %6233 }
 0x7e3   :  { %15978 = vst [vmem:[#allocation80_spill] sm:$0xff] %v13527_v59  ;;  %15979 = vst [vmem:[#allocation137_spill] sm:$0xff] %v13529_v22  ;;  %6653 = vperm.xlu0 %8167, %v6023_v60   ;;  %6528 = vperm.xlu1 %8168, %v5998_v51   ;;  %v15998_v51 = vld [vmem:[#allocation51_spill] sm:$0xff] }
 0x7e4   :  { %v6006_v57 = vmul.f32 %v15998_v51, %v13431_v32  ;;  %v16005_v51 = vld [vmem:[#allocation148_spill] sm:$0xff] }
 0x7e6   :  { %v13539_v44 = vpop.permute.xlu0 %6343  ;;  %v13541_v48 = vpop.permute.xlu1 %6238 }
 0x7e7   :  { %15983 = vst [vmem:[#allocation41_spill] sm:$0xff] %v13539_v44  ;;  %15984 = vst [vmem:[#allocation92_spill] sm:$0xff] %v13541_v48  ;;  %6663 = vperm.xlu0 %8167, %v6025_v36   ;;  %6538 = vperm.xlu1 %8168, %v6000_v40   ;;  %v6044_v36 = vmul.f32 %v15999_v7, %v13557_v63  ;;  %v13594_v7 = vld [vmem:[#allocation5 + $0x8] sm:$0xff]  }
 0x7e8   :  { %v13622_v48 = vld [vmem:[#allocation5 + $0x68] sm:$0xff]  }
 0x7e9   :  { %v16013_v44 = vld [vmem:[#allocation89_spill] sm:$0xff] }
 0x7ea   :  { %v13547_v35 = vpop.permute.xlu0 %6353  ;;  %v13549_v52 = vpop.permute.xlu1 %6243  ;;  %v6049_v4 = vmul.f32 %v16013_v44, %v13557_v63  ;;  %v7225_v44 = vrot.slane %v13479_v14, %v11534_v2 }
 0x7eb   :  { %15987 = vst [vmem:[#allocation54_spill] sm:$0xff] %v13547_v35  ;;  %15988 = vst [vmem:[#allocation71_spill] sm:$0xff] %v13549_v52  ;;  %6673 = vperm.xlu0 %8167, %v6027_v33   ;;  %6548 = vperm.xlu1 %8168, %v6002_v61   ;;  %v16003_v33 = vld [vmem:[#allocation53_spill] sm:$0xff]  ;;  %v13584_v61 = vld [vmem:[#allocation5 + $0x20] sm:$0xff]  }
 0x7ec   :  { %v6008_v3 = vmul.f32 %v16003_v33, %v13431_v32  ;;  %v8708_v33 = vld [vmem:[#allocation5 + $0x48] sm:$0xff]   ;;  %v16011_v35 = vld [vmem:[#allocation118_spill] sm:$0xff] }
 0x7ed   :  { %v6077_v20 = vunpack.c.h.bf16 %v8708_v33  ;;  %v6076_v52 = vunpack.c.l.bf16 %v8708_v33  ;;  %v16008_v32 = vld [vmem:[#allocation97_spill] sm:$0xff] }
 0x7ee   :  { %v13559_v54 = vpop.permute.xlu0 %6363  ;;  %v13561_v58 = vpop.permute.xlu1 %6248 }
 0x7ef   :  { %15992 = vst [vmem:[#allocation72_spill] sm:$0xff] %v13559_v54  ;;  %15993 = vst [vmem:[#allocation121_spill] sm:$0xff] %v13561_v58  ;;  %6683 = vperm.xlu0 %8167, %v6029_v27   ;;  %6558 = vperm.xlu1 %8168, %v6004_v62   ;;  %v13587_v27 = vld [vmem:[#allocation5] sm:$0xff]   ;;  %v13601_v62 = vld [vmem:[#allocation5 + $0x10] sm:$0xff]  }
 0x7f2   :  { %v13567_v60 = vpop.permute.xlu0 %6373  ;;  %v13569_v42 = vpop.permute.xlu1 %6253 }
 0x7f3   :  { %15996 = vst [vmem:[#allocation59_spill] sm:$0xff] %v13567_v60  ;;  %15997 = vst [vmem:[#allocation116_spill] sm:$0xff] %v13569_v42  ;;  %6748 = vperm.xlu0 %8167, %v6042_v9   ;;  %6568 = vperm.xlu1 %8168, %v6006_v57   ;;  %v6074_v9 = vunpack.c.l.bf16 %v8706_v10  ;;  %v6075_v57 = vunpack.c.h.bf16 %v8706_v10  ;;  %v6046_v10 = vmul.f32 %v16005_v51, %v13557_v63  ;;  %v16007_v42 = vld [vmem:[#allocation57_spill] sm:$0xff] }
 0x7f4   :  { %v6010_v58 = vmul.f32 %v16007_v42, %v13469_v24  ;;  %v16010_v42 = vld [vmem:[#allocation63_spill] sm:$0xff]  ;;  %v6016_v51 = vmul.f32 %v16011_v35, %v13469_v24 }
 0x7f5   :  { %v6014_v15 = vmul.f32 %v16010_v42, %v13469_v24  ;;  %v16016_v42 = vld [vmem:[#allocation69_spill] sm:$0xff] }
 0x7f6   :  { %v13578_v40 = vpop.permute.xlu0 %6383  ;;  %v13580_v34 = vpop.permute.xlu1 %6258  ;;  %v13645_v35 = vmul.f32 %v16016_v42, %v13469_v24 }
 0x7f7   :  { %16001 = vst [vmem:[#allocation112_spill] sm:$0xff] %v13578_v40  ;;  %16002 = vst [vmem:[#allocation77_spill] sm:$0xff] %v13580_v34  ;;  %6758 = vperm.xlu0 %8167, %v6044_v36   ;;  %6578 = vperm.xlu1 %8168, %v6008_v3   ;;  %v13606_v40 = vld [vmem:[#allocation5 + $0x58] sm:$0xff]   ;;  %v13610_v3 = vld [vmem:[#allocation5 + $0x60] sm:$0xff]   ;;  %v6012_v34 = vmul.f32 %v16008_v32, %v13469_v24 }
 0x7f8   :  { %v13617_v36 = vld [vmem:[#allocation5 + $0x18] sm:$0xff]  }
 0x7f9   :  { %v16012_v32 = vld [vmem:[#allocation155_spill] sm:$0xff] }
 0x7fa   :  { %v13613_v60 = vpop.permute.xlu0 %6393  ;;  %v6269_v16 = vpop.permute.xlu1 %6268 }
 0x7fb   :  { %16006 = vst [vmem:[#allocation98_spill] sm:$0xff] %v13613_v60  ;;  %v6842_v54 = vmul.f32 %v6269_v16, %v6074_v9  ;;  %6768 = vperm.xlu0 %8167, %v6046_v10   ;;  %6588 = vperm.xlu1 %8168, %v6010_v58   ;;  %v16009_v60 = vld [vmem:[#allocation73_spill] sm:$0xff]  ;;  %v6843_v9 = vmul.f32 %v13479_v14, %v6075_v57  ;;  %v16017_v57 = vld [vmem:[#allocation88_spill] sm:$0xff] }
 0x7fc   :  { %v6047_v22 = vmul.f32 %v16009_v60, %v13557_v63  ;;  %v7221_v33 = vrot.slane %v6269_v16, %v11538_v39  ;;  %v6048_v10 = vmul.f32 %v16012_v32, %v13557_v63  ;;  %v16015_v60 = vld [vmem:[#allocation124_spill] sm:$0xff]  ;;  %v13649_v16 = vmul.f32 %v16017_v57, %v13557_v63  ;;  %v16018_v32 = vld [vmem:[#allocation111_spill] sm:$0xff] }
 0x7fd   :  { %v13641_v13 = vmul.f32 %v16015_v60, %v13557_v63  ;;  %v13653_v39 = vmul.f32 %v16018_v32, %v13469_v24  ;;  %v16019_v60 = vld [vmem:[#allocation130_spill] sm:$0xff]  ;;  %v6078_v57 = vunpack.c.l.bf16 %v13598_v38  ;;  %v16020_v32 = vld [vmem:[#allocation75_spill] sm:$0xff]  ;;  %v6845_v14 = vmul.f32 %v13487_v21, %v6077_v20  ;;  %v16025_v20 = vld [vmem:[#allocation100_spill] sm:$0xff] }
 0x7fe   :  { %v13637_v58 = vpop.permute.xlu0 %6403  ;;  %v6279_v37 = vpop.permute.xlu1 %6278  ;;  %v13659_v45 = vmul.f32 %v16019_v60, %v13557_v63  ;;  %v13666_v59 = vmul.f32 %v16020_v32, %v13469_v24  ;;  %v16024_v32 = vld [vmem:[#allocation157_spill] sm:$0xff] }
 0x7ff   :  { %16014 = vst [vmem:[#allocation104_spill] sm:$0xff] %v13637_v58  ;;  %v6975_v58 = vadd.f32 %v6843_v9, %v6842_v54  ;;  %v6844_v41 = vmul.f32 %v6279_v37, %v6076_v52  ;;  %6773 = vperm.xlu0 %8167, %v6047_v22   ;;  %v7230_v5 = vrot.slane %v6279_v37, %v11542_v11  ;;  %v16021_v54 = vld [vmem:[#allocation114_spill] sm:$0xff] }
 0x800   :  { %6598 = vperm.xlu1 %8168, %v6012_v34   ;;  %v7226_v52 = vsel %vm3639_vm1, %v7225_v44, %v7221_v33  ;;  %v13672_v9 = vmul.f32 %v16021_v54, %v13557_v63  ;;  %v16023_v34 = vld [vmem:[#allocation94_spill] sm:$0xff]  ;;  %v13683_v2 = vmul.f32 %v16024_v32, %v13557_v63  ;;  %v7235_v33 = vrot.slane %v13487_v21, %v11554_v17 }
 0x801   :  { %v6976_v22 = vadd.f32 %v6975_v58, %v6844_v41  ;;  %v7231_v60 = vsel %vm3646_vm2, %v7230_v5, %v7226_v52  ;;  %v13679_v11 = vmul.f32 %v16023_v34, %v13469_v24  ;;  %v13687_v41 = vmul.f32 %v16025_v20, %v13537_v46  ;;  %v16026_v5 = vld [vmem:[#allocation125_spill] sm:$0xff]  ;;  %v16027_v24 = vld [vmem:[#allocation99_spill] sm:$0xff]  ;;  %v13699_v54 = vld [vmem:[#allocation5 + $0x70] sm:$0xff]  }
 0x802   :  { %v13675_v42 = vpop.permute.xlu0 %6413  ;;  %v6289_v37 = vpop.permute.xlu1 %6288  ;;  %v13693_v44 = vmul.f32 %v16026_v5, %v13557_v63  ;;  %v13697_v52 = vmul.f32 %v16027_v24, %v13537_v46  ;;  %v6080_v21 = vunpack.c.l.bf16 %v13606_v40  ;;  %v16030_v5 = vld [vmem:[#allocation163_spill] sm:$0xff] }
 0x803   :  { %16022 = vst [vmem:[#allocation139_spill] sm:$0xff] %v13675_v42  ;;  %v6977_v58 = vadd.f32 %v6976_v22, %v6845_v14  ;;  %6778 = vperm.xlu0 %8167, %v6048_v10   ;;  %v6846_v32 = vmul.f32 %v6289_v37, %v6078_v57  ;;  %v7240_v20 = vrot.slane %v6289_v37, %v11560_v31  ;;  %v16029_v10 = vunpack.c.h.bf16 %v13587_v27  ;;  %v16032_v42 = vld [vmem:[#allocation101_spill] sm:$0xff] }
 0x804   :  { %16028 = vst [vmem:[#allocation129_spill] sm:$0xff] %v13697_v52  ;;  %6608 = vperm.xlu1 %8168, %v6014_v15   ;;  %v7236_v22 = vsel %vm3653_vm3, %v7235_v33, %v7231_v60  ;;  %v13710_v24 = vmul.f32 %v16030_v5, %v13557_v63  ;;  %v13714_v52 = vmul.f32 %v16032_v42, %v13537_v46  ;;  %v16033_v57 = vunpack.c.h.bf16 %v13598_v38  ;;  %v16035_v60 = vld [vmem:[#allocation105_spill] sm:$0xff] }
 0x805   :  { %v6827_v14 = vmul.f32 %v13473_v8, %v16029_v10  ;;  %v6978_v37 = vadd.f32 %v6977_v58, %v6846_v32  ;;  %v7241_v34 = vsel %vm3660_vm4, %v7240_v20, %v7236_v22  ;;  %v13724_v33 = vmul.f32 %v16035_v60, %v13557_v63  ;;  %v16039_v60 = vld [vmem:[#allocation67_spill] sm:$0xff] }
 0x806   :  { %16031 = vst [vmem:[#allocation127_spill] sm:$0xff] %v13710_v24  ;;  %v6847_v15 = vmul.f32 %v13495_v18, %v16033_v57  ;;  %v13720_v31 = vpop.permute.xlu0 %6423  ;;  %v6299_v10 = vpop.permute.xlu1 %6298  ;;  %v16037_v5 = vunpack.c.l.bf16 %v13587_v27  ;;  %v16038_v42 = vunpack.c.l.bf16 %v13594_v7  ;;  %v7245_v58 = vrot.slane %v13495_v18, %v11578_v56  ;;  %v16042_v18 = vld [vmem:[#allocation122_spill] sm:$0xff] }
 0x807   :  { %16034 = vst [vmem:[#allocation132_spill] sm:$0xff] %v13720_v31  ;;  %16036 = vst [vmem:[#allocation91_spill] sm:$0xff] %v13724_v33  ;;  %6783 = vperm.xlu0 %8167, %v6049_v4   ;;  %v6082_v32 = vunpack.c.l.bf16 %v13610_v3  ;;  %v6848_v22 = vmul.f32 %v6299_v10, %v6080_v21  ;;  %v7250_v57 = vrot.slane %v6299_v10, %v11586_v0  ;;  %v16040_v31 = vunpack.c.h.bf16 %v13594_v7 }
 0x808   :  { %v6826_v24 = vmul.f32 %v13461_v47, %v16037_v5  ;;  %v6828_v38 = vmul.f32 %v13481_v25, %v16038_v42  ;;  %v6979_v20 = vadd.f32 %v6978_v37, %v6847_v15  ;;  %6618 = vperm.xlu1 %8168, %v6016_v51   ;;  %v13738_v27 = vmul.f32 %v16039_v60, %v13557_v63 }
 0x809   :  { %v6829_v42 = vmul.f32 %v13489_v26, %v16040_v31  ;;  %v7246_v33 = vsel %vm16041_vm8, %v7245_v58, %v7241_v34  ;;  %v13746_v4 = vmul.f32 %v16042_v18, %v13557_v63  ;;  %v16043_v21 = vunpack.c.h.bf16 %v13606_v40 }
 0x80a   :  { %v6954_v5 = vadd.f32 %v6827_v14, %v6826_v24  ;;  %v6980_v51 = vadd.f32 %v6979_v20, %v6848_v22  ;;  %v7251_v37 = vsel %vm16044_vm6, %v7250_v57, %v7246_v33  ;;  %v13752_v10 = vpop.permute.xlu0 %6433  ;;  %v6309_v14 = vpop.permute.xlu1 %6308  ;;  %v6084_v7 = vunpack.c.l.bf16 %v13622_v48  ;;  %v16047_v33 = vld [vmem:[#allocation78_spill] sm:$0xff]  ;;  %vm16098_vm6 = vmmov %vm16041_vm8 }
 0x80b   :  { %v6849_v15 = vmul.f32 %v13503_v1, %v16043_v21  ;;  %16045 = vst [vmem:[#allocation135_spill] sm:$0xff] %v13752_v10  ;;  %v16046_v31 = vunpack.c.l.bf16 %v13601_v62  ;;  %v7255_v63 = vrot.slane %v13503_v1, %v11593_v30  ;;  %v6850_v58 = vmul.f32 %v6309_v14, %v6082_v32  ;;  %6788 = vperm.xlu0 %8167, %v13641_v13   ;;  %v16069_v13 = vld [vmem:[#allocation215_spill] sm:$0xff] }
 0x80c   :  { %v6955_v24 = vadd.f32 %v6954_v5, %v6828_v38  ;;  %v7260_v20 = vrot.slane %v6309_v14, %v11596_v43  ;;  %6628 = vperm.xlu1 %8168, %v13645_v35   ;;  %v13765_v22 = vmul.f32 %v16047_v33, %v13537_v46  ;;  %v16048_v38 = vld [vmem:[#allocation107_spill] sm:$0xff]  ;;  %v16049_v5 = vunpack.c.h.bf16 %v13601_v62 }
 0x80d   :  { %v6830_v34 = vmul.f32 %v13497_v53, %v16046_v31  ;;  %v6981_v40 = vadd.f32 %v6980_v51, %v6849_v15  ;;  %v13769_v57 = vmul.f32 %v16048_v38, %v13537_v46  ;;  %v7256_v32 = vsel %vm3681_vm7, %v7255_v63, %v7251_v37 }
 0x80e   :  { %v6956_v60 = vadd.f32 %v6955_v24, %v6829_v42  ;;  %v6831_v1 = vmul.f32 %v13505_v50, %v16049_v5  ;;  %v16050_v18 = vunpack.c.h.bf16 %v13610_v3  ;;  %v7261_v15 = vsel %vm16051_vm10, %v7260_v20, %v7256_v32  ;;  %v13780_v51 = vpop.permute.xlu0 %6443  ;;  %v6319_v14 = vpop.permute.xlu1 %6318  ;;  %v16053_v42 = vld [vmem:[#allocation82_spill] sm:$0xff] }
 0x80f   :  { %v6982_v21 = vadd.f32 %v6981_v40, %v6850_v58  ;;  %16052 = vst [vmem:[#allocation141_spill] sm:$0xff] %v13780_v51  ;;  %v13784_v24 = vmul.f32 %v16053_v42, %v13537_v46  ;;  %v7265_v31 = vrot.slane %v13511_v29, %v11600_v19  ;;  %v6852_v33 = vmul.f32 %v6319_v14, %v6084_v7  ;;  %v8716_v58 = vld [vmem:[#allocation5 + $0x78] sm:$0xff]   ;;  %v8718_v7 = vld [vmem:[#allocation5 + $0x80] sm:$0xff]   ;;  %v16073_v51 = vld [vmem:[#allocation65_spill] sm:$0xff] }
 0x810   :  { %v6851_v35 = vmul.f32 %v13511_v29, %v16050_v18  ;;  %v6957_v62 = vadd.f32 %v6956_v60, %v6830_v34  ;;  %6793 = vperm.xlu0 %8167, %v13649_v16   ;;  %v6086_v3 = vunpack.c.l.bf16 %v13699_v54  ;;  %v16054_v37 = vunpack.c.l.bf16 %v13617_v36  ;;  %6638 = vperm.xlu1 %8168, %v13653_v39   ;;  %v13795_v60 = vld [vmem:[#allocation5 + $0x28] sm:$0xff]   ;;  %v13833_v29 = vld [vmem:[#allocation5 + $0x98] sm:$0xff]  }
 0x811   :  { %v6089_v40 = vunpack.c.h.bf16 %v8716_v58  ;;  %v7270_v38 = vrot.slane %v6319_v14, %v11624_v12  ;;  %v6091_v16 = vunpack.c.h.bf16 %v8718_v7  ;;  %v7266_v5 = vsel %vm16055_vm9, %v7265_v31, %v7261_v15 }
 0x812   :  { %v6832_v63 = vmul.f32 %v13513_v49, %v16054_v37  ;;  %v6983_v20 = vadd.f32 %v6982_v21, %v6851_v35  ;;  %v6958_v34 = vadd.f32 %v6957_v62, %v6831_v1  ;;  %v16056_v32 = vunpack.c.h.bf16 %v13622_v48  ;;  %v13806_v1 = vpop.permute.xlu0 %6453  ;;  %v6329_v14 = vpop.permute.xlu1 %6328 }
 0x813   :  { %v16057_v42 = vunpack.c.h.bf16 %v13617_v36  ;;  %v7271_v39 = vsel %vm16058_vm0, %v7270_v38, %v7266_v5  ;;  %16059 = vst [vmem:[#allocation142_spill] sm:$0xff] %v13806_v1  ;;  %v7275_v62 = vrot.slane %v13519_v6, %v11631_v23  ;;  %v6854_v15 = vmul.f32 %v6329_v14, %v6086_v3  ;;  %v13817_v38 = vld [vmem:[#allocation5 + $0x30] sm:$0xff]   ;;  %v16070_v3 = vld [vmem:[#allocation41_spill] sm:$0xff] }
 0x814   :  { %v6853_v18 = vmul.f32 %v13519_v6, %v16056_v32  ;;  %v6984_v21 = vadd.f32 %v6983_v20, %v6852_v33  ;;  %6798 = vperm.xlu0 %8167, %v13659_v45   ;;  %v6088_v48 = vunpack.c.l.bf16 %v8716_v58  ;;  %v6959_v31 = vadd.f32 %v6958_v34, %v6832_v63  ;;  %v13812_v32 = vld [vmem:[#allocation5 + $0x88] sm:$0xff]   ;;  %6648 = vperm.xlu1 %8168, %v13666_v59   ;;  %v13820_v5 = vld [vmem:[#allocation5 + $0x90] sm:$0xff]   ;;  %v16063_v6 = vld [vmem:[#allocation83_spill] sm:$0xff] }
 0x815   :  { %v6833_v35 = vmul.f32 %v13521_v28, %v16057_v42  ;;  %v7280_v20 = vrot.slane %v6329_v14, %v11654_v55  ;;  %v7276_v63 = vsel %vm3709_vm11, %v7275_v62, %v7271_v39  ;;  %v16060_v34 = vunpack.c.h.bf16 %v13699_v54  ;;  %v16065_v39 = vld [vmem:[#allocation150_spill] sm:$0xff] }
 0x816   :  { %v6985_v33 = vadd.f32 %v6984_v21, %v6853_v18  ;;  %v16061_v18 = vld [vmem:[#allocation80_spill] sm:$0xff]  ;;  %v13829_v14 = vpop.permute.xlu0 %6463  ;;  %v6339_v36 = vpop.permute.xlu1 %6338  ;;  %v16064_v54 = vunpack.c.l.bf16 %v13584_v61  ;;  %v16074_v10 = vunpack.c.h.bf16 %v16073_v51  ;;  %v16086_v51 = vld [vmem:[#allocation129_spill] sm:$0xff]  ;;  %vm16100_vm10 = vcmask 458112  }
 0x817   :  { %v6960_v58 = vadd.f32 %v6959_v31, %v6833_v35  ;;  %v6855_v42 = vmul.f32 %v16061_v18, %v16060_v34  ;;  %v7281_v59 = vsel %vm3716_vm12, %v7280_v20, %v7276_v63  ;;  %16062 = vst [vmem:[#allocation86_spill] sm:$0xff] %v13829_v14  ;;  %v7285_v37 = vrot.slane %v16061_v18, %v16063_v6  ;;  %v16067_v20 = vld [vmem:[#allocation214_spill] sm:$0xff]  ;;  %v16068_v34 = vld [vmem:[#allocation19_spill] sm:$0xff]  ;;  %vm16103_vm9 = vmmov %vm16100_vm10 }
 0x818   :  { %v6986_v21 = vadd.f32 %v6985_v33, %v6854_v15  ;;  %v6856_v45 = vmul.f32 %v6339_v36, %v6088_v48  ;;  %6803 = vperm.xlu0 %8167, %v13672_v9   ;;  %v6090_v35 = vunpack.c.l.bf16 %v8718_v7  ;;  %v6834_v62 = vmul.f32 %v16065_v39, %v16064_v54  ;;  %v16066_v15 = vld [vmem:[#allocation84_spill] sm:$0xff]  ;;  %6658 = vperm.xlu1 %8168, %v13679_v11   ;;  %v16072_v11 = vld [vmem:[#allocation54_spill] sm:$0xff] }
 0x819   :  { %v7290_v63 = vrot.slane %v6339_v36, %v16067_v20  ;;  %v7146_v18 = vrot.slane %v13473_v8, %v16068_v34  ;;  %v7295_v48 = vrot.slane %v16070_v3, %v16069_v13  ;;  %v7286_v9 = vsel %vm3723_vm13, %v7285_v37, %v7281_v59 }
 0x81a   :  { %v6987_v33 = vadd.f32 %v6986_v21, %v6855_v42  ;;  %v6092_v7 = vunpack.c.l.bf16 %v13812_v32  ;;  %v6961_v14 = vadd.f32 %v6960_v58, %v6834_v62  ;;  %v6857_v54 = vmul.f32 %v16070_v3, %v6089_v40  ;;  %v13851_v21 = vpop.permute.xlu0 %6473  ;;  %v6349_v36 = vpop.permute.xlu1 %6348  ;;  %v16077_v3 = vld [vmem:[#allocation137_spill] sm:$0xff] }
 0x81b   :  { %v7291_v42 = vsel %vm3730_vm14, %v7290_v63, %v7286_v9  ;;  %16071 = vst [vmem:[#allocation162_spill] sm:$0xff] %v13851_v21  ;;  %v6859_v31 = vmul.f32 %v16072_v11, %v6091_v16  ;;  %v13860_v37 = vmul.f32 %v13851_v21, %v16074_v10  ;;  %v6858_v59 = vmul.f32 %v6349_v36, %v6090_v35  ;;  %v16078_v16 = vld [vmem:[#allocation206_spill] sm:$0xff]  ;;  %v16079_v63 = vld [vmem:[#allocation207_spill] sm:$0xff]  ;;  %v13877_v35 = vld [vmem:[#allocation5 + $0xa8] sm:$0xff]  }
 0x81c   :  { %v6988_v1 = vadd.f32 %v6987_v33, %v6856_v45  ;;  %v13855_v8 = vsel %vm3737_vm15, %v7295_v48, %v7291_v42  ;;  %6808 = vperm.xlu0 %8167, %v13683_v2   ;;  %v16076_v40 = vunpack.c.h.bf16 %v13584_v61  ;;  %v7304_v58 = vrot.slane %v16072_v11, %v16068_v34  ;;  %6668 = vperm.xlu1 %8168, %v13687_v41   ;;  %v13874_v48 = vld [vmem:[#allocation5 + $0xa0] sm:$0xff]  }
 0x81d   :  { %16075 = vst [vmem:[#allocation143_spill] sm:$0xff] %v13860_v37  ;;  %v7300_v33 = vrot.slane %v6349_v36, %v16078_v16  ;;  %v7151_v10 = vrot.slane %v13481_v25, %v16079_v63  ;;  %v6996_v9 = vadd.f32 %v6859_v31, %v6858_v59  ;;  %v16081_v42 = vld [vmem:[#allocation92_spill] sm:$0xff]  ;;  %v7156_v2 = vrot.slane %v13489_v26, %v11554_v17 }
 0x81e   :  { %v6835_v45 = vmul.f32 %v16077_v3, %v16076_v40  ;;  %v13868_v62 = vadd.f32 %v6988_v1, %v6857_v54  ;;  %v7142_v1 = vrot.slane %v13461_v47, %v16078_v16  ;;  %v16080_v54 = vunpack.c.l.bf16 %v13795_v60  ;;  %v13886_v11 = vpop.permute.xlu0 %6483  ;;  %v6359_v25 = vpop.permute.xlu1 %6358 }
 0x81f   :  { %v7305_v41 = vsel %vm3639_vm1, %v7304_v58, %v7300_v33  ;;  %16082 = vst [vmem:[#allocation152_spill] sm:$0xff] %v13886_v11  ;;  %v6094_v40 = vunpack.c.l.bf16 %v13820_v5  ;;  %v6860_v37 = vmul.f32 %v6359_v25, %v6092_v7  ;;  %v7309_v31 = vrot.slane %v6359_v25, %v16079_v63  ;;  %v16084_v33 = vld [vmem:[#allocation71_spill] sm:$0xff]  ;;  %v16085_v11 = vld [vmem:[#allocation72_spill] sm:$0xff] }
 0x820   :  { %v6836_v36 = vmul.f32 %v16081_v42, %v16080_v54  ;;  %6813 = vperm.xlu0 %8167, %v13693_v44   ;;  %v6096_v47 = vunpack.c.l.bf16 %v13833_v29  ;;  %v7147_v59 = vsel %vm3639_vm1, %v7146_v18, %v7142_v1  ;;  %v6962_v54 = vadd.f32 %v6961_v14, %v6835_v45  ;;  %6678 = vperm.xlu1 %8168, %v16086_v51   ;;  %v16088_v18 = vld [vmem:[#allocation119_spill] sm:$0xff]  ;;  %v16090_v1 = vld [vmem:[#allocation121_spill] sm:$0xff] }
 0x821   :  { %v16083_v58 = vunpack.c.h.bf16 %v13795_v60  ;;  %v7314_v21 = vrot.slane %v16085_v11, %v11554_v17  ;;  %v7152_v26 = vsel %vm3646_vm2, %v7151_v10, %v7147_v59  ;;  %v16087_v7 = vunpack.c.h.bf16 %v13812_v32  ;;  %v16093_v59 = vld [vmem:[#allocation116_spill] sm:$0xff] }
 0x822   :  { %v6997_v25 = vadd.f32 %v6996_v9, %v6860_v37  ;;  %v7310_v63 = vsel %vm3646_vm2, %v7309_v31, %v7305_v41  ;;  %v7161_v14 = vrot.slane %v13497_v53, %v16088_v18  ;;  %v6963_v60 = vadd.f32 %v6962_v54, %v6836_v36  ;;  %v13911_v17 = vpop.permute.xlu0 %6493  ;;  %v6369_v10 = vpop.permute.xlu1 %6368 }
 0x823   :  { %v6837_v61 = vmul.f32 %v16084_v33, %v16083_v58  ;;  %v6861_v44 = vmul.f32 %v16085_v11, %v16087_v7  ;;  %v16089_v45 = vunpack.c.l.bf16 %v13817_v38  ;;  %v7315_v51 = vsel %vm3653_vm3, %v7314_v21, %v7310_v63  ;;  %v16091_v11 = vld [vmem:[#allocation127_spill] sm:$0xff] }
 0x824   :  { %v7157_v32 = vsel %vm3653_vm3, %v7156_v2, %v7152_v26  ;;  %v7166_v37 = vrot.slane %v13505_v50, %v11578_v56  ;;  %v6862_v41 = vmul.f32 %v6369_v10, %v6094_v40  ;;  %6818 = vperm.xlu0 %8167, %v16091_v11   ;;  %v7171_v53 = vrot.slane %v13513_v49, %v11586_v0  ;;  %v16095_v2 = vld [vmem:[#allocation59_spill] sm:$0xff] }
 0x825   :  { %v6838_v58 = vmul.f32 %v16090_v1, %v16089_v45  ;;  %v6998_v9 = vadd.f32 %v6997_v25, %v6861_v44  ;;  %v6964_v36 = vadd.f32 %v6963_v60, %v6837_v61  ;;  %v16092_v31 = vunpack.c.h.bf16 %v13817_v38  ;;  %6688 = vperm.xlu1 %8168, %v13714_v52   ;;  %v16097_v44 = vld [vmem:[#allocation77_spill] sm:$0xff]  ;;  %v16099_v11 = vld [vmem:[#allocation91_spill] sm:$0xff] }
 0x826   :  { %v7319_v21 = vrot.slane %v6369_v10, %v16088_v18  ;;  %v7176_v63 = vrot.slane %v13521_v28, %v11593_v30  ;;  %v16094_v50 = vunpack.c.h.bf16 %v13820_v5  ;;  %v7324_v26 = vrot.slane %v16095_v2, %v11578_v56  ;;  %v13937_v60 = vpop.permute.xlu0 %6503  ;;  %v6379_v28 = vpop.permute.xlu1 %6378 }
 0x827   :  { %v6839_v54 = vmul.f32 %v16093_v59, %v16092_v31  ;;  %v6999_v49 = vadd.f32 %v6998_v9, %v6862_v41  ;;  %v7162_v61 = vsel %vm3660_vm4, %v7161_v14, %v7157_v32  ;;  %v6965_v38 = vadd.f32 %v6964_v36, %v6838_v58  ;;  %v16101_v36 = vld [vmem:[#allocation112_spill] sm:$0xff]  ;;  %v13949_v31 = vld [vmem:[#allocation5 + $0xb0] sm:$0xff]  }
 0x828   :  { %v6863_v40 = vmul.f32 %v16095_v2, %v16094_v50  ;;  %v16096_v7 = vunpack.c.l.bf16 %v16066_v15  ;;  %v7320_v52 = vsel %vm3660_vm4, %v7319_v21, %v7315_v51  ;;  %v7167_v5 = vsel %vm16041_vm8, %v7166_v37, %v7162_v61  ;;  %6823 = vperm.xlu0 %8167, %v16099_v11  }
 0x829   :  { %v7325_v10 = vsel %vm16098_vm6, %v7324_v26, %v7320_v52  ;;  %v6098_v9 = vunpack.c.l.bf16 %v13874_v48  ;;  %v7172_v14 = vsel %vm16100_vm10, %v7171_v53, %v7167_v5  ;;  %v6966_v58 = vadd.f32 %v6965_v38, %v6839_v54  ;;  %6753 = vperm.xlu1 %8168, %v13738_v27  }
 0x82a   :  { %v6840_v25 = vmul.f32 %v16097_v44, %v16096_v7  ;;  %v7000_v45 = vadd.f32 %v6999_v49, %v6863_v40  ;;  %v6864_v32 = vmul.f32 %v6379_v28, %v6096_v47  ;;  %v7329_v41 = vrot.slane %v6379_v28, %v11586_v0  ;;  %v13957_v27 = vpop.permute.xlu0 %6513  ;;  %v16105_v7 = vld [vmem:[#allocation109_spill] sm:$0xff] }
 0x82b   :  { %v7177_v51 = vsel %vm3681_vm7, %v7176_v63, %v7172_v14  ;;  %v7334_v37 = vrot.slane %v16101_v36, %v11593_v30  ;;  %v6103_v21 = vunpack.c.h.bf16 %v13949_v31  ;;  %v6100_v50 = vunpack.c.l.bf16 %v13877_v35  ;;  %v6389_v63 = vpop.permute.xlu1 %6388 }
 0x82c   :  { %v16102_v2 = vunpack.c.h.bf16 %v13833_v29  ;;  %v6967_v47 = vadd.f32 %v6966_v58, %v6840_v25  ;;  %v7001_v54 = vadd.f32 %v7000_v45, %v6864_v32  ;;  %v7330_v40 = vsel %vm16103_vm9, %v7329_v41, %v7325_v10  ;;  %v16107_v45 = vld [vmem:[#allocation98_spill] sm:$0xff] }
 0x82d   :  { %v7181_v26 = vrot.slane %v16065_v39, %v11596_v43  ;;  %v7186_v49 = vrot.slane %v16077_v3, %v11600_v19  ;;  %v7335_v61 = vsel %vm3681_vm7, %v7334_v37, %v7330_v40  ;;  %v6866_v38 = vmul.f32 %v6389_v63, %v6098_v9  ;;  %6763 = vperm.xlu1 %8168, %v13746_v4  }
 0x82e   :  { %v6865_v53 = vmul.f32 %v16101_v36, %v16102_v2  ;;  %v16104_v29 = vunpack.c.h.bf16 %v16066_v15  ;;  %v7191_v25 = vrot.slane %v16081_v42, %v11624_v12  ;;  %v7339_v5 = vrot.slane %v6389_v63, %v11596_v43  ;;  %v13981_v32 = vpop.permute.xlu0 %6523 }
 0x82f   :  { %vm16106_vm0 = vcmask 589312   ;;  %v7196_v3 = vrot.slane %v16084_v33, %v11631_v23  ;;  %v7344_v10 = vrot.slane %v16107_v45, %v11600_v19  ;;  %v6102_v15 = vunpack.c.l.bf16 %v13949_v31  ;;  %v6399_v4 = vpop.permute.xlu1 %6398 }
 0x830   :  { %v6841_v52 = vmul.f32 %v16105_v7, %v16104_v29  ;;  %v7002_v28 = vadd.f32 %v7001_v54, %v6865_v53  ;;  %v7182_v39 = vsel %vm16106_vm0, %v7181_v26, %v7177_v51  ;;  %v16108_v9 = vunpack.c.h.bf16 %v13874_v48  ;;  %vm16109_vm8 = vmmov %vm16106_vm0 }
 0x831   :  { %v7340_v58 = vsel %vm16109_vm8, %v7339_v5, %v7335_v61  ;;  %vm16110_vm6 = vcmask 654912   ;;  %v7201_v33 = vrot.slane %v16090_v1, %v11654_v55  ;;  %v6868_v36 = vmul.f32 %v6399_v4, %v6100_v50  ;;  %6693 = vperm.xlu1 %8168, %v13765_v22   ;;  %v16113_v1 = vld [vmem:[#allocation104_spill] sm:$0xff] }
 0x832   :  { %v6968_v11 = vadd.f32 %v6967_v47, %v6841_v52  ;;  %v6867_v42 = vmul.f32 %v16107_v45, %v16108_v9  ;;  %v7003_v14 = vadd.f32 %v7002_v28, %v6866_v38  ;;  %v7187_v41 = vsel %vm16110_vm6, %v7186_v49, %v7182_v39  ;;  %vm16111_vm10 = vmmov %vm16110_vm6  ;;  %v14002_v61 = vpop.permute.xlu0 %6533  ;;  %v8726_v52 = vld [vmem:[#allocation5 + $0xb8] sm:$0xff]   ;;  %v8727_v9 = vld [vmem:[#allocation5 + $0xc0] sm:$0xff]  }
 0x833   :  { %v7345_v51 = vsel %vm16111_vm10, %v7344_v10, %v7340_v58  ;;  %vm16112_vm9 = vcmask 720512   ;;  %v7206_v48 = vrot.slane %v16093_v59, %v16063_v6  ;;  %v7349_v2 = vrot.slane %v6399_v4, %v11624_v12  ;;  %v6409_v22 = vpop.permute.xlu1 %6408  ;;  %v16116_v45 = vld [vmem:[#allocation139_spill] sm:$0xff] }
 0x834   :  { %v7192_v37 = vsel %vm16112_vm9, %v7191_v25, %v7187_v41  ;;  %v7004_v31 = vadd.f32 %v7003_v14, %v6867_v42  ;;  %v7211_v47 = vrot.slane %v16097_v44, %v16067_v20  ;;  %v7354_v54 = vrot.slane %v16113_v1, %v11631_v23  ;;  %vm16115_vm0 = vmmov %vm16112_vm9 }
 0x835   :  { %v7197_v53 = vsel %vm3709_vm11, %v7196_v3, %v7192_v37  ;;  %v6990_v50 = vrot.slane %v13868_v62, 4  ;;  %v6969_v40 = vrot.slane %v6968_v11, 4  ;;  %v16114_v63 = vunpack.c.h.bf16 %v13877_v35  ;;  %6698 = vperm.xlu1 %8168, %v13769_v57  }
 0x836   :  { %v7005_v26 = vadd.f32 %v7004_v31, %v6868_v36  ;;  %v7350_v49 = vsel %vm16115_vm0, %v7349_v2, %v7345_v51  ;;  %v7202_v38 = vsel %vm3716_vm12, %v7201_v33, %v7197_v53  ;;  %v6870_v29 = vmul.f32 %v6409_v22, %v6102_v15  ;;  %v14015_v33 = vpop.permute.xlu0 %6543  ;;  %v16118_v53 = vld [vmem:[#allocation132_spill] sm:$0xff] }
 0x837   :  { %v6869_v59 = vmul.f32 %v16113_v1, %v16114_v63  ;;  %v7355_v44 = vsel %vm3709_vm11, %v7354_v54, %v7350_v49  ;;  %v6104_v25 = vunpack.c.l.bf16 %v8726_v52  ;;  %v7207_v28 = vsel %vm3723_vm13, %v7206_v48, %v7202_v38  ;;  %v6419_v51 = vpop.permute.xlu1 %6418  ;;  %v8728_v54 = vld [vmem:[#allocation5 + $0xc8] sm:$0xff]   ;;  %v16119_v49 = vld [vmem:[#allocation135_spill] sm:$0xff] }
 0x838   :  { %v6105_v5 = vunpack.c.h.bf16 %v8726_v52  ;;  %v7359_v35 = vrot.slane %v6409_v22, %v11654_v55  ;;  %v7212_v3 = vsel %vm3730_vm14, %v7211_v47, %v7207_v28  ;;  %v7364_v10 = vrot.slane %v16116_v45, %v16063_v6 }
 0x839   :  { %v7006_v39 = vadd.f32 %v7005_v26, %v6869_v59  ;;  %v6107_v42 = vunpack.c.h.bf16 %v8727_v9  ;;  %v6991_v14 = vadd.f32 %v6990_v50, %v13868_v62  ;;  %v6970_v15 = vadd.f32 %v6969_v40, %v6968_v11  ;;  %6703 = vperm.xlu1 %8168, %v13784_v24   ;;  %v16117_v62 = vld [vmem:[#allocation117_spill] sm:$0xff] }
 0x83a   :  { %v6871_v58 = vmul.f32 %v16116_v45, %v6103_v21  ;;  %v7360_v41 = vsel %vm3716_vm12, %v7359_v35, %v7355_v44  ;;  %v7216_v57 = vrot.slane %v16105_v7, %v16069_v13  ;;  %v6872_v37 = vmul.f32 %v6419_v51, %v6104_v25  ;;  %v14029_v26 = vpop.permute.xlu0 %6553 }
 0x83b   :  { %v7007_v4 = vadd.f32 %v7006_v39, %v6870_v29  ;;  %v7365_v36 = vsel %vm3723_vm13, %v7364_v10, %v7360_v41  ;;  %v6106_v48 = vunpack.c.l.bf16 %v8727_v9  ;;  %v7369_v2 = vrot.slane %v6419_v51, %v16067_v20  ;;  %v6429_v24 = vpop.permute.xlu1 %6428  ;;  %v16122_v51 = vld [vmem:[#allocation207_spill] sm:$0xff] }
 0x83c   :  { %v6034_v21 = vmul.f32 %v16117_v62, %v13537_v46  ;;  %v7217_v11 = vsel %vm3737_vm15, %v7216_v57, %v7212_v3  ;;  %v7374_v47 = vrot.slane %v16118_v53, %v16069_v13  ;;  %v6992_v1 = vrot.slane %v6991_v14, 2 }
 0x83d   :  { %v7008_v31 = vadd.f32 %v7007_v4, %v6871_v58  ;;  %v6108_v7 = vunpack.c.l.bf16 %v8728_v54  ;;  %v6971_v50 = vrot.slane %v6970_v15, 2  ;;  %v6873_v40 = vmul.f32 %v16118_v53, %v6105_v5 }
 0x83e   :  { %v7370_v59 = vsel %vm3730_vm14, %v7369_v2, %v7365_v36  ;;  %v6875_v22 = vmul.f32 %v16119_v49, %v6107_v42  ;;  %vm16120_vm8 = vcmask 1041409   ;;  %v6874_v29 = vmul.f32 %v6429_v24, %v6106_v48  ;;  %6708 = vperm.xlu1 %8168, %v6034_v21   ;;  %v16121_v42 = vld [vmem:[#allocation55_spill] sm:$0xff]  ;;  %v16123_v36 = vld [vmem:[#allocation106_spill] sm:$0xff] }
 0x83f   :  { %v7009_v63 = vadd.f32 %v7008_v31, %v6872_v37  ;;  %v7771_v38 = vsel %vm16120_vm8, %v13855_v8, %v7217_v11  ;;  %v7375_v44 = vsel %vm3737_vm15, %v7374_v47, %v7370_v59  ;;  %v7383_v52 = vrot.slane %v16119_v49, %v16068_v34  ;;  %v14042_v8 = vpop.permute.xlu0 %6563  ;;  %v6439_v9 = vpop.permute.xlu1 %6438  ;;  %v16124_v37 = vld [vmem:[#allocation141_spill] sm:$0xff]  ;;  %vm16132_vm10 = vmmov %vm16120_vm8 }
 0x840   :  { %v14038_v28 = vsel %vm4294_vm5, %v7375_v44, %v7771_v38  ;;  %v7379_v5 = vrot.slane %v6429_v24, %v16078_v16  ;;  %v6109_v39 = vunpack.c.h.bf16 %v8728_v54  ;;  %v6993_v35 = vadd.f32 %v6992_v1, %v6991_v14  ;;  %v8729_v14 = vld [vmem:[#allocation5 + $0xd0] sm:$0xff]   ;;  %v8730_v38 = vld [vmem:[#allocation5 + $0xd8] sm:$0xff]  }
 0x841   :  { %v7010_v25 = vadd.f32 %v7009_v63, %v6873_v40  ;;  %v7017_v3 = vadd.f32 %v6875_v22, %v6874_v29  ;;  %v6035_v58 = vmul.f32 %v16121_v42, %v13537_v46  ;;  %v6972_v4 = vadd.f32 %v6971_v50, %v6970_v15  ;;  %v16126_v29 = vld [vmem:[#allocation142_spill] sm:$0xff] }
 0x842   :  { %v7384_v10 = vsel %vm3639_vm1, %v7383_v52, %v7379_v5  ;;  %v6876_v41 = vmul.f32 %v6439_v9, %v6108_v7  ;;  %v7388_v57 = vrot.slane %v6439_v9, %v16122_v51  ;;  %v7393_v48 = vrot.slane %v16124_v37, %v16123_v36  ;;  %v16125_v7 = vld [vmem:[#allocation110_spill] sm:$0xff] }
 0x843   :  { %v7011_v45 = vrot.slane %v7010_v25, 4  ;;  %6713 = vperm.xlu1 %8168, %v6035_v58   ;;  %v6110_v2 = vunpack.c.l.bf16 %v8729_v14  ;;  %v6877_v62 = vmul.f32 %v16124_v37, %v6109_v39  ;;  %v6994_v21 = vrot.slane %v6993_v35, 1  ;;  %v14051_v54 = vpop.permute.xlu0 %6573  ;;  %v6449_v59 = vpop.permute.xlu1 %6448  ;;  %v16127_v39 = vld [vmem:[#allocation90_spill] sm:$0xff] }
 0x844   :  { %v7018_v11 = vadd.f32 %v7017_v3, %v6876_v41  ;;  %v7389_v53 = vsel %vm3646_vm2, %v7388_v57, %v7384_v10  ;;  %v6111_v47 = vunpack.c.h.bf16 %v8729_v14  ;;  %v6036_v50 = vmul.f32 %v16125_v7, %v13537_v46  ;;  %v16128_v41 = vld [vmem:[#allocation65_spill] sm:$0xff] }
 0x845   :  { %v7012_v31 = vadd.f32 %v7011_v45, %v7010_v25  ;;  %v7394_v15 = vsel %vm3653_vm3, %v7393_v48, %v7389_v53  ;;  %v6973_v40 = vrot.slane %v6972_v4, 1  ;;  %v6878_v49 = vmul.f32 %v6449_v59, %v6110_v2  ;;  %v16131_v53 = vld [vmem:[#allocation25_spill] sm:$0xff] }
 0x846   :  { %v7019_v63 = vadd.f32 %v7018_v11, %v6877_v62  ;;  %v7398_v22 = vrot.slane %v6449_v59, %v16088_v18  ;;  %v6112_v44 = vunpack.c.l.bf16 %v8730_v38  ;;  %v7403_v52 = vrot.slane %v16126_v29, %v11578_v56 }
 0x847   :  { %v7013_v1 = vrot.slane %v7012_v31, 2  ;;  %6718 = vperm.xlu1 %8168, %v6036_v50   ;;  %v6113_v25 = vunpack.c.h.bf16 %v8730_v38  ;;  %v6995_v5 = vadd.f32 %v6994_v21, %v6993_v35  ;;  %v6037_v3 = vmul.f32 %v16127_v39, %v13537_v46  ;;  %v14063_v58 = vpop.permute.xlu0 %6583  ;;  %v16130_v21 = vld [vmem:[#allocation86_spill] sm:$0xff]  ;;  %v8731_v38 = vld [vmem:[#allocation5 + $0xe8] sm:$0xff]  }
 0x848   :  { %v6879_v45 = vmul.f32 %v16126_v29, %v6111_v47  ;;  %v7020_v9 = vadd.f32 %v7019_v63, %v6878_v49  ;;  %v7399_v42 = vsel %vm3660_vm4, %v7398_v22, %v7394_v15  ;;  %v6114_v57 = vunpack.c.l.bf16 %v16128_v41  ;;  %v16134_v29 = vld [vmem:[#allocation162_spill] sm:$0xff]  ;;  %v16138_v41 = vld [vmem:[#allocation143_spill] sm:$0xff] }
 0x849   :  { %v7014_v24 = vadd.f32 %v7013_v1, %v7012_v31  ;;  %v6974_v37 = vadd.f32 %v6973_v40, %v6972_v4  ;;  %vm16129_vm6 = vcmask 392512   ;;  %v6459_v31 = vpop.permute.xlu1 %6458  ;;  %v7413_v11 = vrot.slane %v16130_v21, %v11593_v30 }
 0x84a   :  { %v7404_v48 = vsel %vm16129_vm6, %v7403_v52, %v7399_v42  ;;  %v7021_v2 = vadd.f32 %v7020_v9, %v6879_v45  ;;  %v6880_v35 = vmul.f32 %v6459_v31, %v6112_v44  ;;  %v7408_v62 = vrot.slane %v6459_v31, %v11586_v0  ;;  %v16136_v45 = vld [vmem:[#allocation61_spill] sm:$0xff]  ;;  %v8732_v31 = vld [vmem:[#allocation5 + $0xf0] sm:$0xff]  }
 0x84b   :  { %v7015_v10 = vrot.slane %v7014_v24, 1  ;;  %6723 = vperm.xlu1 %8168, %v6037_v3   ;;  %v6038_v47 = vmul.f32 %v16131_v53, %v13537_v46  ;;  %v7130_v1 = vsel %vm16132_vm10, %v6995_v5, %v6974_v37  ;;  %v6881_v15 = vmul.f32 %v16130_v21, %v6113_v25  ;;  %v14075_v50 = vpop.permute.xlu0 %6593 }
 0x84c   :  { %v7022_v4 = vadd.f32 %v7021_v2, %v6880_v35  ;;  %vm16133_vm9 = vcmask 458112   ;;  %v6116_v44 = vunpack.c.l.bf16 %v8731_v38  ;;  %v7423_v52 = vrot.slane %v16134_v29, %v11600_v19  ;;  %v16139_v2 = vld [vmem:[#allocation152_spill] sm:$0xff] }
 0x84d   :  { %v7016_v14 = vadd.f32 %v7015_v10, %v7014_v24  ;;  %v7409_v7 = vsel %vm16133_vm9, %v7408_v62, %v7404_v48  ;;  %v6469_v59 = vpop.permute.xlu1 %6468  ;;  %v6117_v25 = vunpack.c.h.bf16 %v8731_v38  ;;  %vm16135_vm0 = vcmask 589312   ;;  %v16140_v62 = vld [vmem:[#allocation87_spill] sm:$0xff] }
 0x84e   :  { %v7414_v63 = vsel %vm3681_vm7, %v7413_v11, %v7409_v7  ;;  %v7023_v24 = vadd.f32 %v7022_v4, %v6881_v15  ;;  %v6882_v49 = vmul.f32 %v6469_v59, %v6114_v57  ;;  %v7418_v22 = vrot.slane %v6469_v59, %v11596_v43 }
 0x84f   :  { %v14078_v40 = vsel %vm4294_vm5, %v7016_v14, %v7130_v1  ;;  %6728 = vperm.xlu1 %8168, %v6038_v47   ;;  %v14085_v3 = vpop.permute.xlu0 %6603  ;;  %v6039_v10 = vmul.f32 %v16136_v45, %v13537_v46  ;;  %vm16137_vm5 = vcmask 654912   ;;  %v6118_v14 = vunpack.c.l.bf16 %v8732_v31 }
 0x850   :  { %v7024_v5 = vadd.f32 %v7023_v24, %v6882_v49  ;;  %v7419_v39 = vsel %vm16135_vm0, %v7418_v22, %v7414_v63  ;;  %v7433_v35 = vrot.slane %v16139_v2, %v11631_v23  ;;  %v6040_v21 = vmul.f32 %v16140_v62, %v13537_v46  ;;  %v8733_v49 = vld [vmem:[#allocation5 + $0xf8] sm:$0xff]  }
 0x851   :  { %v7424_v9 = vsel %vm16137_vm5, %v7423_v52, %v7419_v39  ;;  %v6479_v42 = vpop.permute.xlu1 %6478  ;;  %v6885_v11 = vmul.f32 %v16139_v2, %v6117_v25  ;;  %v6119_v53 = vunpack.c.h.bf16 %v8732_v31  ;;  %vm16141_vm8 = vcmask 720512  }
 0x852   :  { %v7025_v57 = vadd.f32 %v7024_v5, %v16138_v41  ;;  %v6884_v37 = vmul.f32 %v6479_v42, %v6116_v44  ;;  %v7428_v48 = vrot.slane %v6479_v42, %v11624_v12  ;;  %v6120_v22 = vunpack.c.l.bf16 %v8733_v49  ;;  %v16142_v44 = vld [vmem:[#allocation120_spill] sm:$0xff] }
 0x853   :  { %6733 = vperm.xlu1 %8168, %v6039_v10   ;;  %v14098_v15 = vpop.permute.xlu0 %6613  ;;  %v7443_v38 = vrot.slane %v13911_v17, %v16063_v6  ;;  %v6041_v29 = vmul.f32 %v16142_v44, %v13537_v46  ;;  %v6887_v52 = vmul.f32 %v13911_v17, %v6119_v53  ;;  %v6121_v25 = vunpack.c.h.bf16 %v8733_v49  ;;  %v8734_v10 = vld [vmem:[#allocation5 + $0x100] sm:$0xff]  }
 0x854   :  { %v7026_v47 = vadd.f32 %v7025_v57, %v6884_v37  ;;  %v7429_v1 = vsel %vm16141_vm8, %v7428_v48, %v7424_v9  ;;  %v6123_v9 = vunpack.c.h.bf16 %v8734_v10  ;;  %v6122_v31 = vunpack.c.l.bf16 %v8734_v10 }
 0x855   :  { %v7434_v4 = vsel %vm3709_vm11, %v7433_v35, %v7429_v1  ;;  %v6489_v7 = vpop.permute.xlu1 %6488  ;;  %v7453_v17 = vrot.slane %v13937_v60, %v16069_v13  ;;  %v6889_v46 = vmul.f32 %v13937_v60, %v6121_v25  ;;  %vm16143_vm6 = vcmask 1043459   ;;  %v8736_v25 = vld [vmem:[#allocation5 + $0x110] sm:$0xff]  }
 0x856   :  { %v7027_v63 = vadd.f32 %v7026_v47, %v6885_v11  ;;  %v6886_v59 = vmul.f32 %v6489_v7, %v6118_v14  ;;  %v7438_v24 = vrot.slane %v6489_v7, %v11654_v55  ;;  %v6891_v62 = vmul.f32 %v13957_v27, %v6123_v9  ;;  %v8735_v47 = vld [vmem:[#allocation5 + $0x108] sm:$0xff]   ;;  %vm16145_vm0 = vmmov %vm16143_vm6 }
 0x857   :  { %6738 = vperm.xlu1 %8168, %v6040_v21   ;;  %v14108_v45 = vpop.permute.xlu0 %6623  ;;  %v7462_v21 = vrot.slane %v13957_v27, %v16068_v34  ;;  %v6124_v1 = vunpack.c.l.bf16 %v8735_v47  ;;  %vm16144_vm10 = vcmask 392512   ;;  %vm16146_vm5 = vcmask 589312  }
 0x858   :  { %v7028_v5 = vadd.f32 %v7027_v63, %v6886_v59  ;;  %v7439_v39 = vsel %vm3716_vm12, %v7438_v24, %v7434_v4  ;;  %v6125_v59 = vunpack.c.h.bf16 %v8735_v47  ;;  %vm16147_vm8 = vcmask 654912  }
 0x859   :  { %v7444_v42 = vsel %vm3723_vm13, %v7443_v38, %v7439_v39  ;;  %v6499_v41 = vpop.permute.xlu1 %6498  ;;  %v6127_v39 = vunpack.c.h.bf16 %v8736_v25 }
 0x85a   :  { %v7029_v57 = vadd.f32 %v7028_v5, %v6887_v52  ;;  %v6888_v37 = vmul.f32 %v6499_v41, %v6120_v22  ;;  %v7448_v48 = vrot.slane %v6499_v41, %v16067_v20  ;;  %v6126_v5 = vunpack.c.l.bf16 %v8736_v25 }
 0x85b   :  { %6743 = vperm.xlu1 %8168, %v6041_v29   ;;  %v14116_v35 = vpop.permute.xlu0 %6633  ;;  %v6893_v10 = vmul.f32 %v13981_v32, %v6125_v59 }
 0x85c   :  { %v7030_v14 = vadd.f32 %v7029_v57, %v6888_v37  ;;  %v7449_v2 = vsel %vm3730_vm14, %v7448_v48, %v7444_v42  ;;  %v8737_v48 = vld [vmem:[#allocation5 + $0x118] sm:$0xff]  }
 0x85d   :  { %v7454_v11 = vsel %vm3737_vm15, %v7453_v17, %v7449_v2  ;;  %v6509_v53 = vpop.permute.xlu1 %6508 }
 0x85e   :  { %v7031_v4 = vadd.f32 %v7030_v14, %v6889_v46  ;;  %v14124_v7 = vsel %vm16143_vm6, %v7454_v11, %v14038_v28  ;;  %v6890_v60 = vmul.f32 %v6509_v53, %v6122_v31  ;;  %v7458_v63 = vrot.slane %v6509_v53, %v16078_v16 }
 0x85f   :  { %v14128_v38 = vpop.permute.xlu0 %6643  ;;  %v7472_v28 = vrot.slane %v13981_v32, %v16123_v36  ;;  %v6128_v31 = vunpack.c.l.bf16 %v8737_v48  ;;  %v6129_v32 = vunpack.c.h.bf16 %v8737_v48  ;;  %v6895_v11 = vmul.f32 %v14002_v61, %v6127_v39 }
 0x860   :  { %v7032_v24 = vrot.slane %v7031_v4, 4  ;;  %v7038_v49 = vadd.f32 %v6891_v62, %v6890_v60  ;;  %v7463_v22 = vsel %vm3639_vm1, %v7462_v21, %v7458_v63  ;;  %v7482_v21 = vrot.slane %v14002_v61, %v11578_v56  ;;  %v8738_v63 = vld [vmem:[#allocation5 + $0x120] sm:$0xff]  }
 0x861   :  { %v6519_v27 = vpop.permute.xlu1 %6518  ;;  %v6130_v59 = vunpack.c.l.bf16 %v8738_v63  ;;  %v6897_v61 = vmul.f32 %v14015_v33, %v6129_v32  ;;  %vm16148_vm6 = vcmask 720512  }
 0x862   :  { %v7033_v44 = vadd.f32 %v7032_v24, %v7031_v4  ;;  %v6892_v29 = vmul.f32 %v6519_v27, %v6124_v1  ;;  %v7467_v52 = vrot.slane %v6519_v27, %v16122_v51 }
 0x863   :  { %v14136_v46 = vpop.permute.xlu0 %6653 }
 0x864   :  { %v7034_v9 = vrot.slane %v7033_v44, 2  ;;  %v7039_v42 = vadd.f32 %v7038_v49, %v6892_v29  ;;  %v7468_v41 = vsel %vm3646_vm2, %v7467_v52, %v7463_v22  ;;  %v6131_v29 = vunpack.c.h.bf16 %v8738_v63 }
 0x865   :  { %v7473_v57 = vsel %vm3653_vm3, %v7472_v28, %v7468_v41  ;;  %v6529_v37 = vpop.permute.xlu1 %6528 }
 0x866   :  { %v7035_v17 = vadd.f32 %v7034_v9, %v7033_v44  ;;  %v7040_v14 = vadd.f32 %v7039_v42, %v6893_v10  ;;  %v6894_v2 = vmul.f32 %v6529_v37, %v6126_v5  ;;  %v7477_v62 = vrot.slane %v6529_v37, %v16088_v18 }
 0x867   :  { %v7492_v44 = vrot.slane %v14015_v33, %v11593_v30  ;;  %v14148_v52 = vpop.permute.xlu0 %6663  ;;  %v7502_v33 = vrot.slane %v14029_v26, %v11600_v19  ;;  %v6899_v48 = vmul.f32 %v14029_v26, %v6131_v29 }
 0x868   :  { %v7036_v53 = vrot.slane %v7035_v17, 1  ;;  %v7041_v47 = vadd.f32 %v7040_v14, %v6894_v2  ;;  %v7478_v1 = vsel %vm3660_vm4, %v7477_v62, %v7473_v57  ;;  %v8739_v57 = vld [vmem:[#allocation5 + $0x128] sm:$0xff]  }
 0x869   :  { %v7483_v4 = vsel %vm16144_vm10, %v7482_v21, %v7478_v1  ;;  %v6539_v60 = vpop.permute.xlu1 %6538  ;;  %v6132_v37 = vunpack.c.l.bf16 %v8739_v57  ;;  %v7512_v1 = vrot.slane %v14042_v8, %v11631_v23  ;;  %vm16149_vm10 = vcmask 1044484  }
 0x86a   :  { %v7037_v24 = vadd.f32 %v7036_v53, %v7035_v17  ;;  %v7042_v49 = vadd.f32 %v7041_v47, %v6895_v11  ;;  %v6896_v22 = vmul.f32 %v6539_v60, %v6128_v31  ;;  %v7487_v27 = vrot.slane %v6539_v60, %v11586_v0  ;;  %v8740_v53 = vld [vmem:[#allocation5 + $0x130] sm:$0xff]  }
 0x86b   :  { %v6133_v31 = vunpack.c.h.bf16 %v8739_v57  ;;  %v14162_v62 = vpop.permute.xlu0 %6673  ;;  %v6134_v47 = vunpack.c.l.bf16 %v8740_v53 }
 0x86c   :  { %v7043_v25 = vadd.f32 %v7042_v49, %v6896_v22  ;;  %v7488_v5 = vsel %vm16133_vm9, %v7487_v27, %v7483_v4  ;;  %v14153_v28 = vsel %vm16145_vm0, %v7037_v24, %v14078_v40  ;;  %v6135_v4 = vunpack.c.h.bf16 %v8740_v53 }
 0x86d   :  { %v7493_v39 = vsel %vm3681_vm7, %v7492_v44, %v7488_v5  ;;  %v6549_v10 = vpop.permute.xlu1 %6548  ;;  %v6901_v26 = vmul.f32 %v14042_v8, %v6133_v31  ;;  %v8741_v44 = vld [vmem:[#allocation5 + $0x138] sm:$0xff]   ;;  %vm16150_vm9 = vcmask 392512   ;;  %vm16151_vm0 = vcmask 458112  }
 0x86e   :  { %v7044_v9 = vadd.f32 %v7043_v25, %v6897_v61  ;;  %v6898_v42 = vmul.f32 %v6549_v10, %v6130_v59  ;;  %v7497_v41 = vrot.slane %v6549_v10, %v11596_v43  ;;  %v6136_v29 = vunpack.c.l.bf16 %v8741_v44 }
 0x86f   :  { %v7522_v61 = vrot.slane %v14051_v54, %v16063_v6  ;;  %v6903_v25 = vmul.f32 %v14051_v54, %v6135_v4  ;;  %v6137_v5 = vunpack.c.h.bf16 %v8741_v44  ;;  %v14174_v8 = vpop.permute.xlu0 %6683  ;;  %v7551_v4 = vrot.slane %v14085_v3, %v16123_v36 }
 0x870   :  { %v7045_v17 = vadd.f32 %v7044_v9, %v6898_v42  ;;  %v7498_v14 = vsel %vm16146_vm5, %v7497_v41, %v7493_v39  ;;  %vm16152_vm5 = vmmov %vm16149_vm10 }
 0x871   :  { %v7503_v40 = vsel %vm16147_vm8, %v7502_v33, %v7498_v14  ;;  %v6559_v2 = vpop.permute.xlu1 %6558  ;;  %v7532_v33 = vrot.slane %v14063_v58, %v16069_v13  ;;  %vm16154_vm8 = vcmask 589312  }
 0x872   :  { %v7046_v21 = vadd.f32 %v7045_v17, %v6899_v48  ;;  %v6900_v32 = vmul.f32 %v6559_v2, %v6132_v37  ;;  %v7507_v11 = vrot.slane %v6559_v2, %v11624_v12  ;;  %v6905_v48 = vmul.f32 %v14063_v58, %v6137_v5 }
 0x873   :  { %v14186_v2 = vpop.permute.xlu0 %6748 }
 0x874   :  { %v7047_v60 = vadd.f32 %v7046_v21, %v6900_v32  ;;  %v7508_v63 = vsel %vm16148_vm6, %v7507_v11, %v7503_v40  ;;  %v7541_v40 = vrot.slane %v14075_v50, %v16068_v34  ;;  %vm16155_vm6 = vcmask 654912  }
 0x875   :  { %v7513_v59 = vsel %vm3709_vm11, %v7512_v1, %v7508_v63  ;;  %v6569_v24 = vpop.permute.xlu1 %6568 }
 0x876   :  { %v7048_v49 = vadd.f32 %v7047_v60, %v6901_v26  ;;  %v6902_v22 = vmul.f32 %v6569_v24, %v6134_v47  ;;  %v7517_v27 = vrot.slane %v6569_v24, %v11654_v55 }
 0x877   :  { %v14197_v60 = vpop.permute.xlu0 %6758 }
 0x878   :  { %v7049_v39 = vadd.f32 %v7048_v49, %v6902_v22  ;;  %v7518_v10 = vsel %vm3716_vm12, %v7517_v27, %v7513_v59  ;;  %v7561_v27 = vrot.slane %v14098_v15, %v11578_v56 }
 0x879   :  { %v7523_v9 = vsel %vm3723_vm13, %v7522_v61, %v7518_v10  ;;  %v6579_v42 = vpop.permute.xlu1 %6578 }
 0x87a   :  { %v7050_v41 = vadd.f32 %v7049_v39, %v6903_v25  ;;  %v6904_v57 = vmul.f32 %v6579_v42, %v6136_v29  ;;  %v7527_v37 = vrot.slane %v6579_v42, %v16067_v20  ;;  %v8742_v42 = vld [vmem:[#allocation5 + $0x140] sm:$0xff]  }
 0x87b   :  { %v14206_v39 = vpop.permute.xlu0 %6768 }
 0x87c   :  { %v7051_v31 = vadd.f32 %v7050_v41, %v6904_v57  ;;  %v7528_v54 = vsel %vm3730_vm14, %v7527_v37, %v7523_v9  ;;  %v7571_v9 = vrot.slane %v14108_v45, %v11593_v30  ;;  %v6138_v41 = vunpack.c.l.bf16 %v8742_v42 }
 0x87d   :  { %v7533_v17 = vsel %vm3737_vm15, %v7532_v33, %v7528_v54  ;;  %v6589_v14 = vpop.permute.xlu1 %6588  ;;  %v6139_v33 = vunpack.c.h.bf16 %v8742_v42 }
 0x87e   :  { %v7052_v21 = vadd.f32 %v7051_v31, %v6905_v48  ;;  %v7537_v32 = vrot.slane %v6589_v14, %v16078_v16  ;;  %v14191_v11 = vsel %vm16149_vm10, %v7533_v17, %v14124_v7  ;;  %v8743_v48 = vld [vmem:[#allocation5 + $0x148] sm:$0xff]   ;;  %vm16156_vm10 = vcmask 720512  }
 0x87f   :  { %v6140_v31 = vunpack.c.l.bf16 %v8743_v48 }
 0x880   :  { %v7053_v53 = vrot.slane %v7052_v21, 4  ;;  %v7542_v58 = vsel %vm3639_vm1, %v7541_v40, %v7537_v32  ;;  %v6906_v32 = vmul.f32 %v6589_v14, %v6138_v41 }
 0x881   :  { %v6599_v47 = vpop.permute.xlu1 %6598 }
 0x882   :  { %v7054_v1 = vadd.f32 %v7053_v53, %v7052_v21  ;;  %v7546_v26 = vrot.slane %v6599_v47, %v16122_v51  ;;  %v7581_v21 = vrot.slane %v14116_v35, %v11600_v19  ;;  %v14220_v53 = vpop.permute.xlu0 %6773 }
 0x884   :  { %v7055_v63 = vrot.slane %v7054_v1, 2  ;;  %v7547_v59 = vsel %vm3646_vm2, %v7546_v26, %v7542_v58 }
 0x885   :  { %v7552_v24 = vsel %vm3653_vm3, %v7551_v4, %v7547_v59  ;;  %v6609_v49 = vpop.permute.xlu1 %6608  ;;  %v6141_v59 = vunpack.c.h.bf16 %v8743_v48 }
 0x886   :  { %v7056_v7 = vadd.f32 %v7055_v63, %v7054_v1  ;;  %v7556_v22 = vrot.slane %v6609_v49, %v16088_v18  ;;  %v6907_v1 = vmul.f32 %v14075_v50, %v6139_v33 }
 0x888   :  { %v7057_v44 = vrot.slane %v7056_v7, 1  ;;  %v7557_v29 = vsel %vm3660_vm4, %v7556_v22, %v7552_v24  ;;  %v7591_v24 = vrot.slane %v14128_v38, %v11631_v23 }
 0x889   :  { %v7562_v61 = vsel %vm16150_vm9, %v7561_v27, %v7557_v29  ;;  %v6619_v25 = vpop.permute.xlu1 %6618  ;;  %v8744_v27 = vld [vmem:[#allocation5 + $0x150] sm:$0xff]   ;;  %v14235_v29 = vpop.permute.xlu0 %6778  ;;  %vm16157_vm9 = vcmask 1045509  }
 0x88a   :  { %v7058_v5 = vadd.f32 %v7057_v44, %v7056_v7  ;;  %v7566_v10 = vrot.slane %v6619_v25, %v11586_v0  ;;  %v7059_v7 = vadd.f32 %v6907_v1, %v6906_v32  ;;  %v6142_v44 = vunpack.c.l.bf16 %v8744_v27  ;;  %v8745_v32 = vld [vmem:[#allocation5 + $0x158] sm:$0xff]  }
 0x88c   :  { %v7567_v57 = vsel %vm16151_vm0, %v7566_v10, %v7562_v61  ;;  %v14214_v37 = vsel %vm16152_vm5, %v7058_v5, %v14153_v28  ;;  %v6908_v28 = vmul.f32 %v6599_v47, %v6140_v31  ;;  %v6909_v5 = vmul.f32 %v14085_v3, %v6141_v59 }
 0x88d   :  { %16153 = vst [vmem:[#allocation159_spill] sm:$0xff] %v14214_v37  ;;  %v7572_v54 = vsel %vm3681_vm7, %v7571_v9, %v7567_v57  ;;  %v6629_v17 = vpop.permute.xlu1 %6628  ;;  %v7601_v10 = vrot.slane %v14136_v46, %v16063_v6  ;;  %v6910_v41 = vmul.f32 %v6609_v49, %v6142_v44  ;;  %v6143_v31 = vunpack.c.h.bf16 %v8744_v27  ;;  %v8746_v27 = vld [vmem:[#allocation5 + $0x160] sm:$0xff]   ;;  %v8756_v37 = vld [vmem:[#allocation5 + $0x1e8] sm:$0xff]  }
 0x88e   :  { %v7576_v40 = vrot.slane %v6629_v17, %v11596_v43  ;;  %v7060_v22 = vadd.f32 %v7059_v7, %v6908_v28  ;;  %v6146_v44 = vunpack.c.l.bf16 %v8746_v27  ;;  %vm16159_vm0 = vcmask 392512  }
 0x88f   :  { %vm16160_vm5 = vcmask 458112  }
 0x890   :  { %v7577_v58 = vsel %vm16154_vm8, %v7576_v40, %v7572_v54  ;;  %v7061_v42 = vadd.f32 %v7060_v22, %v6909_v5  ;;  %v7611_v54 = vrot.slane %v14148_v52, %v16069_v13  ;;  %v14250_v40 = vpop.permute.xlu0 %6783 }
 0x891   :  { %v7582_v26 = vsel %vm16155_vm6, %v7581_v21, %v7577_v58  ;;  %v14225_v4 = vpop.permute.xlu1 %6638  ;;  %v6144_v58 = vunpack.c.l.bf16 %v8745_v32 }
 0x892   :  { %v7586_v63 = vrot.slane %v14225_v4, %v11624_v12  ;;  %v7062_v21 = vadd.f32 %v7061_v42, %v6910_v41  ;;  %v6914_v41 = vmul.f32 %v6629_v17, %v6146_v44 }
 0x893   :  { %v6912_v59 = vmul.f32 %v6619_v25, %v6144_v58 }
 0x894   :  { %v7587_v14 = vsel %vm16156_vm10, %v7586_v63, %v7582_v26  ;;  %v6911_v26 = vmul.f32 %v14098_v15, %v6143_v31  ;;  %v14263_v7 = vpop.permute.xlu0 %6788 }
 0x895   :  { %v7592_v50 = vsel %vm3709_vm11, %v7591_v24, %v7587_v14  ;;  %v14233_v47 = vpop.permute.xlu1 %6648  ;;  %v6145_v14 = vunpack.c.h.bf16 %v8745_v32  ;;  %v8749_v32 = vld [vmem:[#allocation5 + $0x1d0] sm:$0xff]  }
 0x896   :  { %v7596_v61 = vrot.slane %v14233_v47, %v11654_v55  ;;  %v7063_v63 = vadd.f32 %v7062_v21, %v6911_v26  ;;  %v6174_v58 = vunpack.c.l.bf16 %v8749_v32 }
 0x898   :  { %v7597_v9 = vsel %vm3716_vm12, %v7596_v61, %v7592_v50  ;;  %v7064_v22 = vadd.f32 %v7063_v63, %v6912_v59  ;;  %v8747_v61 = vld [vmem:[#allocation5 + $0x1c0] sm:$0xff]   ;;  %v14268_v15 = vpop.permute.xlu0 %6793  ;;  %v8750_v63 = vld [vmem:[#allocation5 + $0x168] sm:$0xff]  }
 0x899   :  { %v7602_v57 = vsel %vm3723_vm13, %v7601_v10, %v7597_v9  ;;  %v14244_v33 = vpop.permute.xlu1 %6658  ;;  %v6170_v5 = vunpack.c.l.bf16 %v8747_v61  ;;  %v6171_v10 = vunpack.c.h.bf16 %v8747_v61  ;;  %v8748_v9 = vld [vmem:[#allocation5 + $0x1c8] sm:$0xff]  }
 0x89a   :  { %v7606_v48 = vrot.slane %v14244_v33, %v16067_v20  ;;  %v6172_v42 = vunpack.c.l.bf16 %v8748_v9 }
 0x89c   :  { %v7607_v3 = vsel %vm3730_vm14, %v7606_v48, %v7602_v57  ;;  %v6938_v48 = vmul.f32 %v14186_v2, %v6170_v5  ;;  %v6940_v21 = vmul.f32 %v14197_v60, %v6172_v42  ;;  %v14272_v61 = vpop.permute.xlu0 %6798  ;;  %v7695_v42 = vrot.slane %v14186_v2, %v16078_v16 }
 0x89d   :  { %v7612_v49 = vsel %vm3737_vm15, %v7611_v54, %v7607_v3  ;;  %v14254_v1 = vpop.permute.xlu1 %6668  ;;  %v6173_v54 = vunpack.c.h.bf16 %v8748_v9  ;;  %v6147_v3 = vunpack.c.h.bf16 %v8746_v27  ;;  %v6942_v27 = vmul.f32 %v14206_v39, %v6174_v58 }
 0x89e   :  { %v14258_v28 = vsel %vm16157_vm9, %v7612_v49, %v14191_v11  ;;  %v6913_v11 = vmul.f32 %v14108_v45, %v6145_v14  ;;  %v6148_v45 = vunpack.c.l.bf16 %v8750_v63  ;;  %v6175_v14 = vunpack.c.h.bf16 %v8749_v32 }
 0x89f   :  { %16158 = vst [vmem:[#allocation176_spill] sm:$0xff] %v14258_v28  ;;  %v6915_v44 = vmul.f32 %v14116_v35, %v6147_v3  ;;  %v6149_v35 = vunpack.c.h.bf16 %v8750_v63  ;;  %v8752_v3 = vld [vmem:[#allocation5 + $0x1e0] sm:$0xff]   ;;  %v8754_v63 = vld [vmem:[#allocation5 + $0x170] sm:$0xff]   ;;  %v6180_v28 = vunpack.c.l.bf16 %v8756_v37 }
 0x8a0   :  { %v7065_v25 = vadd.f32 %v7064_v22, %v6913_v11 }
 0x8a1   :  { %v14261_v24 = vpop.permute.xlu1 %6678 }
 0x8a2   :  { %v7066_v26 = vadd.f32 %v7065_v25, %v6914_v41  ;;  %v6916_v41 = vmul.f32 %v14225_v4, %v6148_v45  ;;  %v8753_v4 = vld [vmem:[#allocation5 + $0x180] sm:$0xff]  }
 0x8a3   :  { %v6154_v45 = vunpack.c.l.bf16 %v8753_v4 }
 0x8a4   :  { %v7067_v25 = vadd.f32 %v7066_v26, %v6915_v44  ;;  %v14288_v26 = vpop.permute.xlu0 %6803 }
 0x8a5   :  { %v14265_v50 = vpop.permute.xlu1 %6688 }
 0x8a6   :  { %v7068_v44 = vadd.f32 %v7067_v25, %v6916_v41  ;;  %v7714_v25 = vrot.slane %v14206_v39, %v16088_v18 }
 0x8a9   :  { %v6754_v57 = vpop.permute.xlu1 %6753 }
 0x8aa   :  { %v6939_v31 = vmul.f32 %v6754_v57, %v6171_v10  ;;  %v7699_v5 = vrot.slane %v6754_v57, %v16068_v34  ;;  %v8751_v10 = vld [vmem:[#allocation5 + $0x1d8] sm:$0xff]   ;;  %v6178_v57 = vunpack.c.l.bf16 %v8752_v3 }
 0x8ab   :  { %v6176_v11 = vunpack.c.l.bf16 %v8751_v10 }
 0x8ac   :  { %v7101_v49 = vadd.f32 %v6939_v31, %v6938_v48  ;;  %v6943_v31 = vmul.f32 %v14220_v53, %v6175_v14  ;;  %v7700_v32 = vsel %vm3639_vm1, %v7699_v5, %v7695_v42  ;;  %v6155_v14 = vunpack.c.h.bf16 %v8753_v4 }
 0x8ad   :  { %v6764_v59 = vpop.permute.xlu1 %6763  ;;  %v6944_v2 = vmul.f32 %v14235_v29, %v6176_v11  ;;  %v6917_v11 = vmul.f32 %v14128_v38, %v6149_v35  ;;  %v6946_v41 = vmul.f32 %v14263_v7, %v6178_v57  ;;  %v14305_v35 = vpop.permute.xlu0 %6808  ;;  %v6151_v57 = vunpack.c.h.bf16 %v8754_v63 }
 0x8ae   :  { %v7102_v22 = vadd.f32 %v7101_v49, %v6940_v21  ;;  %v6941_v17 = vmul.f32 %v6764_v59, %v6173_v54  ;;  %v6177_v54 = vunpack.c.h.bf16 %v8751_v10  ;;  %v7709_v58 = vrot.slane %v6764_v59, %v16123_v36  ;;  %v8755_v59 = vld [vmem:[#allocation5 + $0x188] sm:$0xff]  }
 0x8af   :  { %v7704_v49 = vrot.slane %v14197_v60, %v16122_v51  ;;  %v7069_v4 = vadd.f32 %v7068_v44, %v6917_v11  ;;  %v6948_v44 = vmul.f32 %v14272_v61, %v6180_v28 }
 0x8b0   :  { %v7103_v9 = vadd.f32 %v7102_v22, %v6941_v17  ;;  %v6179_v17 = vunpack.c.h.bf16 %v8752_v3  ;;  %v6945_v5 = vmul.f32 %v14250_v40, %v6177_v54  ;;  %v6923_v54 = vmul.f32 %v14162_v62, %v6155_v14 }
 0x8b1   :  { %v14280_v48 = vpop.permute.xlu1 %6693  ;;  %v7705_v60 = vsel %vm3646_vm2, %v7704_v49, %v7700_v32  ;;  %v6157_v14 = vunpack.c.h.bf16 %v8755_v59 }
 0x8b2   :  { %v7104_v21 = vadd.f32 %v7103_v9, %v6942_v27  ;;  %v6150_v27 = vunpack.c.l.bf16 %v8754_v63  ;;  %v6156_v9 = vunpack.c.l.bf16 %v8755_v59  ;;  %v6947_v38 = vmul.f32 %v14268_v15, %v6179_v17  ;;  %v8759_v59 = vld [vmem:[#allocation5 + $0x1f0] sm:$0xff]  }
 0x8b4   :  { %v7105_v22 = vadd.f32 %v7104_v21, %v6943_v31  ;;  %v7710_v31 = vsel %vm3653_vm3, %v7709_v58, %v7705_v60  ;;  %v6922_v21 = vmul.f32 %v14254_v1, %v6154_v45  ;;  %v6918_v32 = vmul.f32 %v14233_v47, %v6150_v27  ;;  %v8757_v60 = vld [vmem:[#allocation5 + $0x178] sm:$0xff]  }
 0x8b5   :  { %v14290_v10 = vpop.permute.xlu1 %6698  ;;  %v6924_v58 = vmul.f32 %v14261_v24, %v6156_v9  ;;  %v7715_v39 = vsel %vm3660_vm4, %v7714_v25, %v7710_v31  ;;  %v7719_v45 = vrot.slane %v14220_v53, %v11578_v56  ;;  %v6152_v17 = vunpack.c.l.bf16 %v8757_v60  ;;  %v8758_v31 = vld [vmem:[#allocation5 + $0x190] sm:$0xff]  }
 0x8b6   :  { %v7106_v42 = vadd.f32 %v7105_v22, %v6944_v2  ;;  %v6181_v22 = vunpack.c.h.bf16 %v8756_v37  ;;  %v7080_v47 = vadd.f32 %v6923_v54, %v6922_v21  ;;  %v7724_v9 = vrot.slane %v14235_v29, %v11586_v0  ;;  %v14320_v54 = vpop.permute.xlu0 %6813 }
 0x8b7   :  { %v6158_v25 = vunpack.c.l.bf16 %v8758_v31  ;;  %v6919_v37 = vmul.f32 %v14136_v46, %v6151_v57  ;;  %v6153_v21 = vunpack.c.h.bf16 %v8757_v60  ;;  %v7729_v29 = vrot.slane %v14250_v40, %v11593_v30 }
 0x8b8   :  { %v7107_v3 = vadd.f32 %v7106_v42, %v6945_v5  ;;  %v7070_v5 = vadd.f32 %v7069_v4, %v6918_v32  ;;  %v7720_v42 = vsel %vm16159_vm0, %v7719_v45, %v7715_v39  ;;  %v7081_v63 = vadd.f32 %v7080_v47, %v6924_v58  ;;  %v8761_v47 = vld [vmem:[#allocation5 + $0x1f8] sm:$0xff]  }
 0x8b9   :  { %v14302_v49 = vpop.permute.xlu1 %6703  ;;  %v6949_v28 = vmul.f32 %v14288_v26, %v6181_v22  ;;  %v7725_v4 = vsel %vm16160_vm5, %v7724_v9, %v7720_v42  ;;  %v6159_v32 = vunpack.c.h.bf16 %v8758_v31  ;;  %v6920_v58 = vmul.f32 %v14244_v33, %v6152_v17  ;;  %v8760_v22 = vld [vmem:[#allocation5 + $0x198] sm:$0xff]   ;;  %v8762_v17 = vld [vmem:[#allocation5 + $0x1a0] sm:$0xff]  }
 0x8ba   :  { %v7108_v2 = vadd.f32 %v7107_v3, %v6946_v41  ;;  %v6182_v41 = vunpack.c.l.bf16 %v8759_v59  ;;  %v6925_v3 = vmul.f32 %v14174_v8, %v6157_v14  ;;  %v6183_v39 = vunpack.c.h.bf16 %v8759_v59 }
 0x8bb   :  { %v6926_v45 = vmul.f32 %v14265_v50, %v6158_v25  ;;  %v6160_v14 = vunpack.c.l.bf16 %v8760_v22  ;;  %v6185_v60 = vunpack.c.h.bf16 %v8761_v47  ;;  %v7730_v42 = vsel %vm3681_vm7, %v7729_v29, %v7725_v4  ;;  %v8763_v25 = vld [vmem:[#allocation5 + $0x1a8] sm:$0xff]  }
 0x8bc   :  { %v7109_v27 = vadd.f32 %v7108_v2, %v6947_v38  ;;  %v7071_v38 = vadd.f32 %v7070_v5, %v6919_v37  ;;  %v7082_v57 = vadd.f32 %v7081_v63, %v6925_v3  ;;  %v7734_v40 = vrot.slane %v14263_v7, %v11596_v43 }
 0x8bd   :  { %v14313_v11 = vpop.permute.xlu1 %6708  ;;  %v6927_v33 = vmul.f32 %v14280_v48, %v6159_v32  ;;  %v6161_v5 = vunpack.c.h.bf16 %v8760_v22  ;;  %v6162_v9 = vunpack.c.l.bf16 %v8762_v17  ;;  %v6163_v31 = vunpack.c.h.bf16 %v8762_v17 }
 0x8be   :  { %v7110_v53 = vadd.f32 %v7109_v27, %v6948_v44  ;;  %v6950_v44 = vmul.f32 %v14305_v35, %v6182_v41  ;;  %v6184_v27 = vunpack.c.l.bf16 %v8761_v47  ;;  %v7072_v63 = vadd.f32 %v7071_v38, %v6920_v58  ;;  %v14338_v41 = vpop.permute.xlu0 %6818 }
 0x8bf   :  { %v7616_v59 = vrot.slane %v14254_v1, %v16078_v16  ;;  %v7083_v3 = vadd.f32 %v7082_v57, %v6926_v45  ;;  %v7735_v7 = vsel %vm16154_vm8, %v7734_v40, %v7730_v42  ;;  %v6928_v4 = vmul.f32 %v14290_v10, %v6160_v14  ;;  %v14360_v42 = vld [vmem:[#allocation5 + $0x1b8] sm:$0xff]  }
 0x8c0   :  { %v7111_v2 = vadd.f32 %v7110_v53, %v6949_v28  ;;  %v6164_v53 = vunpack.c.l.bf16 %v8763_v25  ;;  %v7739_v32 = vrot.slane %v14268_v15, %v11600_v19  ;;  %v6951_v29 = vmul.f32 %v14320_v54, %v6183_v39  ;;  %v8764_v15 = vld [vmem:[#allocation5 + $0x1b0] sm:$0xff]  }
 0x8c1   :  { %v7625_v38 = vrot.slane %v14261_v24, %v16122_v51  ;;  %v6165_v58 = vunpack.c.h.bf16 %v8763_v25  ;;  %v7620_v16 = vrot.slane %v14162_v62, %v16068_v34  ;;  %v7084_v1 = vadd.f32 %v7083_v3, %v6927_v33 }
 0x8c2   :  { %v14326_v46 = vpop.permute.xlu1 %6713  ;;  %v7112_v28 = vadd.f32 %v7111_v2, %v6950_v44  ;;  %v6921_v2 = vmul.f32 %v14148_v52, %v6153_v21  ;;  %v6929_v57 = vmul.f32 %v14302_v49, %v6161_v5  ;;  %v7744_v45 = vrot.slane %v14272_v61, %v11624_v12  ;;  %v14365_v33 = vpop.permute.xlu0 %6823 }
 0x8c3   :  { %v6166_v14 = vunpack.c.l.bf16 %v8764_v15  ;;  %v7740_v44 = vsel %vm16155_vm6, %v7739_v32, %v7735_v7  ;;  %v7621_v24 = vsel %vm3639_vm1, %v7620_v16, %v7616_v59  ;;  %v7085_v52 = vadd.f32 %v7084_v1, %v6928_v4  ;;  %vm16161_vm1 = vmmov %vm16156_vm10 }
 0x8c4   :  { %v7113_v39 = vadd.f32 %v7112_v28, %v6951_v29  ;;  %v7073_v51 = vadd.f32 %v7072_v63, %v6921_v2  ;;  %v6930_v21 = vmul.f32 %v14313_v11, %v6162_v9  ;;  %v7626_v34 = vsel %vm3646_vm2, %v7625_v38, %v7621_v24  ;;  %vm16162_vm2 = vmmov %vm16159_vm0 }
 0x8c5   :  { %v6952_v62 = vmul.f32 %v14338_v41, %v6184_v27  ;;  %v6167_v47 = vunpack.c.h.bf16 %v8764_v15  ;;  %v6168_v61 = vunpack.c.l.bf16 %v14360_v42  ;;  %v7635_v40 = vrot.slane %v14265_v50, %v16088_v18  ;;  %vm16165_vm10 = vmmov %vm16155_vm6 }
 0x8c6   :  { %v14334_v37 = vpop.permute.xlu1 %6718  ;;  %v7086_v5 = vadd.f32 %v7085_v52, %v6929_v57  ;;  %v6931_v17 = vmul.f32 %v14326_v46, %v6163_v31  ;;  %v7745_v63 = vsel %vm16161_vm1, %v7744_v45, %v7740_v44  ;;  %v7630_v9 = vrot.slane %v14174_v8, %v16123_v36 }
 0x8c7   :  { %v7749_v27 = vrot.slane %v14288_v26, %v11631_v23  ;;  %v7640_v25 = vrot.slane %v14280_v48, %v11578_v56  ;;  %v7114_v59 = vadd.f32 %v7113_v39, %v6952_v62  ;;  %v7074_v3 = vrot.slane %v7073_v51, 4 }
 0x8c8   :  { %v7754_v18 = vrot.slane %v14305_v35, %v11654_v55  ;;  %v7087_v50 = vadd.f32 %v7086_v5, %v6930_v21  ;;  %v6932_v31 = vmul.f32 %v14334_v37, %v6164_v53  ;;  %v7631_v7 = vsel %vm3653_vm3, %v7630_v9, %v7626_v34  ;;  %vm16163_vm3 = vmmov %vm16160_vm5 }
 0x8c9   :  { %v6953_v4 = vmul.f32 %v14365_v33, %v6185_v60  ;;  %v7645_v36 = vrot.slane %v14290_v10, %v11586_v0  ;;  %v7750_v8 = vsel %vm3709_vm11, %v7749_v27, %v7745_v63  ;;  %v7636_v56 = vsel %vm3660_vm4, %v7635_v40, %v7631_v7  ;;  %vm16164_vm4 = vmmov %vm16154_vm8 }
 0x8ca   :  { %v14353_v22 = vpop.permute.xlu1 %6723  ;;  %v7650_v48 = vrot.slane %v14302_v49, %v11593_v30  ;;  %v7088_v26 = vadd.f32 %v7087_v50, %v6931_v17  ;;  %v7641_v32 = vsel %vm16162_vm2, %v7640_v25, %v7636_v56  ;;  %v7655_v53 = vrot.slane %v14313_v11, %v11596_v43  ;;  %v16167_v25 = vld [vmem:[#allocation176_spill] sm:$0xff] }
 0x8cb   :  { %v6933_v35 = vmul.f32 %v14353_v22, %v6165_v58  ;;  %v6169_v60 = vunpack.c.h.bf16 %v14360_v42  ;;  %v7115_v38 = vadd.f32 %v7114_v59, %v6953_v4  ;;  %v7660_v0 = vrot.slane %v14326_v46, %v11600_v19 }
 0x8cc   :  { %v7089_v10 = vadd.f32 %v7088_v26, %v6932_v31  ;;  %v7755_v16 = vsel %vm3716_vm12, %v7754_v18, %v7750_v8  ;;  %v7075_v30 = vadd.f32 %v7074_v3, %v7073_v51  ;;  %v7759_v49 = vrot.slane %v14320_v54, %v16063_v6 }
 0x8cd   :  { %v7646_v58 = vsel %vm16163_vm3, %v7645_v36, %v7641_v32  ;;  %v7665_v43 = vrot.slane %v14334_v37, %v11624_v12  ;;  %v7670_v57 = vrot.slane %v14353_v22, %v11631_v23  ;;  %v7764_v51 = vrot.slane %v14338_v41, %v16067_v20 }
 0x8ce   :  { %v6729_v28 = vpop.permute.xlu1 %6728  ;;  %v7651_v11 = vsel %vm3681_vm7, %v7650_v48, %v7646_v58  ;;  %v7090_v1 = vadd.f32 %v7089_v10, %v6933_v35  ;;  %v7760_v54 = vsel %vm3723_vm13, %v7759_v49, %v7755_v16  ;;  %vm16166_vm7 = vmmov %vm16161_vm1  ;;  %v7076_v52 = vrot.slane %v7075_v30, 2 }
 0x8cf   :  { %v6934_v2 = vmul.f32 %v6729_v28, %v6166_v14  ;;  %v7656_v46 = vsel %vm16164_vm4, %v7655_v53, %v7651_v11  ;;  %v7675_v45 = vrot.slane %v6729_v28, %v11654_v55  ;;  %v7116_v14 = vrot.slane %v7115_v38, 4 }
 0x8d0   :  { %v7661_v39 = vsel %vm16165_vm10, %v7660_v0, %v7656_v46  ;;  %v7077_v63 = vadd.f32 %v7076_v52, %v7075_v30 }
 0x8d1   :  { %v7091_v44 = vadd.f32 %v7090_v1, %v6934_v2  ;;  %v7666_v23 = vsel %vm16166_vm7, %v7665_v43, %v7661_v39  ;;  %v7117_v62 = vadd.f32 %v7116_v14, %v7115_v38 }
 0x8d2   :  { %v6734_v29 = vpop.permute.xlu1 %6733  ;;  %v7671_v24 = vsel %vm3709_vm11, %v7670_v57, %v7666_v23  ;;  %vm16168_vm11 = vcmask 1046534  }
 0x8d3   :  { %v6935_v19 = vmul.f32 %v6734_v29, %v6167_v47  ;;  %v7680_v12 = vrot.slane %v6734_v29, %v16063_v6  ;;  %v7676_v21 = vsel %vm3716_vm12, %v7675_v45, %v7671_v24  ;;  %v7765_v47 = vsel %vm3730_vm14, %v7764_v51, %v7760_v54 }
 0x8d4   :  { %v7118_v9 = vrot.slane %v7117_v62, 2  ;;  %vm16169_vm12 = vcmask 1047559  }
 0x8d5   :  { %v7092_v55 = vadd.f32 %v7091_v44, %v6935_v19  ;;  %v7681_v6 = vsel %vm3723_vm13, %v7680_v12, %v7676_v21 }
 0x8d6   :  { %v6739_v15 = vpop.permute.xlu1 %6738 }
 0x8d7   :  { %v6936_v37 = vmul.f32 %v6739_v15, %v6168_v61  ;;  %v7685_v22 = vrot.slane %v6739_v15, %v16067_v20  ;;  %v7769_v20 = vrot.slane %v14365_v33, %v16069_v13 }
 0x8d9   :  { %v7093_v42 = vadd.f32 %v7092_v55, %v6936_v37  ;;  %v7686_v40 = vsel %vm3730_vm14, %v7685_v22, %v7681_v6  ;;  %v7770_v27 = vsel %vm3737_vm15, %v7769_v20, %v7765_v47 }
 0x8da   :  { %v6744_v34 = vpop.permute.xlu1 %6743 }
 0x8db   :  { %v6937_v61 = vmul.f32 %v6744_v34, %v6169_v60  ;;  %v7690_v41 = vrot.slane %v6744_v34, %v16069_v13 }
 0x8dd   :  { %v7094_v5 = vadd.f32 %v7093_v42, %v6937_v61  ;;  %v7691_v17 = vsel %vm3737_vm15, %v7690_v41, %v7686_v40 }
 0x8de   :  { %v7776_v28 = vsel %vm16168_vm11, %v7691_v17, %v16167_v25 }
 0x8df   :  { %v7095_v59 = vrot.slane %v7094_v5, 4  ;;  %v7777_v3 = vsel %vm16169_vm12, %v7770_v27, %v7776_v28 }
 0x8e0   :  { %7779 = vst [vmem:[#allocation12] sm:$0xff] %v7777_v3 }
 0x8e1   :  { %v7096_v18 = vadd.f32 %v7095_v59, %v7094_v5 }
 0x8e2   :  { %8887 = shalt.err (!%p8884_p2)
}
 0x8e3   :  { %s8888_s1 = scalar_lea.hbm %s14460_s8, 128 }
 0x8e4   :  { %p8889_p3 = scmp.ne.s32.totalorder %s14460_s8, %s8888_s1  ;;  %p8892_p4 = scmp.lt.u32.totalorder %s8888_s1, %s14460_s8 }
 0x8e6   :  { %p8894_p5 = pnand %p8892_p4, %p8889_p3 }
 0x8e8   :  { %8897 = shalt.err (!%p8894_p5)
}
 0x8e9   :  { %7799 = dma.vmem_to_hbm [thread:$0]  %s7797_s26, 128, %s14460_s8, [#allocation13]   ;;  %v7078_v13 = vrot.slane %v7077_v63, 1  ;;  %v7119_v33 = vadd.f32 %v7118_v9, %v7117_v62  ;;  %v7097_v50 = vrot.slane %v7096_v18, 2  ;;  %v16170_v48 = vld [vmem:[#allocation159_spill] sm:$0xff]  ;;  %vm16171_vm13 = vmmov %vm16157_vm9 }
 0x8ea   :  { %s8942_s12 = smov [#allocation11]   ;;  %vm16172_vm14 = vmmov %vm16168_vm11 }
 0x8eb   :  { %v7098_v31 = vadd.f32 %v7097_v50, %v7096_v18  ;;  %v7079_v7 = vadd.f32 %v7078_v13, %v7077_v63  ;;  %v7120_v4 = vrot.slane %v7119_v33, 1  ;;  %s7786_s13 = sshll.u32 %s8942_s12, 4  ;;  %vm16173_vm15 = vmmov %vm16169_vm12  ;;  %s7787_s13 = int_to_ptr.vmem [resolvable:$true] %s7786_s13 }
 0x8ec   :  { %s8898_s8 = scalar_lea.vmem %s7787_s13, 128  ;;  %p8903_p7 = scmp.lt.s32.totalorder %s7787_s13, %s7787_s13 }
 0x8ed   :  { %v7099_v36 = vrot.slane %v7098_v31, 1  ;;  %v7121_v56 = vadd.f32 %v7120_v4, %v7119_v33  ;;  %v7134_v26 = vsel %vm16171_vm13, %v7079_v7, %v16170_v48  ;;  %p8899_p6 = scmp.ne.s32.totalorder %s7787_s13, %s8898_s8  ;;  %p8904_p8 = scmp.lt.s32.totalorder %s8898_s8, %s8898_s8 }
 0x8ef   :  { %v7100_v8 = vadd.f32 %v7099_v36, %v7098_v31  ;;  %p8905_p9 = por %p8904_p8, %p8903_p7 }
 0x8f1   :  { %v7135_v35 = vsel %vm16172_vm14, %v7100_v8, %v7134_v26  ;;  %p8906_p10 = pnand %p8905_p9, %p8899_p6 }
 0x8f2   :  { %v7136_v32 = vsel %vm16173_vm15, %v7121_v56, %v7135_v35 }
 0x8f3   :  { %7138 = vst [vmem:[#allocation11] sm:$0xff] %v7136_v32 }
 0x8f4   :  { %8909 = shalt.err (!%p8906_p10)
}
 0x8f5   :  { %s8910_s18 = scalar_lea.hbm %s14459_s7, 128 }
 0x8f6   :  { %p8911_p11 = scmp.ne.s32.totalorder %s14459_s7, %s8910_s18  ;;  %p8914_p12 = scmp.lt.u32.totalorder %s8910_s18, %s14459_s7 }
 0x8f8   :  { %p8916_p13 = pnand %p8914_p12, %p8911_p11 }
 0x8fa   :  { %8919 = shalt.err (!%p8916_p13)
}
 0x8fb   :  { %7789 = dma.vmem_to_hbm [thread:$0]  %s7787_s13, 128, %s14459_s7, [#allocation4]  }
 0x8fc   :  { %8926 = dma.done.wait [#allocation4], 128  }
 0x8fd   :  { %8927 = vsyncadd [#allocation4], 4294967168 }
 0x8fe   :  { %8928 = dma.done.wait [#allocation13], 128  }
 0x8ff   :  { %8929 = vsyncadd [#allocation13], 4294967168 }
 0x900   :  { %7806 = vsyncpa [#allocation3], 1 }
 0x901   :  { %7807 = vsyncpa [#allocation6], 1 }
 0x902   :  { %7808 = vsyncpa [#allocation9], 1 }
 0x903   :  { %7809 = vsyncpa [#allocation4], 1 }
 0x904   :  { %7810 = vsyncpa [#allocation13], 1 }

</bundles_post_ra>
